<compile_context>
chip_gen: v7x
topology: tpu7x:2x2x1
jax: 0.10.0
libtpu: 0.0.40
codegen_flags: <defaults>
</compile_context>

<pallas_src>
import math
import functools

import jax
import jax.numpy as jnp
from jax.experimental import pallas as pl
from jax.experimental.pallas import tpu as pltpu

_BN_EPS = 1e-5
_H = 256                      # GRU hidden size (fixed by the module)
_ROW_TILE = 1024              # row tile for the conv / projection matmuls
_GRU_CHUNK = 128              # timesteps per GRU grid step
_VMEM_LIMIT = 32 * 1024 * 1024
_MM_DTYPE = jnp.bfloat16      # MXU operand dtype (f32 accumulation everywhere)
_ACT_DTYPE = jnp.bfloat16     # dtype of inter-block activations written to HBM


def _cdiv(a, b):
    return (a + b - 1) // b


def _round_up(a, b):
    return _cdiv(a, b) * b


# ----------------------------------------------------------------------------
# Kernel 1: row-tiled matmul + bias + per-tile BN partial statistics
# ----------------------------------------------------------------------------
def _mm_stats_kernel(x_ref, w_ref, b_ref, y_ref, st_ref, *, rows_total, tile_rows):
    i = pl.program_id(0)
    y = jnp.dot(x_ref[...], w_ref[...],
                preferred_element_type=jnp.float32) + b_ref[...]
    y_ref[...] = y
    # mask rows that are padding of N (they must not contribute to batch stats)
    rid = jax.lax.broadcasted_iota(jnp.int32, y.shape, 0) + i * tile_rows
    yv = jnp.where(rid < rows_total, y, 0.0)
    s1 = jnp.sum(yv, axis=0, keepdims=True)        # [1, C]
    s2 = jnp.sum(yv * yv, axis=0, keepdims=True)   # [1, C]
    row = jax.lax.broadcasted_iota(jnp.int32, (8, y.shape[1]), 0)
    st_ref[...] = jnp.where(row == 0, s1, 0.0) + jnp.where(row == 1, s2, 0.0)


def _mm_stats(x2d, w2d, b_row, tile_rows=_ROW_TILE):
    """y = x2d @ w2d + b_row, plus per-channel sum / sumsq over the real rows.

    x2d: [N, K] (bf16), w2d: [K, C] (bf16), b_row: [1, C] f32.
    Returns y [N_pad, C] f32, sum [C] f32, sumsq [C] f32.
    """
    N, K = x2d.shape
    C = w2d.shape[1]
    R = min(tile_rows, _round_up(N, 8))
    n_tiles = _cdiv(N, R)
    N_pad = n_tiles * R
    if N_pad != N:
        x2d = jnp.pad(x2d, ((0, N_pad - N), (0, 0)))
    kern = functools.partial(_mm_stats_kernel, rows_total=N, tile_rows=R)
    y, st = pl.pallas_call(
        kern,
        out_shape=(jax.ShapeDtypeStruct((N_pad, C), jnp.float32),
                   jax.ShapeDtypeStruct((n_tiles * 8, C), jnp.float32)),
        grid=(n_tiles,),
        in_specs=[
            pl.BlockSpec((R, K), lambda i: (i, 0)),
            pl.BlockSpec((K, C), lambda i: (0, 0)),
            pl.BlockSpec((1, C), lambda i: (0, 0)),
        ],
        out_specs=(
            pl.BlockSpec((R, C), lambda i: (i, 0)),
            pl.BlockSpec((8, C), lambda i: (i, 0)),
        ),
        compiler_params=pltpu.CompilerParams(
            dimension_semantics=("parallel",),
            vmem_limit_bytes=_VMEM_LIMIT),
    )(x2d, w2d, b_row)
    st = st.reshape(n_tiles, 8, C)
    return y, st[:, 0, :].sum(axis=0), st[:, 1, :].sum(axis=0)


# ----------------------------------------------------------------------------
# Kernel 2: row-tiled BN affine (scale/shift) + optional ELU
# ----------------------------------------------------------------------------
def _norm_act_kernel(y_ref, sc_ref, sh_ref, o_ref, *, apply_act):
    y = y_ref[...] * sc_ref[...] + sh_ref[...]
    if apply_act:
        y = jnp.where(y > 0, y, jnp.exp(jnp.minimum(y, 0.0)) - 1.0)   # ELU(alpha=1)
    o_ref[...] = y.astype(o_ref.dtype)


def _norm_act(y2d, scale_row, shift_row, apply_act,
              out_dtype=_ACT_DTYPE, tile_rows=_ROW_TILE):
    N_pad, C = y2d.shape
    R = min(tile_rows, N_pad)
    n_tiles = N_pad // R
    return pl.pallas_call(
        functools.partial(_norm_act_kernel, apply_act=apply_act),
        out_shape=jax.ShapeDtypeStruct((N_pad, C), out_dtype),
        grid=(n_tiles,),
        in_specs=[
            pl.BlockSpec((R, C), lambda i: (i, 0)),
            pl.BlockSpec((1, C), lambda i: (0, 0)),
            pl.BlockSpec((1, C), lambda i: (0, 0)),
        ],
        out_specs=pl.BlockSpec((R, C), lambda i: (i, 0)),
        compiler_params=pltpu.CompilerParams(
            dimension_semantics=("parallel",),
            vmem_limit_bytes=_VMEM_LIMIT),
    )(y2d, scale_row, shift_row)


# ----------------------------------------------------------------------------
# Row-tiled plain matmul + bias (used for the hoisted GRU input projection)
# ----------------------------------------------------------------------------
def _mm_bias_kernel(x_ref, w_ref, b_ref, o_ref):
    o_ref[...] = jnp.dot(x_ref[...], w_ref[...],
                         preferred_element_type=jnp.float32) + b_ref[...]


def _mm_bias(x2d, w2d, b_row, tile_rows=_ROW_TILE):
    N, K = x2d.shape
    C = w2d.shape[1]
    R = min(tile_rows, _round_up(N, 8))
    n_tiles = _cdiv(N, R)
    N_pad = n_tiles * R
    if N_pad != N:
        x2d = jnp.pad(x2d, ((0, N_pad - N), (0, 0)))
    out = pl.pallas_call(
        _mm_bias_kernel,
        out_shape=jax.ShapeDtypeStruct((N_pad, C), jnp.float32),
        grid=(n_tiles,),
        in_specs=[
            pl.BlockSpec((R, K), lambda i: (i, 0)),
            pl.BlockSpec((K, C), lambda i: (0, 0)),
            pl.BlockSpec((1, C), lambda i: (0, 0)),
        ],
        out_specs=pl.BlockSpec((R, C), lambda i: (i, 0)),
        compiler_params=pltpu.CompilerParams(
            dimension_semantics=("parallel",),
            vmem_limit_bytes=_VMEM_LIMIT),
    )(x2d, w2d, b_row)
    return out[:N]


# ----------------------------------------------------------------------------
# Conv / transposed-conv blocks (channels-last glue around the kernels above)
# ----------------------------------------------------------------------------
def _im2col_nlc(x, k, s, p):
    """x: [B, T, C] -> patches [B, T_out, k*C] (tap-major column blocks)."""
    B, T, C = x.shape
    xp = jnp.pad(x, ((0, 0), (p, p), (0, 0)))
    T_out = (T + 2 * p - k) // s + 1
    cols = [xp[:, tap: tap + (T_out - 1) * s + 1: s, :] for tap in range(k)]
    return jnp.concatenate(cols, axis=-1)


def _bn_affine(s1, s2, count, gamma, beta):
    """Training-mode BatchNorm1d folded into per-channel scale/shift."""
    mean = s1 / count
    var = jnp.maximum(s2 / count - mean * mean, 0.0)
    scale = gamma * jax.lax.rsqrt(var + _BN_EPS)
    shift = beta - mean * scale
    return scale.reshape(1, -1), shift.reshape(1, -1)


def _conv_bn_act(x_btc, w2d, b, gamma, beta, k, s, p, apply_act, out_dtype):
    """Ordinary conv (weight already flattened to [k*Cin, Cout]) + BN + ELU."""
    B, T, Cin = x_btc.shape
    Cout = w2d.shape[1]
    T_out = (T + 2 * p - k) // s + 1
    N = B * T_out
    patches = _im2col_nlc(x_btc, k, s, p).reshape(N, k * Cin)
    y, s1, s2 = _mm_stats(patches.astype(_MM_DTYPE), w2d.astype(_MM_DTYPE),
                          b.reshape(1, Cout))
    scale, shift = _bn_affine(s1, s2, N, gamma, beta)
    o = _norm_act(y, scale, shift, apply_act, out_dtype)
    return o[:N].reshape(B, T_out, Cout)


def conv_block(x_btc, w, b, gamma, beta, k, s, p, apply_act=True):
    """Conv1d + BatchNorm1d + ELU.  x: [B, T, Cin]; w: [Cout, Cin, k] (PyTorch layout)."""
    Cout, Cin, _ = w.shape
    w2d = jnp.transpose(w, (2, 1, 0)).reshape(k * Cin, Cout)   # (tap, cin) -> cout
    return _conv_bn_act(x_btc, w2d, b, gamma, beta, k, s, p, apply_act, _ACT_DTYPE)


def tconv_block_s1(x_btc, w, b, gamma, beta, k, p, apply_act, out_dtype=jnp.float32):
    """ConvTranspose1d (stride 1) == ordinary conv with flipped taps.  w: [Cin, Cout, k]."""
    Cin, Cout, _ = w.shape
    w2d = jnp.transpose(jnp.flip(w, axis=2), (2, 0, 1)).reshape(k * Cin, Cout)
    return _conv_bn_act(x_btc, w2d, b, gamma, beta, k, 1, k - 1 - p, apply_act,
                        out_dtype)


def tconv_block_s2(x_btc, w, b, gamma, beta, apply_act=True):
    """ConvTranspose1d(k=4, s=2, p=1) + BN + ELU via polyphase (no zero-stuffing).

    y[2u]   = x[u-1]·W[:,:,3] + x[u]·W[:,:,1]
    y[2u+1] = x[u]  ·W[:,:,2] + x[u+1]·W[:,:,0]
    BN stats are pooled over both phases (all 2T output positions).
    """
    B, T, Cin = x_btc.shape
    Cout = w.shape[1]
    N = B * T
    xp = jnp.pad(x_btc, ((0, 0), (1, 1), (0, 0)))               # x[-1] = x[T] = 0
    pe = jnp.concatenate([xp[:, 0:T, :], xp[:, 1:T + 1, :]], axis=-1).reshape(N, 2 * Cin)
    po = jnp.concatenate([xp[:, 1:T + 1, :], xp[:, 2:T + 2, :]], axis=-1).reshape(N, 2 * Cin)
    we = jnp.concatenate([w[:, :, 3], w[:, :, 1]], axis=0).astype(_MM_DTYPE)
    wo = jnp.concatenate([w[:, :, 2], w[:, :, 0]], axis=0).astype(_MM_DTYPE)
    b_row = b.reshape(1, Cout)
    ye, s1e, s2e = _mm_stats(pe.astype(_MM_DTYPE), we, b_row)
    yo, s1o, s2o = _mm_stats(po.astype(_MM_DTYPE), wo, b_row)
    scale, shift = _bn_affine(s1e + s1o, s2e + s2o, 2 * N, gamma, beta)
    oe = _norm_act(ye, scale, shift, apply_act)[:N].reshape(B, T, Cout)
    oo = _norm_act(yo, scale, shift, apply_act)[:N].reshape(B, T, Cout)
    return jnp.stack([oe, oo], axis=2).reshape(B, 2 * T, Cout)   # interleave phases


# ----------------------------------------------------------------------------
# 2-layer GRU: hoisted layer-1 input projection + chunked in-kernel recurrence
# ----------------------------------------------------------------------------
def _gru_kernel(gi1_ref, whh1_ref, bhh1_ref, wih2_ref, bih2_ref,
                whh2_ref, bhh2_ref, out_ref, h1_ref, h2_ref,
                *, hidden, mm_dtype):
    H = hidden

    @pl.when(pl.program_id(0) == 0)
    def _init():
        h1_ref[...] = jnp.zeros_like(h1_ref)
        h2_ref[...] = jnp.zeros_like(h2_ref)

    n_steps = out_ref.shape[0]

    @pl.loop(0, n_steps)
    def _step(t):
        h1 = h1_ref[...]
        h2 = h2_ref[...]

        # layer 1: gi1 (x @ Wih1 + bih1) was precomputed outside the recurrence
        gi1 = gi1_ref[t]                                            # [Bp, 3H] f32
        gh1 = jnp.dot(h1.astype(mm_dtype), whh1_ref[...],
                      preferred_element_type=jnp.float32) + bhh1_ref[...]
        r1 = jax.nn.sigmoid(gi1[:, :H] + gh1[:, :H])
        z1 = jax.nn.sigmoid(gi1[:, H:2 * H] + gh1[:, H:2 * H])
        n1 = jnp.tanh(gi1[:, 2 * H:] + r1 * gh1[:, 2 * H:])
        h1n = (1.0 - z1) * n1 + z1 * h1

        # layer 2 (input projection depends on h1n, so it stays in the loop)
        gi2 = jnp.dot(h1n.astype(mm_dtype), wih2_ref[...],
                      preferred_element_type=jnp.float32) + bih2_ref[...]
        gh2 = jnp.dot(h2.astype(mm_dtype), whh2_ref[...],
                      preferred_element_type=jnp.float32) + bhh2_ref[...]
        r2 = jax.nn.sigmoid(gi2[:, :H] + gh2[:, :H])
        z2 = jax.nn.sigmoid(gi2[:, H:2 * H] + gh2[:, H:2 * H])
        n2 = jnp.tanh(gi2[:, 2 * H:] + r2 * gh2[:, 2 * H:])
        h2n = (1.0 - z2) * n2 + z2 * h2

        h1_ref[...] = h1n
        h2_ref[...] = h2n
        out_ref[t] = h2n.astype(out_ref.dtype)


def _gru_call(gi1_tbh, whh1, bhh1, wih2, bih2, whh2, bhh2, chunk):
    T_pad, Bp, H3 = gi1_tbh.shape
    H = H3 // 3
    n_chunks = T_pad // chunk
    full2 = lambda c: (0, 0)
    return pl.pallas_call(
        functools.partial(_gru_kernel, hidden=H, mm_dtype=whh1.dtype),
        out_shape=jax.ShapeDtypeStruct((T_pad, Bp, H), _ACT_DTYPE),
        grid=(n_chunks,),
        in_specs=[
            pl.BlockSpec((chunk, Bp, H3), lambda c: (c, 0, 0)),
            pl.BlockSpec(whh1.shape, full2),
            pl.BlockSpec(bhh1.shape, full2),
            pl.BlockSpec(wih2.shape, full2),
            pl.BlockSpec(bih2.shape, full2),
            pl.BlockSpec(whh2.shape, full2),
            pl.BlockSpec(bhh2.shape, full2),
        ],
        out_specs=pl.BlockSpec((chunk, Bp, H), lambda c: (c, 0, 0)),
        scratch_shapes=[pltpu.VMEM((Bp, H), jnp.float32),
                        pltpu.VMEM((Bp, H), jnp.float32)],
        compiler_params=pltpu.CompilerParams(
            dimension_semantics=("arbitrary",),
            vmem_limit_bytes=_VMEM_LIMIT),
    )(gi1_tbh, whh1, bhh1, wih2, bih2, whh2, bhh2)


def gru_block(x_btc, p):
    """2-layer GRU (batch_first).  x: [B, T, 256] -> [B, T, 256] (bf16)."""
    B, T, H = x_btc.shape
    # hoisted, MXU-friendly layer-1 input projection for all timesteps at once
    gi1 = _mm_bias(x_btc.reshape(B * T, H).astype(_MM_DTYPE),
                   p["g1_wih"].astype(_MM_DTYPE), p["g1_bih"])      # [B*T, 3H] f32
    gi1 = jnp.transpose(gi1.reshape(B, T, 3 * H), (1, 0, 2))        # [T, B, 3H]
    Bp = _round_up(B, 8)                                            # pad batch to 8 sublanes
    chunk = min(_GRU_CHUNK, T)
    T_pad = _round_up(T, chunk)
    gi1 = jnp.pad(gi1, ((0, T_pad - T), (0, Bp - B), (0, 0)))
    out = _gru_call(gi1,
                    p["g1_whh"].astype(_MM_DTYPE), p["g1_bhh"],
                    p["g2_wih"].astype(_MM_DTYPE), p["g2_bih"],
                    p["g2_whh"].astype(_MM_DTYPE), p["g2_bhh"],
                    chunk)
    return jnp.transpose(out[:T, :B], (1, 0, 2))                    # [B, T, 256] bf16


# ----------------------------------------------------------------------------
# GRUSE forward
# ----------------------------------------------------------------------------
def valid_length(length):
    k, s, p = 7, 1, 3
    length = math.ceil((length + 2 * p - k) / s + 1)
    k, s, p = 4, 2, 1
    for _ in range(4):
        length = math.ceil((length + 2 * p - k) / s + 1)
        length = max(length, 1)
    for _ in range(4):
        length = math.ceil((length - 1) * s - 2 * p + k)
    k, s, p = 7, 1, 3
    length = math.ceil((length - 1) * s - 2 * p + k)
    return int(length)


def init_params(key):
    keys = jax.random.split(key, 32)
    it = iter(keys)

    def nrm(shape, scale=0.1):
        return scale * jax.random.normal(next(it), shape, dtype=jnp.float32)

    p = {}
    # encoder Conv1d blocks: weight [Cout, Cin, k]
    enc = [(16, 1, 7), (32, 16, 4), (64, 32, 4), (128, 64, 4), (256, 128, 4)]
    for i, (co, ci, k) in enumerate(enc, 1):
        p[f"c{i}_w"] = nrm((co, ci, k))
        p[f"c{i}_b"] = nrm((co,))
        p[f"c{i}_g"] = jnp.ones((co,), jnp.float32)
        p[f"c{i}_be"] = jnp.zeros((co,), jnp.float32)
    # 2-layer GRU (weights stored pre-transposed: [in, 3H] / [H, 3H], gate order r,z,n)
    for l in (1, 2):
        p[f"g{l}_wih"] = nrm((_H, 3 * _H), 0.05)
        p[f"g{l}_whh"] = nrm((_H, 3 * _H), 0.05)
        p[f"g{l}_bih"] = nrm((1, 3 * _H), 0.05)
        p[f"g{l}_bhh"] = nrm((1, 3 * _H), 0.05)
    # decoder ConvTranspose1d blocks: weight [Cin, Cout, k]
    dec = [(512, 128, 4), (256, 64, 4), (128, 32, 4), (64, 16, 4), (32, 1, 7)]
    for i, (ci, co, k) in enumerate(dec, 1):
        p[f"t{i}_w"] = nrm((ci, co, k))
        p[f"t{i}_b"] = nrm((co,))
        p[f"t{i}_g"] = jnp.ones((co,), jnp.float32)
        p[f"t{i}_be"] = jnp.zeros((co,), jnp.float32)
    return p


def gruse_forward(x, p):
    """x: [B, L] float32 -> enhanced [B, L_out] (L_out = valid_length(L))."""
    B, L = x.shape
    vl = valid_length(L)
    x = jnp.pad(x, ((0, 0), (0, vl - L)))
    x = x[:, :, None].astype(_ACT_DTYPE)                            # [B, L', 1] channels-last

    e1 = conv_block(x,  p["c1_w"], p["c1_b"], p["c1_g"], p["c1_be"], 7, 1, 3)
    e2 = conv_block(e1, p["c2_w"], p["c2_b"], p["c2_g"], p["c2_be"], 4, 2, 1)
    e3 = conv_block(e2, p["c3_w"], p["c3_b"], p["c3_g"], p["c3_be"], 4, 2, 1)
    e4 = conv_block(e3, p["c4_w"], p["c4_b"], p["c4_g"], p["c4_be"], 4, 2, 1)
    e5 = conv_block(e4, p["c5_w"], p["c5_b"], p["c5_g"], p["c5_be"], 4, 2, 1)

    g = gru_block(e5, p)                                            # [B, T, 256] bf16

    d1 = tconv_block_s2(jnp.concatenate([g,  e5], axis=-1),
                        p["t1_w"], p["t1_b"], p["t1_g"], p["t1_be"])
    d2 = tconv_block_s2(jnp.concatenate([d1, e4], axis=-1),
                        p["t2_w"], p["t2_b"], p["t2_g"], p["t2_be"])
    d3 = tconv_block_s2(jnp.concatenate([d2, e3], axis=-1),
                        p["t3_w"], p["t3_b"], p["t3_g"], p["t3_be"])
    d4 = tconv_block_s2(jnp.concatenate([d3, e2], axis=-1),
                        p["t4_w"], p["t4_b"], p["t4_g"], p["t4_be"])
    d5 = tconv_block_s1(jnp.concatenate([d4, e1], axis=-1),
                        p["t5_w"], p["t5_b"], p["t5_g"], p["t5_be"], 7, 3,
                        apply_act=False, out_dtype=jnp.float32)
    return d5[:, :, 0]                                              # squeeze channel, f32


if __name__ == "__main__":
    key = jax.random.PRNGKey(0)
    kp, kx = jax.random.split(key)
    params = init_params(kp)
    # small shapes: batch=2, signal length=64 (valid_length(64) == 64, no pad)
    x = jax.random.normal(kx, (2, 64), dtype=jnp.float32)
    out = jax.jit(gruse_forward)(x, params)
    out = jax.block_until_ready(out)
    assert out.shape == (2, 64), out.shape
    assert bool(jnp.all(jnp.isfinite(out)))
    print("KERNEL_OK")
</pallas_src>

<mosaic_0001>
module attributes {stable_mosaic.version = 11 : i64} {
  func.func @_mm_stats_kernel(%arg0: i32, %arg1: memref<128x7xbf16, #tpu.memory_space<vmem>>, %arg2: memref<7x16xbf16, #tpu.memory_space<vmem>>, %arg3: memref<1x16xf32, #tpu.memory_space<vmem>>, %arg4: memref<128x16xf32, #tpu.memory_space<vmem>>, %arg5: memref<8x16xf32, #tpu.memory_space<vmem>>) attributes {dimension_semantics = [#tpu.dimension_semantics<parallel>], iteration_bounds = array<i64: 1>, scalar_prefetch = 0 : i64, scratch_operands = 0 : i64, tpu.core_type = #tpu.core_type<tc>, window_params = [{transform_indices = @transform_0, window_bounds = array<i64: 128, 7>}, {pipeline_mode = #tpu.pipeline_mode<synchronous>, transform_indices = @transform_1, window_bounds = array<i64: 7, 16>}, {pipeline_mode = #tpu.pipeline_mode<synchronous>, transform_indices = @transform_2, window_bounds = array<i64: 1, 16>}, {transform_indices = @transform_3, window_bounds = array<i64: 128, 16>}, {transform_indices = @transform_4, window_bounds = array<i64: 8, 16>}]} {
    %c0 = arith.constant 0 : index
    %c0_0 = arith.constant 0 : index
    %0 = vector.load %arg1[%c0, %c0_0] : memref<128x7xbf16, #tpu.memory_space<vmem>>, vector<128x7xbf16>
    %c0_1 = arith.constant 0 : index
    %c0_2 = arith.constant 0 : index
    %1 = vector.load %arg2[%c0_1, %c0_2] : memref<7x16xbf16, #tpu.memory_space<vmem>>, vector<7x16xbf16>
    %cst = arith.constant dense<0.000000e+00> : vector<128x16xf32>
    %2 = tpu.matmul %0, %1, %cst {dimension_numbers = #tpu.dot_dimension_numbers<[1], [0], [0], [1], [0, 0, 1, 1], [], []>} : vector<128x7xbf16>, vector<7x16xbf16>, vector<128x16xf32> -> vector<128x16xf32>
    %c0_3 = arith.constant 0 : index
    %c0_4 = arith.constant 0 : index
    %3 = vector.load %arg3[%c0_3, %c0_4] : memref<1x16xf32, #tpu.memory_space<vmem>>, vector<1x16xf32>
    %4 = vector.broadcast %3 : vector<1x16xf32> to vector<128x16xf32>
    %5 = arith.addf %2, %4 : vector<128x16xf32>
    %c0_5 = arith.constant 0 : index
    %c0_6 = arith.constant 0 : index
    %6 = vector.load %arg4[%c0_5, %c0_6] : memref<128x16xf32, #tpu.memory_space<vmem>>, vector<128x16xf32>
    tpu.vector_store %arg4[%c0_5, %c0_6], %5 {strides = array<i32>} : memref<128x16xf32, #tpu.memory_space<vmem>>, vector<128x16xf32>,
    %7 = tpu.iota {dimensions = array<i32: 0>} : vector<128x16xi32>
    %c128_i32 = arith.constant 128 : i32
    %8 = arith.muli %arg0, %c128_i32 : i32
    %9 = vector.broadcast %8 : i32 to vector<128x16xi32>
    %10 = arith.addi %7, %9 : vector<128x16xi32>
    %c128_i32_7 = arith.constant 128 : i32
    %11 = vector.broadcast %c128_i32_7 : i32 to vector<128x16xi32>
    %12 = arith.cmpi slt, %10, %11 : vector<128x16xi32>
    %cst_8 = arith.constant 0.000000e+00 : f32
    %13 = vector.broadcast %cst_8 : f32 to vector<128x16xf32>
    %14 = arith.select %12, %5, %13 : vector<128x16xi1>, vector<128x16xf32>
    %cst_9 = arith.constant dense<0.000000e+00> : vector<16xf32>
    %15 = vector.multi_reduction <add>, %14, %cst_9 [0] : vector<128x16xf32> to vector<16xf32>
    %16 = vector.shape_cast %15 : vector<16xf32> to vector<1x16xf32>
    %17 = arith.mulf %14, %14 : vector<128x16xf32>
    %cst_10 = arith.constant dense<0.000000e+00> : vector<16xf32>
    %18 = vector.multi_reduction <add>, %17, %cst_10 [0] : vector<128x16xf32> to vector<16xf32>
    %19 = vector.shape_cast %18 : vector<16xf32> to vector<1x16xf32>
    %20 = tpu.iota {dimensions = array<i32: 0>} : vector<8x16xi32>
    %c0_i32 = arith.constant 0 : i32
    %21 = vector.broadcast %c0_i32 : i32 to vector<8x16xi32>
    %22 = arith.cmpi eq, %20, %21 : vector<8x16xi32>
    %cst_11 = arith.constant 0.000000e+00 : f32
    %23 = vector.shape_cast %16 : vector<1x16xf32> to vector<1x16xf32>
    %24 = vector.broadcast %23 : vector<1x16xf32> to vector<8x16xf32>
    %25 = vector.broadcast %cst_11 : f32 to vector<8x16xf32>
    %26 = arith.select %22, %24, %25 : vector<8x16xi1>, vector<8x16xf32>
    %c1_i32 = arith.constant 1 : i32
    %27 = vector.broadcast %c1_i32 : i32 to vector<8x16xi32>
    %28 = arith.cmpi eq, %20, %27 : vector<8x16xi32>
    %cst_12 = arith.constant 0.000000e+00 : f32
    %29 = vector.shape_cast %19 : vector<1x16xf32> to vector<1x16xf32>
    %30 = vector.broadcast %29 : vector<1x16xf32> to vector<8x16xf32>
    %31 = vector.broadcast %cst_12 : f32 to vector<8x16xf32>
    %32 = arith.select %28, %30, %31 : vector<8x16xi1>, vector<8x16xf32>
    %33 = arith.addf %26, %32 : vector<8x16xf32>
    %c0_13 = arith.constant 0 : index
    %c0_14 = arith.constant 0 : index
    %34 = vector.load %arg5[%c0_13, %c0_14] : memref<8x16xf32, #tpu.memory_space<vmem>>, vector<8x16xf32>
    tpu.vector_store %arg5[%c0_13, %c0_14], %33 {strides = array<i32>} : memref<8x16xf32, #tpu.memory_space<vmem>>, vector<8x16xf32>,
    return
  }
  func.func @transform_0(%arg0: i32) -> (i32, i32) {
    %c0_i32 = arith.constant 0 : i32
    %c0_i32_0 = arith.constant 0 : i32
    return %arg0, %c0_i32 : i32, i32
  }
  func.func @transform_1(%arg0: i32) -> (i32, i32) {
    %c0_i32 = arith.constant 0 : i32
    %c0_i32_0 = arith.constant 0 : i32
    %c0_i32_1 = arith.constant 0 : i32
    return %c0_i32, %c0_i32_0 : i32, i32
  }
  func.func @transform_2(%arg0: i32) -> (i32, i32) {
    %c0_i32 = arith.constant 0 : i32
    %c0_i32_0 = arith.constant 0 : i32
    %c0_i32_1 = arith.constant 0 : i32
    return %c0_i32, %c0_i32_0 : i32, i32
  }
  func.func @transform_3(%arg0: i32) -> (i32, i32) {
    %c0_i32 = arith.constant 0 : i32
    %c0_i32_0 = arith.constant 0 : i32
    return %arg0, %c0_i32 : i32, i32
  }
  func.func @transform_4(%arg0: i32) -> (i32, i32) {
    %c0_i32 = arith.constant 0 : i32
    %c0_i32_0 = arith.constant 0 : i32
    return %arg0, %c0_i32 : i32, i32
  }
}

module attributes {stable_mosaic.version = 11 : i64} {
  func.func @_norm_act_kernel(%arg0: i32, %arg1: memref<128x16xf32, #tpu.memory_space<vmem>>, %arg2: memref<1x16xf32, #tpu.memory_space<vmem>>, %arg3: memref<1x16xf32, #tpu.memory_space<vmem>>, %arg4: memref<128x16xbf16, #tpu.memory_space<vmem>>) attributes {dimension_semantics = [#tpu.dimension_semantics<parallel>], iteration_bounds = array<i64: 1>, scalar_prefetch = 0 : i64, scratch_operands = 0 : i64, tpu.core_type = #tpu.core_type<tc>, window_params = [{transform_indices = @transform_0, window_bounds = array<i64: 128, 16>}, {pipeline_mode = #tpu.pipeline_mode<synchronous>, transform_indices = @transform_1, window_bounds = array<i64: 1, 16>}, {pipeline_mode = #tpu.pipeline_mode<synchronous>, transform_indices = @transform_2, window_bounds = array<i64: 1, 16>}, {transform_indices = @transform_3, window_bounds = array<i64: 128, 16>}]} {
    %c0 = arith.constant 0 : index
    %c0_0 = arith.constant 0 : index
    %0 = vector.load %arg1[%c0, %c0_0] : memref<128x16xf32, #tpu.memory_space<vmem>>, vector<128x16xf32>
    %c0_1 = arith.constant 0 : index
    %c0_2 = arith.constant 0 : index
    %1 = vector.load %arg2[%c0_1, %c0_2] : memref<1x16xf32, #tpu.memory_space<vmem>>, vector<1x16xf32>
    %2 = vector.broadcast %1 : vector<1x16xf32> to vector<128x16xf32>
    %3 = arith.mulf %0, %2 : vector<128x16xf32>
    %c0_3 = arith.constant 0 : index
    %c0_4 = arith.constant 0 : index
    %4 = vector.load %arg3[%c0_3, %c0_4] : memref<1x16xf32, #tpu.memory_space<vmem>>, vector<1x16xf32>
    %5 = vector.broadcast %4 : vector<1x16xf32> to vector<128x16xf32>
    %6 = arith.addf %3, %5 : vector<128x16xf32>
    %cst = arith.constant 0.000000e+00 : f32
    %7 = vector.broadcast %cst : f32 to vector<128x16xf32>
    %8 = arith.cmpf ogt, %6, %7 : vector<128x16xf32>
    %cst_5 = arith.constant 0.000000e+00 : f32
    %9 = vector.broadcast %cst_5 : f32 to vector<128x16xf32>
    %10 = arith.minimumf %6, %9 : vector<128x16xf32>
    %11 = math.exp %10 : vector<128x16xf32>
    %cst_6 = arith.constant 1.000000e+00 : f32
    %12 = vector.broadcast %cst_6 : f32 to vector<128x16xf32>
    %13 = arith.subf %11, %12 : vector<128x16xf32>
    %14 = arith.select %8, %6, %13 : vector<128x16xi1>, vector<128x16xf32>
    %15 = arith.truncf %14 : vector<128x16xf32> to vector<128x16xbf16>
    %c0_7 = arith.constant 0 : index
    %c0_8 = arith.constant 0 : index
    %16 = vector.load %arg4[%c0_7, %c0_8] : memref<128x16xbf16, #tpu.memory_space<vmem>>, vector<128x16xbf16>
    tpu.vector_store %arg4[%c0_7, %c0_8], %15 {strides = array<i32>} : memref<128x16xbf16, #tpu.memory_space<vmem>>, vector<128x16xbf16>,
    return
  }
  func.func @transform_0(%arg0: i32) -> (i32, i32) {
    %c0_i32 = arith.constant 0 : i32
    %c0_i32_0 = arith.constant 0 : i32
    return %arg0, %c0_i32 : i32, i32
  }
  func.func @transform_1(%arg0: i32) -> (i32, i32) {
    %c0_i32 = arith.constant 0 : i32
    %c0_i32_0 = arith.constant 0 : i32
    %c0_i32_1 = arith.constant 0 : i32
    return %c0_i32, %c0_i32_0 : i32, i32
  }
  func.func @transform_2(%arg0: i32) -> (i32, i32) {
    %c0_i32 = arith.constant 0 : i32
    %c0_i32_0 = arith.constant 0 : i32
    %c0_i32_1 = arith.constant 0 : i32
    return %c0_i32, %c0_i32_0 : i32, i32
  }
  func.func @transform_3(%arg0: i32) -> (i32, i32) {
    %c0_i32 = arith.constant 0 : i32
    %c0_i32_0 = arith.constant 0 : i32
    return %arg0, %c0_i32 : i32, i32
  }
}

module attributes {stable_mosaic.version = 11 : i64} {
  func.func @_mm_stats_kernel(%arg0: i32, %arg1: memref<64x64xbf16, #tpu.memory_space<vmem>>, %arg2: memref<64x32xbf16, #tpu.memory_space<vmem>>, %arg3: memref<1x32xf32, #tpu.memory_space<vmem>>, %arg4: memref<64x32xf32, #tpu.memory_space<vmem>>, %arg5: memref<8x32xf32, #tpu.memory_space<vmem>>) attributes {dimension_semantics = [#tpu.dimension_semantics<parallel>], iteration_bounds = array<i64: 1>, scalar_prefetch = 0 : i64, scratch_operands = 0 : i64, tpu.core_type = #tpu.core_type<tc>, window_params = [{transform_indices = @transform_0, window_bounds = array<i64: 64, 64>}, {pipeline_mode = #tpu.pipeline_mode<synchronous>, transform_indices = @transform_1, window_bounds = array<i64: 64, 32>}, {pipeline_mode = #tpu.pipeline_mode<synchronous>, transform_indices = @transform_2, window_bounds = array<i64: 1, 32>}, {transform_indices = @transform_3, window_bounds = array<i64: 64, 32>}, {transform_indices = @transform_4, window_bounds = array<i64: 8, 32>}]} {
    %c0 = arith.constant 0 : index
    %c0_0 = arith.constant 0 : index
    %0 = vector.load %arg1[%c0, %c0_0] : memref<64x64xbf16, #tpu.memory_space<vmem>>, vector<64x64xbf16>
    %c0_1 = arith.constant 0 : index
    %c0_2 = arith.constant 0 : index
    %1 = vector.load %arg2[%c0_1, %c0_2] : memref<64x32xbf16, #tpu.memory_space<vmem>>, vector<64x32xbf16>
    %cst = arith.constant dense<0.000000e+00> : vector<64x32xf32>
    %2 = tpu.matmul %0, %1, %cst {dimension_numbers = #tpu.dot_dimension_numbers<[1], [0], [0], [1], [0, 0, 1, 1], [], []>} : vector<64x64xbf16>, vector<64x32xbf16>, vector<64x32xf32> -> vector<64x32xf32>
    %c0_3 = arith.constant 0 : index
    %c0_4 = arith.constant 0 : index
    %3 = vector.load %arg3[%c0_3, %c0_4] : memref<1x32xf32, #tpu.memory_space<vmem>>, vector<1x32xf32>
    %4 = vector.broadcast %3 : vector<1x32xf32> to vector<64x32xf32>
    %5 = arith.addf %2, %4 : vector<64x32xf32>
    %c0_5 = arith.constant 0 : index
    %c0_6 = arith.constant 0 : index
    %6 = vector.load %arg4[%c0_5, %c0_6] : memref<64x32xf32, #tpu.memory_space<vmem>>, vector<64x32xf32>
    tpu.vector_store %arg4[%c0_5, %c0_6], %5 {strides = array<i32>} : memref<64x32xf32, #tpu.memory_space<vmem>>, vector<64x32xf32>,
    %7 = tpu.iota {dimensions = array<i32: 0>} : vector<64x32xi32>
    %c64_i32 = arith.constant 64 : i32
    %8 = arith.muli %arg0, %c64_i32 : i32
    %9 = vector.broadcast %8 : i32 to vector<64x32xi32>
    %10 = arith.addi %7, %9 : vector<64x32xi32>
    %c64_i32_7 = arith.constant 64 : i32
    %11 = vector.broadcast %c64_i32_7 : i32 to vector<64x32xi32>
    %12 = arith.cmpi slt, %10, %11 : vector<64x32xi32>
    %cst_8 = arith.constant 0.000000e+00 : f32
    %13 = vector.broadcast %cst_8 : f32 to vector<64x32xf32>
    %14 = arith.select %12, %5, %13 : vector<64x32xi1>, vector<64x32xf32>
    %cst_9 = arith.constant dense<0.000000e+00> : vector<32xf32>
    %15 = vector.multi_reduction <add>, %14, %cst_9 [0] : vector<64x32xf32> to vector<32xf32>
    %16 = vector.shape_cast %15 : vector<32xf32> to vector<1x32xf32>
    %17 = arith.mulf %14, %14 : vector<64x32xf32>
    %cst_10 = arith.constant dense<0.000000e+00> : vector<32xf32>
    %18 = vector.multi_reduction <add>, %17, %cst_10 [0] : vector<64x32xf32> to vector<32xf32>
    %19 = vector.shape_cast %18 : vector<32xf32> to vector<1x32xf32>
    %20 = tpu.iota {dimensions = array<i32: 0>} : vector<8x32xi32>
    %c0_i32 = arith.constant 0 : i32
    %21 = vector.broadcast %c0_i32 : i32 to vector<8x32xi32>
    %22 = arith.cmpi eq, %20, %21 : vector<8x32xi32>
    %cst_11 = arith.constant 0.000000e+00 : f32
    %23 = vector.shape_cast %16 : vector<1x32xf32> to vector<1x32xf32>
    %24 = vector.broadcast %23 : vector<1x32xf32> to vector<8x32xf32>
    %25 = vector.broadcast %cst_11 : f32 to vector<8x32xf32>
    %26 = arith.select %22, %24, %25 : vector<8x32xi1>, vector<8x32xf32>
    %c1_i32 = arith.constant 1 : i32
    %27 = vector.broadcast %c1_i32 : i32 to vector<8x32xi32>
    %28 = arith.cmpi eq, %20, %27 : vector<8x32xi32>
    %cst_12 = arith.constant 0.000000e+00 : f32
    %29 = vector.shape_cast %19 : vector<1x32xf32> to vector<1x32xf32>
    %30 = vector.broadcast %29 : vector<1x32xf32> to vector<8x32xf32>
    %31 = vector.broadcast %cst_12 : f32 to vector<8x32xf32>
    %32 = arith.select %28, %30, %31 : vector<8x32xi1>, vector<8x32xf32>
    %33 = arith.addf %26, %32 : vector<8x32xf32>
    %c0_13 = arith.constant 0 : index
    %c0_14 = arith.constant 0 : index
    %34 = vector.load %arg5[%c0_13, %c0_14] : memref<8x32xf32, #tpu.memory_space<vmem>>, vector<8x32xf32>
    tpu.vector_store %arg5[%c0_13, %c0_14], %33 {strides = array<i32>} : memref<8x32xf32, #tpu.memory_space<vmem>>, vector<8x32xf32>,
    return
  }
  func.func @transform_0(%arg0: i32) -> (i32, i32) {
    %c0_i32 = arith.constant 0 : i32
    %c0_i32_0 = arith.constant 0 : i32
    return %arg0, %c0_i32 : i32, i32
  }
  func.func @transform_1(%arg0: i32) -> (i32, i32) {
    %c0_i32 = arith.constant 0 : i32
    %c0_i32_0 = arith.constant 0 : i32
    %c0_i32_1 = arith.constant 0 : i32
    return %c0_i32, %c0_i32_0 : i32, i32
  }
  func.func @transform_2(%arg0: i32) -> (i32, i32) {
    %c0_i32 = arith.constant 0 : i32
    %c0_i32_0 = arith.constant 0 : i32
    %c0_i32_1 = arith.constant 0 : i32
    return %c0_i32, %c0_i32_0 : i32, i32
  }
  func.func @transform_3(%arg0: i32) -> (i32, i32) {
    %c0_i32 = arith.constant 0 : i32
    %c0_i32_0 = arith.constant 0 : i32
    return %arg0, %c0_i32 : i32, i32
  }
  func.func @transform_4(%arg0: i32) -> (i32, i32) {
    %c0_i32 = arith.constant 0 : i32
    %c0_i32_0 = arith.constant 0 : i32
    return %arg0, %c0_i32 : i32, i32
  }
}

module attributes {stable_mosaic.version = 11 : i64} {
  func.func @_norm_act_kernel(%arg0: i32, %arg1: memref<64x32xf32, #tpu.memory_space<vmem>>, %arg2: memref<1x32xf32, #tpu.memory_space<vmem>>, %arg3: memref<1x32xf32, #tpu.memory_space<vmem>>, %arg4: memref<64x32xbf16, #tpu.memory_space<vmem>>) attributes {dimension_semantics = [#tpu.dimension_semantics<parallel>], iteration_bounds = array<i64: 1>, scalar_prefetch = 0 : i64, scratch_operands = 0 : i64, tpu.core_type = #tpu.core_type<tc>, window_params = [{transform_indices = @transform_0, window_bounds = array<i64: 64, 32>}, {pipeline_mode = #tpu.pipeline_mode<synchronous>, transform_indices = @transform_1, window_bounds = array<i64: 1, 32>}, {pipeline_mode = #tpu.pipeline_mode<synchronous>, transform_indices = @transform_2, window_bounds = array<i64: 1, 32>}, {transform_indices = @transform_3, window_bounds = array<i64: 64, 32>}]} {
    %c0 = arith.constant 0 : index
    %c0_0 = arith.constant 0 : index
    %0 = vector.load %arg1[%c0, %c0_0] : memref<64x32xf32, #tpu.memory_space<vmem>>, vector<64x32xf32>
    %c0_1 = arith.constant 0 : index
    %c0_2 = arith.constant 0 : index
    %1 = vector.load %arg2[%c0_1, %c0_2] : memref<1x32xf32, #tpu.memory_space<vmem>>, vector<1x32xf32>
    %2 = vector.broadcast %1 : vector<1x32xf32> to vector<64x32xf32>
    %3 = arith.mulf %0, %2 : vector<64x32xf32>
    %c0_3 = arith.constant 0 : index
    %c0_4 = arith.constant 0 : index
    %4 = vector.load %arg3[%c0_3, %c0_4] : memref<1x32xf32, #tpu.memory_space<vmem>>, vector<1x32xf32>
    %5 = vector.broadcast %4 : vector<1x32xf32> to vector<64x32xf32>
    %6 = arith.addf %3, %5 : vector<64x32xf32>
    %cst = arith.constant 0.000000e+00 : f32
    %7 = vector.broadcast %cst : f32 to vector<64x32xf32>
    %8 = arith.cmpf ogt, %6, %7 : vector<64x32xf32>
    %cst_5 = arith.constant 0.000000e+00 : f32
    %9 = vector.broadcast %cst_5 : f32 to vector<64x32xf32>
    %10 = arith.minimumf %6, %9 : vector<64x32xf32>
    %11 = math.exp %10 : vector<64x32xf32>
    %cst_6 = arith.constant 1.000000e+00 : f32
    %12 = vector.broadcast %cst_6 : f32 to vector<64x32xf32>
    %13 = arith.subf %11, %12 : vector<64x32xf32>
    %14 = arith.select %8, %6, %13 : vector<64x32xi1>, vector<64x32xf32>
    %15 = arith.truncf %14 : vector<64x32xf32> to vector<64x32xbf16>
    %c0_7 = arith.constant 0 : index
    %c0_8 = arith.constant 0 : index
    %16 = vector.load %arg4[%c0_7, %c0_8] : memref<64x32xbf16, #tpu.memory_space<vmem>>, vector<64x32xbf16>
    tpu.vector_store %arg4[%c0_7, %c0_8], %15 {strides = array<i32>} : memref<64x32xbf16, #tpu.memory_space<vmem>>, vector<64x32xbf16>,
    return
  }
  func.func @transform_0(%arg0: i32) -> (i32, i32) {
    %c0_i32 = arith.constant 0 : i32
    %c0_i32_0 = arith.constant 0 : i32
    return %arg0, %c0_i32 : i32, i32
  }
  func.func @transform_1(%arg0: i32) -> (i32, i32) {
    %c0_i32 = arith.constant 0 : i32
    %c0_i32_0 = arith.constant 0 : i32
    %c0_i32_1 = arith.constant 0 : i32
    return %c0_i32, %c0_i32_0 : i32, i32
  }
  func.func @transform_2(%arg0: i32) -> (i32, i32) {
    %c0_i32 = arith.constant 0 : i32
    %c0_i32_0 = arith.constant 0 : i32
    %c0_i32_1 = arith.constant 0 : i32
    return %c0_i32, %c0_i32_0 : i32, i32
  }
  func.func @transform_3(%arg0: i32) -> (i32, i32) {
    %c0_i32 = arith.constant 0 : i32
    %c0_i32_0 = arith.constant 0 : i32
    return %arg0, %c0_i32 : i32, i32
  }
}

module attributes {stable_mosaic.version = 11 : i64} {
  func.func @_mm_stats_kernel(%arg0: i32, %arg1: memref<32x128xbf16, #tpu.memory_space<vmem>>, %arg2: memref<128x64xbf16, #tpu.memory_space<vmem>>, %arg3: memref<1x64xf32, #tpu.memory_space<vmem>>, %arg4: memref<32x64xf32, #tpu.memory_space<vmem>>, %arg5: memref<8x64xf32, #tpu.memory_space<vmem>>) attributes {dimension_semantics = [#tpu.dimension_semantics<parallel>], iteration_bounds = array<i64: 1>, scalar_prefetch = 0 : i64, scratch_operands = 0 : i64, tpu.core_type = #tpu.core_type<tc>, window_params = [{transform_indices = @transform_0, window_bounds = array<i64: 32, 128>}, {pipeline_mode = #tpu.pipeline_mode<synchronous>, transform_indices = @transform_1, window_bounds = array<i64: 128, 64>}, {pipeline_mode = #tpu.pipeline_mode<synchronous>, transform_indices = @transform_2, window_bounds = array<i64: 1, 64>}, {transform_indices = @transform_3, window_bounds = array<i64: 32, 64>}, {transform_indices = @transform_4, window_bounds = array<i64: 8, 64>}]} {
    %c0 = arith.constant 0 : index
    %c0_0 = arith.constant 0 : index
    %0 = vector.load %arg1[%c0, %c0_0] : memref<32x128xbf16, #tpu.memory_space<vmem>>, vector<32x128xbf16>
    %c0_1 = arith.constant 0 : index
    %c0_2 = arith.constant 0 : index
    %1 = vector.load %arg2[%c0_1, %c0_2] : memref<128x64xbf16, #tpu.memory_space<vmem>>, vector<128x64xbf16>
    %cst = arith.constant dense<0.000000e+00> : vector<32x64xf32>
    %2 = tpu.matmul %0, %1, %cst {dimension_numbers = #tpu.dot_dimension_numbers<[1], [0], [0], [1], [0, 0, 1, 1], [], []>} : vector<32x128xbf16>, vector<128x64xbf16>, vector<32x64xf32> -> vector<32x64xf32>
    %c0_3 = arith.constant 0 : index
    %c0_4 = arith.constant 0 : index
    %3 = vector.load %arg3[%c0_3, %c0_4] : memref<1x64xf32, #tpu.memory_space<vmem>>, vector<1x64xf32>
    %4 = vector.broadcast %3 : vector<1x64xf32> to vector<32x64xf32>
    %5 = arith.addf %2, %4 : vector<32x64xf32>
    %c0_5 = arith.constant 0 : index
    %c0_6 = arith.constant 0 : index
    %6 = vector.load %arg4[%c0_5, %c0_6] : memref<32x64xf32, #tpu.memory_space<vmem>>, vector<32x64xf32>
    tpu.vector_store %arg4[%c0_5, %c0_6], %5 {strides = array<i32>} : memref<32x64xf32, #tpu.memory_space<vmem>>, vector<32x64xf32>,
    %7 = tpu.iota {dimensions = array<i32: 0>} : vector<32x64xi32>
    %c32_i32 = arith.constant 32 : i32
    %8 = arith.muli %arg0, %c32_i32 : i32
    %9 = vector.broadcast %8 : i32 to vector<32x64xi32>
    %10 = arith.addi %7, %9 : vector<32x64xi32>
    %c32_i32_7 = arith.constant 32 : i32
    %11 = vector.broadcast %c32_i32_7 : i32 to vector<32x64xi32>
    %12 = arith.cmpi slt, %10, %11 : vector<32x64xi32>
    %cst_8 = arith.constant 0.000000e+00 : f32
    %13 = vector.broadcast %cst_8 : f32 to vector<32x64xf32>
    %14 = arith.select %12, %5, %13 : vector<32x64xi1>, vector<32x64xf32>
    %cst_9 = arith.constant dense<0.000000e+00> : vector<64xf32>
    %15 = vector.multi_reduction <add>, %14, %cst_9 [0] : vector<32x64xf32> to vector<64xf32>
    %16 = vector.shape_cast %15 : vector<64xf32> to vector<1x64xf32>
    %17 = arith.mulf %14, %14 : vector<32x64xf32>
    %cst_10 = arith.constant dense<0.000000e+00> : vector<64xf32>
    %18 = vector.multi_reduction <add>, %17, %cst_10 [0] : vector<32x64xf32> to vector<64xf32>
    %19 = vector.shape_cast %18 : vector<64xf32> to vector<1x64xf32>
    %20 = tpu.iota {dimensions = array<i32: 0>} : vector<8x64xi32>
    %c0_i32 = arith.constant 0 : i32
    %21 = vector.broadcast %c0_i32 : i32 to vector<8x64xi32>
    %22 = arith.cmpi eq, %20, %21 : vector<8x64xi32>
    %cst_11 = arith.constant 0.000000e+00 : f32
    %23 = vector.shape_cast %16 : vector<1x64xf32> to vector<1x64xf32>
    %24 = vector.broadcast %23 : vector<1x64xf32> to vector<8x64xf32>
    %25 = vector.broadcast %cst_11 : f32 to vector<8x64xf32>
    %26 = arith.select %22, %24, %25 : vector<8x64xi1>, vector<8x64xf32>
    %c1_i32 = arith.constant 1 : i32
    %27 = vector.broadcast %c1_i32 : i32 to vector<8x64xi32>
    %28 = arith.cmpi eq, %20, %27 : vector<8x64xi32>
    %cst_12 = arith.constant 0.000000e+00 : f32
    %29 = vector.shape_cast %19 : vector<1x64xf32> to vector<1x64xf32>
    %30 = vector.broadcast %29 : vector<1x64xf32> to vector<8x64xf32>
    %31 = vector.broadcast %cst_12 : f32 to vector<8x64xf32>
    %32 = arith.select %28, %30, %31 : vector<8x64xi1>, vector<8x64xf32>
    %33 = arith.addf %26, %32 : vector<8x64xf32>
    %c0_13 = arith.constant 0 : index
    %c0_14 = arith.constant 0 : index
    %34 = vector.load %arg5[%c0_13, %c0_14] : memref<8x64xf32, #tpu.memory_space<vmem>>, vector<8x64xf32>
    tpu.vector_store %arg5[%c0_13, %c0_14], %33 {strides = array<i32>} : memref<8x64xf32, #tpu.memory_space<vmem>>, vector<8x64xf32>,
    return
  }
  func.func @transform_0(%arg0: i32) -> (i32, i32) {
    %c0_i32 = arith.constant 0 : i32
    %c0_i32_0 = arith.constant 0 : i32
    return %arg0, %c0_i32 : i32, i32
  }
  func.func @transform_1(%arg0: i32) -> (i32, i32) {
    %c0_i32 = arith.constant 0 : i32
    %c0_i32_0 = arith.constant 0 : i32
    %c0_i32_1 = arith.constant 0 : i32
    return %c0_i32, %c0_i32_0 : i32, i32
  }
  func.func @transform_2(%arg0: i32) -> (i32, i32) {
    %c0_i32 = arith.constant 0 : i32
    %c0_i32_0 = arith.constant 0 : i32
    %c0_i32_1 = arith.constant 0 : i32
    return %c0_i32, %c0_i32_0 : i32, i32
  }
  func.func @transform_3(%arg0: i32) -> (i32, i32) {
    %c0_i32 = arith.constant 0 : i32
    %c0_i32_0 = arith.constant 0 : i32
    return %arg0, %c0_i32 : i32, i32
  }
  func.func @transform_4(%arg0: i32) -> (i32, i32) {
    %c0_i32 = arith.constant 0 : i32
    %c0_i32_0 = arith.constant 0 : i32
    return %arg0, %c0_i32 : i32, i32
  }
}

module attributes {stable_mosaic.version = 11 : i64} {
  func.func @_norm_act_kernel(%arg0: i32, %arg1: memref<32x64xf32, #tpu.memory_space<vmem>>, %arg2: memref<1x64xf32, #tpu.memory_space<vmem>>, %arg3: memref<1x64xf32, #tpu.memory_space<vmem>>, %arg4: memref<32x64xbf16, #tpu.memory_space<vmem>>) attributes {dimension_semantics = [#tpu.dimension_semantics<parallel>], iteration_bounds = array<i64: 1>, scalar_prefetch = 0 : i64, scratch_operands = 0 : i64, tpu.core_type = #tpu.core_type<tc>, window_params = [{transform_indices = @transform_0, window_bounds = array<i64: 32, 64>}, {pipeline_mode = #tpu.pipeline_mode<synchronous>, transform_indices = @transform_1, window_bounds = array<i64: 1, 64>}, {pipeline_mode = #tpu.pipeline_mode<synchronous>, transform_indices = @transform_2, window_bounds = array<i64: 1, 64>}, {transform_indices = @transform_3, window_bounds = array<i64: 32, 64>}]} {
    %c0 = arith.constant 0 : index
    %c0_0 = arith.constant 0 : index
    %0 = vector.load %arg1[%c0, %c0_0] : memref<32x64xf32, #tpu.memory_space<vmem>>, vector<32x64xf32>
    %c0_1 = arith.constant 0 : index
    %c0_2 = arith.constant 0 : index
    %1 = vector.load %arg2[%c0_1, %c0_2] : memref<1x64xf32, #tpu.memory_space<vmem>>, vector<1x64xf32>
    %2 = vector.broadcast %1 : vector<1x64xf32> to vector<32x64xf32>
    %3 = arith.mulf %0, %2 : vector<32x64xf32>
    %c0_3 = arith.constant 0 : index
    %c0_4 = arith.constant 0 : index
    %4 = vector.load %arg3[%c0_3, %c0_4] : memref<1x64xf32, #tpu.memory_space<vmem>>, vector<1x64xf32>
    %5 = vector.broadcast %4 : vector<1x64xf32> to vector<32x64xf32>
    %6 = arith.addf %3, %5 : vector<32x64xf32>
    %cst = arith.constant 0.000000e+00 : f32
    %7 = vector.broadcast %cst : f32 to vector<32x64xf32>
    %8 = arith.cmpf ogt, %6, %7 : vector<32x64xf32>
    %cst_5 = arith.constant 0.000000e+00 : f32
    %9 = vector.broadcast %cst_5 : f32 to vector<32x64xf32>
    %10 = arith.minimumf %6, %9 : vector<32x64xf32>
    %11 = math.exp %10 : vector<32x64xf32>
    %cst_6 = arith.constant 1.000000e+00 : f32
    %12 = vector.broadcast %cst_6 : f32 to vector<32x64xf32>
    %13 = arith.subf %11, %12 : vector<32x64xf32>
    %14 = arith.select %8, %6, %13 : vector<32x64xi1>, vector<32x64xf32>
    %15 = arith.truncf %14 : vector<32x64xf32> to vector<32x64xbf16>
    %c0_7 = arith.constant 0 : index
    %c0_8 = arith.constant 0 : index
    %16 = vector.load %arg4[%c0_7, %c0_8] : memref<32x64xbf16, #tpu.memory_space<vmem>>, vector<32x64xbf16>
    tpu.vector_store %arg4[%c0_7, %c0_8], %15 {strides = array<i32>} : memref<32x64xbf16, #tpu.memory_space<vmem>>, vector<32x64xbf16>,
    return
  }
  func.func @transform_0(%arg0: i32) -> (i32, i32) {
    %c0_i32 = arith.constant 0 : i32
    %c0_i32_0 = arith.constant 0 : i32
    return %arg0, %c0_i32 : i32, i32
  }
  func.func @transform_1(%arg0: i32) -> (i32, i32) {
    %c0_i32 = arith.constant 0 : i32
    %c0_i32_0 = arith.constant 0 : i32
    %c0_i32_1 = arith.constant 0 : i32
    return %c0_i32, %c0_i32_0 : i32, i32
  }
  func.func @transform_2(%arg0: i32) -> (i32, i32) {
    %c0_i32 = arith.constant 0 : i32
    %c0_i32_0 = arith.constant 0 : i32
    %c0_i32_1 = arith.constant 0 : i32
    return %c0_i32, %c0_i32_0 : i32, i32
  }
  func.func @transform_3(%arg0: i32) -> (i32, i32) {
    %c0_i32 = arith.constant 0 : i32
    %c0_i32_0 = arith.constant 0 : i32
    return %arg0, %c0_i32 : i32, i32
  }
}

module attributes {stable_mosaic.version = 11 : i64} {
  func.func @_mm_stats_kernel(%arg0: i32, %arg1: memref<16x256xbf16, #tpu.memory_space<vmem>>, %arg2: memref<256x128xbf16, #tpu.memory_space<vmem>>, %arg3: memref<1x128xf32, #tpu.memory_space<vmem>>, %arg4: memref<16x128xf32, #tpu.memory_space<vmem>>, %arg5: memref<8x128xf32, #tpu.memory_space<vmem>>) attributes {dimension_semantics = [#tpu.dimension_semantics<parallel>], iteration_bounds = array<i64: 1>, scalar_prefetch = 0 : i64, scratch_operands = 0 : i64, tpu.core_type = #tpu.core_type<tc>, window_params = [{transform_indices = @transform_0, window_bounds = array<i64: 16, 256>}, {pipeline_mode = #tpu.pipeline_mode<synchronous>, transform_indices = @transform_1, window_bounds = array<i64: 256, 128>}, {pipeline_mode = #tpu.pipeline_mode<synchronous>, transform_indices = @transform_2, window_bounds = array<i64: 1, 128>}, {transform_indices = @transform_3, window_bounds = array<i64: 16, 128>}, {transform_indices = @transform_4, window_bounds = array<i64: 8, 128>}]} {
    %c0 = arith.constant 0 : index
    %c0_0 = arith.constant 0 : index
    %0 = vector.load %arg1[%c0, %c0_0] : memref<16x256xbf16, #tpu.memory_space<vmem>>, vector<16x256xbf16>
    %c0_1 = arith.constant 0 : index
    %c0_2 = arith.constant 0 : index
    %1 = vector.load %arg2[%c0_1, %c0_2] : memref<256x128xbf16, #tpu.memory_space<vmem>>, vector<256x128xbf16>
    %cst = arith.constant dense<0.000000e+00> : vector<16x128xf32>
    %2 = tpu.matmul %0, %1, %cst {dimension_numbers = #tpu.dot_dimension_numbers<[1], [0], [0], [1], [0, 0, 1, 1], [], []>} : vector<16x256xbf16>, vector<256x128xbf16>, vector<16x128xf32> -> vector<16x128xf32>
    %c0_3 = arith.constant 0 : index
    %c0_4 = arith.constant 0 : index
    %3 = vector.load %arg3[%c0_3, %c0_4] : memref<1x128xf32, #tpu.memory_space<vmem>>, vector<1x128xf32>
    %4 = vector.broadcast %3 : vector<1x128xf32> to vector<16x128xf32>
    %5 = arith.addf %2, %4 : vector<16x128xf32>
    %c0_5 = arith.constant 0 : index
    %c0_6 = arith.constant 0 : index
    %6 = vector.load %arg4[%c0_5, %c0_6] : memref<16x128xf32, #tpu.memory_space<vmem>>, vector<16x128xf32>
    tpu.vector_store %arg4[%c0_5, %c0_6], %5 {strides = array<i32>} : memref<16x128xf32, #tpu.memory_space<vmem>>, vector<16x128xf32>,
    %7 = tpu.iota {dimensions = array<i32: 0>} : vector<16x128xi32>
    %c16_i32 = arith.constant 16 : i32
    %8 = arith.muli %arg0, %c16_i32 : i32
    %9 = vector.broadcast %8 : i32 to vector<16x128xi32>
    %10 = arith.addi %7, %9 : vector<16x128xi32>
    %c16_i32_7 = arith.constant 16 : i32
    %11 = vector.broadcast %c16_i32_7 : i32 to vector<16x128xi32>
    %12 = arith.cmpi slt, %10, %11 : vector<16x128xi32>
    %cst_8 = arith.constant 0.000000e+00 : f32
    %13 = vector.broadcast %cst_8 : f32 to vector<16x128xf32>
    %14 = arith.select %12, %5, %13 : vector<16x128xi1>, vector<16x128xf32>
    %cst_9 = arith.constant dense<0.000000e+00> : vector<128xf32>
    %15 = vector.multi_reduction <add>, %14, %cst_9 [0] : vector<16x128xf32> to vector<128xf32>
    %16 = vector.shape_cast %15 : vector<128xf32> to vector<1x128xf32>
    %17 = arith.mulf %14, %14 : vector<16x128xf32>
    %cst_10 = arith.constant dense<0.000000e+00> : vector<128xf32>
    %18 = vector.multi_reduction <add>, %17, %cst_10 [0] : vector<16x128xf32> to vector<128xf32>
    %19 = vector.shape_cast %18 : vector<128xf32> to vector<1x128xf32>
    %20 = tpu.iota {dimensions = array<i32: 0>} : vector<8x128xi32>
    %c0_i32 = arith.constant 0 : i32
    %21 = vector.broadcast %c0_i32 : i32 to vector<8x128xi32>
    %22 = arith.cmpi eq, %20, %21 : vector<8x128xi32>
    %cst_11 = arith.constant 0.000000e+00 : f32
    %23 = vector.shape_cast %16 : vector<1x128xf32> to vector<1x128xf32>
    %24 = vector.broadcast %23 : vector<1x128xf32> to vector<8x128xf32>
    %25 = vector.broadcast %cst_11 : f32 to vector<8x128xf32>
    %26 = arith.select %22, %24, %25 : vector<8x128xi1>, vector<8x128xf32>
    %c1_i32 = arith.constant 1 : i32
    %27 = vector.broadcast %c1_i32 : i32 to vector<8x128xi32>
    %28 = arith.cmpi eq, %20, %27 : vector<8x128xi32>
    %cst_12 = arith.constant 0.000000e+00 : f32
    %29 = vector.shape_cast %19 : vector<1x128xf32> to vector<1x128xf32>
    %30 = vector.broadcast %29 : vector<1x128xf32> to vector<8x128xf32>
    %31 = vector.broadcast %cst_12 : f32 to vector<8x128xf32>
    %32 = arith.select %28, %30, %31 : vector<8x128xi1>, vector<8x128xf32>
    %33 = arith.addf %26, %32 : vector<8x128xf32>
    %c0_13 = arith.constant 0 : index
    %c0_14 = arith.constant 0 : index
    %34 = vector.load %arg5[%c0_13, %c0_14] : memref<8x128xf32, #tpu.memory_space<vmem>>, vector<8x128xf32>
    tpu.vector_store %arg5[%c0_13, %c0_14], %33 {strides = array<i32>} : memref<8x128xf32, #tpu.memory_space<vmem>>, vector<8x128xf32>,
    return
  }
  func.func @transform_0(%arg0: i32) -> (i32, i32) {
    %c0_i32 = arith.constant 0 : i32
    %c0_i32_0 = arith.constant 0 : i32
    return %arg0, %c0_i32 : i32, i32
  }
  func.func @transform_1(%arg0: i32) -> (i32, i32) {
    %c0_i32 = arith.constant 0 : i32
    %c0_i32_0 = arith.constant 0 : i32
    %c0_i32_1 = arith.constant 0 : i32
    return %c0_i32, %c0_i32_0 : i32, i32
  }
  func.func @transform_2(%arg0: i32) -> (i32, i32) {
    %c0_i32 = arith.constant 0 : i32
    %c0_i32_0 = arith.constant 0 : i32
    %c0_i32_1 = arith.constant 0 : i32
    return %c0_i32, %c0_i32_0 : i32, i32
  }
  func.func @transform_3(%arg0: i32) -> (i32, i32) {
    %c0_i32 = arith.constant 0 : i32
    %c0_i32_0 = arith.constant 0 : i32
    return %arg0, %c0_i32 : i32, i32
  }
  func.func @transform_4(%arg0: i32) -> (i32, i32) {
    %c0_i32 = arith.constant 0 : i32
    %c0_i32_0 = arith.constant 0 : i32
    return %arg0, %c0_i32 : i32, i32
  }
}

module attributes {stable_mosaic.version = 11 : i64} {
  func.func @_norm_act_kernel(%arg0: i32, %arg1: memref<16x128xf32, #tpu.memory_space<vmem>>, %arg2: memref<1x128xf32, #tpu.memory_space<vmem>>, %arg3: memref<1x128xf32, #tpu.memory_space<vmem>>, %arg4: memref<16x128xbf16, #tpu.memory_space<vmem>>) attributes {dimension_semantics = [#tpu.dimension_semantics<parallel>], iteration_bounds = array<i64: 1>, scalar_prefetch = 0 : i64, scratch_operands = 0 : i64, tpu.core_type = #tpu.core_type<tc>, window_params = [{transform_indices = @transform_0, window_bounds = array<i64: 16, 128>}, {pipeline_mode = #tpu.pipeline_mode<synchronous>, transform_indices = @transform_1, window_bounds = array<i64: 1, 128>}, {pipeline_mode = #tpu.pipeline_mode<synchronous>, transform_indices = @transform_2, window_bounds = array<i64: 1, 128>}, {transform_indices = @transform_3, window_bounds = array<i64: 16, 128>}]} {
    %c0 = arith.constant 0 : index
    %c0_0 = arith.constant 0 : index
    %0 = vector.load %arg1[%c0, %c0_0] : memref<16x128xf32, #tpu.memory_space<vmem>>, vector<16x128xf32>
    %c0_1 = arith.constant 0 : index
    %c0_2 = arith.constant 0 : index
    %1 = vector.load %arg2[%c0_1, %c0_2] : memref<1x128xf32, #tpu.memory_space<vmem>>, vector<1x128xf32>
    %2 = vector.broadcast %1 : vector<1x128xf32> to vector<16x128xf32>
    %3 = arith.mulf %0, %2 : vector<16x128xf32>
    %c0_3 = arith.constant 0 : index
    %c0_4 = arith.constant 0 : index
    %4 = vector.load %arg3[%c0_3, %c0_4] : memref<1x128xf32, #tpu.memory_space<vmem>>, vector<1x128xf32>
    %5 = vector.broadcast %4 : vector<1x128xf32> to vector<16x128xf32>
    %6 = arith.addf %3, %5 : vector<16x128xf32>
    %cst = arith.constant 0.000000e+00 : f32
    %7 = vector.broadcast %cst : f32 to vector<16x128xf32>
    %8 = arith.cmpf ogt, %6, %7 : vector<16x128xf32>
    %cst_5 = arith.constant 0.000000e+00 : f32
    %9 = vector.broadcast %cst_5 : f32 to vector<16x128xf32>
    %10 = arith.minimumf %6, %9 : vector<16x128xf32>
    %11 = math.exp %10 : vector<16x128xf32>
    %cst_6 = arith.constant 1.000000e+00 : f32
    %12 = vector.broadcast %cst_6 : f32 to vector<16x128xf32>
    %13 = arith.subf %11, %12 : vector<16x128xf32>
    %14 = arith.select %8, %6, %13 : vector<16x128xi1>, vector<16x128xf32>
    %15 = arith.truncf %14 : vector<16x128xf32> to vector<16x128xbf16>
    %c0_7 = arith.constant 0 : index
    %c0_8 = arith.constant 0 : index
    %16 = vector.load %arg4[%c0_7, %c0_8] : memref<16x128xbf16, #tpu.memory_space<vmem>>, vector<16x128xbf16>
    tpu.vector_store %arg4[%c0_7, %c0_8], %15 {strides = array<i32>} : memref<16x128xbf16, #tpu.memory_space<vmem>>, vector<16x128xbf16>,
    return
  }
  func.func @transform_0(%arg0: i32) -> (i32, i32) {
    %c0_i32 = arith.constant 0 : i32
    %c0_i32_0 = arith.constant 0 : i32
    return %arg0, %c0_i32 : i32, i32
  }
  func.func @transform_1(%arg0: i32) -> (i32, i32) {
    %c0_i32 = arith.constant 0 : i32
    %c0_i32_0 = arith.constant 0 : i32
    %c0_i32_1 = arith.constant 0 : i32
    return %c0_i32, %c0_i32_0 : i32, i32
  }
  func.func @transform_2(%arg0: i32) -> (i32, i32) {
    %c0_i32 = arith.constant 0 : i32
    %c0_i32_0 = arith.constant 0 : i32
    %c0_i32_1 = arith.constant 0 : i32
    return %c0_i32, %c0_i32_0 : i32, i32
  }
  func.func @transform_3(%arg0: i32) -> (i32, i32) {
    %c0_i32 = arith.constant 0 : i32
    %c0_i32_0 = arith.constant 0 : i32
    return %arg0, %c0_i32 : i32, i32
  }
}

module attributes {stable_mosaic.version = 11 : i64} {
  func.func @_mm_stats_kernel(%arg0: i32, %arg1: memref<8x512xbf16, #tpu.memory_space<vmem>>, %arg2: memref<512x256xbf16, #tpu.memory_space<vmem>>, %arg3: memref<1x256xf32, #tpu.memory_space<vmem>>, %arg4: memref<8x256xf32, #tpu.memory_space<vmem>>, %arg5: memref<8x256xf32, #tpu.memory_space<vmem>>) attributes {dimension_semantics = [#tpu.dimension_semantics<parallel>], iteration_bounds = array<i64: 1>, scalar_prefetch = 0 : i64, scratch_operands = 0 : i64, tpu.core_type = #tpu.core_type<tc>, window_params = [{transform_indices = @transform_0, window_bounds = array<i64: 8, 512>}, {pipeline_mode = #tpu.pipeline_mode<synchronous>, transform_indices = @transform_1, window_bounds = array<i64: 512, 256>}, {pipeline_mode = #tpu.pipeline_mode<synchronous>, transform_indices = @transform_2, window_bounds = array<i64: 1, 256>}, {transform_indices = @transform_3, window_bounds = array<i64: 8, 256>}, {transform_indices = @transform_4, window_bounds = array<i64: 8, 256>}]} {
    %c0 = arith.constant 0 : index
    %c0_0 = arith.constant 0 : index
    %0 = vector.load %arg1[%c0, %c0_0] : memref<8x512xbf16, #tpu.memory_space<vmem>>, vector<8x512xbf16>
    %c0_1 = arith.constant 0 : index
    %c0_2 = arith.constant 0 : index
    %1 = vector.load %arg2[%c0_1, %c0_2] : memref<512x256xbf16, #tpu.memory_space<vmem>>, vector<512x256xbf16>
    %cst = arith.constant dense<0.000000e+00> : vector<8x256xf32>
    %2 = tpu.matmul %0, %1, %cst {dimension_numbers = #tpu.dot_dimension_numbers<[1], [0], [0], [1], [0, 0, 1, 1], [], []>} : vector<8x512xbf16>, vector<512x256xbf16>, vector<8x256xf32> -> vector<8x256xf32>
    %c0_3 = arith.constant 0 : index
    %c0_4 = arith.constant 0 : index
    %3 = vector.load %arg3[%c0_3, %c0_4] : memref<1x256xf32, #tpu.memory_space<vmem>>, vector<1x256xf32>
    %4 = vector.broadcast %3 : vector<1x256xf32> to vector<8x256xf32>
    %5 = arith.addf %2, %4 : vector<8x256xf32>
    %c0_5 = arith.constant 0 : index
    %c0_6 = arith.constant 0 : index
    %6 = vector.load %arg4[%c0_5, %c0_6] : memref<8x256xf32, #tpu.memory_space<vmem>>, vector<8x256xf32>
    tpu.vector_store %arg4[%c0_5, %c0_6], %5 {strides = array<i32>} : memref<8x256xf32, #tpu.memory_space<vmem>>, vector<8x256xf32>,
    %7 = tpu.iota {dimensions = array<i32: 0>} : vector<8x256xi32>
    %c8_i32 = arith.constant 8 : i32
    %8 = arith.muli %arg0, %c8_i32 : i32
    %9 = vector.broadcast %8 : i32 to vector<8x256xi32>
    %10 = arith.addi %7, %9 : vector<8x256xi32>
    %c8_i32_7 = arith.constant 8 : i32
    %11 = vector.broadcast %c8_i32_7 : i32 to vector<8x256xi32>
    %12 = arith.cmpi slt, %10, %11 : vector<8x256xi32>
    %cst_8 = arith.constant 0.000000e+00 : f32
    %13 = vector.broadcast %cst_8 : f32 to vector<8x256xf32>
    %14 = arith.select %12, %5, %13 : vector<8x256xi1>, vector<8x256xf32>
    %cst_9 = arith.constant dense<0.000000e+00> : vector<256xf32>
    %15 = vector.multi_reduction <add>, %14, %cst_9 [0] : vector<8x256xf32> to vector<256xf32>
    %16 = vector.shape_cast %15 : vector<256xf32> to vector<1x256xf32>
    %17 = arith.mulf %14, %14 : vector<8x256xf32>
    %cst_10 = arith.constant dense<0.000000e+00> : vector<256xf32>
    %18 = vector.multi_reduction <add>, %17, %cst_10 [0] : vector<8x256xf32> to vector<256xf32>
    %19 = vector.shape_cast %18 : vector<256xf32> to vector<1x256xf32>
    %20 = tpu.iota {dimensions = array<i32: 0>} : vector<8x256xi32>
    %c0_i32 = arith.constant 0 : i32
    %21 = vector.broadcast %c0_i32 : i32 to vector<8x256xi32>
    %22 = arith.cmpi eq, %20, %21 : vector<8x256xi32>
    %cst_11 = arith.constant 0.000000e+00 : f32
    %23 = vector.shape_cast %16 : vector<1x256xf32> to vector<1x256xf32>
    %24 = vector.broadcast %23 : vector<1x256xf32> to vector<8x256xf32>
    %25 = vector.broadcast %cst_11 : f32 to vector<8x256xf32>
    %26 = arith.select %22, %24, %25 : vector<8x256xi1>, vector<8x256xf32>
    %c1_i32 = arith.constant 1 : i32
    %27 = vector.broadcast %c1_i32 : i32 to vector<8x256xi32>
    %28 = arith.cmpi eq, %20, %27 : vector<8x256xi32>
    %cst_12 = arith.constant 0.000000e+00 : f32
    %29 = vector.shape_cast %19 : vector<1x256xf32> to vector<1x256xf32>
    %30 = vector.broadcast %29 : vector<1x256xf32> to vector<8x256xf32>
    %31 = vector.broadcast %cst_12 : f32 to vector<8x256xf32>
    %32 = arith.select %28, %30, %31 : vector<8x256xi1>, vector<8x256xf32>
    %33 = arith.addf %26, %32 : vector<8x256xf32>
    %c0_13 = arith.constant 0 : index
    %c0_14 = arith.constant 0 : index
    %34 = vector.load %arg5[%c0_13, %c0_14] : memref<8x256xf32, #tpu.memory_space<vmem>>, vector<8x256xf32>
    tpu.vector_store %arg5[%c0_13, %c0_14], %33 {strides = array<i32>} : memref<8x256xf32, #tpu.memory_space<vmem>>, vector<8x256xf32>,
    return
  }
  func.func @transform_0(%arg0: i32) -> (i32, i32) {
    %c0_i32 = arith.constant 0 : i32
    %c0_i32_0 = arith.constant 0 : i32
    return %arg0, %c0_i32 : i32, i32
  }
  func.func @transform_1(%arg0: i32) -> (i32, i32) {
    %c0_i32 = arith.constant 0 : i32
    %c0_i32_0 = arith.constant 0 : i32
    %c0_i32_1 = arith.constant 0 : i32
    return %c0_i32, %c0_i32_0 : i32, i32
  }
  func.func @transform_2(%arg0: i32) -> (i32, i32) {
    %c0_i32 = arith.constant 0 : i32
    %c0_i32_0 = arith.constant 0 : i32
    %c0_i32_1 = arith.constant 0 : i32
    return %c0_i32, %c0_i32_0 : i32, i32
  }
  func.func @transform_3(%arg0: i32) -> (i32, i32) {
    %c0_i32 = arith.constant 0 : i32
    %c0_i32_0 = arith.constant 0 : i32
    return %arg0, %c0_i32 : i32, i32
  }
  func.func @transform_4(%arg0: i32) -> (i32, i32) {
    %c0_i32 = arith.constant 0 : i32
    %c0_i32_0 = arith.constant 0 : i32
    return %arg0, %c0_i32 : i32, i32
  }
}

module attributes {stable_mosaic.version = 11 : i64} {
  func.func @_norm_act_kernel(%arg0: i32, %arg1: memref<8x256xf32, #tpu.memory_space<vmem>>, %arg2: memref<1x256xf32, #tpu.memory_space<vmem>>, %arg3: memref<1x256xf32, #tpu.memory_space<vmem>>, %arg4: memref<8x256xbf16, #tpu.memory_space<vmem>>) attributes {dimension_semantics = [#tpu.dimension_semantics<parallel>], iteration_bounds = array<i64: 1>, scalar_prefetch = 0 : i64, scratch_operands = 0 : i64, tpu.core_type = #tpu.core_type<tc>, window_params = [{transform_indices = @transform_0, window_bounds = array<i64: 8, 256>}, {pipeline_mode = #tpu.pipeline_mode<synchronous>, transform_indices = @transform_1, window_bounds = array<i64: 1, 256>}, {pipeline_mode = #tpu.pipeline_mode<synchronous>, transform_indices = @transform_2, window_bounds = array<i64: 1, 256>}, {transform_indices = @transform_3, window_bounds = array<i64: 8, 256>}]} {
    %c0 = arith.constant 0 : index
    %c0_0 = arith.constant 0 : index
    %0 = vector.load %arg1[%c0, %c0_0] : memref<8x256xf32, #tpu.memory_space<vmem>>, vector<8x256xf32>
    %c0_1 = arith.constant 0 : index
    %c0_2 = arith.constant 0 : index
    %1 = vector.load %arg2[%c0_1, %c0_2] : memref<1x256xf32, #tpu.memory_space<vmem>>, vector<1x256xf32>
    %2 = vector.broadcast %1 : vector<1x256xf32> to vector<8x256xf32>
    %3 = arith.mulf %0, %2 : vector<8x256xf32>
    %c0_3 = arith.constant 0 : index
    %c0_4 = arith.constant 0 : index
    %4 = vector.load %arg3[%c0_3, %c0_4] : memref<1x256xf32, #tpu.memory_space<vmem>>, vector<1x256xf32>
    %5 = vector.broadcast %4 : vector<1x256xf32> to vector<8x256xf32>
    %6 = arith.addf %3, %5 : vector<8x256xf32>
    %cst = arith.constant 0.000000e+00 : f32
    %7 = vector.broadcast %cst : f32 to vector<8x256xf32>
    %8 = arith.cmpf ogt, %6, %7 : vector<8x256xf32>
    %cst_5 = arith.constant 0.000000e+00 : f32
    %9 = vector.broadcast %cst_5 : f32 to vector<8x256xf32>
    %10 = arith.minimumf %6, %9 : vector<8x256xf32>
    %11 = math.exp %10 : vector<8x256xf32>
    %cst_6 = arith.constant 1.000000e+00 : f32
    %12 = vector.broadcast %cst_6 : f32 to vector<8x256xf32>
    %13 = arith.subf %11, %12 : vector<8x256xf32>
    %14 = arith.select %8, %6, %13 : vector<8x256xi1>, vector<8x256xf32>
    %15 = arith.truncf %14 : vector<8x256xf32> to vector<8x256xbf16>
    %c0_7 = arith.constant 0 : index
    %c0_8 = arith.constant 0 : index
    %16 = vector.load %arg4[%c0_7, %c0_8] : memref<8x256xbf16, #tpu.memory_space<vmem>>, vector<8x256xbf16>
    tpu.vector_store %arg4[%c0_7, %c0_8], %15 {strides = array<i32>} : memref<8x256xbf16, #tpu.memory_space<vmem>>, vector<8x256xbf16>,
    return
  }
  func.func @transform_0(%arg0: i32) -> (i32, i32) {
    %c0_i32 = arith.constant 0 : i32
    %c0_i32_0 = arith.constant 0 : i32
    return %arg0, %c0_i32 : i32, i32
  }
  func.func @transform_1(%arg0: i32) -> (i32, i32) {
    %c0_i32 = arith.constant 0 : i32
    %c0_i32_0 = arith.constant 0 : i32
    %c0_i32_1 = arith.constant 0 : i32
    return %c0_i32, %c0_i32_0 : i32, i32
  }
  func.func @transform_2(%arg0: i32) -> (i32, i32) {
    %c0_i32 = arith.constant 0 : i32
    %c0_i32_0 = arith.constant 0 : i32
    %c0_i32_1 = arith.constant 0 : i32
    return %c0_i32, %c0_i32_0 : i32, i32
  }
  func.func @transform_3(%arg0: i32) -> (i32, i32) {
    %c0_i32 = arith.constant 0 : i32
    %c0_i32_0 = arith.constant 0 : i32
    return %arg0, %c0_i32 : i32, i32
  }
}

module attributes {stable_mosaic.version = 11 : i64} {
  func.func @_mm_bias_kernel(%arg0: i32, %arg1: memref<8x256xbf16, #tpu.memory_space<vmem>>, %arg2: memref<256x768xbf16, #tpu.memory_space<vmem>>, %arg3: memref<1x768xf32, #tpu.memory_space<vmem>>, %arg4: memref<8x768xf32, #tpu.memory_space<vmem>>) attributes {dimension_semantics = [#tpu.dimension_semantics<parallel>], iteration_bounds = array<i64: 1>, scalar_prefetch = 0 : i64, scratch_operands = 0 : i64, tpu.core_type = #tpu.core_type<tc>, window_params = [{transform_indices = @transform_0, window_bounds = array<i64: 8, 256>}, {pipeline_mode = #tpu.pipeline_mode<synchronous>, transform_indices = @transform_1, window_bounds = array<i64: 256, 768>}, {pipeline_mode = #tpu.pipeline_mode<synchronous>, transform_indices = @transform_2, window_bounds = array<i64: 1, 768>}, {transform_indices = @transform_3, window_bounds = array<i64: 8, 768>}]} {
    %c0 = arith.constant 0 : index
    %c0_0 = arith.constant 0 : index
    %0 = vector.load %arg1[%c0, %c0_0] : memref<8x256xbf16, #tpu.memory_space<vmem>>, vector<8x256xbf16>
    %c0_1 = arith.constant 0 : index
    %c0_2 = arith.constant 0 : index
    %1 = vector.load %arg2[%c0_1, %c0_2] : memref<256x768xbf16, #tpu.memory_space<vmem>>, vector<256x768xbf16>
    %cst = arith.constant dense<0.000000e+00> : vector<8x768xf32>
    %2 = tpu.matmul %0, %1, %cst {dimension_numbers = #tpu.dot_dimension_numbers<[1], [0], [0], [1], [0, 0, 1, 1], [], []>} : vector<8x256xbf16>, vector<256x768xbf16>, vector<8x768xf32> -> vector<8x768xf32>
    %c0_3 = arith.constant 0 : index
    %c0_4 = arith.constant 0 : index
    %3 = vector.load %arg3[%c0_3, %c0_4] : memref<1x768xf32, #tpu.memory_space<vmem>>, vector<1x768xf32>
    %4 = vector.broadcast %3 : vector<1x768xf32> to vector<8x768xf32>
    %5 = arith.addf %2, %4 : vector<8x768xf32>
    %c0_5 = arith.constant 0 : index
    %c0_6 = arith.constant 0 : index
    %6 = vector.load %arg4[%c0_5, %c0_6] : memref<8x768xf32, #tpu.memory_space<vmem>>, vector<8x768xf32>
    tpu.vector_store %arg4[%c0_5, %c0_6], %5 {strides = array<i32>} : memref<8x768xf32, #tpu.memory_space<vmem>>, vector<8x768xf32>,
    return
  }
  func.func @transform_0(%arg0: i32) -> (i32, i32) {
    %c0_i32 = arith.constant 0 : i32
    %c0_i32_0 = arith.constant 0 : i32
    return %arg0, %c0_i32 : i32, i32
  }
  func.func @transform_1(%arg0: i32) -> (i32, i32) {
    %c0_i32 = arith.constant 0 : i32
    %c0_i32_0 = arith.constant 0 : i32
    %c0_i32_1 = arith.constant 0 : i32
    return %c0_i32, %c0_i32_0 : i32, i32
  }
  func.func @transform_2(%arg0: i32) -> (i32, i32) {
    %c0_i32 = arith.constant 0 : i32
    %c0_i32_0 = arith.constant 0 : i32
    %c0_i32_1 = arith.constant 0 : i32
    return %c0_i32, %c0_i32_0 : i32, i32
  }
  func.func @transform_3(%arg0: i32) -> (i32, i32) {
    %c0_i32 = arith.constant 0 : i32
    %c0_i32_0 = arith.constant 0 : i32
    return %arg0, %c0_i32 : i32, i32
  }
}

module attributes {stable_mosaic.version = 11 : i64} {
  func.func @_gru_kernel(%arg0: i32, %arg1: memref<4x8x768xf32, #tpu.memory_space<vmem>>, %arg2: memref<256x768xbf16, #tpu.memory_space<vmem>>, %arg3: memref<1x768xf32, #tpu.memory_space<vmem>>, %arg4: memref<256x768xbf16, #tpu.memory_space<vmem>>, %arg5: memref<1x768xf32, #tpu.memory_space<vmem>>, %arg6: memref<256x768xbf16, #tpu.memory_space<vmem>>, %arg7: memref<1x768xf32, #tpu.memory_space<vmem>>, %arg8: memref<4x8x256xbf16, #tpu.memory_space<vmem>>, %arg9: memref<8x256xf32, #tpu.memory_space<vmem>>, %arg10: memref<8x256xf32, #tpu.memory_space<vmem>>) attributes {dimension_semantics = [#tpu.dimension_semantics<arbitrary>], iteration_bounds = array<i64: 1>, scalar_prefetch = 0 : i64, scratch_operands = 2 : i64, tpu.core_type = #tpu.core_type<tc>, window_params = [{transform_indices = @transform_0, window_bounds = array<i64: 4, 8, 768>}, {pipeline_mode = #tpu.pipeline_mode<synchronous>, transform_indices = @transform_1, window_bounds = array<i64: 256, 768>}, {pipeline_mode = #tpu.pipeline_mode<synchronous>, transform_indices = @transform_2, window_bounds = array<i64: 1, 768>}, {pipeline_mode = #tpu.pipeline_mode<synchronous>, transform_indices = @transform_3, window_bounds = array<i64: 256, 768>}, {pipeline_mode = #tpu.pipeline_mode<synchronous>, transform_indices = @transform_4, window_bounds = array<i64: 1, 768>}, {pipeline_mode = #tpu.pipeline_mode<synchronous>, transform_indices = @transform_5, window_bounds = array<i64: 256, 768>}, {pipeline_mode = #tpu.pipeline_mode<synchronous>, transform_indices = @transform_6, window_bounds = array<i64: 1, 768>}, {transform_indices = @transform_7, window_bounds = array<i64: 4, 8, 256>}]} {
    %c0_i32 = arith.constant 0 : i32
    %0 = arith.cmpi eq, %arg0, %c0_i32 : i32
    %1 = arith.extui %0 : i1 to i32
    %c0_i32_0 = arith.constant 0 : i32
    %2 = arith.cmpi ne, %1, %c0_i32_0 : i32
    scf.if %2 {
      %cst = arith.constant 0.000000e+00 : f32
      %4 = vector.broadcast %cst : f32 to vector<8x256xf32>
      %c0 = arith.constant 0 : index
      %c0_3 = arith.constant 0 : index
      %5 = vector.load %arg9[%c0, %c0_3] : memref<8x256xf32, #tpu.memory_space<vmem>>, vector<8x256xf32>
      tpu.vector_store %arg9[%c0, %c0_3], %4 {strides = array<i32>} : memref<8x256xf32, #tpu.memory_space<vmem>>, vector<8x256xf32>,
      %cst_4 = arith.constant 0.000000e+00 : f32
      %6 = vector.broadcast %cst_4 : f32 to vector<8x256xf32>
      %c0_5 = arith.constant 0 : index
      %c0_6 = arith.constant 0 : index
      %7 = vector.load %arg10[%c0_5, %c0_6] : memref<8x256xf32, #tpu.memory_space<vmem>>, vector<8x256xf32>
      tpu.vector_store %arg10[%c0_5, %c0_6], %6 {strides = array<i32>} : memref<8x256xf32, #tpu.memory_space<vmem>>, vector<8x256xf32>,
    } else {
    }
    %c0_i32_1 = arith.constant 0 : i32
    %c4_i32 = arith.constant 4 : i32
    %3 = arith.addi %c0_i32_1, %c4_i32 : i32
    %c1_i32 = arith.constant 1 : i32
    scf.for %arg11 = %c0_i32_1 to %3 step %c1_i32  : i32 {
      %c1_i32_3 = arith.constant 1 : i32
      %4 = arith.muli %arg11, %c1_i32_3 : i32
      %c0_i32_4 = arith.constant 0 : i32
      %5 = arith.addi %c0_i32_4, %4 : i32
      %c0 = arith.constant 0 : index
      %c0_5 = arith.constant 0 : index
      %6 = vector.load %arg9[%c0, %c0_5] : memref<8x256xf32, #tpu.memory_space<vmem>>, vector<8x256xf32>
      %c0_6 = arith.constant 0 : index
      %c0_7 = arith.constant 0 : index
      %7 = vector.load %arg10[%c0_6, %c0_7] : memref<8x256xf32, #tpu.memory_space<vmem>>, vector<8x256xf32>
      %8 = arith.index_cast %5 : i32 to index
      %c0_8 = arith.constant 0 : index
      %c0_9 = arith.constant 0 : index
      %9 = vector.load %arg1[%8, %c0_8, %c0_9] : memref<4x8x768xf32, #tpu.memory_space<vmem>>, vector<1x8x768xf32>
      %10 = vector.shape_cast %9 : vector<1x8x768xf32> to vector<8x768xf32>
      %11 = arith.truncf %6 : vector<8x256xf32> to vector<8x256xbf16>
      %c0_10 = arith.constant 0 : index
      %c0_11 = arith.constant 0 : index
      %12 = vector.load %arg2[%c0_10, %c0_11] : memref<256x768xbf16, #tpu.memory_space<vmem>>, vector<256x768xbf16>
      %cst = arith.constant dense<0.000000e+00> : vector<8x768xf32>
      %13 = tpu.matmul %11, %12, %cst {dimension_numbers = #tpu.dot_dimension_numbers<[1], [0], [0], [1], [0, 0, 1, 1], [], []>} : vector<8x256xbf16>, vector<256x768xbf16>, vector<8x768xf32> -> vector<8x768xf32>
      %c0_12 = arith.constant 0 : index
      %c0_13 = arith.constant 0 : index
      %14 = vector.load %arg3[%c0_12, %c0_13] : memref<1x768xf32, #tpu.memory_space<vmem>>, vector<1x768xf32>
      %15 = vector.broadcast %14 : vector<1x768xf32> to vector<8x768xf32>
      %16 = arith.addf %13, %15 : vector<8x768xf32>
      %17 = vector.extract_strided_slice %10 {offsets = [0, 0], sizes = [8, 256], strides = [1, 1]} : vector<8x768xf32> to vector<8x256xf32>
      %18 = vector.extract_strided_slice %16 {offsets = [0, 0], sizes = [8, 256], strides = [1, 1]} : vector<8x768xf32> to vector<8x256xf32>
      %19 = arith.addf %17, %18 : vector<8x256xf32>
      %20 = arith.negf %19 : vector<8x256xf32>
      %21 = math.exp %20 : vector<8x256xf32>
      %cst_14 = arith.constant 1.000000e+00 : f32
      %22 = vector.broadcast %cst_14 : f32 to vector<8x256xf32>
      %23 = arith.addf %22, %21 : vector<8x256xf32>
      %24 = arith.divf %22, %23 : vector<8x256xf32>
      %25 = vector.extract_strided_slice %10 {offsets = [0, 256], sizes = [8, 256], strides = [1, 1]} : vector<8x768xf32> to vector<8x256xf32>
      %26 = vector.extract_strided_slice %16 {offsets = [0, 256], sizes = [8, 256], strides = [1, 1]} : vector<8x768xf32> to vector<8x256xf32>
      %27 = arith.addf %25, %26 : vector<8x256xf32>
      %28 = arith.negf %27 : vector<8x256xf32>
      %29 = math.exp %28 : vector<8x256xf32>
      %cst_15 = arith.constant 1.000000e+00 : f32
      %30 = vector.broadcast %cst_15 : f32 to vector<8x256xf32>
      %31 = arith.addf %30, %29 : vector<8x256xf32>
      %32 = arith.divf %30, %31 : vector<8x256xf32>
      %33 = vector.extract_strided_slice %10 {offsets = [0, 512], sizes = [8, 256], strides = [1, 1]} : vector<8x768xf32> to vector<8x256xf32>
      %34 = vector.extract_strided_slice %16 {offsets = [0, 512], sizes = [8, 256], strides = [1, 1]} : vector<8x768xf32> to vector<8x256xf32>
      %35 = arith.mulf %24, %34 : vector<8x256xf32>
      %36 = arith.addf %33, %35 : vector<8x256xf32>
      %37 = math.tanh %36 : vector<8x256xf32>
      %cst_16 = arith.constant 1.000000e+00 : f32
      %38 = vector.broadcast %cst_16 : f32 to vector<8x256xf32>
      %39 = arith.subf %38, %32 : vector<8x256xf32>
      %40 = arith.mulf %39, %37 : vector<8x256xf32>
      %41 = arith.mulf %32, %6 : vector<8x256xf32>
      %42 = arith.addf %40, %41 : vector<8x256xf32>
      %43 = arith.truncf %42 : vector<8x256xf32> to vector<8x256xbf16>
      %c0_17 = arith.constant 0 : index
      %c0_18 = arith.constant 0 : index
      %44 = vector.load %arg4[%c0_17, %c0_18] : memref<256x768xbf16, #tpu.memory_space<vmem>>, vector<256x768xbf16>
      %cst_19 = arith.constant dense<0.000000e+00> : vector<8x768xf32>
      %45 = tpu.matmul %43, %44, %cst_19 {dimension_numbers = #tpu.dot_dimension_numbers<[1], [0], [0], [1], [0, 0, 1, 1], [], []>} : vector<8x256xbf16>, vector<256x768xbf16>, vector<8x768xf32> -> vector<8x768xf32>
      %c0_20 = arith.constant 0 : index
      %c0_21 = arith.constant 0 : index
      %46 = vector.load %arg5[%c0_20, %c0_21] : memref<1x768xf32, #tpu.memory_space<vmem>>, vector<1x768xf32>
      %47 = vector.broadcast %46 : vector<1x768xf32> to vector<8x768xf32>
      %48 = arith.addf %45, %47 : vector<8x768xf32>
      %49 = arith.truncf %7 : vector<8x256xf32> to vector<8x256xbf16>
      %c0_22 = arith.constant 0 : index
      %c0_23 = arith.constant 0 : index
      %50 = vector.load %arg6[%c0_22, %c0_23] : memref<256x768xbf16, #tpu.memory_space<vmem>>, vector<256x768xbf16>
      %cst_24 = arith.constant dense<0.000000e+00> : vector<8x768xf32>
      %51 = tpu.matmul %49, %50, %cst_24 {dimension_numbers = #tpu.dot_dimension_numbers<[1], [0], [0], [1], [0, 0, 1, 1], [], []>} : vector<8x256xbf16>, vector<256x768xbf16>, vector<8x768xf32> -> vector<8x768xf32>
      %c0_25 = arith.constant 0 : index
      %c0_26 = arith.constant 0 : index
      %52 = vector.load %arg7[%c0_25, %c0_26] : memref<1x768xf32, #tpu.memory_space<vmem>>, vector<1x768xf32>
      %53 = vector.broadcast %52 : vector<1x768xf32> to vector<8x768xf32>
      %54 = arith.addf %51, %53 : vector<8x768xf32>
      %55 = vector.extract_strided_slice %48 {offsets = [0, 0], sizes = [8, 256], strides = [1, 1]} : vector<8x768xf32> to vector<8x256xf32>
      %56 = vector.extract_strided_slice %54 {offsets = [0, 0], sizes = [8, 256], strides = [1, 1]} : vector<8x768xf32> to vector<8x256xf32>
      %57 = arith.addf %55, %56 : vector<8x256xf32>
      %58 = arith.negf %57 : vector<8x256xf32>
      %59 = math.exp %58 : vector<8x256xf32>
      %cst_27 = arith.constant 1.000000e+00 : f32
      %60 = vector.broadcast %cst_27 : f32 to vector<8x256xf32>
      %61 = arith.addf %60, %59 : vector<8x256xf32>
      %62 = arith.divf %60, %61 : vector<8x256xf32>
      %63 = vector.extract_strided_slice %48 {offsets = [0, 256], sizes = [8, 256], strides = [1, 1]} : vector<8x768xf32> to vector<8x256xf32>
      %64 = vector.extract_strided_slice %54 {offsets = [0, 256], sizes = [8, 256], strides = [1, 1]} : vector<8x768xf32> to vector<8x256xf32>
      %65 = arith.addf %63, %64 : vector<8x256xf32>
      %66 = arith.negf %65 : vector<8x256xf32>
      %67 = math.exp %66 : vector<8x256xf32>
      %cst_28 = arith.constant 1.000000e+00 : f32
      %68 = vector.broadcast %cst_28 : f32 to vector<8x256xf32>
      %69 = arith.addf %68, %67 : vector<8x256xf32>
      %70 = arith.divf %68, %69 : vector<8x256xf32>
      %71 = vector.extract_strided_slice %48 {offsets = [0, 512], sizes = [8, 256], strides = [1, 1]} : vector<8x768xf32> to vector<8x256xf32>
      %72 = vector.extract_strided_slice %54 {offsets = [0, 512], sizes = [8, 256], strides = [1, 1]} : vector<8x768xf32> to vector<8x256xf32>
      %73 = arith.mulf %62, %72 : vector<8x256xf32>
      %74 = arith.addf %71, %73 : vector<8x256xf32>
      %75 = math.tanh %74 : vector<8x256xf32>
      %cst_29 = arith.constant 1.000000e+00 : f32
      %76 = vector.broadcast %cst_29 : f32 to vector<8x256xf32>
      %77 = arith.subf %76, %70 : vector<8x256xf32>
      %78 = arith.mulf %77, %75 : vector<8x256xf32>
      %79 = arith.mulf %70, %7 : vector<8x256xf32>
      %80 = arith.addf %78, %79 : vector<8x256xf32>
      %c0_30 = arith.constant 0 : index
      %c0_31 = arith.constant 0 : index
      %81 = vector.load %arg9[%c0_30, %c0_31] : memref<8x256xf32, #tpu.memory_space<vmem>>, vector<8x256xf32>
      tpu.vector_store %arg9[%c0_30, %c0_31], %42 {strides = array<i32>} : memref<8x256xf32, #tpu.memory_space<vmem>>, vector<8x256xf32>,
      %c0_32 = arith.constant 0 : index
      %c0_33 = arith.constant 0 : index
      %82 = vector.load %arg10[%c0_32, %c0_33] : memref<8x256xf32, #tpu.memory_space<vmem>>, vector<8x256xf32>
      tpu.vector_store %arg10[%c0_32, %c0_33], %80 {strides = array<i32>} : memref<8x256xf32, #tpu.memory_space<vmem>>, vector<8x256xf32>,
      %83 = arith.truncf %80 : vector<8x256xf32> to vector<8x256xbf16>
      %84 = arith.index_cast %5 : i32 to index
      %c0_34 = arith.constant 0 : index
      %c0_35 = arith.constant 0 : index
      %85 = vector.load %arg8[%84, %c0_34, %c0_35] : memref<4x8x256xbf16, #tpu.memory_space<vmem>>, vector<1x8x256xbf16>
      %86 = vector.shape_cast %85 : vector<1x8x256xbf16> to vector<8x256xbf16>
      %87 = vector.shape_cast %83 : vector<8x256xbf16> to vector<1x8x256xbf16>
      tpu.vector_store %arg8[%84, %c0_34, %c0_35], %87 {strides = array<i32>} : memref<4x8x256xbf16, #tpu.memory_space<vmem>>, vector<1x8x256xbf16>,
    }
    %c4_i32_2 = arith.constant 4 : i32
    return
  }
  func.func @transform_0(%arg0: i32) -> (i32, i32, i32) {
    %c0_i32 = arith.constant 0 : i32
    %c0_i32_0 = arith.constant 0 : i32
    %c0_i32_1 = arith.constant 0 : i32
    return %arg0, %c0_i32, %c0_i32_0 : i32, i32, i32
  }
  func.func @transform_1(%arg0: i32) -> (i32, i32) {
    %c0_i32 = arith.constant 0 : i32
    %c0_i32_0 = arith.constant 0 : i32
    %c0_i32_1 = arith.constant 0 : i32
    return %c0_i32, %c0_i32_0 : i32, i32
  }
  func.func @transform_2(%arg0: i32) -> (i32, i32) {
    %c0_i32 = arith.constant 0 : i32
    %c0_i32_0 = arith.constant 0 : i32
    %c0_i32_1 = arith.constant 0 : i32
    return %c0_i32, %c0_i32_0 : i32, i32
  }
  func.func @transform_3(%arg0: i32) -> (i32, i32) {
    %c0_i32 = arith.constant 0 : i32
    %c0_i32_0 = arith.constant 0 : i32
    %c0_i32_1 = arith.constant 0 : i32
    return %c0_i32, %c0_i32_0 : i32, i32
  }
  func.func @transform_4(%arg0: i32) -> (i32, i32) {
    %c0_i32 = arith.constant 0 : i32
    %c0_i32_0 = arith.constant 0 : i32
    %c0_i32_1 = arith.constant 0 : i32
    return %c0_i32, %c0_i32_0 : i32, i32
  }
  func.func @transform_5(%arg0: i32) -> (i32, i32) {
    %c0_i32 = arith.constant 0 : i32
    %c0_i32_0 = arith.constant 0 : i32
    %c0_i32_1 = arith.constant 0 : i32
    return %c0_i32, %c0_i32_0 : i32, i32
  }
  func.func @transform_6(%arg0: i32) -> (i32, i32) {
    %c0_i32 = arith.constant 0 : i32
    %c0_i32_0 = arith.constant 0 : i32
    %c0_i32_1 = arith.constant 0 : i32
    return %c0_i32, %c0_i32_0 : i32, i32
  }
  func.func @transform_7(%arg0: i32) -> (i32, i32, i32) {
    %c0_i32 = arith.constant 0 : i32
    %c0_i32_0 = arith.constant 0 : i32
    %c0_i32_1 = arith.constant 0 : i32
    return %arg0, %c0_i32, %c0_i32_0 : i32, i32, i32
  }
}

module attributes {stable_mosaic.version = 11 : i64} {
  func.func @_mm_stats_kernel(%arg0: i32, %arg1: memref<8x1024xbf16, #tpu.memory_space<vmem>>, %arg2: memref<1024x128xbf16, #tpu.memory_space<vmem>>, %arg3: memref<1x128xf32, #tpu.memory_space<vmem>>, %arg4: memref<8x128xf32, #tpu.memory_space<vmem>>, %arg5: memref<8x128xf32, #tpu.memory_space<vmem>>) attributes {dimension_semantics = [#tpu.dimension_semantics<parallel>], iteration_bounds = array<i64: 1>, scalar_prefetch = 0 : i64, scratch_operands = 0 : i64, tpu.core_type = #tpu.core_type<tc>, window_params = [{transform_indices = @transform_0, window_bounds = array<i64: 8, 1024>}, {pipeline_mode = #tpu.pipeline_mode<synchronous>, transform_indices = @transform_1, window_bounds = array<i64: 1024, 128>}, {pipeline_mode = #tpu.pipeline_mode<synchronous>, transform_indices = @transform_2, window_bounds = array<i64: 1, 128>}, {transform_indices = @transform_3, window_bounds = array<i64: 8, 128>}, {transform_indices = @transform_4, window_bounds = array<i64: 8, 128>}]} {
    %c0 = arith.constant 0 : index
    %c0_0 = arith.constant 0 : index
    %0 = vector.load %arg1[%c0, %c0_0] : memref<8x1024xbf16, #tpu.memory_space<vmem>>, vector<8x1024xbf16>
    %c0_1 = arith.constant 0 : index
    %c0_2 = arith.constant 0 : index
    %1 = vector.load %arg2[%c0_1, %c0_2] : memref<1024x128xbf16, #tpu.memory_space<vmem>>, vector<1024x128xbf16>
    %cst = arith.constant dense<0.000000e+00> : vector<8x128xf32>
    %2 = tpu.matmul %0, %1, %cst {dimension_numbers = #tpu.dot_dimension_numbers<[1], [0], [0], [1], [0, 0, 1, 1], [], []>} : vector<8x1024xbf16>, vector<1024x128xbf16>, vector<8x128xf32> -> vector<8x128xf32>
    %c0_3 = arith.constant 0 : index
    %c0_4 = arith.constant 0 : index
    %3 = vector.load %arg3[%c0_3, %c0_4] : memref<1x128xf32, #tpu.memory_space<vmem>>, vector<1x128xf32>
    %4 = vector.broadcast %3 : vector<1x128xf32> to vector<8x128xf32>
    %5 = arith.addf %2, %4 : vector<8x128xf32>
    %c0_5 = arith.constant 0 : index
    %c0_6 = arith.constant 0 : index
    %6 = vector.load %arg4[%c0_5, %c0_6] : memref<8x128xf32, #tpu.memory_space<vmem>>, vector<8x128xf32>
    tpu.vector_store %arg4[%c0_5, %c0_6], %5 {strides = array<i32>} : memref<8x128xf32, #tpu.memory_space<vmem>>, vector<8x128xf32>,
    %7 = tpu.iota {dimensions = array<i32: 0>} : vector<8x128xi32>
    %c8_i32 = arith.constant 8 : i32
    %8 = arith.muli %arg0, %c8_i32 : i32
    %9 = vector.broadcast %8 : i32 to vector<8x128xi32>
    %10 = arith.addi %7, %9 : vector<8x128xi32>
    %c8_i32_7 = arith.constant 8 : i32
    %11 = vector.broadcast %c8_i32_7 : i32 to vector<8x128xi32>
    %12 = arith.cmpi slt, %10, %11 : vector<8x128xi32>
    %cst_8 = arith.constant 0.000000e+00 : f32
    %13 = vector.broadcast %cst_8 : f32 to vector<8x128xf32>
    %14 = arith.select %12, %5, %13 : vector<8x128xi1>, vector<8x128xf32>
    %cst_9 = arith.constant dense<0.000000e+00> : vector<128xf32>
    %15 = vector.multi_reduction <add>, %14, %cst_9 [0] : vector<8x128xf32> to vector<128xf32>
    %16 = vector.shape_cast %15 : vector<128xf32> to vector<1x128xf32>
    %17 = arith.mulf %14, %14 : vector<8x128xf32>
    %cst_10 = arith.constant dense<0.000000e+00> : vector<128xf32>
    %18 = vector.multi_reduction <add>, %17, %cst_10 [0] : vector<8x128xf32> to vector<128xf32>
    %19 = vector.shape_cast %18 : vector<128xf32> to vector<1x128xf32>
    %20 = tpu.iota {dimensions = array<i32: 0>} : vector<8x128xi32>
    %c0_i32 = arith.constant 0 : i32
    %21 = vector.broadcast %c0_i32 : i32 to vector<8x128xi32>
    %22 = arith.cmpi eq, %20, %21 : vector<8x128xi32>
    %cst_11 = arith.constant 0.000000e+00 : f32
    %23 = vector.shape_cast %16 : vector<1x128xf32> to vector<1x128xf32>
    %24 = vector.broadcast %23 : vector<1x128xf32> to vector<8x128xf32>
    %25 = vector.broadcast %cst_11 : f32 to vector<8x128xf32>
    %26 = arith.select %22, %24, %25 : vector<8x128xi1>, vector<8x128xf32>
    %c1_i32 = arith.constant 1 : i32
    %27 = vector.broadcast %c1_i32 : i32 to vector<8x128xi32>
    %28 = arith.cmpi eq, %20, %27 : vector<8x128xi32>
    %cst_12 = arith.constant 0.000000e+00 : f32
    %29 = vector.shape_cast %19 : vector<1x128xf32> to vector<1x128xf32>
    %30 = vector.broadcast %29 : vector<1x128xf32> to vector<8x128xf32>
    %31 = vector.broadcast %cst_12 : f32 to vector<8x128xf32>
    %32 = arith.select %28, %30, %31 : vector<8x128xi1>, vector<8x128xf32>
    %33 = arith.addf %26, %32 : vector<8x128xf32>
    %c0_13 = arith.constant 0 : index
    %c0_14 = arith.constant 0 : index
    %34 = vector.load %arg5[%c0_13, %c0_14] : memref<8x128xf32, #tpu.memory_space<vmem>>, vector<8x128xf32>
    tpu.vector_store %arg5[%c0_13, %c0_14], %33 {strides = array<i32>} : memref<8x128xf32, #tpu.memory_space<vmem>>, vector<8x128xf32>,
    return
  }
  func.func @transform_0(%arg0: i32) -> (i32, i32) {
    %c0_i32 = arith.constant 0 : i32
    %c0_i32_0 = arith.constant 0 : i32
    return %arg0, %c0_i32 : i32, i32
  }
  func.func @transform_1(%arg0: i32) -> (i32, i32) {
    %c0_i32 = arith.constant 0 : i32
    %c0_i32_0 = arith.constant 0 : i32
    %c0_i32_1 = arith.constant 0 : i32
    return %c0_i32, %c0_i32_0 : i32, i32
  }
  func.func @transform_2(%arg0: i32) -> (i32, i32) {
    %c0_i32 = arith.constant 0 : i32
    %c0_i32_0 = arith.constant 0 : i32
    %c0_i32_1 = arith.constant 0 : i32
    return %c0_i32, %c0_i32_0 : i32, i32
  }
  func.func @transform_3(%arg0: i32) -> (i32, i32) {
    %c0_i32 = arith.constant 0 : i32
    %c0_i32_0 = arith.constant 0 : i32
    return %arg0, %c0_i32 : i32, i32
  }
  func.func @transform_4(%arg0: i32) -> (i32, i32) {
    %c0_i32 = arith.constant 0 : i32
    %c0_i32_0 = arith.constant 0 : i32
    return %arg0, %c0_i32 : i32, i32
  }
}

module attributes {stable_mosaic.version = 11 : i64} {
  func.func @_norm_act_kernel(%arg0: i32, %arg1: memref<8x128xf32, #tpu.memory_space<vmem>>, %arg2: memref<1x128xf32, #tpu.memory_space<vmem>>, %arg3: memref<1x128xf32, #tpu.memory_space<vmem>>, %arg4: memref<8x128xbf16, #tpu.memory_space<vmem>>) attributes {dimension_semantics = [#tpu.dimension_semantics<parallel>], iteration_bounds = array<i64: 1>, scalar_prefetch = 0 : i64, scratch_operands = 0 : i64, tpu.core_type = #tpu.core_type<tc>, window_params = [{transform_indices = @transform_0, window_bounds = array<i64: 8, 128>}, {pipeline_mode = #tpu.pipeline_mode<synchronous>, transform_indices = @transform_1, window_bounds = array<i64: 1, 128>}, {pipeline_mode = #tpu.pipeline_mode<synchronous>, transform_indices = @transform_2, window_bounds = array<i64: 1, 128>}, {transform_indices = @transform_3, window_bounds = array<i64: 8, 128>}]} {
    %c0 = arith.constant 0 : index
    %c0_0 = arith.constant 0 : index
    %0 = vector.load %arg1[%c0, %c0_0] : memref<8x128xf32, #tpu.memory_space<vmem>>, vector<8x128xf32>
    %c0_1 = arith.constant 0 : index
    %c0_2 = arith.constant 0 : index
    %1 = vector.load %arg2[%c0_1, %c0_2] : memref<1x128xf32, #tpu.memory_space<vmem>>, vector<1x128xf32>
    %2 = vector.broadcast %1 : vector<1x128xf32> to vector<8x128xf32>
    %3 = arith.mulf %0, %2 : vector<8x128xf32>
    %c0_3 = arith.constant 0 : index
    %c0_4 = arith.constant 0 : index
    %4 = vector.load %arg3[%c0_3, %c0_4] : memref<1x128xf32, #tpu.memory_space<vmem>>, vector<1x128xf32>
    %5 = vector.broadcast %4 : vector<1x128xf32> to vector<8x128xf32>
    %6 = arith.addf %3, %5 : vector<8x128xf32>
    %cst = arith.constant 0.000000e+00 : f32
    %7 = vector.broadcast %cst : f32 to vector<8x128xf32>
    %8 = arith.cmpf ogt, %6, %7 : vector<8x128xf32>
    %cst_5 = arith.constant 0.000000e+00 : f32
    %9 = vector.broadcast %cst_5 : f32 to vector<8x128xf32>
    %10 = arith.minimumf %6, %9 : vector<8x128xf32>
    %11 = math.exp %10 : vector<8x128xf32>
    %cst_6 = arith.constant 1.000000e+00 : f32
    %12 = vector.broadcast %cst_6 : f32 to vector<8x128xf32>
    %13 = arith.subf %11, %12 : vector<8x128xf32>
    %14 = arith.select %8, %6, %13 : vector<8x128xi1>, vector<8x128xf32>
    %15 = arith.truncf %14 : vector<8x128xf32> to vector<8x128xbf16>
    %c0_7 = arith.constant 0 : index
    %c0_8 = arith.constant 0 : index
    %16 = vector.load %arg4[%c0_7, %c0_8] : memref<8x128xbf16, #tpu.memory_space<vmem>>, vector<8x128xbf16>
    tpu.vector_store %arg4[%c0_7, %c0_8], %15 {strides = array<i32>} : memref<8x128xbf16, #tpu.memory_space<vmem>>, vector<8x128xbf16>,
    return
  }
  func.func @transform_0(%arg0: i32) -> (i32, i32) {
    %c0_i32 = arith.constant 0 : i32
    %c0_i32_0 = arith.constant 0 : i32
    return %arg0, %c0_i32 : i32, i32
  }
  func.func @transform_1(%arg0: i32) -> (i32, i32) {
    %c0_i32 = arith.constant 0 : i32
    %c0_i32_0 = arith.constant 0 : i32
    %c0_i32_1 = arith.constant 0 : i32
    return %c0_i32, %c0_i32_0 : i32, i32
  }
  func.func @transform_2(%arg0: i32) -> (i32, i32) {
    %c0_i32 = arith.constant 0 : i32
    %c0_i32_0 = arith.constant 0 : i32
    %c0_i32_1 = arith.constant 0 : i32
    return %c0_i32, %c0_i32_0 : i32, i32
  }
  func.func @transform_3(%arg0: i32) -> (i32, i32) {
    %c0_i32 = arith.constant 0 : i32
    %c0_i32_0 = arith.constant 0 : i32
    return %arg0, %c0_i32 : i32, i32
  }
}

module attributes {stable_mosaic.version = 11 : i64} {
  func.func @_mm_stats_kernel(%arg0: i32, %arg1: memref<16x512xbf16, #tpu.memory_space<vmem>>, %arg2: memref<512x64xbf16, #tpu.memory_space<vmem>>, %arg3: memref<1x64xf32, #tpu.memory_space<vmem>>, %arg4: memref<16x64xf32, #tpu.memory_space<vmem>>, %arg5: memref<8x64xf32, #tpu.memory_space<vmem>>) attributes {dimension_semantics = [#tpu.dimension_semantics<parallel>], iteration_bounds = array<i64: 1>, scalar_prefetch = 0 : i64, scratch_operands = 0 : i64, tpu.core_type = #tpu.core_type<tc>, window_params = [{transform_indices = @transform_0, window_bounds = array<i64: 16, 512>}, {pipeline_mode = #tpu.pipeline_mode<synchronous>, transform_indices = @transform_1, window_bounds = array<i64: 512, 64>}, {pipeline_mode = #tpu.pipeline_mode<synchronous>, transform_indices = @transform_2, window_bounds = array<i64: 1, 64>}, {transform_indices = @transform_3, window_bounds = array<i64: 16, 64>}, {transform_indices = @transform_4, window_bounds = array<i64: 8, 64>}]} {
    %c0 = arith.constant 0 : index
    %c0_0 = arith.constant 0 : index
    %0 = vector.load %arg1[%c0, %c0_0] : memref<16x512xbf16, #tpu.memory_space<vmem>>, vector<16x512xbf16>
    %c0_1 = arith.constant 0 : index
    %c0_2 = arith.constant 0 : index
    %1 = vector.load %arg2[%c0_1, %c0_2] : memref<512x64xbf16, #tpu.memory_space<vmem>>, vector<512x64xbf16>
    %cst = arith.constant dense<0.000000e+00> : vector<16x64xf32>
    %2 = tpu.matmul %0, %1, %cst {dimension_numbers = #tpu.dot_dimension_numbers<[1], [0], [0], [1], [0, 0, 1, 1], [], []>} : vector<16x512xbf16>, vector<512x64xbf16>, vector<16x64xf32> -> vector<16x64xf32>
    %c0_3 = arith.constant 0 : index
    %c0_4 = arith.constant 0 : index
    %3 = vector.load %arg3[%c0_3, %c0_4] : memref<1x64xf32, #tpu.memory_space<vmem>>, vector<1x64xf32>
    %4 = vector.broadcast %3 : vector<1x64xf32> to vector<16x64xf32>
    %5 = arith.addf %2, %4 : vector<16x64xf32>
    %c0_5 = arith.constant 0 : index
    %c0_6 = arith.constant 0 : index
    %6 = vector.load %arg4[%c0_5, %c0_6] : memref<16x64xf32, #tpu.memory_space<vmem>>, vector<16x64xf32>
    tpu.vector_store %arg4[%c0_5, %c0_6], %5 {strides = array<i32>} : memref<16x64xf32, #tpu.memory_space<vmem>>, vector<16x64xf32>,
    %7 = tpu.iota {dimensions = array<i32: 0>} : vector<16x64xi32>
    %c16_i32 = arith.constant 16 : i32
    %8 = arith.muli %arg0, %c16_i32 : i32
    %9 = vector.broadcast %8 : i32 to vector<16x64xi32>
    %10 = arith.addi %7, %9 : vector<16x64xi32>
    %c16_i32_7 = arith.constant 16 : i32
    %11 = vector.broadcast %c16_i32_7 : i32 to vector<16x64xi32>
    %12 = arith.cmpi slt, %10, %11 : vector<16x64xi32>
    %cst_8 = arith.constant 0.000000e+00 : f32
    %13 = vector.broadcast %cst_8 : f32 to vector<16x64xf32>
    %14 = arith.select %12, %5, %13 : vector<16x64xi1>, vector<16x64xf32>
    %cst_9 = arith.constant dense<0.000000e+00> : vector<64xf32>
    %15 = vector.multi_reduction <add>, %14, %cst_9 [0] : vector<16x64xf32> to vector<64xf32>
    %16 = vector.shape_cast %15 : vector<64xf32> to vector<1x64xf32>
    %17 = arith.mulf %14, %14 : vector<16x64xf32>
    %cst_10 = arith.constant dense<0.000000e+00> : vector<64xf32>
    %18 = vector.multi_reduction <add>, %17, %cst_10 [0] : vector<16x64xf32> to vector<64xf32>
    %19 = vector.shape_cast %18 : vector<64xf32> to vector<1x64xf32>
    %20 = tpu.iota {dimensions = array<i32: 0>} : vector<8x64xi32>
    %c0_i32 = arith.constant 0 : i32
    %21 = vector.broadcast %c0_i32 : i32 to vector<8x64xi32>
    %22 = arith.cmpi eq, %20, %21 : vector<8x64xi32>
    %cst_11 = arith.constant 0.000000e+00 : f32
    %23 = vector.shape_cast %16 : vector<1x64xf32> to vector<1x64xf32>
    %24 = vector.broadcast %23 : vector<1x64xf32> to vector<8x64xf32>
    %25 = vector.broadcast %cst_11 : f32 to vector<8x64xf32>
    %26 = arith.select %22, %24, %25 : vector<8x64xi1>, vector<8x64xf32>
    %c1_i32 = arith.constant 1 : i32
    %27 = vector.broadcast %c1_i32 : i32 to vector<8x64xi32>
    %28 = arith.cmpi eq, %20, %27 : vector<8x64xi32>
    %cst_12 = arith.constant 0.000000e+00 : f32
    %29 = vector.shape_cast %19 : vector<1x64xf32> to vector<1x64xf32>
    %30 = vector.broadcast %29 : vector<1x64xf32> to vector<8x64xf32>
    %31 = vector.broadcast %cst_12 : f32 to vector<8x64xf32>
    %32 = arith.select %28, %30, %31 : vector<8x64xi1>, vector<8x64xf32>
    %33 = arith.addf %26, %32 : vector<8x64xf32>
    %c0_13 = arith.constant 0 : index
    %c0_14 = arith.constant 0 : index
    %34 = vector.load %arg5[%c0_13, %c0_14] : memref<8x64xf32, #tpu.memory_space<vmem>>, vector<8x64xf32>
    tpu.vector_store %arg5[%c0_13, %c0_14], %33 {strides = array<i32>} : memref<8x64xf32, #tpu.memory_space<vmem>>, vector<8x64xf32>,
    return
  }
  func.func @transform_0(%arg0: i32) -> (i32, i32) {
    %c0_i32 = arith.constant 0 : i32
    %c0_i32_0 = arith.constant 0 : i32
    return %arg0, %c0_i32 : i32, i32
  }
  func.func @transform_1(%arg0: i32) -> (i32, i32) {
    %c0_i32 = arith.constant 0 : i32
    %c0_i32_0 = arith.constant 0 : i32
    %c0_i32_1 = arith.constant 0 : i32
    return %c0_i32, %c0_i32_0 : i32, i32
  }
  func.func @transform_2(%arg0: i32) -> (i32, i32) {
    %c0_i32 = arith.constant 0 : i32
    %c0_i32_0 = arith.constant 0 : i32
    %c0_i32_1 = arith.constant 0 : i32
    return %c0_i32, %c0_i32_0 : i32, i32
  }
  func.func @transform_3(%arg0: i32) -> (i32, i32) {
    %c0_i32 = arith.constant 0 : i32
    %c0_i32_0 = arith.constant 0 : i32
    return %arg0, %c0_i32 : i32, i32
  }
  func.func @transform_4(%arg0: i32) -> (i32, i32) {
    %c0_i32 = arith.constant 0 : i32
    %c0_i32_0 = arith.constant 0 : i32
    return %arg0, %c0_i32 : i32, i32
  }
}

module attributes {stable_mosaic.version = 11 : i64} {
  func.func @_norm_act_kernel(%arg0: i32, %arg1: memref<16x64xf32, #tpu.memory_space<vmem>>, %arg2: memref<1x64xf32, #tpu.memory_space<vmem>>, %arg3: memref<1x64xf32, #tpu.memory_space<vmem>>, %arg4: memref<16x64xbf16, #tpu.memory_space<vmem>>) attributes {dimension_semantics = [#tpu.dimension_semantics<parallel>], iteration_bounds = array<i64: 1>, scalar_prefetch = 0 : i64, scratch_operands = 0 : i64, tpu.core_type = #tpu.core_type<tc>, window_params = [{transform_indices = @transform_0, window_bounds = array<i64: 16, 64>}, {pipeline_mode = #tpu.pipeline_mode<synchronous>, transform_indices = @transform_1, window_bounds = array<i64: 1, 64>}, {pipeline_mode = #tpu.pipeline_mode<synchronous>, transform_indices = @transform_2, window_bounds = array<i64: 1, 64>}, {transform_indices = @transform_3, window_bounds = array<i64: 16, 64>}]} {
    %c0 = arith.constant 0 : index
    %c0_0 = arith.constant 0 : index
    %0 = vector.load %arg1[%c0, %c0_0] : memref<16x64xf32, #tpu.memory_space<vmem>>, vector<16x64xf32>
    %c0_1 = arith.constant 0 : index
    %c0_2 = arith.constant 0 : index
    %1 = vector.load %arg2[%c0_1, %c0_2] : memref<1x64xf32, #tpu.memory_space<vmem>>, vector<1x64xf32>
    %2 = vector.broadcast %1 : vector<1x64xf32> to vector<16x64xf32>
    %3 = arith.mulf %0, %2 : vector<16x64xf32>
    %c0_3 = arith.constant 0 : index
    %c0_4 = arith.constant 0 : index
    %4 = vector.load %arg3[%c0_3, %c0_4] : memref<1x64xf32, #tpu.memory_space<vmem>>, vector<1x64xf32>
    %5 = vector.broadcast %4 : vector<1x64xf32> to vector<16x64xf32>
    %6 = arith.addf %3, %5 : vector<16x64xf32>
    %cst = arith.constant 0.000000e+00 : f32
    %7 = vector.broadcast %cst : f32 to vector<16x64xf32>
    %8 = arith.cmpf ogt, %6, %7 : vector<16x64xf32>
    %cst_5 = arith.constant 0.000000e+00 : f32
    %9 = vector.broadcast %cst_5 : f32 to vector<16x64xf32>
    %10 = arith.minimumf %6, %9 : vector<16x64xf32>
    %11 = math.exp %10 : vector<16x64xf32>
    %cst_6 = arith.constant 1.000000e+00 : f32
    %12 = vector.broadcast %cst_6 : f32 to vector<16x64xf32>
    %13 = arith.subf %11, %12 : vector<16x64xf32>
    %14 = arith.select %8, %6, %13 : vector<16x64xi1>, vector<16x64xf32>
    %15 = arith.truncf %14 : vector<16x64xf32> to vector<16x64xbf16>
    %c0_7 = arith.constant 0 : index
    %c0_8 = arith.constant 0 : index
    %16 = vector.load %arg4[%c0_7, %c0_8] : memref<16x64xbf16, #tpu.memory_space<vmem>>, vector<16x64xbf16>
    tpu.vector_store %arg4[%c0_7, %c0_8], %15 {strides = array<i32>} : memref<16x64xbf16, #tpu.memory_space<vmem>>, vector<16x64xbf16>,
    return
  }
  func.func @transform_0(%arg0: i32) -> (i32, i32) {
    %c0_i32 = arith.constant 0 : i32
    %c0_i32_0 = arith.constant 0 : i32
    return %arg0, %c0_i32 : i32, i32
  }
  func.func @transform_1(%arg0: i32) -> (i32, i32) {
    %c0_i32 = arith.constant 0 : i32
    %c0_i32_0 = arith.constant 0 : i32
    %c0_i32_1 = arith.constant 0 : i32
    return %c0_i32, %c0_i32_0 : i32, i32
  }
  func.func @transform_2(%arg0: i32) -> (i32, i32) {
    %c0_i32 = arith.constant 0 : i32
    %c0_i32_0 = arith.constant 0 : i32
    %c0_i32_1 = arith.constant 0 : i32
    return %c0_i32, %c0_i32_0 : i32, i32
  }
  func.func @transform_3(%arg0: i32) -> (i32, i32) {
    %c0_i32 = arith.constant 0 : i32
    %c0_i32_0 = arith.constant 0 : i32
    return %arg0, %c0_i32 : i32, i32
  }
}

module attributes {stable_mosaic.version = 11 : i64} {
  func.func @_mm_stats_kernel(%arg0: i32, %arg1: memref<32x256xbf16, #tpu.memory_space<vmem>>, %arg2: memref<256x32xbf16, #tpu.memory_space<vmem>>, %arg3: memref<1x32xf32, #tpu.memory_space<vmem>>, %arg4: memref<32x32xf32, #tpu.memory_space<vmem>>, %arg5: memref<8x32xf32, #tpu.memory_space<vmem>>) attributes {dimension_semantics = [#tpu.dimension_semantics<parallel>], iteration_bounds = array<i64: 1>, scalar_prefetch = 0 : i64, scratch_operands = 0 : i64, tpu.core_type = #tpu.core_type<tc>, window_params = [{transform_indices = @transform_0, window_bounds = array<i64: 32, 256>}, {pipeline_mode = #tpu.pipeline_mode<synchronous>, transform_indices = @transform_1, window_bounds = array<i64: 256, 32>}, {pipeline_mode = #tpu.pipeline_mode<synchronous>, transform_indices = @transform_2, window_bounds = array<i64: 1, 32>}, {transform_indices = @transform_3, window_bounds = array<i64: 32, 32>}, {transform_indices = @transform_4, window_bounds = array<i64: 8, 32>}]} {
    %c0 = arith.constant 0 : index
    %c0_0 = arith.constant 0 : index
    %0 = vector.load %arg1[%c0, %c0_0] : memref<32x256xbf16, #tpu.memory_space<vmem>>, vector<32x256xbf16>
    %c0_1 = arith.constant 0 : index
    %c0_2 = arith.constant 0 : index
    %1 = vector.load %arg2[%c0_1, %c0_2] : memref<256x32xbf16, #tpu.memory_space<vmem>>, vector<256x32xbf16>
    %cst = arith.constant dense<0.000000e+00> : vector<32x32xf32>
    %2 = tpu.matmul %0, %1, %cst {dimension_numbers = #tpu.dot_dimension_numbers<[1], [0], [0], [1], [0, 0, 1, 1], [], []>} : vector<32x256xbf16>, vector<256x32xbf16>, vector<32x32xf32> -> vector<32x32xf32>
    %c0_3 = arith.constant 0 : index
    %c0_4 = arith.constant 0 : index
    %3 = vector.load %arg3[%c0_3, %c0_4] : memref<1x32xf32, #tpu.memory_space<vmem>>, vector<1x32xf32>
    %4 = vector.broadcast %3 : vector<1x32xf32> to vector<32x32xf32>
    %5 = arith.addf %2, %4 : vector<32x32xf32>
    %c0_5 = arith.constant 0 : index
    %c0_6 = arith.constant 0 : index
    %6 = vector.load %arg4[%c0_5, %c0_6] : memref<32x32xf32, #tpu.memory_space<vmem>>, vector<32x32xf32>
    tpu.vector_store %arg4[%c0_5, %c0_6], %5 {strides = array<i32>} : memref<32x32xf32, #tpu.memory_space<vmem>>, vector<32x32xf32>,
    %7 = tpu.iota {dimensions = array<i32: 0>} : vector<32x32xi32>
    %c32_i32 = arith.constant 32 : i32
    %8 = arith.muli %arg0, %c32_i32 : i32
    %9 = vector.broadcast %8 : i32 to vector<32x32xi32>
    %10 = arith.addi %7, %9 : vector<32x32xi32>
    %c32_i32_7 = arith.constant 32 : i32
    %11 = vector.broadcast %c32_i32_7 : i32 to vector<32x32xi32>
    %12 = arith.cmpi slt, %10, %11 : vector<32x32xi32>
    %cst_8 = arith.constant 0.000000e+00 : f32
    %13 = vector.broadcast %cst_8 : f32 to vector<32x32xf32>
    %14 = arith.select %12, %5, %13 : vector<32x32xi1>, vector<32x32xf32>
    %cst_9 = arith.constant dense<0.000000e+00> : vector<32xf32>
    %15 = vector.multi_reduction <add>, %14, %cst_9 [0] : vector<32x32xf32> to vector<32xf32>
    %16 = vector.shape_cast %15 : vector<32xf32> to vector<1x32xf32>
    %17 = arith.mulf %14, %14 : vector<32x32xf32>
    %cst_10 = arith.constant dense<0.000000e+00> : vector<32xf32>
    %18 = vector.multi_reduction <add>, %17, %cst_10 [0] : vector<32x32xf32> to vector<32xf32>
    %19 = vector.shape_cast %18 : vector<32xf32> to vector<1x32xf32>
    %20 = tpu.iota {dimensions = array<i32: 0>} : vector<8x32xi32>
    %c0_i32 = arith.constant 0 : i32
    %21 = vector.broadcast %c0_i32 : i32 to vector<8x32xi32>
    %22 = arith.cmpi eq, %20, %21 : vector<8x32xi32>
    %cst_11 = arith.constant 0.000000e+00 : f32
    %23 = vector.shape_cast %16 : vector<1x32xf32> to vector<1x32xf32>
    %24 = vector.broadcast %23 : vector<1x32xf32> to vector<8x32xf32>
    %25 = vector.broadcast %cst_11 : f32 to vector<8x32xf32>
    %26 = arith.select %22, %24, %25 : vector<8x32xi1>, vector<8x32xf32>
    %c1_i32 = arith.constant 1 : i32
    %27 = vector.broadcast %c1_i32 : i32 to vector<8x32xi32>
    %28 = arith.cmpi eq, %20, %27 : vector<8x32xi32>
    %cst_12 = arith.constant 0.000000e+00 : f32
    %29 = vector.shape_cast %19 : vector<1x32xf32> to vector<1x32xf32>
    %30 = vector.broadcast %29 : vector<1x32xf32> to vector<8x32xf32>
    %31 = vector.broadcast %cst_12 : f32 to vector<8x32xf32>
    %32 = arith.select %28, %30, %31 : vector<8x32xi1>, vector<8x32xf32>
    %33 = arith.addf %26, %32 : vector<8x32xf32>
    %c0_13 = arith.constant 0 : index
    %c0_14 = arith.constant 0 : index
    %34 = vector.load %arg5[%c0_13, %c0_14] : memref<8x32xf32, #tpu.memory_space<vmem>>, vector<8x32xf32>
    tpu.vector_store %arg5[%c0_13, %c0_14], %33 {strides = array<i32>} : memref<8x32xf32, #tpu.memory_space<vmem>>, vector<8x32xf32>,
    return
  }
  func.func @transform_0(%arg0: i32) -> (i32, i32) {
    %c0_i32 = arith.constant 0 : i32
    %c0_i32_0 = arith.constant 0 : i32
    return %arg0, %c0_i32 : i32, i32
  }
  func.func @transform_1(%arg0: i32) -> (i32, i32) {
    %c0_i32 = arith.constant 0 : i32
    %c0_i32_0 = arith.constant 0 : i32
    %c0_i32_1 = arith.constant 0 : i32
    return %c0_i32, %c0_i32_0 : i32, i32
  }
  func.func @transform_2(%arg0: i32) -> (i32, i32) {
    %c0_i32 = arith.constant 0 : i32
    %c0_i32_0 = arith.constant 0 : i32
    %c0_i32_1 = arith.constant 0 : i32
    return %c0_i32, %c0_i32_0 : i32, i32
  }
  func.func @transform_3(%arg0: i32) -> (i32, i32) {
    %c0_i32 = arith.constant 0 : i32
    %c0_i32_0 = arith.constant 0 : i32
    return %arg0, %c0_i32 : i32, i32
  }
  func.func @transform_4(%arg0: i32) -> (i32, i32) {
    %c0_i32 = arith.constant 0 : i32
    %c0_i32_0 = arith.constant 0 : i32
    return %arg0, %c0_i32 : i32, i32
  }
}

module attributes {stable_mosaic.version = 11 : i64} {
  func.func @_norm_act_kernel(%arg0: i32, %arg1: memref<32x32xf32, #tpu.memory_space<vmem>>, %arg2: memref<1x32xf32, #tpu.memory_space<vmem>>, %arg3: memref<1x32xf32, #tpu.memory_space<vmem>>, %arg4: memref<32x32xbf16, #tpu.memory_space<vmem>>) attributes {dimension_semantics = [#tpu.dimension_semantics<parallel>], iteration_bounds = array<i64: 1>, scalar_prefetch = 0 : i64, scratch_operands = 0 : i64, tpu.core_type = #tpu.core_type<tc>, window_params = [{transform_indices = @transform_0, window_bounds = array<i64: 32, 32>}, {pipeline_mode = #tpu.pipeline_mode<synchronous>, transform_indices = @transform_1, window_bounds = array<i64: 1, 32>}, {pipeline_mode = #tpu.pipeline_mode<synchronous>, transform_indices = @transform_2, window_bounds = array<i64: 1, 32>}, {transform_indices = @transform_3, window_bounds = array<i64: 32, 32>}]} {
    %c0 = arith.constant 0 : index
    %c0_0 = arith.constant 0 : index
    %0 = vector.load %arg1[%c0, %c0_0] : memref<32x32xf32, #tpu.memory_space<vmem>>, vector<32x32xf32>
    %c0_1 = arith.constant 0 : index
    %c0_2 = arith.constant 0 : index
    %1 = vector.load %arg2[%c0_1, %c0_2] : memref<1x32xf32, #tpu.memory_space<vmem>>, vector<1x32xf32>
    %2 = vector.broadcast %1 : vector<1x32xf32> to vector<32x32xf32>
    %3 = arith.mulf %0, %2 : vector<32x32xf32>
    %c0_3 = arith.constant 0 : index
    %c0_4 = arith.constant 0 : index
    %4 = vector.load %arg3[%c0_3, %c0_4] : memref<1x32xf32, #tpu.memory_space<vmem>>, vector<1x32xf32>
    %5 = vector.broadcast %4 : vector<1x32xf32> to vector<32x32xf32>
    %6 = arith.addf %3, %5 : vector<32x32xf32>
    %cst = arith.constant 0.000000e+00 : f32
    %7 = vector.broadcast %cst : f32 to vector<32x32xf32>
    %8 = arith.cmpf ogt, %6, %7 : vector<32x32xf32>
    %cst_5 = arith.constant 0.000000e+00 : f32
    %9 = vector.broadcast %cst_5 : f32 to vector<32x32xf32>
    %10 = arith.minimumf %6, %9 : vector<32x32xf32>
    %11 = math.exp %10 : vector<32x32xf32>
    %cst_6 = arith.constant 1.000000e+00 : f32
    %12 = vector.broadcast %cst_6 : f32 to vector<32x32xf32>
    %13 = arith.subf %11, %12 : vector<32x32xf32>
    %14 = arith.select %8, %6, %13 : vector<32x32xi1>, vector<32x32xf32>
    %15 = arith.truncf %14 : vector<32x32xf32> to vector<32x32xbf16>
    %c0_7 = arith.constant 0 : index
    %c0_8 = arith.constant 0 : index
    %16 = vector.load %arg4[%c0_7, %c0_8] : memref<32x32xbf16, #tpu.memory_space<vmem>>, vector<32x32xbf16>
    tpu.vector_store %arg4[%c0_7, %c0_8], %15 {strides = array<i32>} : memref<32x32xbf16, #tpu.memory_space<vmem>>, vector<32x32xbf16>,
    return
  }
  func.func @transform_0(%arg0: i32) -> (i32, i32) {
    %c0_i32 = arith.constant 0 : i32
    %c0_i32_0 = arith.constant 0 : i32
    return %arg0, %c0_i32 : i32, i32
  }
  func.func @transform_1(%arg0: i32) -> (i32, i32) {
    %c0_i32 = arith.constant 0 : i32
    %c0_i32_0 = arith.constant 0 : i32
    %c0_i32_1 = arith.constant 0 : i32
    return %c0_i32, %c0_i32_0 : i32, i32
  }
  func.func @transform_2(%arg0: i32) -> (i32, i32) {
    %c0_i32 = arith.constant 0 : i32
    %c0_i32_0 = arith.constant 0 : i32
    %c0_i32_1 = arith.constant 0 : i32
    return %c0_i32, %c0_i32_0 : i32, i32
  }
  func.func @transform_3(%arg0: i32) -> (i32, i32) {
    %c0_i32 = arith.constant 0 : i32
    %c0_i32_0 = arith.constant 0 : i32
    return %arg0, %c0_i32 : i32, i32
  }
}

module attributes {stable_mosaic.version = 11 : i64} {
  func.func @_mm_stats_kernel(%arg0: i32, %arg1: memref<64x128xbf16, #tpu.memory_space<vmem>>, %arg2: memref<128x16xbf16, #tpu.memory_space<vmem>>, %arg3: memref<1x16xf32, #tpu.memory_space<vmem>>, %arg4: memref<64x16xf32, #tpu.memory_space<vmem>>, %arg5: memref<8x16xf32, #tpu.memory_space<vmem>>) attributes {dimension_semantics = [#tpu.dimension_semantics<parallel>], iteration_bounds = array<i64: 1>, scalar_prefetch = 0 : i64, scratch_operands = 0 : i64, tpu.core_type = #tpu.core_type<tc>, window_params = [{transform_indices = @transform_0, window_bounds = array<i64: 64, 128>}, {pipeline_mode = #tpu.pipeline_mode<synchronous>, transform_indices = @transform_1, window_bounds = array<i64: 128, 16>}, {pipeline_mode = #tpu.pipeline_mode<synchronous>, transform_indices = @transform_2, window_bounds = array<i64: 1, 16>}, {transform_indices = @transform_3, window_bounds = array<i64: 64, 16>}, {transform_indices = @transform_4, window_bounds = array<i64: 8, 16>}]} {
    %c0 = arith.constant 0 : index
    %c0_0 = arith.constant 0 : index
    %0 = vector.load %arg1[%c0, %c0_0] : memref<64x128xbf16, #tpu.memory_space<vmem>>, vector<64x128xbf16>
    %c0_1 = arith.constant 0 : index
    %c0_2 = arith.constant 0 : index
    %1 = vector.load %arg2[%c0_1, %c0_2] : memref<128x16xbf16, #tpu.memory_space<vmem>>, vector<128x16xbf16>
    %cst = arith.constant dense<0.000000e+00> : vector<64x16xf32>
    %2 = tpu.matmul %0, %1, %cst {dimension_numbers = #tpu.dot_dimension_numbers<[1], [0], [0], [1], [0, 0, 1, 1], [], []>} : vector<64x128xbf16>, vector<128x16xbf16>, vector<64x16xf32> -> vector<64x16xf32>
    %c0_3 = arith.constant 0 : index
    %c0_4 = arith.constant 0 : index
    %3 = vector.load %arg3[%c0_3, %c0_4] : memref<1x16xf32, #tpu.memory_space<vmem>>, vector<1x16xf32>
    %4 = vector.broadcast %3 : vector<1x16xf32> to vector<64x16xf32>
    %5 = arith.addf %2, %4 : vector<64x16xf32>
    %c0_5 = arith.constant 0 : index
    %c0_6 = arith.constant 0 : index
    %6 = vector.load %arg4[%c0_5, %c0_6] : memref<64x16xf32, #tpu.memory_space<vmem>>, vector<64x16xf32>
    tpu.vector_store %arg4[%c0_5, %c0_6], %5 {strides = array<i32>} : memref<64x16xf32, #tpu.memory_space<vmem>>, vector<64x16xf32>,
    %7 = tpu.iota {dimensions = array<i32: 0>} : vector<64x16xi32>
    %c64_i32 = arith.constant 64 : i32
    %8 = arith.muli %arg0, %c64_i32 : i32
    %9 = vector.broadcast %8 : i32 to vector<64x16xi32>
    %10 = arith.addi %7, %9 : vector<64x16xi32>
    %c64_i32_7 = arith.constant 64 : i32
    %11 = vector.broadcast %c64_i32_7 : i32 to vector<64x16xi32>
    %12 = arith.cmpi slt, %10, %11 : vector<64x16xi32>
    %cst_8 = arith.constant 0.000000e+00 : f32
    %13 = vector.broadcast %cst_8 : f32 to vector<64x16xf32>
    %14 = arith.select %12, %5, %13 : vector<64x16xi1>, vector<64x16xf32>
    %cst_9 = arith.constant dense<0.000000e+00> : vector<16xf32>
    %15 = vector.multi_reduction <add>, %14, %cst_9 [0] : vector<64x16xf32> to vector<16xf32>
    %16 = vector.shape_cast %15 : vector<16xf32> to vector<1x16xf32>
    %17 = arith.mulf %14, %14 : vector<64x16xf32>
    %cst_10 = arith.constant dense<0.000000e+00> : vector<16xf32>
    %18 = vector.multi_reduction <add>, %17, %cst_10 [0] : vector<64x16xf32> to vector<16xf32>
    %19 = vector.shape_cast %18 : vector<16xf32> to vector<1x16xf32>
    %20 = tpu.iota {dimensions = array<i32: 0>} : vector<8x16xi32>
    %c0_i32 = arith.constant 0 : i32
    %21 = vector.broadcast %c0_i32 : i32 to vector<8x16xi32>
    %22 = arith.cmpi eq, %20, %21 : vector<8x16xi32>
    %cst_11 = arith.constant 0.000000e+00 : f32
    %23 = vector.shape_cast %16 : vector<1x16xf32> to vector<1x16xf32>
    %24 = vector.broadcast %23 : vector<1x16xf32> to vector<8x16xf32>
    %25 = vector.broadcast %cst_11 : f32 to vector<8x16xf32>
    %26 = arith.select %22, %24, %25 : vector<8x16xi1>, vector<8x16xf32>
    %c1_i32 = arith.constant 1 : i32
    %27 = vector.broadcast %c1_i32 : i32 to vector<8x16xi32>
    %28 = arith.cmpi eq, %20, %27 : vector<8x16xi32>
    %cst_12 = arith.constant 0.000000e+00 : f32
    %29 = vector.shape_cast %19 : vector<1x16xf32> to vector<1x16xf32>
    %30 = vector.broadcast %29 : vector<1x16xf32> to vector<8x16xf32>
    %31 = vector.broadcast %cst_12 : f32 to vector<8x16xf32>
    %32 = arith.select %28, %30, %31 : vector<8x16xi1>, vector<8x16xf32>
    %33 = arith.addf %26, %32 : vector<8x16xf32>
    %c0_13 = arith.constant 0 : index
    %c0_14 = arith.constant 0 : index
    %34 = vector.load %arg5[%c0_13, %c0_14] : memref<8x16xf32, #tpu.memory_space<vmem>>, vector<8x16xf32>
    tpu.vector_store %arg5[%c0_13, %c0_14], %33 {strides = array<i32>} : memref<8x16xf32, #tpu.memory_space<vmem>>, vector<8x16xf32>,
    return
  }
  func.func @transform_0(%arg0: i32) -> (i32, i32) {
    %c0_i32 = arith.constant 0 : i32
    %c0_i32_0 = arith.constant 0 : i32
    return %arg0, %c0_i32 : i32, i32
  }
  func.func @transform_1(%arg0: i32) -> (i32, i32) {
    %c0_i32 = arith.constant 0 : i32
    %c0_i32_0 = arith.constant 0 : i32
    %c0_i32_1 = arith.constant 0 : i32
    return %c0_i32, %c0_i32_0 : i32, i32
  }
  func.func @transform_2(%arg0: i32) -> (i32, i32) {
    %c0_i32 = arith.constant 0 : i32
    %c0_i32_0 = arith.constant 0 : i32
    %c0_i32_1 = arith.constant 0 : i32
    return %c0_i32, %c0_i32_0 : i32, i32
  }
  func.func @transform_3(%arg0: i32) -> (i32, i32) {
    %c0_i32 = arith.constant 0 : i32
    %c0_i32_0 = arith.constant 0 : i32
    return %arg0, %c0_i32 : i32, i32
  }
  func.func @transform_4(%arg0: i32) -> (i32, i32) {
    %c0_i32 = arith.constant 0 : i32
    %c0_i32_0 = arith.constant 0 : i32
    return %arg0, %c0_i32 : i32, i32
  }
}

module attributes {stable_mosaic.version = 11 : i64} {
  func.func @_norm_act_kernel(%arg0: i32, %arg1: memref<64x16xf32, #tpu.memory_space<vmem>>, %arg2: memref<1x16xf32, #tpu.memory_space<vmem>>, %arg3: memref<1x16xf32, #tpu.memory_space<vmem>>, %arg4: memref<64x16xbf16, #tpu.memory_space<vmem>>) attributes {dimension_semantics = [#tpu.dimension_semantics<parallel>], iteration_bounds = array<i64: 1>, scalar_prefetch = 0 : i64, scratch_operands = 0 : i64, tpu.core_type = #tpu.core_type<tc>, window_params = [{transform_indices = @transform_0, window_bounds = array<i64: 64, 16>}, {pipeline_mode = #tpu.pipeline_mode<synchronous>, transform_indices = @transform_1, window_bounds = array<i64: 1, 16>}, {pipeline_mode = #tpu.pipeline_mode<synchronous>, transform_indices = @transform_2, window_bounds = array<i64: 1, 16>}, {transform_indices = @transform_3, window_bounds = array<i64: 64, 16>}]} {
    %c0 = arith.constant 0 : index
    %c0_0 = arith.constant 0 : index
    %0 = vector.load %arg1[%c0, %c0_0] : memref<64x16xf32, #tpu.memory_space<vmem>>, vector<64x16xf32>
    %c0_1 = arith.constant 0 : index
    %c0_2 = arith.constant 0 : index
    %1 = vector.load %arg2[%c0_1, %c0_2] : memref<1x16xf32, #tpu.memory_space<vmem>>, vector<1x16xf32>
    %2 = vector.broadcast %1 : vector<1x16xf32> to vector<64x16xf32>
    %3 = arith.mulf %0, %2 : vector<64x16xf32>
    %c0_3 = arith.constant 0 : index
    %c0_4 = arith.constant 0 : index
    %4 = vector.load %arg3[%c0_3, %c0_4] : memref<1x16xf32, #tpu.memory_space<vmem>>, vector<1x16xf32>
    %5 = vector.broadcast %4 : vector<1x16xf32> to vector<64x16xf32>
    %6 = arith.addf %3, %5 : vector<64x16xf32>
    %cst = arith.constant 0.000000e+00 : f32
    %7 = vector.broadcast %cst : f32 to vector<64x16xf32>
    %8 = arith.cmpf ogt, %6, %7 : vector<64x16xf32>
    %cst_5 = arith.constant 0.000000e+00 : f32
    %9 = vector.broadcast %cst_5 : f32 to vector<64x16xf32>
    %10 = arith.minimumf %6, %9 : vector<64x16xf32>
    %11 = math.exp %10 : vector<64x16xf32>
    %cst_6 = arith.constant 1.000000e+00 : f32
    %12 = vector.broadcast %cst_6 : f32 to vector<64x16xf32>
    %13 = arith.subf %11, %12 : vector<64x16xf32>
    %14 = arith.select %8, %6, %13 : vector<64x16xi1>, vector<64x16xf32>
    %15 = arith.truncf %14 : vector<64x16xf32> to vector<64x16xbf16>
    %c0_7 = arith.constant 0 : index
    %c0_8 = arith.constant 0 : index
    %16 = vector.load %arg4[%c0_7, %c0_8] : memref<64x16xbf16, #tpu.memory_space<vmem>>, vector<64x16xbf16>
    tpu.vector_store %arg4[%c0_7, %c0_8], %15 {strides = array<i32>} : memref<64x16xbf16, #tpu.memory_space<vmem>>, vector<64x16xbf16>,
    return
  }
  func.func @transform_0(%arg0: i32) -> (i32, i32) {
    %c0_i32 = arith.constant 0 : i32
    %c0_i32_0 = arith.constant 0 : i32
    return %arg0, %c0_i32 : i32, i32
  }
  func.func @transform_1(%arg0: i32) -> (i32, i32) {
    %c0_i32 = arith.constant 0 : i32
    %c0_i32_0 = arith.constant 0 : i32
    %c0_i32_1 = arith.constant 0 : i32
    return %c0_i32, %c0_i32_0 : i32, i32
  }
  func.func @transform_2(%arg0: i32) -> (i32, i32) {
    %c0_i32 = arith.constant 0 : i32
    %c0_i32_0 = arith.constant 0 : i32
    %c0_i32_1 = arith.constant 0 : i32
    return %c0_i32, %c0_i32_0 : i32, i32
  }
  func.func @transform_3(%arg0: i32) -> (i32, i32) {
    %c0_i32 = arith.constant 0 : i32
    %c0_i32_0 = arith.constant 0 : i32
    return %arg0, %c0_i32 : i32, i32
  }
}

module attributes {stable_mosaic.version = 11 : i64} {
  func.func @_mm_stats_kernel(%arg0: i32, %arg1: memref<128x224xbf16, #tpu.memory_space<vmem>>, %arg2: memref<224x1xbf16, #tpu.memory_space<vmem>>, %arg3: memref<1x1xf32, #tpu.memory_space<vmem>>, %arg4: memref<128x1xf32, #tpu.memory_space<vmem>>, %arg5: memref<8x1xf32, #tpu.memory_space<vmem>>) attributes {dimension_semantics = [#tpu.dimension_semantics<parallel>], iteration_bounds = array<i64: 1>, scalar_prefetch = 0 : i64, scratch_operands = 0 : i64, tpu.core_type = #tpu.core_type<tc>, window_params = [{transform_indices = @transform_0, window_bounds = array<i64: 128, 224>}, {pipeline_mode = #tpu.pipeline_mode<synchronous>, transform_indices = @transform_1, window_bounds = array<i64: 224, 1>}, {pipeline_mode = #tpu.pipeline_mode<synchronous>, transform_indices = @transform_2, window_bounds = array<i64: 1, 1>}, {transform_indices = @transform_3, window_bounds = array<i64: 128, 1>}, {transform_indices = @transform_4, window_bounds = array<i64: 8, 1>}]} {
    %c0 = arith.constant 0 : index
    %c0_0 = arith.constant 0 : index
    %0 = vector.load %arg1[%c0, %c0_0] : memref<128x224xbf16, #tpu.memory_space<vmem>>, vector<128x224xbf16>
    %c0_1 = arith.constant 0 : index
    %c0_2 = arith.constant 0 : index
    %1 = vector.load %arg2[%c0_1, %c0_2] : memref<224x1xbf16, #tpu.memory_space<vmem>>, vector<224x1xbf16>
    %cst = arith.constant dense<0.000000e+00> : vector<128x1xf32>
    %2 = tpu.matmul %0, %1, %cst {dimension_numbers = #tpu.dot_dimension_numbers<[1], [0], [0], [1], [0, 0, 1, 1], [], []>} : vector<128x224xbf16>, vector<224x1xbf16>, vector<128x1xf32> -> vector<128x1xf32>
    %c0_3 = arith.constant 0 : index
    %c0_4 = arith.constant 0 : index
    %3 = vector.load %arg3[%c0_3, %c0_4] : memref<1x1xf32, #tpu.memory_space<vmem>>, vector<1x1xf32>
    %4 = vector.broadcast %3 : vector<1x1xf32> to vector<128x1xf32>
    %5 = arith.addf %2, %4 : vector<128x1xf32>
    %c0_5 = arith.constant 0 : index
    %c0_6 = arith.constant 0 : index
    %6 = vector.load %arg4[%c0_5, %c0_6] : memref<128x1xf32, #tpu.memory_space<vmem>>, vector<128x1xf32>
    tpu.vector_store %arg4[%c0_5, %c0_6], %5 {strides = array<i32>} : memref<128x1xf32, #tpu.memory_space<vmem>>, vector<128x1xf32>,
    %7 = tpu.iota {dimensions = array<i32: 0>} : vector<128x1xi32>
    %c128_i32 = arith.constant 128 : i32
    %8 = arith.muli %arg0, %c128_i32 : i32
    %9 = vector.broadcast %8 : i32 to vector<128x1xi32>
    %10 = arith.addi %7, %9 : vector<128x1xi32>
    %c128_i32_7 = arith.constant 128 : i32
    %11 = vector.broadcast %c128_i32_7 : i32 to vector<128x1xi32>
    %12 = arith.cmpi slt, %10, %11 : vector<128x1xi32>
    %cst_8 = arith.constant 0.000000e+00 : f32
    %13 = vector.broadcast %cst_8 : f32 to vector<128x1xf32>
    %14 = arith.select %12, %5, %13 : vector<128x1xi1>, vector<128x1xf32>
    %cst_9 = arith.constant dense<0.000000e+00> : vector<1xf32>
    %15 = vector.multi_reduction <add>, %14, %cst_9 [0] : vector<128x1xf32> to vector<1xf32>
    %16 = vector.shape_cast %15 : vector<1xf32> to vector<1x1xf32>
    %17 = arith.mulf %14, %14 : vector<128x1xf32>
    %cst_10 = arith.constant dense<0.000000e+00> : vector<1xf32>
    %18 = vector.multi_reduction <add>, %17, %cst_10 [0] : vector<128x1xf32> to vector<1xf32>
    %19 = vector.shape_cast %18 : vector<1xf32> to vector<1x1xf32>
    %20 = tpu.iota {dimensions = array<i32: 0>} : vector<8x1xi32>
    %c0_i32 = arith.constant 0 : i32
    %21 = vector.broadcast %c0_i32 : i32 to vector<8x1xi32>
    %22 = arith.cmpi eq, %20, %21 : vector<8x1xi32>
    %cst_11 = arith.constant 0.000000e+00 : f32
    %23 = vector.shape_cast %16 : vector<1x1xf32> to vector<1x1xf32>
    %24 = vector.broadcast %23 : vector<1x1xf32> to vector<8x1xf32>
    %25 = vector.broadcast %cst_11 : f32 to vector<8x1xf32>
    %26 = arith.select %22, %24, %25 : vector<8x1xi1>, vector<8x1xf32>
    %c1_i32 = arith.constant 1 : i32
    %27 = vector.broadcast %c1_i32 : i32 to vector<8x1xi32>
    %28 = arith.cmpi eq, %20, %27 : vector<8x1xi32>
    %cst_12 = arith.constant 0.000000e+00 : f32
    %29 = vector.shape_cast %19 : vector<1x1xf32> to vector<1x1xf32>
    %30 = vector.broadcast %29 : vector<1x1xf32> to vector<8x1xf32>
    %31 = vector.broadcast %cst_12 : f32 to vector<8x1xf32>
    %32 = arith.select %28, %30, %31 : vector<8x1xi1>, vector<8x1xf32>
    %33 = arith.addf %26, %32 : vector<8x1xf32>
    %c0_13 = arith.constant 0 : index
    %c0_14 = arith.constant 0 : index
    %34 = vector.load %arg5[%c0_13, %c0_14] : memref<8x1xf32, #tpu.memory_space<vmem>>, vector<8x1xf32>
    tpu.vector_store %arg5[%c0_13, %c0_14], %33 {strides = array<i32>} : memref<8x1xf32, #tpu.memory_space<vmem>>, vector<8x1xf32>,
    return
  }
  func.func @transform_0(%arg0: i32) -> (i32, i32) {
    %c0_i32 = arith.constant 0 : i32
    %c0_i32_0 = arith.constant 0 : i32
    return %arg0, %c0_i32 : i32, i32
  }
  func.func @transform_1(%arg0: i32) -> (i32, i32) {
    %c0_i32 = arith.constant 0 : i32
    %c0_i32_0 = arith.constant 0 : i32
    %c0_i32_1 = arith.constant 0 : i32
    return %c0_i32, %c0_i32_0 : i32, i32
  }
  func.func @transform_2(%arg0: i32) -> (i32, i32) {
    %c0_i32 = arith.constant 0 : i32
    %c0_i32_0 = arith.constant 0 : i32
    %c0_i32_1 = arith.constant 0 : i32
    return %c0_i32, %c0_i32_0 : i32, i32
  }
  func.func @transform_3(%arg0: i32) -> (i32, i32) {
    %c0_i32 = arith.constant 0 : i32
    %c0_i32_0 = arith.constant 0 : i32
    return %arg0, %c0_i32 : i32, i32
  }
  func.func @transform_4(%arg0: i32) -> (i32, i32) {
    %c0_i32 = arith.constant 0 : i32
    %c0_i32_0 = arith.constant 0 : i32
    return %arg0, %c0_i32 : i32, i32
  }
}

module attributes {stable_mosaic.version = 11 : i64} {
  func.func @_norm_act_kernel(%arg0: i32, %arg1: memref<128x1xf32, #tpu.memory_space<vmem>>, %arg2: memref<1x1xf32, #tpu.memory_space<vmem>>, %arg3: memref<1x1xf32, #tpu.memory_space<vmem>>, %arg4: memref<128x1xf32, #tpu.memory_space<vmem>>) attributes {dimension_semantics = [#tpu.dimension_semantics<parallel>], iteration_bounds = array<i64: 1>, scalar_prefetch = 0 : i64, scratch_operands = 0 : i64, tpu.core_type = #tpu.core_type<tc>, window_params = [{transform_indices = @transform_0, window_bounds = array<i64: 128, 1>}, {pipeline_mode = #tpu.pipeline_mode<synchronous>, transform_indices = @transform_1, window_bounds = array<i64: 1, 1>}, {pipeline_mode = #tpu.pipeline_mode<synchronous>, transform_indices = @transform_2, window_bounds = array<i64: 1, 1>}, {transform_indices = @transform_3, window_bounds = array<i64: 128, 1>}]} {
    %c0 = arith.constant 0 : index
    %c0_0 = arith.constant 0 : index
    %0 = vector.load %arg1[%c0, %c0_0] : memref<128x1xf32, #tpu.memory_space<vmem>>, vector<128x1xf32>
    %c0_1 = arith.constant 0 : index
    %c0_2 = arith.constant 0 : index
    %1 = vector.load %arg2[%c0_1, %c0_2] : memref<1x1xf32, #tpu.memory_space<vmem>>, vector<1x1xf32>
    %2 = vector.broadcast %1 : vector<1x1xf32> to vector<128x1xf32>
    %3 = arith.mulf %0, %2 : vector<128x1xf32>
    %c0_3 = arith.constant 0 : index
    %c0_4 = arith.constant 0 : index
    %4 = vector.load %arg3[%c0_3, %c0_4] : memref<1x1xf32, #tpu.memory_space<vmem>>, vector<1x1xf32>
    %5 = vector.broadcast %4 : vector<1x1xf32> to vector<128x1xf32>
    %6 = arith.addf %3, %5 : vector<128x1xf32>
    %c0_5 = arith.constant 0 : index
    %c0_6 = arith.constant 0 : index
    %7 = vector.load %arg4[%c0_5, %c0_6] : memref<128x1xf32, #tpu.memory_space<vmem>>, vector<128x1xf32>
    tpu.vector_store %arg4[%c0_5, %c0_6], %6 {strides = array<i32>} : memref<128x1xf32, #tpu.memory_space<vmem>>, vector<128x1xf32>,
    return
  }
  func.func @transform_0(%arg0: i32) -> (i32, i32) {
    %c0_i32 = arith.constant 0 : i32
    %c0_i32_0 = arith.constant 0 : i32
    return %arg0, %c0_i32 : i32, i32
  }
  func.func @transform_1(%arg0: i32) -> (i32, i32) {
    %c0_i32 = arith.constant 0 : i32
    %c0_i32_0 = arith.constant 0 : i32
    %c0_i32_1 = arith.constant 0 : i32
    return %c0_i32, %c0_i32_0 : i32, i32
  }
  func.func @transform_2(%arg0: i32) -> (i32, i32) {
    %c0_i32 = arith.constant 0 : i32
    %c0_i32_0 = arith.constant 0 : i32
    %c0_i32_1 = arith.constant 0 : i32
    return %c0_i32, %c0_i32_0 : i32, i32
  }
  func.func @transform_3(%arg0: i32) -> (i32, i32) {
    %c0_i32 = arith.constant 0 : i32
    %c0_i32_0 = arith.constant 0 : i32
    return %arg0, %c0_i32 : i32, i32
  }
}

</mosaic_0001>

<bundles_post_ra>
// kernel: gruse_forward.31
= control target key start
LH: loop header
LB: loop body
LE: loop exit
PB: predicated region body
PF: predicated region fallthrough
CT: control target
= control target key end

     0   :  { %vm236_vm2 = vcmask 125952   ;;  %s601_s0 = inlined_call_operand.vmem [shape: f32[128,16], index: 0, kind: input, shape index: {}]   ;;  %s602_s1 = inlined_call_operand.vmem [shape: f32[1,16], index: 1, kind: input, shape index: {}]   ;;  %s603_s2 = inlined_call_operand.vmem [shape: f32[1,16], index: 2, kind: input, shape index: {}]   ;;  %s604_s3 = inlined_call_operand.vmem [shape: bf16[128,16], index: 3, kind: output, shape index: {}]  }
   0x1   :  { %v14_v0 = vld [vmem:[%s601_s0] sm:$0xff]  ;;  %v15_v4 = vld [vmem:[%s601_s0 + $0x8] sm:$0xff]  ;;  %v16_v5 = vld [vmem:[%s601_s0 + $0x10] sm:$0xff] }
   0x2   :  { %v365_v1 = vld [vmem:[%s602_s1] ss:$0 sm:$0xff]  ;;  %v17_v6 = vld [vmem:[%s601_s0 + $0x18] sm:$0xff]  ;;  %v19_v11 = vld [vmem:[%s601_s0 + $0x28] sm:$0xff] }
   0x3   :  { %v370_v2 = vld [vmem:[%s603_s2] ss:$0 sm:$0xff]  ;;  %v37_v3 = vmul.f32 %v365_v1, %v14_v0  ;;  %v38_v7 = vmul.f32 %v365_v1, %v15_v4  ;;  %v39_v8 = vmul.f32 %v365_v1, %v16_v5  ;;  %v40_v9 = vmul.f32 %v365_v1, %v17_v6  ;;  %v20_v12 = vld [vmem:[%s601_s0 + $0x30] sm:$0xff]  ;;  %v21_v16 = vld [vmem:[%s601_s0 + $0x38] sm:$0xff] }
   0x4   :  { %v18_v10 = vld [vmem:[%s601_s0 + $0x20] sm:$0xff]  ;;  %v42_v15 = vmul.f32 %v365_v1, %v19_v11  ;;  %v43_v23 = vmul.f32 %v365_v1, %v20_v12  ;;  %v44_v26 = vmul.f32 %v365_v1, %v21_v16  ;;  %v23_v39 = vld [vmem:[%s601_s0 + $0x48] sm:$0xff]  ;;  %v24_v40 = vld [vmem:[%s601_s0 + $0x50] sm:$0xff] }
   0x5   :  { %v395_v13 = vadd.f32 %v370_v2, %v37_v3  ;;  %v41_v14 = vmul.f32 %v365_v1, %v18_v10  ;;  %v403_v17 = vadd.f32 %v370_v2, %v38_v7  ;;  %v406_v18 = vadd.f32 %v370_v2, %v39_v8  ;;  %v22_v29 = vld [vmem:[%s601_s0 + $0x40] sm:$0xff]  ;;  %v25_v45 = vld [vmem:[%s601_s0 + $0x58] sm:$0xff]  ;;  %v27_v50 = vld [vmem:[%s601_s0 + $0x68] sm:$0xff] }
   0x6   :  { %v409_v19 = vadd.f32 %v370_v2, %v40_v9  ;;  %v416_v22 = vadd.f32 %v370_v2, %v42_v15  ;;  %v429_v35 = vadd.f32 %v370_v2, %v43_v23  ;;  %v432_v37 = vadd.f32 %v370_v2, %v44_v26  ;;  %v26_v49 = vld [vmem:[%s601_s0 + $0x60] sm:$0xff]  ;;  %v28_v61 = vld [vmem:[%s601_s0 + $0x70] sm:$0xff]  ;;  %v29_v0 = vld [vmem:[%s601_s0 + $0x78] sm:$0xff] }
   0x7   :  { %v92_v20 = vmin.f32 %v395_v13, 0.0  ;;  %v413_v21 = vadd.f32 %v370_v2, %v41_v14  ;;  %v93_v24 = vmin.f32 %v403_v17, 0.0  ;;  %v94_v25 = vmin.f32 %v406_v18, 0.0 }
   0x8   :  { %v95_v28 = vmin.f32 %v409_v19, 0.0  ;;  %v97_v34 = vmin.f32 %v416_v22, 0.0  ;;  %v45_v38 = vmul.f32 %v365_v1, %v22_v29  ;;  %vm76_vm0 = vcmp.gt.f32.partialorder %v395_v13, 0.0 }
   0x9   :  { %v108_v27 = vmul.f32 1.442695, %v92_v20  ;;  %v110_v30 = vmul.f32 1.442695, %v93_v24  ;;  %v112_v31 = vmul.f32 1.442695, %v94_v25  ;;  %v46_v47 = vmul.f32 %v365_v1, %v23_v39 }
   0xa   :  { %v96_v32 = vmin.f32 %v413_v21, 0.0  ;;  %v114_v33 = vmul.f32 1.442695, %v95_v28  ;;  %v118_v41 = vmul.f32 1.442695, %v97_v34  ;;  %v98_v42 = vmin.f32 %v429_v35, 0.0 }
   0xb   :  { %307 = vpow2.f32 %v108_v27  ;;  %vm77_vm1 = vcmp.gt.f32.partialorder %v403_v17, 0.0  ;;  %v99_v43 = vmin.f32 %v432_v37, 0.0  ;;  %v446_v44 = vadd.f32 %v370_v2, %v45_v38 }
   0xc   :  { %309 = vpow2.f32 %v110_v30  ;;  %v116_v36 = vmul.f32 1.442695, %v96_v32  ;;  %v120_v46 = vmul.f32 1.442695, %v98_v42  ;;  %v47_v48 = vmul.f32 %v365_v1, %v24_v40 }
   0xd   :  { %311 = vpow2.f32 %v112_v31  ;;  %vm78_vm3 = vcmp.gt.f32.partialorder %v406_v18, 0.0  ;;  %v122_v51 = vmul.f32 1.442695, %v99_v43  ;;  %v100_v52 = vmin.f32 %v446_v44, 0.0 }
   0xe   :  { %313 = vpow2.f32 %v114_v33  ;;  %v462_v53 = vadd.f32 %v370_v2, %v46_v47  ;;  %v465_v54 = vadd.f32 %v370_v2, %v47_v48  ;;  %v48_v55 = vmul.f32 %v365_v1, %v25_v45 }
   0xf   :  { %315 = vpow2.f32 %v116_v36  ;;  %v124_v56 = vmul.f32 1.442695, %v100_v52  ;;  %v49_v57 = vmul.f32 %v365_v1, %v26_v49  ;;  %v50_v58 = vmul.f32 %v365_v1, %v27_v50 }
  0x10   :  { %317 = vpow2.f32 %v118_v41  ;;  %vm79_vm4 = vcmp.gt.f32.partialorder %v409_v19, 0.0  ;;  %vm80_vm5 = vcmp.gt.f32.partialorder %v413_v21, 0.0  ;;  %v101_v59 = vmin.f32 %v462_v53, 0.0 }
  0x11   :  { %319 = vpow2.f32 %v120_v46  ;;  %v102_v60 = vmin.f32 %v465_v54, 0.0  ;;  %vm81_vm6 = vcmp.gt.f32.partialorder %v416_v22, 0.0  ;;  %v479_v62 = vadd.f32 %v370_v2, %v48_v55 }
  0x12   :  { %321 = vpow2.f32 %v122_v51  ;;  %v482_v63 = vadd.f32 %v370_v2, %v49_v57  ;;  %vm82_vm7 = vcmp.gt.f32.partialorder %v429_v35, 0.0  ;;  %vm83_vm8 = vcmp.gt.f32.partialorder %v432_v37, 0.0 }
  0x13   :  { %323 = vpow2.f32 %v124_v56  ;;  %v126_v4 = vmul.f32 1.442695, %v101_v59  ;;  %v128_v5 = vmul.f32 1.442695, %v102_v60  ;;  %vm84_vm9 = vcmp.gt.f32.partialorder %v446_v44, 0.0 }
  0x14   :  { %v103_v8 = vmin.f32 %v479_v62, 0.0  ;;  %v492_v9 = vadd.f32 %v370_v2, %v50_v58  ;;  %v51_v10 = vmul.f32 %v365_v1, %v28_v61  ;;  %v104_v14 = vmin.f32 %v482_v63, 0.0 }
  0x15   :  { %v308_v3 = vpop.eup %307  ;;  %325 = vpow2.f32 %v126_v4  ;;  %v52_v15 = vmul.f32 %v365_v1, %v29_v0  ;;  %vm85_vm10 = vcmp.gt.f32.partialorder %v462_v53, 0.0  ;;  %vm86_vm11 = vcmp.gt.f32.partialorder %v465_v54, 0.0 }
  0x16   :  { %v310_v6 = vpop.eup %309  ;;  %v259_v7 = vadd.f32 -1.0, %v308_v3  ;;  %327 = vpow2.f32 %v128_v5  ;;  %v130_v24 = vmul.f32 1.442695, %v103_v8  ;;  %v132_v29 = vmul.f32 1.442695, %v104_v14 }
  0x17   :  { %v312_v11 = vpop.eup %311  ;;  %v260_v12 = vadd.f32 -1.0, %v310_v6  ;;  %v105_v40 = vmin.f32 %v492_v9, 0.0  ;;  %v74_v43 = vadd.f32 %v370_v2, %v51_v10  ;;  %v75_v48 = vadd.f32 %v370_v2, %v52_v15 }
  0x18   :  { %v314_v16 = vpop.eup %313  ;;  %v156_v20 = vsel %vm76_vm0, %v395_v13, %v259_v7  ;;  %v261_v23 = vadd.f32 -1.0, %v312_v11  ;;  %329 = vpow2.f32 %v130_v24  ;;  %vm87_vm12 = vcmp.gt.f32.partialorder %v479_v62, 0.0 }
  0x19   :  { %v316_v25 = vpop.eup %315  ;;  %v291_v26 = vpack.c.bf16 %v156_v20, %v156_v20  ;;  %v157_v27 = vsel %vm77_vm1, %v403_v17, %v260_v12  ;;  %v262_v28 = vadd.f32 -1.0, %v314_v16  ;;  %331 = vpow2.f32 %v132_v29 }
  0x1a   :  { %v318_v30 = vpop.eup %317  ;;  %v292_v31 = vpack.c.bf16 %v157_v27, %v157_v27  ;;  %v158_v1 = vsel %vm78_vm3, %v406_v18, %v261_v23  ;;  %v263_v32 = vadd.f32 -1.0, %v316_v25  ;;  %v134_v47 = vmul.f32 1.442695, %v105_v40 }
  0x1b   :  { %v320_v13 = vpop.eup %319  ;;  %237 = vst.msk [vmem:[%s604_s3] sm:$0xf] %vm236_vm2, %v291_v26  ;;  %v293_v33 = vpack.c.bf16 %v158_v1, %v158_v1  ;;  %v159_v17 = vsel %vm79_vm4, %v409_v19, %v262_v28  ;;  %v264_v34 = vadd.f32 -1.0, %v318_v30  ;;  %v106_v51 = vmin.f32 %v74_v43, 0.0 }
  0x1c   :  { %v322_v36 = vpop.eup %321  ;;  %238 = vst.msk [vmem:[%s604_s3 + $0x4] sm:$0xf] %vm236_vm2, %v292_v31  ;;  %v294_v18 = vpack.c.bf16 %v159_v17, %v159_v17  ;;  %v160_v38 = vsel %vm80_vm5, %v413_v21, %v263_v32  ;;  %v265_v39 = vadd.f32 -1.0, %v320_v13  ;;  %333 = vpow2.f32 %v134_v47 }
  0x1d   :  { %239 = vst.msk [vmem:[%s604_s3 + $0x8] sm:$0xf] %vm236_vm2, %v293_v33  ;;  %v295_v19 = vpack.c.bf16 %v160_v38, %v160_v38  ;;  %v161_v41 = vsel %vm81_vm6, %v416_v22, %v264_v34  ;;  %v266_v42 = vadd.f32 -1.0, %v322_v36  ;;  %v324_v45 = vpop.eup %323  ;;  %v136_v58 = vmul.f32 1.442695, %v106_v51 }
  0x1e   :  { %240 = vst.msk [vmem:[%s604_s3 + $0xc] sm:$0xf] %vm236_vm2, %v294_v18  ;;  %v296_v21 = vpack.c.bf16 %v161_v41, %v161_v41  ;;  %v162_v46 = vsel %vm82_vm7, %v429_v35, %v265_v39  ;;  %v267_v50 = vadd.f32 -1.0, %v324_v45  ;;  %vm88_vm13 = vcmp.gt.f32.partialorder %v482_v63, 0.0 }
  0x1f   :  { %241 = vst.msk [vmem:[%s604_s3 + $0x10] sm:$0xf] %vm236_vm2, %v295_v19  ;;  %v297_v22 = vpack.c.bf16 %v162_v46, %v162_v46  ;;  %v163_v49 = vsel %vm83_vm8, %v432_v37, %v266_v42  ;;  %v326_v2 = vpop.eup %325  ;;  %v107_v37 = vmin.f32 %v75_v48, 0.0  ;;  %335 = vpow2.f32 %v136_v58 }
  0x20   :  { %242 = vst.msk [vmem:[%s604_s3 + $0x14] sm:$0xf] %vm236_vm2, %v296_v21  ;;  %v298_v35 = vpack.c.bf16 %v163_v49, %v163_v49  ;;  %v164_v52 = vsel %vm84_vm9, %v446_v44, %v267_v50  ;;  %v328_v55 = vpop.eup %327  ;;  %v268_v57 = vadd.f32 -1.0, %v326_v2  ;;  %vm89_vm14 = vcmp.gt.f32.partialorder %v492_v9, 0.0 }
  0x21   :  { %243 = vst.msk [vmem:[%s604_s3 + $0x18] sm:$0xf] %vm236_vm2, %v297_v22  ;;  %v299_v56 = vpack.c.bf16 %v164_v52, %v164_v52  ;;  %v269_v59 = vadd.f32 -1.0, %v328_v55  ;;  %v138_v60 = vmul.f32 1.442695, %v107_v37  ;;  %vm90_vm15 = vcmp.gt.f32.partialorder %v74_v43, 0.0 }
  0x22   :  { %244 = vst.msk [vmem:[%s604_s3 + $0x1c] sm:$0xf] %vm236_vm2, %v298_v35  ;;  %v330_v61 = vpop.eup %329  ;;  %v165_v44 = vsel %vm85_vm10, %v462_v53, %v268_v57  ;;  %vm91_vm0 = vcmp.gt.f32.partialorder %v75_v48, 0.0 }
  0x23   :  { %245 = vst.msk [vmem:[%s604_s3 + $0x20] sm:$0xf] %vm236_vm2, %v299_v56  ;;  %v332_v0 = vpop.eup %331  ;;  %v300_v3 = vpack.c.bf16 %v165_v44, %v165_v44  ;;  %v166_v4 = vsel %vm86_vm11, %v465_v54, %v269_v59  ;;  %v270_v5 = vadd.f32 -1.0, %v330_v61  ;;  %337 = vpow2.f32 %v138_v60 }
  0x24   :  { %v301_v6 = vpack.c.bf16 %v166_v4, %v166_v4  ;;  %v271_v7 = vadd.f32 -1.0, %v332_v0 }
  0x25   :  { %246 = vst.msk [vmem:[%s604_s3 + $0x24] sm:$0xf] %vm236_vm2, %v300_v3  ;;  %v167_v53 = vsel %vm87_vm12, %v479_v62, %v270_v5 }
  0x26   :  { %247 = vst.msk [vmem:[%s604_s3 + $0x28] sm:$0xf] %vm236_vm2, %v301_v6  ;;  %v302_v8 = vpack.c.bf16 %v167_v53, %v167_v53  ;;  %v168_v10 = vsel %vm88_vm13, %v482_v63, %v271_v7  ;;  %v334_v11 = vpop.eup %333 }
  0x27   :  { %v303_v54 = vpack.c.bf16 %v168_v10, %v168_v10  ;;  %v272_v62 = vadd.f32 -1.0, %v334_v11 }
  0x28   :  { %248 = vst.msk [vmem:[%s604_s3 + $0x2c] sm:$0xf] %vm236_vm2, %v302_v8 }
  0x29   :  { %249 = vst.msk [vmem:[%s604_s3 + $0x30] sm:$0xf] %vm236_vm2, %v303_v54  ;;  %v169_v12 = vsel %vm89_vm14, %v492_v9, %v272_v62  ;;  %v336_v14 = vpop.eup %335 }
  0x2a   :  { %v304_v15 = vpack.c.bf16 %v169_v12, %v169_v12  ;;  %v273_v16 = vadd.f32 -1.0, %v336_v14 }
  0x2c   :  { %250 = vst.msk [vmem:[%s604_s3 + $0x34] sm:$0xf] %vm236_vm2, %v304_v15  ;;  %v170_v23 = vsel %vm90_vm15, %v74_v43, %v273_v16 }
  0x2d   :  { %v338_v63 = vpop.eup %337  ;;  %v305_v24 = vpack.c.bf16 %v170_v23, %v170_v23 }
  0x2e   :  { %v274_v20 = vadd.f32 -1.0, %v338_v63 }
  0x2f   :  { %251 = vst.msk [vmem:[%s604_s3 + $0x38] sm:$0xf] %vm236_vm2, %v305_v24 }
  0x30   :  { %v171_v25 = vsel %vm91_vm0, %v75_v48, %v274_v20 }
  0x31   :  { %v306_v26 = vpack.c.bf16 %v171_v25, %v171_v25 }
  0x33   :  { %252 = vst.msk [vmem:[%s604_s3 + $0x3c] sm:$0xf] %vm236_vm2, %v306_v26 }

// kernel: gruse_forward.30
= control target key start
LH: loop header
LB: loop body
LE: loop exit
PB: predicated region body
PF: predicated region fallthrough
CT: control target
= control target key end

     0   :  { %vm106_vm0 = vcmask 1042432   ;;  %vm107_vm1 = vcmask 1043456   ;;  %vm81_vm2 = vcmask 56320   ;;  %v453_v1 = vmov 65535   ;;  %s653_s1 = inlined_call_operand.vmem [shape: bf16[7,16], index: 1, kind: input, shape index: {}]   ;;  %s654_s0 = inlined_call_operand.vmem [shape: bf16[128,7], index: 0, kind: input, shape index: {}]   ;;  %s655_s2 = inlined_call_operand.vmem [shape: f32[1,16], index: 2, kind: input, shape index: {}]   ;;  %s656_s3 = inlined_call_operand.vmem [shape: f32[128,16], index: 3, kind: output, shape index: {0}]   ;;  %s657_s4 = inlined_call_operand.vmem [shape: f32[8,16], index: 4, kind: output, shape index: {1}]  }
   0x1   :  { %v33_v0 = vld [vmem:[%s653_s1] sm:$0xf]  ;;  %v108_v2 = vsel %vm106_vm0, 4294967295, %v453_v1  ;;  %v446_v6 = vld [vmem:[%s654_s0 + $0x8] sm:$0xff]   ;;  %v447_v7 = vld [vmem:[%s654_s0 + $0x10] sm:$0xff]   ;;  %vm210_vm3 = vcmask 130048  }
   0x2   :  { %v445_v3 = vld [vmem:[%s654_s0] sm:$0xff]   ;;  %v109_v4 = vsel %vm107_vm1, %v108_v2, 0  ;;  %v450_v9 = vld [vmem:[%s654_s0 + $0x28] sm:$0xff]   ;;  %v451_v10 = vld [vmem:[%s654_s0 + $0x30] sm:$0xff]  }
   0x3   :  { %v111_v5 = vand.u32 %v109_v4, %v33_v0  ;;  %426 = vmatprep.mubr.msk.bf16.mxu0 %vm81_vm2, %v445_v3  ;;  %v449_v8 = vld [vmem:[%s654_s0 + $0x20] sm:$0xff]   ;;  %v448_v11 = vld [vmem:[%s654_s0 + $0x18] sm:$0xff]  }
   0x4   :  { %434 = vmatprep.mubr.msk.bf16.mxu1 %vm81_vm2, %v449_v8  ;;  %v452_v12 = vld [vmem:[%s654_s0 + $0x38] sm:$0xff]   ;;  %v517_v13 = vld [vmem:[%s655_s2] ss:$0 sm:$0xff] }
   0x5   :  { %424 = vmatprep.subr.bf16.mxu0 %v111_v5  ;;  %442 = vmatprep.subr.bf16.mxu1 %v111_v5 }
   0x6   :  { %425 = vmatpush3.bf16.msra.mxu0 %v111_v5  ;;  %443 = vmatpush3.bf16.msra.mxu1 %v111_v5 }
   0x9   :  { %427 = vmatmul.mubr.msk.bf16.vlgmr.msra.gmra.mrb[0].mxu0 %vm81_vm2, %v446_v6  ;;  %435 = vmatmul.mubr.msk.bf16.vlgmr.msra.gmra.mrb[0].mxu1 %vm81_vm2, %v450_v9 }
   0xa   :  { %430 = vmatprep.mubr.msk.bf16.mxu0 %vm81_vm2, %v447_v7  ;;  %438 = vmatprep.mubr.msk.bf16.mxu1 %vm81_vm2, %v451_v10 }
  0x11   :  { %431 = vmatmul.mubr.msk.bf16.gmra.mrb[4].mxu0 %vm81_vm2, %v448_v11  ;;  %439 = vmatmul.mubr.msk.bf16.gmra.mrb[4].mxu1 %vm81_vm2, %v452_v12 }
  0xdc   :  { %v428_v14 = vpop.f32.mrb[0].mxu0  ;;  %v436_v15 = vpop.f32.mrb[0].mxu1 }
  0xdd   :  { %v156_v16 = vadd.f32 %v428_v14, %v517_v13  ;;  %v147_v17 = vpop.f32.mrb[1].mxu0  ;;  %v521_v18 = vadd.f32 %v436_v15, %v517_v13  ;;  %v179_v19 = vpop.f32.mrb[1].mxu1 }
  0xde   :  { %v148_v20 = vadd.f32 %v517_v13, %v147_v17  ;;  %v429_v21 = vpop.f32.mrb[2].mxu0  ;;  %v525_v22 = vadd.f32 %v517_v13, %v179_v19  ;;  %v437_v23 = vpop.f32.mrb[2].mxu1 }
  0xdf   :  { %213 = vst.msk [vmem:[%s656_s3 + $0x10] sm:$0xff] %vm210_vm3, %v156_v16  ;;  %v159_v24 = vadd.f32 %v429_v21, %v517_v13  ;;  %v150_v25 = vpop.f32.mrb[3].mxu0  ;;  %221 = vst.msk [vmem:[%s656_s3 + $0x50] sm:$0xff] %vm210_vm3, %v521_v18  ;;  %v182_v26 = vpop.f32.mrb[3].mxu1  ;;  %v333_v29 = vmul.f32 %v156_v16, %v156_v16  ;;  %v558_v35 = vadd.f32 %v437_v23, %v517_v13  ;;  %v297_v36 = vsel %vm210_vm3, %v156_v16, 0.0 }
  0xe0   :  { %211 = vst.msk [vmem:[%s656_s3] sm:$0xff] %vm210_vm3, %v148_v20  ;;  %v331_v27 = vmul.f32 %v148_v20, %v148_v20  ;;  %v151_v28 = vadd.f32 %v517_v13, %v150_v25  ;;  %219 = vst.msk [vmem:[%s656_s3 + $0x40] sm:$0xff] %vm210_vm3, %v525_v22  ;;  %v294_v30 = vsel %vm210_vm3, %v148_v20, 0.0  ;;  %v183_v40 = vadd.f32 %v517_v13, %v182_v26 }
  0xe1   :  { %214 = vst.msk [vmem:[%s656_s3 + $0x18] sm:$0xff] %vm210_vm3, %v159_v24  ;;  %v334_v33 = vmul.f32 %v159_v24, %v159_v24  ;;  %222 = vst.msk [vmem:[%s656_s3 + $0x58] sm:$0xff] %vm210_vm3, %v558_v35  ;;  %v350_v47 = vsel %vm210_vm3, %v333_v29, 0.0  ;;  %v299_v48 = vsel %vm210_vm3, %v159_v24, 0.0  ;;  %v339_v1 = vmul.f32 %v525_v22, %v525_v22 }
  0xe2   :  { %212 = vst.msk [vmem:[%s656_s3 + $0x8] sm:$0xff] %vm210_vm3, %v151_v28  ;;  %v295_v31 = vsel %vm210_vm3, %v151_v28, 0.0  ;;  %v332_v32 = vmul.f32 %v151_v28, %v151_v28  ;;  %v347_v37 = vsel %vm210_vm3, %v331_v27, 0.0  ;;  %220 = vst.msk [vmem:[%s656_s3 + $0x48] sm:$0xff] %vm210_vm3, %v183_v40  ;;  %v309_v17 = vsel %vm210_vm3, %v525_v22, 0.0 }
  0xe3   :  { %v296_v34 = vadd.f32 %v295_v31, %v294_v30  ;;  %v352_v52 = vsel %vm210_vm3, %v334_v33, 0.0  ;;  %v362_v23 = vsel %vm210_vm3, %v339_v1, 0.0  ;;  %v340_v24 = vmul.f32 %v183_v40, %v183_v40 }
  0xe4   :  { %v348_v38 = vsel %vm210_vm3, %v332_v32, 0.0  ;;  %v432_v39 = vpop.f32.mrb[4].mxu0  ;;  %v440_v41 = vpop.f32.mrb[4].mxu1  ;;  %v311_v26 = vsel %vm210_vm3, %v183_v40, 0.0  ;;  %v341_v27 = vmul.f32 %v521_v18, %v521_v18  ;;  %v313_v29 = vsel %vm210_vm3, %v521_v18, 0.0 }
  0xe5   :  { %v298_v42 = vadd.f32 %v297_v36, %v296_v34  ;;  %v349_v43 = vadd.f32 %v348_v38, %v347_v37  ;;  %v172_v44 = vadd.f32 %v432_v39, %v517_v13  ;;  %v163_v45 = vpop.f32.mrb[5].mxu0  ;;  %v195_v46 = vpop.f32.mrb[5].mxu1  ;;  %v204_v7 = vadd.f32 %v440_v41, %v517_v13 }
  0xe6   :  { %v164_v49 = vadd.f32 %v517_v13, %v163_v45  ;;  %v433_v50 = vpop.f32.mrb[6].mxu0  ;;  %v441_v51 = vpop.f32.mrb[6].mxu1  ;;  %v196_v8 = vadd.f32 %v517_v13, %v195_v46  ;;  %v342_v31 = vmul.f32 %v558_v35, %v558_v35  ;;  %v364_v33 = vsel %vm210_vm3, %v340_v24, 0.0 }
  0xe7   :  { %v351_v53 = vadd.f32 %v350_v47, %v349_v43  ;;  %217 = vst.msk [vmem:[%s656_s3 + $0x30] sm:$0xff] %vm210_vm3, %v172_v44  ;;  %v300_v54 = vadd.f32 %v299_v48, %v298_v42  ;;  %v166_v55 = vpop.f32.mrb[7].mxu0  ;;  %v198_v56 = vpop.f32.mrb[7].mxu1  ;;  %v175_v59 = vadd.f32 %v433_v50, %v517_v13  ;;  %v337_v2 = vmul.f32 %v172_v44, %v172_v44 }
  0xe8   :  { %215 = vst.msk [vmem:[%s656_s3 + $0x20] sm:$0xff] %vm210_vm3, %v164_v49  ;;  %v301_v57 = vsel %vm210_vm3, %v164_v49, 0.0  ;;  %v335_v58 = vmul.f32 %v164_v49, %v164_v49  ;;  %v167_v60 = vadd.f32 %v517_v13, %v166_v55  ;;  %v305_v6 = vsel %vm210_vm3, %v172_v44, 0.0  ;;  %225 = vst.msk [vmem:[%s656_s3 + $0x70] sm:$0xff] %vm210_vm3, %v204_v7 }
  0xe9   :  { %v302_v61 = vadd.f32 %v301_v57, %v300_v54  ;;  %v353_v62 = vadd.f32 %v352_v52, %v351_v53  ;;  %218 = vst.msk [vmem:[%s656_s3 + $0x38] sm:$0xff] %vm210_vm3, %v175_v59  ;;  %v207_v9 = vadd.f32 %v441_v51, %v517_v13  ;;  %v338_v10 = vmul.f32 %v175_v59, %v175_v59 }
  0xea   :  { %v354_v63 = vsel %vm210_vm3, %v335_v58, 0.0  ;;  %216 = vst.msk [vmem:[%s656_s3 + $0x28] sm:$0xff] %vm210_vm3, %v167_v60  ;;  %v303_v0 = vsel %vm210_vm3, %v167_v60, 0.0  ;;  %v336_v5 = vmul.f32 %v167_v60, %v167_v60  ;;  %v199_v14 = vadd.f32 %v517_v13, %v198_v56  ;;  %223 = vst.msk [vmem:[%s656_s3 + $0x60] sm:$0xff] %vm210_vm3, %v196_v8 }
  0xeb   :  { %v355_v3 = vadd.f32 %v354_v63, %v353_v62  ;;  %v304_v4 = vadd.f32 %v303_v0, %v302_v61  ;;  %v307_v15 = vsel %vm210_vm3, %v175_v59, 0.0  ;;  %226 = vst.msk [vmem:[%s656_s3 + $0x78] sm:$0xff] %vm210_vm3, %v207_v9  ;;  %v358_v13 = vsel %vm210_vm3, %v337_v2, 0.0 }
  0xec   :  { %v356_v12 = vsel %vm210_vm3, %v336_v5, 0.0  ;;  %224 = vst.msk [vmem:[%s656_s3 + $0x68] sm:$0xff] %vm210_vm3, %v199_v14  ;;  %v360_v21 = vsel %vm210_vm3, %v338_v10, 0.0  ;;  %v343_v34 = vmul.f32 %v196_v8, %v196_v8  ;;  %v315_v36 = vsel %vm210_vm3, %v558_v35, 0.0 }
  0xed   :  { %v306_v11 = vadd.f32 %v305_v6, %v304_v4  ;;  %v357_v16 = vadd.f32 %v356_v12, %v355_v3  ;;  %v317_v38 = vsel %vm210_vm3, %v196_v8, 0.0  ;;  %v366_v39 = vsel %vm210_vm3, %v341_v27, 0.0 }
  0xee   :  { %v368_v18 = vsel %vm210_vm3, %v342_v31, 0.0  ;;  %v370_v43 = vsel %vm210_vm3, %v343_v34, 0.0  ;;  %v344_v44 = vmul.f32 %v199_v14, %v199_v14  ;;  %v319_v46 = vsel %vm210_vm3, %v199_v14, 0.0 }
  0xef   :  { %v308_v19 = vadd.f32 %v307_v15, %v306_v11  ;;  %v359_v20 = vadd.f32 %v358_v13, %v357_v16  ;;  %v345_v47 = vmul.f32 %v204_v7, %v204_v7  ;;  %v321_v35 = vsel %vm210_vm3, %v204_v7, 0.0 }
  0xf0   :  { %v346_v50 = vmul.f32 %v207_v9, %v207_v9  ;;  %v372_v52 = vsel %vm210_vm3, %v344_v44, 0.0  ;;  %v323_v53 = vsel %vm210_vm3, %v207_v9, 0.0  ;;  %v227_v63 = vlaneseq }
  0xf1   :  { %v310_v22 = vadd.f32 %v309_v17, %v308_v19  ;;  %v361_v25 = vadd.f32 %v360_v21, %v359_v20  ;;  %v374_v55 = vsel %vm210_vm3, %v345_v47, 0.0 }
  0xf2   :  { %v376_v58 = vsel %vm210_vm3, %v346_v50, 0.0  ;;  %v228_v4 = vshrl.u32 %v227_v63, 7 }
  0xf3   :  { %v312_v28 = vadd.f32 %v311_v26, %v310_v22  ;;  %v363_v30 = vadd.f32 %v362_v23, %v361_v25 }
  0xf4   :  { %vm384_vm4 = vcmp.eq.s32.totalorder %v228_v4, 0  ;;  %vm386_vm5 = vcmp.eq.s32.totalorder %v228_v4, 1 }
  0xf5   :  { %v314_v32 = vadd.f32 %v313_v29, %v312_v28  ;;  %v365_v37 = vadd.f32 %v364_v33, %v363_v30 }
  0xf7   :  { %v316_v40 = vadd.f32 %v315_v36, %v314_v32  ;;  %v367_v41 = vadd.f32 %v366_v39, %v365_v37 }
  0xf9   :  { %v318_v42 = vadd.f32 %v317_v38, %v316_v40  ;;  %v369_v45 = vadd.f32 %v368_v18, %v367_v41 }
  0xfb   :  { %v320_v48 = vadd.f32 %v319_v46, %v318_v42  ;;  %v371_v49 = vadd.f32 %v370_v43, %v369_v45 }
  0xfd   :  { %v322_v51 = vadd.f32 %v321_v35, %v320_v48  ;;  %v373_v54 = vadd.f32 %v372_v52, %v371_v49 }
  0xff   :  { %v324_v56 = vadd.f32 %v323_v53, %v322_v51  ;;  %v375_v57 = vadd.f32 %v374_v55, %v373_v54 }
 0x101   :  { %v325_v59 = vrot.slane %v324_v56, 4  ;;  %v377_v60 = vadd.f32 %v376_v58, %v375_v57 }
 0x103   :  { %v326_v61 = vadd.f32 %v325_v59, %v324_v56  ;;  %v378_v62 = vrot.slane %v377_v60, 4 }
 0x105   :  { %v327_v0 = vrot.slane %v326_v61, 2  ;;  %v379_v1 = vadd.f32 %v378_v62, %v377_v60 }
 0x107   :  { %v328_v2 = vadd.f32 %v327_v0, %v326_v61  ;;  %v380_v3 = vrot.slane %v379_v1, 2 }
 0x109   :  { %v329_v5 = vrot.slane %v328_v2, 1  ;;  %v381_v6 = vadd.f32 %v380_v3, %v379_v1 }
 0x10b   :  { %v330_v7 = vadd.f32 %v329_v5, %v328_v2  ;;  %v382_v8 = vrot.slane %v381_v6, 1 }
 0x10d   :  { %v383_v9 = vadd.f32 %v382_v8, %v381_v6  ;;  %v385_v10 = vsel %vm384_vm4, %v330_v7, 0.0 }
 0x10f   :  { %v387_v11 = vsel %vm386_vm5, %v383_v9, 0.0 }
 0x110   :  { %v388_v12 = vadd.f32 %v387_v11, %v385_v10 }
 0x112   :  { %389 = vst.msk [vmem:[%s657_s4] sm:$0xff] %vm210_vm3, %v388_v12 }

// kernel: gruse_forward.33
= control target key start
LH: loop header
LB: loop body
LE: loop exit
PB: predicated region body
PF: predicated region fallthrough
CT: control target
= control target key end

     0   :  { %vm132_vm3 = vcmask 257024   ;;  %s279_s0 = inlined_call_operand.vmem [shape: f32[64,32], index: 0, kind: input, shape index: {}]   ;;  %s280_s1 = inlined_call_operand.vmem [shape: f32[1,32], index: 1, kind: input, shape index: {}]   ;;  %s281_s2 = inlined_call_operand.vmem [shape: f32[1,32], index: 2, kind: input, shape index: {}]   ;;  %s282_s3 = inlined_call_operand.vmem [shape: bf16[64,32], index: 3, kind: output, shape index: {}]  }
   0x1   :  { %v14_v0 = vld [vmem:[%s279_s0] sm:$0xff]  ;;  %v15_v4 = vld [vmem:[%s279_s0 + $0x8] sm:$0xff]  ;;  %v16_v5 = vld [vmem:[%s279_s0 + $0x10] sm:$0xff] }
   0x2   :  { %v145_v1 = vld [vmem:[%s280_s1] ss:$0 sm:$0xff]  ;;  %v17_v6 = vld [vmem:[%s279_s0 + $0x18] sm:$0xff]  ;;  %v19_v11 = vld [vmem:[%s279_s0 + $0x28] sm:$0xff] }
   0x3   :  { %v146_v2 = vld [vmem:[%s281_s2] ss:$0 sm:$0xff]  ;;  %v29_v3 = vmul.f32 %v145_v1, %v14_v0  ;;  %v30_v7 = vmul.f32 %v145_v1, %v15_v4  ;;  %v31_v8 = vmul.f32 %v145_v1, %v16_v5  ;;  %v32_v9 = vmul.f32 %v145_v1, %v17_v6  ;;  %v20_v12 = vld [vmem:[%s279_s0 + $0x30] sm:$0xff]  ;;  %v21_v16 = vld [vmem:[%s279_s0 + $0x38] sm:$0xff] }
   0x4   :  { %v18_v10 = vld [vmem:[%s279_s0 + $0x20] sm:$0xff]  ;;  %v34_v15 = vmul.f32 %v145_v1, %v19_v11  ;;  %v35_v23 = vmul.f32 %v145_v1, %v20_v12  ;;  %v36_v26 = vmul.f32 %v145_v1, %v21_v16 }
   0x5   :  { %v44_v13 = vadd.f32 %v146_v2, %v29_v3  ;;  %v33_v14 = vmul.f32 %v145_v1, %v18_v10  ;;  %v45_v17 = vadd.f32 %v146_v2, %v30_v7  ;;  %v46_v18 = vadd.f32 %v146_v2, %v31_v8 }
   0x6   :  { %v47_v19 = vadd.f32 %v146_v2, %v32_v9  ;;  %v239_v22 = vadd.f32 %v146_v2, %v34_v15  ;;  %v50_v34 = vadd.f32 %v146_v2, %v35_v23  ;;  %v51_v36 = vadd.f32 %v146_v2, %v36_v26 }
   0x7   :  { %v60_v20 = vmin.f32 %v44_v13, 0.0  ;;  %v237_v21 = vadd.f32 %v146_v2, %v33_v14  ;;  %v61_v24 = vmin.f32 %v45_v17, 0.0  ;;  %v62_v25 = vmin.f32 %v46_v18, 0.0 }
   0x8   :  { %v63_v28 = vmin.f32 %v47_v19, 0.0  ;;  %v65_v33 = vmin.f32 %v239_v22, 0.0  ;;  %v66_v38 = vmin.f32 %v50_v34, 0.0  ;;  %v67_v39 = vmin.f32 %v51_v36, 0.0 }
   0x9   :  { %v68_v27 = vmul.f32 1.442695, %v60_v20  ;;  %v70_v29 = vmul.f32 1.442695, %v61_v24  ;;  %v72_v30 = vmul.f32 1.442695, %v62_v25 }
   0xa   :  { %v64_v31 = vmin.f32 %v237_v21, 0.0  ;;  %v74_v32 = vmul.f32 1.442695, %v63_v28  ;;  %v78_v37 = vmul.f32 1.442695, %v65_v33  ;;  %vm52_vm0 = vcmp.gt.f32.partialorder %v44_v13, 0.0 }
   0xb   :  { %171 = vpow2.f32 %v68_v27  ;;  %v80_v40 = vmul.f32 1.442695, %v66_v38  ;;  %v82_v41 = vmul.f32 1.442695, %v67_v39  ;;  %vm53_vm1 = vcmp.gt.f32.partialorder %v45_v17, 0.0 }
   0xc   :  { %173 = vpow2.f32 %v70_v29  ;;  %v76_v35 = vmul.f32 1.442695, %v64_v31  ;;  %vm54_vm2 = vcmp.gt.f32.partialorder %v46_v18, 0.0  ;;  %vm55_vm4 = vcmp.gt.f32.partialorder %v47_v19, 0.0 }
   0xd   :  { %175 = vpow2.f32 %v72_v30  ;;  %vm56_vm5 = vcmp.gt.f32.partialorder %v237_v21, 0.0  ;;  %vm57_vm6 = vcmp.gt.f32.partialorder %v239_v22, 0.0  ;;  %vm58_vm7 = vcmp.gt.f32.partialorder %v50_v34, 0.0 }
   0xe   :  { %177 = vpow2.f32 %v74_v32  ;;  %vm59_vm8 = vcmp.gt.f32.partialorder %v51_v36, 0.0 }
   0xf   :  { %179 = vpow2.f32 %v76_v35 }
  0x10   :  { %181 = vpow2.f32 %v78_v37 }
  0x11   :  { %183 = vpow2.f32 %v80_v40 }
  0x12   :  { %185 = vpow2.f32 %v82_v41 }
  0x15   :  { %v172_v42 = vpop.eup %171 }
  0x16   :  { %v174_v43 = vpop.eup %173  ;;  %v147_v44 = vadd.f32 -1.0, %v172_v42 }
  0x17   :  { %v176_v45 = vpop.eup %175  ;;  %v148_v46 = vadd.f32 -1.0, %v174_v43 }
  0x18   :  { %v178_v47 = vpop.eup %177  ;;  %v92_v48 = vsel %vm52_vm0, %v44_v13, %v147_v44  ;;  %v149_v49 = vadd.f32 -1.0, %v176_v45 }
  0x19   :  { %v180_v50 = vpop.eup %179  ;;  %v163_v51 = vpack.c.bf16 %v92_v48, %v92_v48  ;;  %v93_v52 = vsel %vm53_vm1, %v45_v17, %v148_v46  ;;  %v150_v53 = vadd.f32 -1.0, %v178_v47 }
  0x1a   :  { %v182_v54 = vpop.eup %181  ;;  %v164_v55 = vpack.c.bf16 %v93_v52, %v93_v52  ;;  %v94_v56 = vsel %vm54_vm2, %v46_v18, %v149_v49  ;;  %v151_v57 = vadd.f32 -1.0, %v180_v50 }
  0x1b   :  { %v184_v58 = vpop.eup %183  ;;  %133 = vst.msk [vmem:[%s282_s3] sm:$0xf] %vm132_vm3, %v163_v51  ;;  %v165_v59 = vpack.c.bf16 %v94_v56, %v94_v56  ;;  %v95_v60 = vsel %vm55_vm4, %v47_v19, %v150_v53  ;;  %v152_v61 = vadd.f32 -1.0, %v182_v54 }
  0x1c   :  { %v186_v62 = vpop.eup %185  ;;  %134 = vst.msk [vmem:[%s282_s3 + $0x4] sm:$0xf] %vm132_vm3, %v164_v55  ;;  %v166_v63 = vpack.c.bf16 %v95_v60, %v95_v60  ;;  %v96_v0 = vsel %vm56_vm5, %v237_v21, %v151_v57  ;;  %v153_v1 = vadd.f32 -1.0, %v184_v58 }
  0x1d   :  { %135 = vst.msk [vmem:[%s282_s3 + $0x8] sm:$0xf] %vm132_vm3, %v165_v59  ;;  %v167_v2 = vpack.c.bf16 %v96_v0, %v96_v0  ;;  %v97_v3 = vsel %vm57_vm6, %v239_v22, %v152_v61  ;;  %v154_v4 = vadd.f32 -1.0, %v186_v62 }
  0x1e   :  { %136 = vst.msk [vmem:[%s282_s3 + $0xc] sm:$0xf] %vm132_vm3, %v166_v63  ;;  %v168_v5 = vpack.c.bf16 %v97_v3, %v97_v3  ;;  %v98_v6 = vsel %vm58_vm7, %v50_v34, %v153_v1 }
  0x1f   :  { %137 = vst.msk [vmem:[%s282_s3 + $0x10] sm:$0xf] %vm132_vm3, %v167_v2  ;;  %v169_v7 = vpack.c.bf16 %v98_v6, %v98_v6  ;;  %v99_v8 = vsel %vm59_vm8, %v51_v36, %v154_v4 }
  0x20   :  { %138 = vst.msk [vmem:[%s282_s3 + $0x14] sm:$0xf] %vm132_vm3, %v168_v5  ;;  %v170_v9 = vpack.c.bf16 %v99_v8, %v99_v8 }
  0x21   :  { %139 = vst.msk [vmem:[%s282_s3 + $0x18] sm:$0xf] %vm132_vm3, %v169_v7 }
  0x22   :  { %140 = vst.msk [vmem:[%s282_s3 + $0x1c] sm:$0xf] %vm132_vm3, %v170_v9 }

// kernel: gruse_forward.32
= control target key start
LH: loop header
LB: loop body
LE: loop exit
PB: predicated region body
PF: predicated region fallthrough
CT: control target
= control target key end

     0   :  { %vm84_vm0 = vcmask 523264   ;;  %vm162_vm1 = vcmask 261120   ;;  %s431_s1 = inlined_call_operand.vmem [shape: bf16[64,32], index: 1, kind: input, shape index: {}]   ;;  %s432_s0 = inlined_call_operand.vmem [shape: bf16[64,64], index: 0, kind: input, shape index: {}]   ;;  %s433_s2 = inlined_call_operand.vmem [shape: f32[1,32], index: 2, kind: input, shape index: {}]   ;;  %s434_s3 = inlined_call_operand.vmem [shape: f32[64,32], index: 3, kind: output, shape index: {0}]   ;;  %s435_s4 = inlined_call_operand.vmem [shape: f32[8,32], index: 4, kind: output, shape index: {1}]  }
   0x1   :  { %v315_v0 = vld [vmem:[%s431_s1] sm:$0xff]   ;;  %v316_v1 = vld [vmem:[%s431_s1 + $0x8] sm:$0xff]   ;;  %v317_v2 = vld [vmem:[%s431_s1 + $0x10] sm:$0xff]  }
   0x2   :  { %291 = vmatprep.subr.bf16.mxu0 %v315_v0  ;;  %307 = vmatprep.subr.bf16.mxu1 %v315_v0  ;;  %v319_v3 = vld [vmem:[%s432_s0] sm:$0xff]   ;;  %v321_v4 = vld [vmem:[%s432_s0 + $0x10] sm:$0xff]   ;;  %v318_v5 = vld [vmem:[%s431_s1 + $0x18] sm:$0xff]  }
   0x3   :  { %292 = vmatpush3.bf16.msra.mxu0 %v315_v0  ;;  %311 = vmatpush3.bf16.msra.mxu1 %v315_v0  ;;  %v320_v6 = vld [vmem:[%s432_s0 + $0x8] sm:$0xff]   ;;  %v322_v7 = vld [vmem:[%s432_s0 + $0x18] sm:$0xff]   ;;  %v270_v8 = vld [vmem:[%s433_s2] ss:$0 sm:$0xff] }
   0x4   :  { %293 = vmatprep.subr.bf16.mxu0 %v316_v1  ;;  %308 = vmatprep.subr.bf16.mxu1 %v316_v1 }
   0x5   :  { %299 = vmatprep.mubr.msk.bf16.mxu0 %vm84_vm0, %v319_v3  ;;  %303 = vmatprep.mubr.msk.bf16.mxu1 %vm84_vm0, %v321_v4 }
   0x7   :  { %294 = vmatpush3.bf16.msra.mxu0 %v316_v1  ;;  %312 = vmatpush3.bf16.msra.mxu1 %v316_v1 }
   0x8   :  { %295 = vmatprep.subr.bf16.mxu0 %v317_v2  ;;  %309 = vmatprep.subr.bf16.mxu1 %v317_v2 }
   0xb   :  { %296 = vmatpush3.bf16.msra.mxu0 %v317_v2  ;;  %313 = vmatpush3.bf16.msra.mxu1 %v317_v2  ;;  %v171_v2 = vlaneseq }
   0xc   :  { %297 = vmatprep.subr.bf16.mxu0 %v318_v5  ;;  %310 = vmatprep.subr.bf16.mxu1 %v318_v5 }
   0xf   :  { %298 = vmatpush3.bf16.msra.mxu0 %v318_v5  ;;  %314 = vmatpush3.bf16.msra.mxu1 %v318_v5 }
  0x12   :  { %300 = vmatmul.mubr.msk.bf16.vlgmr.msra.gmra.mrb[0].mxu0 %vm84_vm0, %v320_v6  ;;  %304 = vmatmul.mubr.msk.bf16.vlgmr.msra.gmra.mrb[0].mxu1 %vm84_vm0, %v322_v7  ;;  %v172_v7 = vshrl.u32 %v171_v2, 7 }
  0x14   :  { %vm256_vm2 = vcmp.eq.s32.totalorder %v172_v7, 0  ;;  %vm258_vm3 = vcmp.eq.s32.totalorder %v172_v7, 1 }
  0xe5   :  { %v301_v9 = vpop.f32.mrb[0].mxu0  ;;  %v305_v10 = vpop.f32.mrb[0].mxu1 }
  0xe6   :  { %v140_v11 = vadd.f32 %v301_v9, %v270_v8  ;;  %v131_v12 = vpop.f32.mrb[1].mxu0  ;;  %v156_v13 = vadd.f32 %v305_v10, %v270_v8  ;;  %v147_v14 = vpop.f32.mrb[1].mxu1 }
  0xe7   :  { %v132_v15 = vadd.f32 %v270_v8, %v131_v12  ;;  %v302_v16 = vpop.f32.mrb[2].mxu0  ;;  %v148_v17 = vadd.f32 %v270_v8, %v147_v14  ;;  %v306_v18 = vpop.f32.mrb[2].mxu1 }
  0xe8   :  { %165 = vst.msk [vmem:[%s434_s3 + $0x10] sm:$0xff] %vm162_vm1, %v140_v11  ;;  %v143_v19 = vadd.f32 %v302_v16, %v270_v8  ;;  %v134_v20 = vpop.f32.mrb[3].mxu0  ;;  %169 = vst.msk [vmem:[%s434_s3 + $0x30] sm:$0xff] %vm162_vm1, %v156_v13  ;;  %v150_v21 = vpop.f32.mrb[3].mxu1  ;;  %v229_v24 = vmul.f32 %v140_v11, %v140_v11  ;;  %v209_v28 = vsel %vm162_vm1, %v140_v11, 0.0  ;;  %v159_v31 = vadd.f32 %v306_v18, %v270_v8 }
  0xe9   :  { %163 = vst.msk [vmem:[%s434_s3] sm:$0xff] %vm162_vm1, %v132_v15  ;;  %v227_v22 = vmul.f32 %v132_v15, %v132_v15  ;;  %v135_v23 = vadd.f32 %v270_v8, %v134_v20  ;;  %167 = vst.msk [vmem:[%s434_s3 + $0x20] sm:$0xff] %vm162_vm1, %v148_v17  ;;  %v206_v25 = vsel %vm162_vm1, %v132_v15, 0.0  ;;  %v231_v34 = vmul.f32 %v148_v17, %v148_v17 }
  0xea   :  { %166 = vst.msk [vmem:[%s434_s3 + $0x18] sm:$0xff] %vm162_vm1, %v143_v19  ;;  %v230_v29 = vmul.f32 %v143_v19, %v143_v19  ;;  %v151_v35 = vadd.f32 %v270_v8, %v150_v21  ;;  %170 = vst.msk [vmem:[%s434_s3 + $0x38] sm:$0xff] %vm162_vm1, %v159_v31  ;;  %v238_v38 = vsel %vm162_vm1, %v229_v24, 0.0  ;;  %v211_v39 = vsel %vm162_vm1, %v143_v19, 0.0 }
  0xeb   :  { %164 = vst.msk [vmem:[%s434_s3 + $0x8] sm:$0xff] %vm162_vm1, %v135_v23  ;;  %v207_v26 = vsel %vm162_vm1, %v135_v23, 0.0  ;;  %v228_v27 = vmul.f32 %v135_v23, %v135_v23  ;;  %v235_v32 = vsel %vm162_vm1, %v227_v22, 0.0  ;;  %v213_v40 = vsel %vm162_vm1, %v148_v17, 0.0 }
  0xec   :  { %v208_v30 = vadd.f32 %v207_v26, %v206_v25  ;;  %168 = vst.msk [vmem:[%s434_s3 + $0x28] sm:$0xff] %vm162_vm1, %v151_v35  ;;  %v240_v43 = vsel %vm162_vm1, %v230_v29, 0.0  ;;  %v242_v44 = vsel %vm162_vm1, %v231_v34, 0.0  ;;  %v232_v45 = vmul.f32 %v151_v35, %v151_v35 }
  0xed   :  { %v236_v33 = vsel %vm162_vm1, %v228_v27, 0.0  ;;  %v233_v48 = vmul.f32 %v156_v13, %v156_v13  ;;  %v215_v49 = vsel %vm162_vm1, %v151_v35, 0.0  ;;  %v217_v52 = vsel %vm162_vm1, %v156_v13, 0.0 }
  0xee   :  { %v210_v36 = vadd.f32 %v209_v28, %v208_v30  ;;  %v237_v37 = vadd.f32 %v236_v33, %v235_v32  ;;  %v234_v53 = vmul.f32 %v159_v31, %v159_v31  ;;  %v244_v54 = vsel %vm162_vm1, %v232_v45, 0.0 }
  0xef   :  { %v246_v57 = vsel %vm162_vm1, %v233_v48, 0.0  ;;  %v219_v58 = vsel %vm162_vm1, %v159_v31, 0.0 }
  0xf0   :  { %v239_v41 = vadd.f32 %v238_v38, %v237_v37  ;;  %v212_v42 = vadd.f32 %v211_v39, %v210_v36  ;;  %v248_v61 = vsel %vm162_vm1, %v234_v53, 0.0 }
  0xf2   :  { %v214_v46 = vadd.f32 %v213_v40, %v212_v42  ;;  %v241_v47 = vadd.f32 %v240_v43, %v239_v41 }
  0xf4   :  { %v243_v50 = vadd.f32 %v242_v44, %v241_v47  ;;  %v216_v51 = vadd.f32 %v215_v49, %v214_v46 }
  0xf6   :  { %v218_v55 = vadd.f32 %v217_v52, %v216_v51  ;;  %v245_v56 = vadd.f32 %v244_v54, %v243_v50 }
  0xf8   :  { %v220_v59 = vadd.f32 %v219_v58, %v218_v55  ;;  %v247_v60 = vadd.f32 %v246_v57, %v245_v56 }
  0xfa   :  { %v221_v62 = vrot.slane %v220_v59, 4  ;;  %v249_v63 = vadd.f32 %v248_v61, %v247_v60 }
  0xfc   :  { %v222_v0 = vadd.f32 %v221_v62, %v220_v59  ;;  %v250_v1 = vrot.slane %v249_v63, 4 }
  0xfe   :  { %v223_v3 = vrot.slane %v222_v0, 2  ;;  %v251_v4 = vadd.f32 %v250_v1, %v249_v63 }
 0x100   :  { %v224_v5 = vadd.f32 %v223_v3, %v222_v0  ;;  %v252_v6 = vrot.slane %v251_v4, 2 }
 0x102   :  { %v225_v8 = vrot.slane %v224_v5, 1  ;;  %v253_v9 = vadd.f32 %v252_v6, %v251_v4 }
 0x104   :  { %v226_v10 = vadd.f32 %v225_v8, %v224_v5  ;;  %v254_v11 = vrot.slane %v253_v9, 1 }
 0x106   :  { %v255_v12 = vadd.f32 %v254_v11, %v253_v9  ;;  %v257_v13 = vsel %vm256_vm2, %v226_v10, 0.0 }
 0x108   :  { %v259_v14 = vsel %vm258_vm3, %v255_v12, 0.0 }
 0x109   :  { %v260_v15 = vadd.f32 %v259_v14, %v257_v13 }
 0x10b   :  { %261 = vst.msk [vmem:[%s435_s4] sm:$0xff] %vm162_vm1, %v260_v15 }

// kernel: gruse_forward.34
= control target key start
LH: loop header
LB: loop body
LE: loop exit
PB: predicated region body
PF: predicated region fallthrough
CT: control target
= control target key end

     0   :  { %vm153_vm0 = vcmask 523264   ;;  %v158_v40 = vlaneseq  ;;  %s358_s1 = inlined_call_operand.vmem [shape: bf16[128,64], index: 1, kind: input, shape index: {}]   ;;  %s359_s0 = inlined_call_operand.vmem [shape: bf16[32,128], index: 0, kind: input, shape index: {}]   ;;  %s360_s2 = inlined_call_operand.vmem [shape: f32[1,64], index: 2, kind: input, shape index: {}]   ;;  %s361_s3 = inlined_call_operand.vmem [shape: f32[32,64], index: 3, kind: output, shape index: {0}]   ;;  %s362_s4 = inlined_call_operand.vmem [shape: f32[8,64], index: 4, kind: output, shape index: {1}]  }
   0x1   :  { %v262_v0 = vld [vmem:[%s358_s1] sm:$0xff]   ;;  %v263_v1 = vld [vmem:[%s358_s1 + $0x8] sm:$0xff]   ;;  %v264_v2 = vld [vmem:[%s358_s1 + $0x10] sm:$0xff]  }
   0x2   :  { %242 = vmatprep.subr.bf16.mxu0 %v262_v0  ;;  %v265_v3 = vld [vmem:[%s358_s1 + $0x18] sm:$0xff]   ;;  %v270_v4 = vld [vmem:[%s359_s0] sm:$0xff]   ;;  %v267_v6 = vld [vmem:[%s358_s1 + $0x28] sm:$0xff]   ;;  %v159_v45 = vshrl.u32 %v158_v40, 7 }
   0x3   :  { %243 = vmatpush3.bf16.msra.mxu0 %v262_v0  ;;  %258 = vmatprep.mubr.bf16.mxu0 %v270_v4  ;;  %v266_v5 = vld [vmem:[%s358_s1 + $0x20] sm:$0xff]   ;;  %v268_v7 = vld [vmem:[%s358_s1 + $0x30] sm:$0xff]   ;;  %v269_v8 = vld [vmem:[%s358_s1 + $0x38] sm:$0xff]  }
   0x4   :  { %244 = vmatprep.subr.bf16.mxu0 %v263_v1  ;;  %v271_v9 = vld [vmem:[%s359_s0 + $0x8] sm:$0xff]   ;;  %v221_v10 = vld [vmem:[%s360_s2] ss:$0 sm:$0xff]  ;;  %vm207_vm1 = vcmp.eq.s32.totalorder %v159_v45, 0  ;;  %vm209_vm2 = vcmp.eq.s32.totalorder %v159_v45, 1 }
   0x7   :  { %245 = vmatpush3.bf16.msra.mxu0 %v263_v1 }
   0x8   :  { %246 = vmatprep.subr.bf16.mxu0 %v264_v2 }
   0xb   :  { %247 = vmatpush3.bf16.msra.mxu0 %v264_v2 }
   0xc   :  { %248 = vmatprep.subr.bf16.mxu0 %v265_v3 }
   0xf   :  { %249 = vmatpush3.bf16.msra.mxu0 %v265_v3 }
  0x10   :  { %250 = vmatprep.subr.bf16.mxu0 %v266_v5 }
  0x13   :  { %251 = vmatpush3.bf16.msra.mxu0 %v266_v5 }
  0x14   :  { %252 = vmatprep.subr.bf16.mxu0 %v267_v6 }
  0x17   :  { %253 = vmatpush3.bf16.msra.mxu0 %v267_v6 }
  0x18   :  { %254 = vmatprep.subr.bf16.mxu0 %v268_v7 }
  0x1b   :  { %255 = vmatpush3.bf16.msra.mxu0 %v268_v7 }
  0x1c   :  { %256 = vmatprep.subr.bf16.mxu0 %v269_v8 }
  0x1f   :  { %257 = vmatpush3.bf16.msra.mxu0 %v269_v8 }
  0x22   :  { %259 = vmatmul.mubr.bf16.vlgmr.msra.gmra.mrb[0].mxu0 %v271_v9 }
  0xf5   :  { %v260_v11 = vpop.f32.mrb[0].mxu0 }
  0xf6   :  { %v147_v12 = vadd.f32 %v260_v11, %v221_v10  ;;  %v138_v13 = vpop.f32.mrb[1].mxu0 }
  0xf7   :  { %v139_v14 = vadd.f32 %v221_v10, %v138_v13  ;;  %v261_v15 = vpop.f32.mrb[2].mxu0 }
  0xf8   :  { %156 = vst.msk [vmem:[%s361_s3 + $0x10] sm:$0xff] %vm153_vm0, %v147_v12  ;;  %v150_v16 = vadd.f32 %v261_v15, %v221_v10  ;;  %v141_v17 = vpop.f32.mrb[3].mxu0  ;;  %v192_v20 = vmul.f32 %v147_v12, %v147_v12  ;;  %v180_v25 = vsel %vm153_vm0, %v147_v12, 0.0 }
  0xf9   :  { %154 = vst.msk [vmem:[%s361_s3] sm:$0xff] %vm153_vm0, %v139_v14  ;;  %v190_v18 = vmul.f32 %v139_v14, %v139_v14  ;;  %v142_v19 = vadd.f32 %v221_v10, %v141_v17  ;;  %v177_v21 = vsel %vm153_vm0, %v139_v14, 0.0 }
  0xfa   :  { %157 = vst.msk [vmem:[%s361_s3 + $0x18] sm:$0xff] %vm153_vm0, %v150_v16  ;;  %v193_v27 = vmul.f32 %v150_v16, %v150_v16  ;;  %v197_v31 = vsel %vm153_vm0, %v192_v20, 0.0  ;;  %v182_v32 = vsel %vm153_vm0, %v150_v16, 0.0 }
  0xfb   :  { %155 = vst.msk [vmem:[%s361_s3 + $0x8] sm:$0xff] %vm153_vm0, %v142_v19  ;;  %v178_v22 = vsel %vm153_vm0, %v142_v19, 0.0  ;;  %v191_v23 = vmul.f32 %v142_v19, %v142_v19  ;;  %v194_v26 = vsel %vm153_vm0, %v190_v18, 0.0 }
  0xfc   :  { %v179_v24 = vadd.f32 %v178_v22, %v177_v21  ;;  %v199_v35 = vsel %vm153_vm0, %v193_v27, 0.0 }
  0xfd   :  { %v195_v28 = vsel %vm153_vm0, %v191_v23, 0.0 }
  0xfe   :  { %v181_v29 = vadd.f32 %v180_v25, %v179_v24  ;;  %v196_v30 = vadd.f32 %v195_v28, %v194_v26 }
 0x100   :  { %v183_v33 = vadd.f32 %v182_v32, %v181_v29  ;;  %v198_v34 = vadd.f32 %v197_v31, %v196_v30 }
 0x102   :  { %v184_v36 = vrot.slane %v183_v33, 4  ;;  %v200_v37 = vadd.f32 %v199_v35, %v198_v34 }
 0x104   :  { %v185_v38 = vadd.f32 %v184_v36, %v183_v33  ;;  %v201_v39 = vrot.slane %v200_v37, 4 }
 0x106   :  { %v186_v41 = vrot.slane %v185_v38, 2  ;;  %v202_v42 = vadd.f32 %v201_v39, %v200_v37 }
 0x108   :  { %v187_v43 = vadd.f32 %v186_v41, %v185_v38  ;;  %v203_v44 = vrot.slane %v202_v42, 2 }
 0x10a   :  { %v188_v46 = vrot.slane %v187_v43, 1  ;;  %v204_v47 = vadd.f32 %v203_v44, %v202_v42 }
 0x10c   :  { %v189_v48 = vadd.f32 %v188_v46, %v187_v43  ;;  %v205_v49 = vrot.slane %v204_v47, 1 }
 0x10e   :  { %v206_v50 = vadd.f32 %v205_v49, %v204_v47  ;;  %v208_v51 = vsel %vm207_vm1, %v189_v48, 0.0 }
 0x110   :  { %v210_v52 = vsel %vm209_vm2, %v206_v50, 0.0 }
 0x111   :  { %v211_v53 = vadd.f32 %v210_v52, %v208_v51 }
 0x113   :  { %212 = vst.msk [vmem:[%s362_s4] sm:$0xff] %vm153_vm0, %v211_v53 }

// kernel: gruse_forward.35
= control target key start
LH: loop header
LB: loop body
LE: loop exit
PB: predicated region body
PF: predicated region fallthrough
CT: control target
= control target key end

     0   :  { %vm80_vm3 = vcmask 519168   ;;  %s161_s0 = inlined_call_operand.vmem [shape: f32[32,64], index: 0, kind: input, shape index: {}]   ;;  %s162_s1 = inlined_call_operand.vmem [shape: f32[1,64], index: 1, kind: input, shape index: {}]   ;;  %s163_s2 = inlined_call_operand.vmem [shape: f32[1,64], index: 2, kind: input, shape index: {}]   ;;  %s164_s3 = inlined_call_operand.vmem [shape: bf16[32,64], index: 3, kind: output, shape index: {}]  }
   0x1   :  { %v14_v0 = vld [vmem:[%s161_s0] sm:$0xff]  ;;  %v15_v4 = vld [vmem:[%s161_s0 + $0x8] sm:$0xff]  ;;  %v16_v5 = vld [vmem:[%s161_s0 + $0x10] sm:$0xff] }
   0x2   :  { %v89_v1 = vld [vmem:[%s162_s1] ss:$0 sm:$0xff]  ;;  %v17_v6 = vld [vmem:[%s161_s0 + $0x18] sm:$0xff] }
   0x3   :  { %v90_v2 = vld [vmem:[%s163_s2] ss:$0 sm:$0xff]  ;;  %v25_v3 = vmul.f32 %v89_v1, %v14_v0  ;;  %v26_v7 = vmul.f32 %v89_v1, %v15_v4  ;;  %v27_v8 = vmul.f32 %v89_v1, %v16_v5  ;;  %v28_v9 = vmul.f32 %v89_v1, %v17_v6 }
   0x5   :  { %v36_v10 = vadd.f32 %v90_v2, %v25_v3  ;;  %v37_v11 = vadd.f32 %v90_v2, %v26_v7  ;;  %v38_v12 = vadd.f32 %v90_v2, %v27_v8  ;;  %v39_v13 = vadd.f32 %v90_v2, %v28_v9 }
   0x7   :  { %v44_v14 = vmin.f32 %v36_v10, 0.0  ;;  %v45_v15 = vmin.f32 %v37_v11, 0.0  ;;  %v46_v16 = vmin.f32 %v38_v12, 0.0  ;;  %v47_v18 = vmin.f32 %v39_v13, 0.0 }
   0x8   :  { %vm40_vm0 = vcmp.gt.f32.partialorder %v36_v10, 0.0  ;;  %vm41_vm1 = vcmp.gt.f32.partialorder %v37_v11, 0.0  ;;  %vm42_vm2 = vcmp.gt.f32.partialorder %v38_v12, 0.0  ;;  %vm43_vm4 = vcmp.gt.f32.partialorder %v39_v13, 0.0 }
   0x9   :  { %v48_v17 = vmul.f32 1.442695, %v44_v14  ;;  %v50_v19 = vmul.f32 1.442695, %v45_v15  ;;  %v52_v20 = vmul.f32 1.442695, %v46_v16 }
   0xa   :  { %v54_v21 = vmul.f32 1.442695, %v47_v18 }
   0xb   :  { %103 = vpow2.f32 %v48_v17 }
   0xc   :  { %105 = vpow2.f32 %v50_v19 }
   0xd   :  { %107 = vpow2.f32 %v52_v20 }
   0xe   :  { %109 = vpow2.f32 %v54_v21 }
  0x15   :  { %v104_v22 = vpop.eup %103 }
  0x16   :  { %v106_v23 = vpop.eup %105  ;;  %v91_v24 = vadd.f32 -1.0, %v104_v22 }
  0x17   :  { %v108_v25 = vpop.eup %107  ;;  %v92_v26 = vadd.f32 -1.0, %v106_v23 }
  0x18   :  { %v110_v27 = vpop.eup %109  ;;  %v60_v28 = vsel %vm40_vm0, %v36_v10, %v91_v24  ;;  %v93_v29 = vadd.f32 -1.0, %v108_v25 }
  0x19   :  { %v99_v30 = vpack.c.bf16 %v60_v28, %v60_v28  ;;  %v61_v31 = vsel %vm41_vm1, %v37_v11, %v92_v26  ;;  %v94_v32 = vadd.f32 -1.0, %v110_v27 }
  0x1a   :  { %v100_v33 = vpack.c.bf16 %v61_v31, %v61_v31  ;;  %v62_v34 = vsel %vm42_vm2, %v38_v12, %v93_v29 }
  0x1b   :  { %81 = vst.msk [vmem:[%s164_s3] sm:$0xf] %vm80_vm3, %v99_v30  ;;  %v101_v35 = vpack.c.bf16 %v62_v34, %v62_v34  ;;  %v63_v36 = vsel %vm43_vm4, %v39_v13, %v94_v32 }
  0x1c   :  { %82 = vst.msk [vmem:[%s164_s3 + $0x4] sm:$0xf] %vm80_vm3, %v100_v33  ;;  %v102_v37 = vpack.c.bf16 %v63_v36, %v63_v36 }
  0x1d   :  { %83 = vst.msk [vmem:[%s164_s3 + $0x8] sm:$0xf] %vm80_vm3, %v101_v35 }
  0x1e   :  { %84 = vst.msk [vmem:[%s164_s3 + $0xc] sm:$0xf] %vm80_vm3, %v102_v37 }

// kernel: gruse_forward.37
= control target key start
LH: loop header
LB: loop body
LE: loop exit
PB: predicated region body
PF: predicated region fallthrough
CT: control target
= control target key end

     0   :  { %s112_s0 = inlined_call_operand.vmem [shape: f32[16,128], index: 0, kind: input, shape index: {}]   ;;  %s113_s1 = inlined_call_operand.vmem [shape: f32[1,128], index: 1, kind: input, shape index: {}]   ;;  %s114_s2 = inlined_call_operand.vmem [shape: f32[1,128], index: 2, kind: input, shape index: {}]   ;;  %s115_s3 = inlined_call_operand.vmem [shape: bf16[16,128], index: 3, kind: output, shape index: {}]  }
   0x1   :  { %v14_v0 = vld [vmem:[%s112_s0] sm:$0xff]  ;;  %v15_v1 = vld [vmem:[%s112_s0 + $0x8] sm:$0xff] }
   0x2   :  { %v60_v2 = vld [vmem:[%s113_s1] ss:$0 sm:$0xff] }
   0x3   :  { %v23_v3 = vmul.f32 %v60_v2, %v14_v0  ;;  %v24_v4 = vmul.f32 %v60_v2, %v15_v1  ;;  %v61_v5 = vld [vmem:[%s114_s2] ss:$0 sm:$0xff] }
   0x5   :  { %v32_v6 = vadd.f32 %v61_v5, %v23_v3  ;;  %v33_v7 = vadd.f32 %v61_v5, %v24_v4 }
   0x7   :  { %v36_v8 = vmin.f32 %v32_v6, 0.0  ;;  %v37_v9 = vmin.f32 %v33_v7, 0.0  ;;  %vm34_vm0 = vcmp.gt.f32.partialorder %v32_v6, 0.0  ;;  %vm35_vm1 = vcmp.gt.f32.partialorder %v33_v7, 0.0 }
   0x9   :  { %v38_v10 = vmul.f32 1.442695, %v36_v8  ;;  %v40_v11 = vmul.f32 1.442695, %v37_v9 }
   0xb   :  { %73 = vpow2.f32 %v38_v10 }
   0xc   :  { %75 = vpow2.f32 %v40_v11 }
  0x15   :  { %v74_v12 = vpop.eup %73 }
  0x16   :  { %v76_v13 = vpop.eup %75  ;;  %v62_v14 = vadd.f32 -1.0, %v74_v12 }
  0x17   :  { %v63_v15 = vadd.f32 -1.0, %v76_v13 }
  0x18   :  { %v44_v16 = vsel %vm34_vm0, %v32_v6, %v62_v14 }
  0x19   :  { %v45_v17 = vsel %vm35_vm1, %v33_v7, %v63_v15 }
  0x1a   :  { %v71_v18 = vpack.c.bf16 %v45_v17, %v44_v16 }
  0x1c   :  { %72 = vst [vmem:[%s115_s3] sm:$0xff] %v71_v18  }

// kernel: gruse_forward.36
= control target key start
LH: loop header
LB: loop body
LE: loop exit
PB: predicated region body
PF: predicated region fallthrough
CT: control target
= control target key end

     0   :  { %v207_v34 = vlaneseq  ;;  %s399_s1 = inlined_call_operand.vmem [shape: bf16[256,128], index: 1, kind: input, shape index: {}]   ;;  %s400_s0 = inlined_call_operand.vmem [shape: bf16[16,256], index: 0, kind: input, shape index: {}]   ;;  %s401_s2 = inlined_call_operand.vmem [shape: f32[1,128], index: 2, kind: input, shape index: {}]   ;;  %s402_s3 = inlined_call_operand.vmem [shape: f32[16,128], index: 3, kind: output, shape index: {0}]   ;;  %s403_s4 = inlined_call_operand.vmem [shape: f32[8,128], index: 4, kind: output, shape index: {1}]  }
   0x1   :  { %v289_v0 = vld [vmem:[%s399_s1 + $0x40] sm:$0xff]   ;;  %v291_v2 = vld [vmem:[%s399_s1 + $0x48] sm:$0xff]   ;;  %v293_v4 = vld [vmem:[%s399_s1 + $0x50] sm:$0xff]  }
   0x2   :  { %v290_v1 = vld [vmem:[%s399_s1] sm:$0xff]   ;;  %267 = vmatprep.subr.bf16.mxu0 %v289_v0  ;;  %v292_v3 = vld [vmem:[%s399_s1 + $0x8] sm:$0xff]   ;;  %v294_v5 = vld [vmem:[%s399_s1 + $0x10] sm:$0xff]   ;;  %v208_v39 = vshrl.u32 %v207_v34, 7 }
   0x3   :  { %268 = vmatpush3.bf16.msra.mxu0 %v290_v1  ;;  %v295_v6 = vld [vmem:[%s399_s1 + $0x58] sm:$0xff]   ;;  %v297_v8 = vld [vmem:[%s399_s1 + $0x60] sm:$0xff]   ;;  %v299_v10 = vld [vmem:[%s399_s1 + $0x68] sm:$0xff]  }
   0x4   :  { %269 = vmatprep.subr.bf16.mxu0 %v291_v2  ;;  %v296_v7 = vld [vmem:[%s399_s1 + $0x18] sm:$0xff]   ;;  %v298_v9 = vld [vmem:[%s399_s1 + $0x20] sm:$0xff]   ;;  %v300_v12 = vld [vmem:[%s399_s1 + $0x28] sm:$0xff]   ;;  %vm234_vm0 = vcmp.eq.s32.totalorder %v208_v39, 0  ;;  %vm236_vm1 = vcmp.eq.s32.totalorder %v208_v39, 1 }
   0x5   :  { %v307_v11 = vld [vmem:[%s400_s0 + $0x4] ss:$8 sps:$4 sm:$0xff]   ;;  %v301_v13 = vld [vmem:[%s399_s1 + $0x70] sm:$0xff]   ;;  %v303_v15 = vld [vmem:[%s399_s1 + $0x78] sm:$0xff]  }
   0x6   :  { %196 = vmatprep.mubr.bf16.mxu0 %v307_v11  ;;  %v302_v14 = vld [vmem:[%s399_s1 + $0x30] sm:$0xff]   ;;  %v304_v16 = vld [vmem:[%s399_s1 + $0x38] sm:$0xff]   ;;  %v305_v17 = vld [vmem:[%s400_s0] ss:$8 sps:$4 sm:$0xff]  }
   0x7   :  { %270 = vmatpush3.bf16.msra.mxu0 %v292_v3  ;;  %v248_v19 = vld [vmem:[%s401_s2] ss:$0 sm:$0xff] }
   0x8   :  { %271 = vmatprep.subr.bf16.mxu0 %v293_v4 }
   0xb   :  { %272 = vmatpush3.bf16.msra.mxu0 %v294_v5 }
   0xc   :  { %273 = vmatprep.subr.bf16.mxu0 %v295_v6 }
   0xf   :  { %274 = vmatpush3.bf16.msra.mxu0 %v296_v7 }
  0x10   :  { %275 = vmatprep.subr.bf16.mxu0 %v297_v8 }
  0x13   :  { %276 = vmatpush3.bf16.msra.mxu0 %v298_v9 }
  0x14   :  { %277 = vmatprep.subr.bf16.mxu0 %v299_v10 }
  0x17   :  { %278 = vmatpush3.bf16.msra.mxu0 %v300_v12 }
  0x18   :  { %279 = vmatprep.subr.bf16.mxu0 %v301_v13 }
  0x1b   :  { %280 = vmatpush3.bf16.msra.mxu0 %v302_v14 }
  0x1c   :  { %281 = vmatprep.subr.bf16.mxu0 %v303_v15 }
  0x1f   :  { %282 = vmatpush3.bf16.msra.mxu0 %v304_v16 }
  0x22   :  { %197 = vmatmul.mubr.bf16.vlgmr.msra.gmra.mrb[0].mxu0 %v305_v17 }
  0xf5   :  { %v283_v18 = vpop.f32.mrb[0].mxu0 }
  0xf6   :  { %v284_v20 = vpop.f32.mrb[1].mxu0 }
  0xf7   :  { %v285_v21 = vadd.f32 %v284_v20, %v283_v18  ;;  %v286_v22 = vpop.f32.mrb[2].mxu0 }
  0xf8   :  { %v287_v23 = vpop.f32.mrb[3].mxu0 }
  0xf9   :  { %v199_v24 = vadd.f32 %v285_v21, %v248_v19  ;;  %v288_v25 = vadd.f32 %v287_v23, %v286_v22 }
  0xfb   :  { %205 = vst [vmem:[%s402_s3] sm:$0xff] %v199_v24  ;;  %v202_v26 = vadd.f32 %v288_v25, %v248_v19  ;;  %v225_v27 = vmul.f32 %v199_v24, %v199_v24 }
  0xfd   :  { %206 = vst [vmem:[%s402_s3 + $0x8] sm:$0xff] %v202_v26  ;;  %v218_v28 = vadd.f32 %v202_v26, %v199_v24  ;;  %v226_v29 = vmul.f32 %v202_v26, %v202_v26 }
  0xff   :  { %v219_v30 = vrot.slane %v218_v28, 4  ;;  %v227_v31 = vadd.f32 %v226_v29, %v225_v27 }
 0x101   :  { %v220_v32 = vadd.f32 %v219_v30, %v218_v28  ;;  %v228_v33 = vrot.slane %v227_v31, 4 }
 0x103   :  { %v221_v35 = vrot.slane %v220_v32, 2  ;;  %v229_v36 = vadd.f32 %v228_v33, %v227_v31 }
 0x105   :  { %v222_v37 = vadd.f32 %v221_v35, %v220_v32  ;;  %v230_v38 = vrot.slane %v229_v36, 2 }
 0x107   :  { %v223_v40 = vrot.slane %v222_v37, 1  ;;  %v231_v41 = vadd.f32 %v230_v38, %v229_v36 }
 0x109   :  { %v224_v42 = vadd.f32 %v223_v40, %v222_v37  ;;  %v232_v43 = vrot.slane %v231_v41, 1 }
 0x10b   :  { %v233_v44 = vadd.f32 %v232_v43, %v231_v41  ;;  %v235_v45 = vsel %vm234_vm0, %v224_v42, 0.0 }
 0x10d   :  { %v237_v46 = vsel %vm236_vm1, %v233_v44, 0.0 }
 0x10e   :  { %v238_v47 = vadd.f32 %v237_v46, %v235_v45 }
 0x110   :  { %239 = vst [vmem:[%s403_s4] sm:$0xff] %v238_v47 }

// kernel: gruse_forward.38
= control target key start
LH: loop header
LB: loop body
LE: loop exit
PB: predicated region body
PF: predicated region fallthrough
CT: control target
= control target key end

     0   :  { %s974_s1 = inlined_call_operand.vmem [shape: bf16[512,256], index: 1, kind: input, shape index: {}]   ;;  %s975_s0 = inlined_call_operand.vmem [shape: bf16[8,512], index: 0, kind: input, shape index: {}]   ;;  %s976_s2 = inlined_call_operand.vmem [shape: f32[1,256], index: 2, kind: input, shape index: {}]   ;;  %s977_s3 = inlined_call_operand.vmem [shape: f32[8,256], index: 3, kind: output, shape index: {0}]   ;;  %s978_s4 = inlined_call_operand.vmem [shape: f32[8,256], index: 4, kind: output, shape index: {1}]  }
   0x1   :  { %v636_v0 = vld [vmem:[%s974_s1 + $0x4] ss:$8 sps:$4 sm:$0xff]   ;;  %v640_v2 = vld [vmem:[%s974_s1] ss:$8 sps:$4 sm:$0xff]   ;;  %v642_v4 = vld [vmem:[%s974_s1 + $0x14] ss:$8 sps:$4 sm:$0xff]  }
   0x2   :  { %v638_v1 = vld [vmem:[%s974_s1 + $0x104] ss:$8 sps:$4 sm:$0xff]   ;;  %428 = vmatprep.subr.bf16.mxu1 %v636_v0  ;;  %v641_v3 = vld [vmem:[%s974_s1 + $0x100] ss:$8 sps:$4 sm:$0xff]   ;;  %v644_v5 = vld [vmem:[%s974_s1 + $0x114] ss:$8 sps:$4 sm:$0xff]  }
   0x3   :  { %469 = vmatprep.subr.bf16.mxu0 %v638_v1  ;;  %429 = vmatpush1.bf16.msra.mxu1 %v640_v2  ;;  %v646_v6 = vld [vmem:[%s974_s1 + $0x10] ss:$8 sps:$4 sm:$0xff]   ;;  %v648_v8 = vld [vmem:[%s974_s1 + $0x24] ss:$8 sps:$4 sm:$0xff]   ;;  %v652_v10 = vld [vmem:[%s974_s1 + $0x20] ss:$8 sps:$4 sm:$0xff]  }
   0x4   :  { %470 = vmatpush1.bf16.msra.mxu0 %v641_v3  ;;  %430 = vmatprep.subr.bf16.mxu1 %v642_v4  ;;  %v647_v7 = vld [vmem:[%s974_s1 + $0x110] ss:$8 sps:$4 sm:$0xff]   ;;  %v650_v9 = vld [vmem:[%s974_s1 + $0x124] ss:$8 sps:$4 sm:$0xff]   ;;  %v653_v11 = vld [vmem:[%s974_s1 + $0x120] ss:$8 sps:$4 sm:$0xff]  }
   0x5   :  { %471 = vmatprep.subr.bf16.mxu0 %v644_v5  ;;  %v654_v12 = vld [vmem:[%s974_s1 + $0x34] ss:$8 sps:$4 sm:$0xff]   ;;  %v658_v14 = vld [vmem:[%s974_s1 + $0x30] ss:$8 sps:$4 sm:$0xff]   ;;  %v660_v16 = vld [vmem:[%s974_s1 + $0x44] ss:$8 sps:$4 sm:$0xff]  }
   0x6   :  { %v656_v13 = vld [vmem:[%s974_s1 + $0x134] ss:$8 sps:$4 sm:$0xff]   ;;  %v659_v15 = vld [vmem:[%s974_s1 + $0x130] ss:$8 sps:$4 sm:$0xff]   ;;  %v662_v17 = vld [vmem:[%s974_s1 + $0x144] ss:$8 sps:$4 sm:$0xff]  }
   0x7   :  { %431 = vmatpush1.bf16.msra.mxu1 %v646_v6  ;;  %v664_v18 = vld [vmem:[%s974_s1 + $0x40] ss:$8 sps:$4 sm:$0xff]   ;;  %v666_v20 = vld [vmem:[%s974_s1 + $0x54] ss:$8 sps:$4 sm:$0xff]   ;;  %v670_v22 = vld [vmem:[%s974_s1 + $0x50] ss:$8 sps:$4 sm:$0xff]   ;;  %v84_v6 = vlaneseq }
   0x8   :  { %472 = vmatpush1.bf16.msra.mxu0 %v647_v7  ;;  %432 = vmatprep.subr.bf16.mxu1 %v648_v8  ;;  %v665_v19 = vld [vmem:[%s974_s1 + $0x140] ss:$8 sps:$4 sm:$0xff]   ;;  %v668_v21 = vld [vmem:[%s974_s1 + $0x154] ss:$8 sps:$4 sm:$0xff]   ;;  %v671_v23 = vld [vmem:[%s974_s1 + $0x150] ss:$8 sps:$4 sm:$0xff]  }
   0x9   :  { %473 = vmatprep.subr.bf16.mxu0 %v650_v9  ;;  %v672_v24 = vld [vmem:[%s974_s1 + $0x64] ss:$8 sps:$4 sm:$0xff]   ;;  %v676_v26 = vld [vmem:[%s974_s1 + $0x60] ss:$8 sps:$4 sm:$0xff]   ;;  %v678_v28 = vld [vmem:[%s974_s1 + $0x74] ss:$8 sps:$4 sm:$0xff]  }
   0xa   :  { %v674_v25 = vld [vmem:[%s974_s1 + $0x164] ss:$8 sps:$4 sm:$0xff]   ;;  %v677_v27 = vld [vmem:[%s974_s1 + $0x160] ss:$8 sps:$4 sm:$0xff]   ;;  %v680_v29 = vld [vmem:[%s974_s1 + $0x174] ss:$8 sps:$4 sm:$0xff]  }
   0xb   :  { %433 = vmatpush1.bf16.msra.mxu1 %v652_v10  ;;  %v682_v30 = vld [vmem:[%s974_s1 + $0x70] ss:$8 sps:$4 sm:$0xff]   ;;  %v684_v32 = vld [vmem:[%s974_s1 + $0x84] ss:$8 sps:$4 sm:$0xff]   ;;  %v688_v34 = vld [vmem:[%s974_s1 + $0x80] ss:$8 sps:$4 sm:$0xff]  }
   0xc   :  { %474 = vmatpush1.bf16.msra.mxu0 %v653_v11  ;;  %434 = vmatprep.subr.bf16.mxu1 %v654_v12  ;;  %v683_v31 = vld [vmem:[%s974_s1 + $0x170] ss:$8 sps:$4 sm:$0xff]   ;;  %v686_v33 = vld [vmem:[%s974_s1 + $0x184] ss:$8 sps:$4 sm:$0xff]   ;;  %v689_v35 = vld [vmem:[%s974_s1 + $0x180] ss:$8 sps:$4 sm:$0xff]  }
   0xd   :  { %475 = vmatprep.subr.bf16.mxu0 %v656_v13  ;;  %v690_v36 = vld [vmem:[%s974_s1 + $0x94] ss:$8 sps:$4 sm:$0xff]   ;;  %v694_v38 = vld [vmem:[%s974_s1 + $0x90] ss:$8 sps:$4 sm:$0xff]   ;;  %v696_v40 = vld [vmem:[%s974_s1 + $0xa4] ss:$8 sps:$4 sm:$0xff]  }
   0xe   :  { %v692_v37 = vld [vmem:[%s974_s1 + $0x194] ss:$8 sps:$4 sm:$0xff]   ;;  %v695_v39 = vld [vmem:[%s974_s1 + $0x190] ss:$8 sps:$4 sm:$0xff]   ;;  %v698_v41 = vld [vmem:[%s974_s1 + $0x1a4] ss:$8 sps:$4 sm:$0xff]  }
   0xf   :  { %435 = vmatpush1.bf16.msra.mxu1 %v658_v14  ;;  %v700_v42 = vld [vmem:[%s974_s1 + $0xa0] ss:$8 sps:$4 sm:$0xff]   ;;  %v702_v44 = vld [vmem:[%s974_s1 + $0xb4] ss:$8 sps:$4 sm:$0xff]   ;;  %v706_v49 = vld [vmem:[%s974_s1 + $0xb0] ss:$8 sps:$4 sm:$0xff]  }
  0x10   :  { %476 = vmatpush1.bf16.msra.mxu0 %v659_v15  ;;  %436 = vmatprep.subr.bf16.mxu1 %v660_v16  ;;  %v701_v43 = vld [vmem:[%s974_s1 + $0x1a0] ss:$8 sps:$4 sm:$0xff]   ;;  %v704_v45 = vld [vmem:[%s974_s1 + $0x1b4] ss:$8 sps:$4 sm:$0xff]   ;;  %v707_v50 = vld [vmem:[%s974_s1 + $0x1b0] ss:$8 sps:$4 sm:$0xff]  }
  0x11   :  { %477 = vmatprep.subr.bf16.mxu0 %v662_v17  ;;  %v16_v46 = vld [vmem:[%s975_s0] sm:$0xff]  ;;  %v17_v48 = vld [vmem:[%s975_s0 + $0x8] sm:$0xff]  ;;  %v714_v56 = vld [vmem:[%s974_s1 + $0xd4] ss:$8 sps:$4 sm:$0xff]   ;;  %v85_v7 = vshrl.u32 %v84_v6, 7 }
  0x12   :  { %v565_v47 = vcombine.high %v16_v46, %v16_v46  ;;  %v567_v51 = vcombine.high %v17_v48, %v17_v48  ;;  %v708_v52 = vld [vmem:[%s974_s1 + $0xc4] ss:$8 sps:$4 sm:$0xff]   ;;  %v712_v54 = vld [vmem:[%s974_s1 + $0xc0] ss:$8 sps:$4 sm:$0xff]   ;;  %v716_v57 = vld [vmem:[%s974_s1 + $0x1d4] ss:$8 sps:$4 sm:$0xff]   ;;  %v564_v4 = vcombine.low %v16_v46, %v16_v46  ;;  %v566_v5 = vcombine.low %v17_v48, %v17_v48 }
  0x13   :  { %437 = vmatpush1.bf16.msra.mxu1 %v664_v18  ;;  %v710_v53 = vld [vmem:[%s974_s1 + $0x1c4] ss:$8 sps:$4 sm:$0xff]   ;;  %v713_v55 = vld [vmem:[%s974_s1 + $0x1c0] ss:$8 sps:$4 sm:$0xff]   ;;  %v718_v58 = vld [vmem:[%s974_s1 + $0xd0] ss:$8 sps:$4 sm:$0xff]  }
  0x14   :  { %478 = vmatpush1.bf16.msra.mxu0 %v665_v19  ;;  %438 = vmatprep.subr.bf16.mxu1 %v666_v20  ;;  %v719_v59 = vld [vmem:[%s974_s1 + $0x1d0] ss:$8 sps:$4 sm:$0xff]   ;;  %v720_v60 = vld [vmem:[%s974_s1 + $0xe4] ss:$8 sps:$4 sm:$0xff]   ;;  %v724_v62 = vld [vmem:[%s974_s1 + $0xe0] ss:$8 sps:$4 sm:$0xff]  }
  0x15   :  { %479 = vmatprep.subr.bf16.mxu0 %v668_v21  ;;  %460 = vmatprep.mubr.bf16.mxu1 %v565_v47  ;;  %v722_v61 = vld [vmem:[%s974_s1 + $0x1e4] ss:$8 sps:$4 sm:$0xff]   ;;  %v725_v63 = vld [vmem:[%s974_s1 + $0x1e0] ss:$8 sps:$4 sm:$0xff]   ;;  %v726_v0 = vld [vmem:[%s974_s1 + $0xf4] ss:$8 sps:$4 sm:$0xff]  }
  0x16   :  { %501 = vmatprep.mubr.bf16.mxu0 %v567_v51  ;;  %v728_v1 = vld [vmem:[%s974_s1 + $0x1f4] ss:$8 sps:$4 sm:$0xff]   ;;  %v730_v2 = vld [vmem:[%s974_s1 + $0xf0] ss:$8 sps:$4 sm:$0xff]   ;;  %v86_v8 = vsub.s32 0, %v85_v7  ;;  %v90_v10 = vsub.s32 1, %v85_v7 }
  0x17   :  { %439 = vmatpush1.bf16.msra.mxu1 %v670_v22  ;;  %v731_v3 = vld [vmem:[%s974_s1 + $0x1f0] ss:$8 sps:$4 sm:$0xff]   ;;  %v82_v9 = vld [vmem:[%s976_s2] sm:$0x3]  ;;  %vm546_vm0 = vcmp.eq.s32.totalorder %v85_v7, 0  ;;  %vm549_vm1 = vcmp.eq.s32.totalorder %v85_v7, 1 }
  0x18   :  { %480 = vmatpush1.bf16.msra.mxu0 %v671_v23  ;;  %440 = vmatprep.subr.bf16.mxu1 %v672_v24  ;;  %v87_v11 = vrot.slane %v82_v9, %v86_v8  ;;  %v91_v12 = vrot.slane %v82_v9, %v90_v10 }
  0x19   :  { %481 = vmatprep.subr.bf16.mxu0 %v674_v25 }
  0x1b   :  { %441 = vmatpush1.bf16.msra.mxu1 %v676_v26 }
  0x1c   :  { %482 = vmatpush1.bf16.msra.mxu0 %v677_v27  ;;  %442 = vmatprep.subr.bf16.mxu1 %v678_v28 }
  0x1d   :  { %483 = vmatprep.subr.bf16.mxu0 %v680_v29 }
  0x1f   :  { %443 = vmatpush1.bf16.msra.mxu1 %v682_v30 }
  0x20   :  { %484 = vmatpush1.bf16.msra.mxu0 %v683_v31  ;;  %444 = vmatprep.subr.bf16.mxu1 %v684_v32 }
  0x21   :  { %485 = vmatprep.subr.bf16.mxu0 %v686_v33 }
  0x23   :  { %445 = vmatpush1.bf16.msra.mxu1 %v688_v34 }
  0x24   :  { %486 = vmatpush1.bf16.msra.mxu0 %v689_v35  ;;  %446 = vmatprep.subr.bf16.mxu1 %v690_v36 }
  0x25   :  { %487 = vmatprep.subr.bf16.mxu0 %v692_v37 }
  0x27   :  { %447 = vmatpush1.bf16.msra.mxu1 %v694_v38 }
  0x28   :  { %488 = vmatpush1.bf16.msra.mxu0 %v695_v39  ;;  %448 = vmatprep.subr.bf16.mxu1 %v696_v40 }
  0x29   :  { %489 = vmatprep.subr.bf16.mxu0 %v698_v41 }
  0x2b   :  { %449 = vmatpush1.bf16.msra.mxu1 %v700_v42 }
  0x2c   :  { %490 = vmatpush1.bf16.msra.mxu0 %v701_v43  ;;  %450 = vmatprep.subr.bf16.mxu1 %v702_v44 }
  0x2d   :  { %491 = vmatprep.subr.bf16.mxu0 %v704_v45 }
  0x2f   :  { %451 = vmatpush1.bf16.msra.mxu1 %v706_v49 }
  0x30   :  { %492 = vmatpush1.bf16.msra.mxu0 %v707_v50  ;;  %452 = vmatprep.subr.bf16.mxu1 %v708_v52 }
  0x31   :  { %493 = vmatprep.subr.bf16.mxu0 %v710_v53 }
  0x33   :  { %453 = vmatpush1.bf16.msra.mxu1 %v712_v54 }
  0x34   :  { %494 = vmatpush1.bf16.msra.mxu0 %v713_v55  ;;  %454 = vmatprep.subr.bf16.mxu1 %v714_v56 }
  0x35   :  { %495 = vmatprep.subr.bf16.mxu0 %v716_v57 }
  0x37   :  { %455 = vmatpush1.bf16.msra.mxu1 %v718_v58 }
  0x38   :  { %496 = vmatpush1.bf16.msra.mxu0 %v719_v59  ;;  %456 = vmatprep.subr.bf16.mxu1 %v720_v60 }
  0x39   :  { %497 = vmatprep.subr.bf16.mxu0 %v722_v61 }
  0x3b   :  { %457 = vmatpush1.bf16.msra.mxu1 %v724_v62 }
  0x3c   :  { %498 = vmatpush1.bf16.msra.mxu0 %v725_v63  ;;  %458 = vmatprep.subr.bf16.mxu1 %v726_v0 }
  0x3d   :  { %499 = vmatprep.subr.bf16.mxu0 %v728_v1 }
  0x3f   :  { %459 = vmatpush1.bf16.msra.mxu1 %v730_v2 }
  0x40   :  { %500 = vmatpush1.bf16.msra.mxu0 %v731_v3 }
  0x42   :  { %461 = vmatmul.mubr.bf16.vlgmr.msra.gmra.mrb[0].mxu1 %v564_v4 }
  0x43   :  { %502 = vmatmul.mubr.bf16.vlgmr.msra.gmra.mrb[0].mxu0 %v566_v5 }
 0x115   :  { %v462_v13 = vpop.f32.mrb[0].mxu1 }
 0x116   :  { %v503_v14 = vpop.f32.mrb[0].mxu0  ;;  %v463_v15 = vadd.f32 %v462_v13, %v87_v11  ;;  %v464_v16 = vpop.f32.mrb[1].mxu1 }
 0x117   :  { %v505_v17 = vpop.f32.mrb[1].mxu0  ;;  %v465_v18 = vadd.f32 %v464_v16, %v91_v12  ;;  %v466_v19 = vpop.f32.mrb[2].mxu1 }
 0x118   :  { %v507_v20 = vpop.f32.mrb[2].mxu0  ;;  %v504_v21 = vadd.f32 %v503_v14, %v463_v15  ;;  %v467_v22 = vpop.f32.mrb[3].mxu1 }
 0x119   :  { %v508_v23 = vpop.f32.mrb[3].mxu0  ;;  %v506_v24 = vadd.f32 %v505_v17, %v465_v18 }
 0x11a   :  { %510 = vst [vmem:[%s977_s3] sm:$0xff] %v504_v21  ;;  %v520_v25 = vrot.slane %v504_v21, 4  ;;  %v532_v26 = vmul.f32 %v504_v21, %v504_v21 }
 0x11b   :  { %511 = vst [vmem:[%s977_s3 + $0x8] sm:$0xff] %v506_v24  ;;  %v526_v27 = vrot.slane %v506_v24, 4  ;;  %v533_v28 = vmul.f32 %v506_v24, %v506_v24 }
 0x11c   :  { %v521_v29 = vadd.f32 %v520_v25, %v504_v21  ;;  %v534_v30 = vrot.slane %v532_v26, 4 }
 0x11d   :  { %v527_v31 = vadd.f32 %v526_v27, %v506_v24  ;;  %v540_v32 = vrot.slane %v533_v28, 4 }
 0x11e   :  { %v522_v33 = vrot.slane %v521_v29, 2  ;;  %v535_v34 = vadd.f32 %v534_v30, %v532_v26 }
 0x11f   :  { %v528_v35 = vrot.slane %v527_v31, 2  ;;  %v541_v36 = vadd.f32 %v540_v32, %v533_v28 }
 0x120   :  { %v523_v37 = vadd.f32 %v522_v33, %v521_v29  ;;  %v536_v38 = vrot.slane %v535_v34, 2 }
 0x121   :  { %v529_v39 = vadd.f32 %v528_v35, %v527_v31  ;;  %v542_v40 = vrot.slane %v541_v36, 2 }
 0x122   :  { %v524_v41 = vrot.slane %v523_v37, 1  ;;  %v537_v42 = vadd.f32 %v536_v38, %v535_v34 }
 0x123   :  { %v530_v43 = vrot.slane %v529_v39, 1  ;;  %v543_v44 = vadd.f32 %v542_v40, %v541_v36 }
 0x124   :  { %v525_v45 = vadd.f32 %v524_v41, %v523_v37  ;;  %v538_v46 = vrot.slane %v537_v42, 1 }
 0x125   :  { %v531_v47 = vadd.f32 %v530_v43, %v529_v39  ;;  %v544_v48 = vrot.slane %v543_v44, 1 }
 0x126   :  { %v539_v49 = vadd.f32 %v538_v46, %v537_v42  ;;  %v547_v51 = vsel %vm546_vm0, %v525_v45, 0.0 }
 0x127   :  { %v545_v50 = vadd.f32 %v544_v48, %v543_v44  ;;  %v548_v54 = vsel %vm546_vm0, %v531_v47, 0.0 }
 0x128   :  { %v550_v52 = vsel %vm549_vm1, %v539_v49, 0.0 }
 0x129   :  { %v552_v53 = vadd.f32 %v550_v52, %v547_v51  ;;  %v551_v55 = vsel %vm549_vm1, %v545_v50, 0.0 }
 0x12a   :  { %v553_v56 = vadd.f32 %v551_v55, %v548_v54 }
 0x12b   :  { %554 = vst [vmem:[%s978_s4] sm:$0xff] %v552_v53 }
 0x12c   :  { %555 = vst [vmem:[%s978_s4 + $0x8] sm:$0xff] %v553_v56 }

// kernel: gruse_forward.39
= control target key start
LH: loop header
LB: loop body
LE: loop exit
PB: predicated region body
PF: predicated region fallthrough
CT: control target
= control target key end

     0   :  { %v18_v0 = vlaneseq  ;;  %s112_s1 = inlined_call_operand.vmem [shape: f32[1,256], index: 1, kind: input, shape index: {}]   ;;  %s113_s2 = inlined_call_operand.vmem [shape: f32[1,256], index: 2, kind: input, shape index: {}]   ;;  %s114_s0 = inlined_call_operand.vmem [shape: f32[8,256], index: 0, kind: input, shape index: {}]   ;;  %s115_s3 = inlined_call_operand.vmem [shape: bf16[8,256], index: 3, kind: output, shape index: {}]  }
   0x1   :  { %v16_v2 = vld [vmem:[%s112_s1] sm:$0x3]  ;;  %v15_v7 = vld [vmem:[%s114_s0 + $0x8] sm:$0xff] }
   0x2   :  { %v19_v1 = vshrl.u32 %v18_v0, 7  ;;  %v30_v3 = vld [vmem:[%s113_s2] sm:$0x3] }
   0x3   :  { %v14_v6 = vld [vmem:[%s114_s0] sm:$0xff] }
   0x4   :  { %v20_v4 = vsub.s32 0, %v19_v1  ;;  %v24_v5 = vsub.s32 1, %v19_v1 }
   0x6   :  { %v21_v8 = vrot.slane %v16_v2, %v20_v4  ;;  %v25_v9 = vrot.slane %v16_v2, %v24_v5  ;;  %v35_v10 = vrot.slane %v30_v3, %v20_v4  ;;  %v39_v11 = vrot.slane %v30_v3, %v24_v5 }
   0x8   :  { %v28_v12 = vmul.f32 %v21_v8, %v14_v6  ;;  %v29_v13 = vmul.f32 %v25_v9, %v15_v7 }
   0xa   :  { %v42_v14 = vadd.f32 %v35_v10, %v28_v12  ;;  %v43_v15 = vadd.f32 %v39_v11, %v29_v13 }
   0xc   :  { %v46_v16 = vmin.f32 %v42_v14, 0.0  ;;  %v47_v17 = vmin.f32 %v43_v15, 0.0  ;;  %vm44_vm0 = vcmp.gt.f32.partialorder %v42_v14, 0.0  ;;  %vm45_vm1 = vcmp.gt.f32.partialorder %v43_v15, 0.0 }
   0xe   :  { %v48_v18 = vmul.f32 1.442695, %v46_v16  ;;  %v50_v19 = vmul.f32 1.442695, %v47_v17 }
  0x10   :  { %73 = vpow2.f32 %v48_v18 }
  0x11   :  { %75 = vpow2.f32 %v50_v19 }
  0x1a   :  { %v74_v20 = vpop.eup %73 }
  0x1b   :  { %v76_v21 = vpop.eup %75  ;;  %v69_v22 = vadd.f32 -1.0, %v74_v20 }
  0x1c   :  { %v70_v23 = vadd.f32 -1.0, %v76_v21 }
  0x1d   :  { %v54_v24 = vsel %vm44_vm0, %v42_v14, %v69_v22 }
  0x1e   :  { %v55_v25 = vsel %vm45_vm1, %v43_v15, %v70_v23 }
  0x1f   :  { %v72_v26 = vpack.c.bf16 %v55_v25, %v54_v24 }
  0x21   :  { %64 = vst [vmem:[%s115_s3] sm:$0xff] %v72_v26 }

// kernel: gruse_forward.40
= control target key start
LH: loop header
LB: loop body
LE: loop exit
PB: predicated region body
PF: predicated region fallthrough
CT: control target
= control target key end

     0   :  { %s1355_s1 = inlined_call_operand.vmem [shape: bf16[256,768], index: 1, kind: input, shape index: {}]   ;;  %s1356_s0 = inlined_call_operand.vmem [shape: bf16[8,256], index: 0, kind: input, shape index: {}]   ;;  %s1357_s2 = inlined_call_operand.vmem [shape: f32[1,768], index: 2, kind: input, shape index: {}]   ;;  %s1358_s3 = inlined_call_operand.vmem [shape: f32[8,768], index: 3, kind: output, shape index: {}]  }
   0x1   :  { %v861_v0 = vld [vmem:[%s1355_s1 + $0x4] ss:$24 sps:$4 sm:$0xff]   ;;  %v863_v1 = vld [vmem:[%s1355_s1] ss:$24 sps:$4 sm:$0xff]   ;;  %v864_v2 = vld [vmem:[%s1355_s1 + $0x34] ss:$24 sps:$4 sm:$0xff]  }
   0x2   :  { %630 = vmatprep.subr.bf16.mxu0 %v861_v0  ;;  %v866_v3 = vld [vmem:[%s1355_s1 + $0x30] ss:$24 sps:$4 sm:$0xff]   ;;  %v867_v4 = vld [vmem:[%s1355_s1 + $0x64] ss:$24 sps:$4 sm:$0xff]   ;;  %v869_v5 = vld [vmem:[%s1355_s1 + $0x60] ss:$24 sps:$4 sm:$0xff]  }
   0x3   :  { %631 = vmatpush1.bf16.msra.mxu0 %v863_v1  ;;  %v870_v6 = vld [vmem:[%s1355_s1 + $0x94] ss:$24 sps:$4 sm:$0xff]   ;;  %v872_v7 = vld [vmem:[%s1355_s1 + $0x90] ss:$24 sps:$4 sm:$0xff]   ;;  %v873_v8 = vld [vmem:[%s1355_s1 + $0xc4] ss:$24 sps:$4 sm:$0xff]  }
   0x4   :  { %632 = vmatprep.subr.bf16.mxu0 %v864_v2  ;;  %v875_v9 = vld [vmem:[%s1355_s1 + $0xc0] ss:$24 sps:$4 sm:$0xff]   ;;  %v876_v10 = vld [vmem:[%s1355_s1 + $0xf4] ss:$24 sps:$4 sm:$0xff]   ;;  %v878_v11 = vld [vmem:[%s1355_s1 + $0xf0] ss:$24 sps:$4 sm:$0xff]  }
   0x5   :  { %v879_v12 = vld [vmem:[%s1355_s1 + $0x124] ss:$24 sps:$4 sm:$0xff]   ;;  %v911_v14 = vld [vmem:[%s1355_s1 + $0x8] ss:$24 sps:$4 sm:$0xff]   ;;  %v882_v18 = vld [vmem:[%s1355_s1 + $0x154] ss:$24 sps:$4 sm:$0xff]  }
   0x6   :  { %v909_v13 = vld [vmem:[%s1355_s1 + $0xc] ss:$24 sps:$4 sm:$0xff]   ;;  %v881_v16 = vld [vmem:[%s1355_s1 + $0x120] ss:$24 sps:$4 sm:$0xff]   ;;  %v917_v19 = vld [vmem:[%s1355_s1 + $0x3c] ss:$24 sps:$4 sm:$0xff]  }
   0x7   :  { %633 = vmatpush1.bf16.msra.mxu0 %v866_v3  ;;  %v1075_v15 = vld [vmem:[%s1356_s0] sm:$0xff]  ;;  %671 = vmatprep.subr.bf16.mxu1 %v909_v13  ;;  %v919_v20 = vld [vmem:[%s1355_s1 + $0x38] ss:$24 sps:$4 sm:$0xff]   ;;  %v929_v25 = vld [vmem:[%s1355_s1 + $0x9c] ss:$24 sps:$4 sm:$0xff]  }
   0x8   :  { %634 = vmatprep.subr.bf16.mxu0 %v867_v4  ;;  %v1082_v17 = vcombine.high %v1075_v15, %v1075_v15  ;;  %672 = vmatpush1.bf16.msra.mxu1 %v911_v14  ;;  %v884_v21 = vld [vmem:[%s1355_s1 + $0x150] ss:$24 sps:$4 sm:$0xff]   ;;  %v923_v22 = vld [vmem:[%s1355_s1 + $0x6c] ss:$24 sps:$4 sm:$0xff]   ;;  %v887_v26 = vld [vmem:[%s1355_s1 + $0x180] ss:$24 sps:$4 sm:$0xff]   ;;  %v1205_v57 = vcombine.low %v1075_v15, %v1075_v15 }
   0x9   :  { %673 = vmatprep.subr.bf16.mxu1 %v917_v19  ;;  %v885_v23 = vld [vmem:[%s1355_s1 + $0x184] ss:$24 sps:$4 sm:$0xff]   ;;  %v925_v24 = vld [vmem:[%s1355_s1 + $0x68] ss:$24 sps:$4 sm:$0xff]   ;;  %v888_v27 = vld [vmem:[%s1355_s1 + $0x1b4] ss:$24 sps:$4 sm:$0xff]  }
   0xa   :  { %662 = vmatprep.mubr.bf16.mxu0 %v1082_v17  ;;  %703 = vmatprep.mubr.bf16.mxu1 %v1082_v17  ;;  %v931_v28 = vld [vmem:[%s1355_s1 + $0x98] ss:$24 sps:$4 sm:$0xff]   ;;  %v935_v29 = vld [vmem:[%s1355_s1 + $0xcc] ss:$24 sps:$4 sm:$0xff]   ;;  %v937_v32 = vld [vmem:[%s1355_s1 + $0xc8] ss:$24 sps:$4 sm:$0xff]  }
   0xb   :  { %635 = vmatpush1.bf16.msra.mxu0 %v869_v5  ;;  %v890_v30 = vld [vmem:[%s1355_s1 + $0x1b0] ss:$24 sps:$4 sm:$0xff]   ;;  %v891_v31 = vld [vmem:[%s1355_s1 + $0x1e4] ss:$24 sps:$4 sm:$0xff]   ;;  %v893_v34 = vld [vmem:[%s1355_s1 + $0x1e0] ss:$24 sps:$4 sm:$0xff]  }
   0xc   :  { %636 = vmatprep.subr.bf16.mxu0 %v870_v6  ;;  %674 = vmatpush1.bf16.msra.mxu1 %v919_v20  ;;  %v941_v33 = vld [vmem:[%s1355_s1 + $0xfc] ss:$24 sps:$4 sm:$0xff]   ;;  %v943_v36 = vld [vmem:[%s1355_s1 + $0xf8] ss:$24 sps:$4 sm:$0xff]   ;;  %v947_v37 = vld [vmem:[%s1355_s1 + $0x12c] ss:$24 sps:$4 sm:$0xff]  }
   0xd   :  { %675 = vmatprep.subr.bf16.mxu1 %v923_v22  ;;  %v894_v35 = vld [vmem:[%s1355_s1 + $0x214] ss:$24 sps:$4 sm:$0xff]   ;;  %v896_v38 = vld [vmem:[%s1355_s1 + $0x210] ss:$24 sps:$4 sm:$0xff]   ;;  %v897_v39 = vld [vmem:[%s1355_s1 + $0x244] ss:$24 sps:$4 sm:$0xff]  }
   0xe   :  { %v949_v40 = vld [vmem:[%s1355_s1 + $0x128] ss:$24 sps:$4 sm:$0xff]   ;;  %v953_v41 = vld [vmem:[%s1355_s1 + $0x15c] ss:$24 sps:$4 sm:$0xff]   ;;  %v955_v44 = vld [vmem:[%s1355_s1 + $0x158] ss:$24 sps:$4 sm:$0xff]  }
   0xf   :  { %637 = vmatpush1.bf16.msra.mxu0 %v872_v7  ;;  %v899_v42 = vld [vmem:[%s1355_s1 + $0x240] ss:$24 sps:$4 sm:$0xff]   ;;  %v900_v43 = vld [vmem:[%s1355_s1 + $0x274] ss:$24 sps:$4 sm:$0xff]   ;;  %v902_v46 = vld [vmem:[%s1355_s1 + $0x270] ss:$24 sps:$4 sm:$0xff]  }
  0x10   :  { %638 = vmatprep.subr.bf16.mxu0 %v873_v8  ;;  %676 = vmatpush1.bf16.msra.mxu1 %v925_v24  ;;  %v959_v45 = vld [vmem:[%s1355_s1 + $0x18c] ss:$24 sps:$4 sm:$0xff]   ;;  %v961_v48 = vld [vmem:[%s1355_s1 + $0x188] ss:$24 sps:$4 sm:$0xff]   ;;  %v965_v49 = vld [vmem:[%s1355_s1 + $0x1bc] ss:$24 sps:$4 sm:$0xff]  }
  0x11   :  { %677 = vmatprep.subr.bf16.mxu1 %v929_v25  ;;  %v903_v47 = vld [vmem:[%s1355_s1 + $0x2a4] ss:$24 sps:$4 sm:$0xff]   ;;  %v905_v50 = vld [vmem:[%s1355_s1 + $0x2a0] ss:$24 sps:$4 sm:$0xff]   ;;  %v906_v51 = vld [vmem:[%s1355_s1 + $0x2d4] ss:$24 sps:$4 sm:$0xff]  }
  0x12   :  { %v967_v52 = vld [vmem:[%s1355_s1 + $0x1b8] ss:$24 sps:$4 sm:$0xff]   ;;  %v971_v53 = vld [vmem:[%s1355_s1 + $0x1ec] ss:$24 sps:$4 sm:$0xff]   ;;  %v973_v56 = vld [vmem:[%s1355_s1 + $0x1e8] ss:$24 sps:$4 sm:$0xff]  }
  0x13   :  { %639 = vmatpush1.bf16.msra.mxu0 %v875_v9  ;;  %v908_v54 = vld [vmem:[%s1355_s1 + $0x2d0] ss:$24 sps:$4 sm:$0xff]   ;;  %v916_v55 = vld [vmem:[%s1355_s1 + $0x14] ss:$24 sps:$4 sm:$0xff]   ;;  %v922_v60 = vld [vmem:[%s1355_s1 + $0x44] ss:$24 sps:$4 sm:$0xff]  }
  0x14   :  { %640 = vmatprep.subr.bf16.mxu0 %v876_v10  ;;  %678 = vmatpush1.bf16.msra.mxu1 %v931_v28  ;;  %v977_v58 = vld [vmem:[%s1355_s1 + $0x21c] ss:$24 sps:$4 sm:$0xff]   ;;  %v914_v59 = vld [vmem:[%s1355_s1 + $0x10] ss:$24 sps:$4 sm:$0xff]   ;;  %v983_v62 = vld [vmem:[%s1355_s1 + $0x24c] ss:$24 sps:$4 sm:$0xff]  }
  0x15   :  { %679 = vmatprep.subr.bf16.mxu1 %v935_v29  ;;  %v979_v61 = vld [vmem:[%s1355_s1 + $0x218] ss:$24 sps:$4 sm:$0xff]   ;;  %v928_v0 = vld [vmem:[%s1355_s1 + $0x74] ss:$24 sps:$4 sm:$0xff]   ;;  %v985_v1 = vld [vmem:[%s1355_s1 + $0x248] ss:$24 sps:$4 sm:$0xff]  }
  0x16   :  { %v920_v63 = vld [vmem:[%s1355_s1 + $0x40] ss:$24 sps:$4 sm:$0xff]   ;;  %v989_v2 = vld [vmem:[%s1355_s1 + $0x27c] ss:$24 sps:$4 sm:$0xff]   ;;  %v926_v3 = vld [vmem:[%s1355_s1 + $0x70] ss:$24 sps:$4 sm:$0xff]  }
  0x17   :  { %641 = vmatpush1.bf16.msra.mxu0 %v878_v11  ;;  %v934_v4 = vld [vmem:[%s1355_s1 + $0xa4] ss:$24 sps:$4 sm:$0xff]   ;;  %v991_v5 = vld [vmem:[%s1355_s1 + $0x278] ss:$24 sps:$4 sm:$0xff]   ;;  %v940_v8 = vld [vmem:[%s1355_s1 + $0xd4] ss:$24 sps:$4 sm:$0xff]  }
  0x18   :  { %642 = vmatprep.subr.bf16.mxu0 %v879_v12  ;;  %680 = vmatpush1.bf16.msra.mxu1 %v937_v32  ;;  %v995_v6 = vld [vmem:[%s1355_s1 + $0x2ac] ss:$24 sps:$4 sm:$0xff]   ;;  %v932_v7 = vld [vmem:[%s1355_s1 + $0xa0] ss:$24 sps:$4 sm:$0xff]   ;;  %v1001_v10 = vld [vmem:[%s1355_s1 + $0x2dc] ss:$24 sps:$4 sm:$0xff]  }
  0x19   :  { %681 = vmatprep.subr.bf16.mxu1 %v941_v33  ;;  %v997_v9 = vld [vmem:[%s1355_s1 + $0x2a8] ss:$24 sps:$4 sm:$0xff]   ;;  %v946_v12 = vld [vmem:[%s1355_s1 + $0x104] ss:$24 sps:$4 sm:$0xff]   ;;  %v1003_v13 = vld [vmem:[%s1355_s1 + $0x2d8] ss:$24 sps:$4 sm:$0xff]  }
  0x1a   :  { %v938_v11 = vld [vmem:[%s1355_s1 + $0xd0] ss:$24 sps:$4 sm:$0xff]   ;;  %v944_v14 = vld [vmem:[%s1355_s1 + $0x100] ss:$24 sps:$4 sm:$0xff]   ;;  %v952_v15 = vld [vmem:[%s1355_s1 + $0x134] ss:$24 sps:$4 sm:$0xff]  }
  0x1b   :  { %643 = vmatpush1.bf16.msra.mxu0 %v881_v16  ;;  %v950_v16 = vld [vmem:[%s1355_s1 + $0x130] ss:$24 sps:$4 sm:$0xff]   ;;  %v964_v19 = vld [vmem:[%s1355_s1 + $0x194] ss:$24 sps:$4 sm:$0xff]   ;;  %v968_v22 = vld [vmem:[%s1355_s1 + $0x1c0] ss:$24 sps:$4 sm:$0xff]  }
  0x1c   :  { %644 = vmatprep.subr.bf16.mxu0 %v882_v18  ;;  %682 = vmatpush1.bf16.msra.mxu1 %v943_v36  ;;  %v956_v18 = vld [vmem:[%s1355_s1 + $0x160] ss:$24 sps:$4 sm:$0xff]   ;;  %v962_v20 = vld [vmem:[%s1355_s1 + $0x190] ss:$24 sps:$4 sm:$0xff]   ;;  %v982_v25 = vld [vmem:[%s1355_s1 + $0x224] ss:$24 sps:$4 sm:$0xff]  }
  0x1d   :  { %683 = vmatprep.subr.bf16.mxu1 %v947_v37  ;;  %v974_v24 = vld [vmem:[%s1355_s1 + $0x1f0] ss:$24 sps:$4 sm:$0xff]   ;;  %v994_v29 = vld [vmem:[%s1355_s1 + $0x284] ss:$24 sps:$4 sm:$0xff]  }
  0x1e   :  { %v986_v28 = vld [vmem:[%s1355_s1 + $0x250] ss:$24 sps:$4 sm:$0xff]   ;;  %v1006_v33 = vld [vmem:[%s1355_s1 + $0x2e4] ss:$24 sps:$4 sm:$0xff]  }
  0x1f   :  { %645 = vmatpush1.bf16.msra.mxu0 %v884_v21  ;;  %v970_v21 = vld [vmem:[%s1355_s1 + $0x1c4] ss:$24 sps:$4 sm:$0xff]   ;;  %v998_v32 = vld [vmem:[%s1355_s1 + $0x2b0] ss:$24 sps:$4 sm:$0xff]  }
  0x20   :  { %646 = vmatprep.subr.bf16.mxu0 %v885_v23  ;;  %684 = vmatpush1.bf16.msra.mxu1 %v949_v40  ;;  %v976_v23 = vld [vmem:[%s1355_s1 + $0x1f4] ss:$24 sps:$4 sm:$0xff]  }
  0x21   :  { %685 = vmatprep.subr.bf16.mxu1 %v953_v41 }
  0x23   :  { %647 = vmatpush1.bf16.msra.mxu0 %v887_v26  ;;  %v980_v26 = vld [vmem:[%s1355_s1 + $0x220] ss:$24 sps:$4 sm:$0xff]  }
  0x24   :  { %648 = vmatprep.subr.bf16.mxu0 %v888_v27  ;;  %686 = vmatpush1.bf16.msra.mxu1 %v955_v44  ;;  %v988_v27 = vld [vmem:[%s1355_s1 + $0x254] ss:$24 sps:$4 sm:$0xff]  }
  0x25   :  { %687 = vmatprep.subr.bf16.mxu1 %v959_v45 }
  0x27   :  { %649 = vmatpush1.bf16.msra.mxu0 %v890_v30  ;;  %v992_v30 = vld [vmem:[%s1355_s1 + $0x280] ss:$24 sps:$4 sm:$0xff]  }
  0x28   :  { %650 = vmatprep.subr.bf16.mxu0 %v891_v31  ;;  %688 = vmatpush1.bf16.msra.mxu1 %v961_v48  ;;  %v1000_v31 = vld [vmem:[%s1355_s1 + $0x2b4] ss:$24 sps:$4 sm:$0xff]  }
  0x29   :  { %689 = vmatprep.subr.bf16.mxu1 %v965_v49 }
  0x2b   :  { %651 = vmatpush1.bf16.msra.mxu0 %v893_v34  ;;  %v1004_v34 = vld [vmem:[%s1355_s1 + $0x2e0] ss:$24 sps:$4 sm:$0xff]  }
  0x2c   :  { %652 = vmatprep.subr.bf16.mxu0 %v894_v35  ;;  %690 = vmatpush1.bf16.msra.mxu1 %v967_v52  ;;  %v113_v35 = vlaneseq }
  0x2d   :  { %691 = vmatprep.subr.bf16.mxu1 %v971_v53 }
  0x2e   :  { %v114_v36 = vshrl.u32 %v113_v35, 7 }
  0x2f   :  { %653 = vmatpush1.bf16.msra.mxu0 %v896_v38  ;;  %v111_v38 = vld [vmem:[%s1357_s2] sm:$0x3f] }
  0x30   :  { %654 = vmatprep.subr.bf16.mxu0 %v897_v39  ;;  %692 = vmatpush1.bf16.msra.mxu1 %v973_v56  ;;  %v115_v37 = vsub.s32 0, %v114_v36  ;;  %v119_v39 = vsub.s32 1, %v114_v36  ;;  %v123_v48 = vsub.s32 2, %v114_v36  ;;  %v127_v49 = vsub.s32 3, %v114_v36 }
  0x31   :  { %693 = vmatprep.subr.bf16.mxu1 %v977_v58  ;;  %v131_v58 = vsub.s32 4, %v114_v36 }
  0x32   :  { %v116_v40 = vrot.slane %v111_v38, %v115_v37  ;;  %v120_v41 = vrot.slane %v111_v38, %v119_v39 }
  0x33   :  { %655 = vmatpush1.bf16.msra.mxu0 %v899_v42 }
  0x34   :  { %656 = vmatprep.subr.bf16.mxu0 %v900_v43  ;;  %694 = vmatpush1.bf16.msra.mxu1 %v979_v61 }
  0x35   :  { %695 = vmatprep.subr.bf16.mxu1 %v983_v62 }
  0x37   :  { %657 = vmatpush1.bf16.msra.mxu0 %v902_v46 }
  0x38   :  { %658 = vmatprep.subr.bf16.mxu0 %v903_v47  ;;  %696 = vmatpush1.bf16.msra.mxu1 %v985_v1 }
  0x39   :  { %697 = vmatprep.subr.bf16.mxu1 %v989_v2 }
  0x3b   :  { %659 = vmatpush1.bf16.msra.mxu0 %v905_v50  ;;  %v124_v50 = vrot.slane %v111_v38, %v123_v48 }
  0x3c   :  { %660 = vmatprep.subr.bf16.mxu0 %v906_v51  ;;  %698 = vmatpush1.bf16.msra.mxu1 %v991_v5  ;;  %v128_v51 = vrot.slane %v111_v38, %v127_v49 }
  0x3d   :  { %699 = vmatprep.subr.bf16.mxu1 %v995_v6 }
  0x3f   :  { %661 = vmatpush1.bf16.msra.mxu0 %v908_v54 }
  0x40   :  { %712 = vmatprep.subr.bf16.mxu0 %v916_v55  ;;  %700 = vmatpush1.bf16.msra.mxu1 %v997_v9 }
  0x41   :  { %701 = vmatprep.subr.bf16.mxu1 %v1001_v10 }
  0x42   :  { %663 = vmatmul.mubr.bf16.vlgmr.msra.gmra.mrb[0].mxu0 %v1205_v57 }
  0x43   :  { %713 = vmatpush1.bf16.msra.mxu0 %v914_v59  ;;  %744 = vmatprep.mubr.bf16.mxu0 %v1082_v17  ;;  %v958_v17 = vld [vmem:[%s1355_s1 + $0x164] ss:$24 sps:$4 sm:$0xff]   ;;  %v135_v59 = vsub.s32 5, %v114_v36 }
  0x44   :  { %714 = vmatprep.subr.bf16.mxu0 %v922_v60  ;;  %702 = vmatpush1.bf16.msra.mxu1 %v1003_v13  ;;  %v132_v60 = vrot.slane %v111_v38, %v131_v58 }
  0x45   :  { %v136_v61 = vrot.slane %v111_v38, %v135_v59 }
  0x47   :  { %715 = vmatpush1.bf16.msra.mxu0 %v920_v63  ;;  %704 = vmatmul.mubr.bf16.vlgmr.msra.gmra.mrb[0].mxu1 %v1205_v57 }
  0x48   :  { %716 = vmatprep.subr.bf16.mxu0 %v928_v0 }
  0x4b   :  { %717 = vmatpush1.bf16.msra.mxu0 %v926_v3 }
  0x4c   :  { %718 = vmatprep.subr.bf16.mxu0 %v934_v4 }
  0x4f   :  { %719 = vmatpush1.bf16.msra.mxu0 %v932_v7 }
  0x50   :  { %720 = vmatprep.subr.bf16.mxu0 %v940_v8 }
  0x53   :  { %721 = vmatpush1.bf16.msra.mxu0 %v938_v11 }
  0x54   :  { %722 = vmatprep.subr.bf16.mxu0 %v946_v12 }
  0x57   :  { %723 = vmatpush1.bf16.msra.mxu0 %v944_v14 }
  0x58   :  { %724 = vmatprep.subr.bf16.mxu0 %v952_v15 }
  0x5b   :  { %725 = vmatpush1.bf16.msra.mxu0 %v950_v16 }
  0x5c   :  { %726 = vmatprep.subr.bf16.mxu0 %v958_v17 }
  0x5f   :  { %727 = vmatpush1.bf16.msra.mxu0 %v956_v18 }
  0x60   :  { %728 = vmatprep.subr.bf16.mxu0 %v964_v19 }
  0x63   :  { %729 = vmatpush1.bf16.msra.mxu0 %v962_v20 }
  0x64   :  { %730 = vmatprep.subr.bf16.mxu0 %v970_v21 }
  0x67   :  { %731 = vmatpush1.bf16.msra.mxu0 %v968_v22 }
  0x68   :  { %732 = vmatprep.subr.bf16.mxu0 %v976_v23 }
  0x6b   :  { %733 = vmatpush1.bf16.msra.mxu0 %v974_v24 }
  0x6c   :  { %734 = vmatprep.subr.bf16.mxu0 %v982_v25 }
  0x6f   :  { %735 = vmatpush1.bf16.msra.mxu0 %v980_v26 }
  0x70   :  { %736 = vmatprep.subr.bf16.mxu0 %v988_v27 }
  0x73   :  { %737 = vmatpush1.bf16.msra.mxu0 %v986_v28 }
  0x74   :  { %738 = vmatprep.subr.bf16.mxu0 %v994_v29 }
  0x77   :  { %739 = vmatpush1.bf16.msra.mxu0 %v992_v30 }
  0x78   :  { %740 = vmatprep.subr.bf16.mxu0 %v1000_v31 }
  0x7b   :  { %741 = vmatpush1.bf16.msra.mxu0 %v998_v32 }
  0x7c   :  { %742 = vmatprep.subr.bf16.mxu0 %v1006_v33 }
  0x7f   :  { %743 = vmatpush1.bf16.msra.mxu0 %v1004_v34 }
  0x82   :  { %745 = vmatmul.mubr.bf16.vlgmr.msra.gmra.mrb[4].mxu0 %v1205_v57 }
 0x115   :  { %v664_v42 = vpop.f32.mrb[0].mxu0 }
 0x116   :  { %v665_v43 = vadd.f32 %v664_v42, %v116_v40  ;;  %v666_v44 = vpop.f32.mrb[1].mxu0 }
 0x117   :  { %v667_v45 = vadd.f32 %v666_v44, %v120_v41  ;;  %v668_v46 = vpop.f32.mrb[2].mxu0 }
 0x118   :  { %753 = vst [vmem:[%s1358_s3] sm:$0xff] %v665_v43  ;;  %v669_v47 = vpop.f32.mrb[3].mxu0 }
 0x119   :  { %754 = vst [vmem:[%s1358_s3 + $0x8] sm:$0xff] %v667_v45 }
 0x11a   :  { %v705_v52 = vpop.f32.mrb[0].mxu1 }
 0x11b   :  { %v706_v53 = vadd.f32 %v705_v52, %v124_v50  ;;  %v707_v54 = vpop.f32.mrb[1].mxu1 }
 0x11c   :  { %v708_v55 = vadd.f32 %v707_v54, %v128_v51  ;;  %v709_v56 = vpop.f32.mrb[2].mxu1 }
 0x11d   :  { %755 = vst [vmem:[%s1358_s3 + $0x10] sm:$0xff] %v706_v53  ;;  %v710_v57 = vpop.f32.mrb[3].mxu1 }
 0x11e   :  { %756 = vst [vmem:[%s1358_s3 + $0x18] sm:$0xff] %v708_v55 }
 0x155   :  { %v746_v62 = vpop.f32.mrb[4].mxu0 }
 0x156   :  { %v747_v63 = vadd.f32 %v746_v62, %v132_v60  ;;  %v748_v0 = vpop.f32.mrb[5].mxu0 }
 0x157   :  { %v749_v1 = vadd.f32 %v748_v0, %v136_v61  ;;  %v750_v2 = vpop.f32.mrb[6].mxu0 }
 0x158   :  { %757 = vst [vmem:[%s1358_s3 + $0x20] sm:$0xff] %v747_v63  ;;  %v751_v3 = vpop.f32.mrb[7].mxu0 }
 0x159   :  { %758 = vst [vmem:[%s1358_s3 + $0x28] sm:$0xff] %v749_v1 }

// kernel: gruse_forward.44
= control target key start
LH: loop header
LB: loop body
LE: loop exit
PB: predicated region body
PF: predicated region fallthrough
CT: control target
= control target key end

     0   :  { %s80_s0 = inlined_call_operand.vmem [shape: f32[8,128], index: 0, kind: input, shape index: {}]   ;;  %s81_s1 = inlined_call_operand.vmem [shape: f32[1,128], index: 1, kind: input, shape index: {}]   ;;  %s82_s2 = inlined_call_operand.vmem [shape: f32[1,128], index: 2, kind: input, shape index: {}]   ;;  %s83_s3 = inlined_call_operand.vmem [shape: bf16[8,128], index: 3, kind: output, shape index: {}]  }
   0x1   :  { %v14_v0 = vld [vmem:[%s80_s0] sm:$0xff] }
   0x2   :  { %v43_v1 = vld [vmem:[%s81_s1] ss:$0 sm:$0xff] }
   0x3   :  { %v44_v2 = vld [vmem:[%s82_s2] ss:$0 sm:$0xff]  ;;  %v22_v3 = vmul.f32 %v43_v1, %v14_v0 }
   0x5   :  { %v30_v4 = vadd.f32 %v44_v2, %v22_v3 }
   0x7   :  { %v32_v5 = vmin.f32 %v30_v4, 0.0  ;;  %vm31_vm0 = vcmp.gt.f32.partialorder %v30_v4, 0.0 }
   0x9   :  { %v33_v6 = vmul.f32 1.442695, %v32_v5 }
   0xb   :  { %46 = vpow2.f32 %v33_v6 }
  0x15   :  { %v47_v7 = vpop.eup %46 }
  0x16   :  { %v45_v8 = vadd.f32 -1.0, %v47_v7 }
  0x18   :  { %v36_v9 = vsel %vm31_vm0, %v30_v4, %v45_v8 }
  0x19   :  { %v37_v10 = vpack.c.bf16 %v36_v9, %v36_v9 }
  0x1b   :  { %38 = vst [vmem:[%s83_s3] sm:$0xf] %v37_v10 }

// kernel: gruse_forward.42
= control target key start
LH: loop header
LB: loop body
LE: loop exit
PB: predicated region body
PF: predicated region fallthrough
CT: control target
= control target key end

     0   :  { %s1234_s1 = inlined_call_operand.vmem [shape: bf16[1024,128], index: 1, kind: input, shape index: {}]   ;;  %s1235_s0 = inlined_call_operand.vmem [shape: bf16[8,1024], index: 0, kind: input, shape index: {}]   ;;  %s1236_s2 = inlined_call_operand.vmem [shape: f32[1,128], index: 2, kind: input, shape index: {}]   ;;  %s1237_s3 = inlined_call_operand.vmem [shape: f32[8,128], index: 3, kind: output, shape index: {0}]   ;;  %s1238_s4 = inlined_call_operand.vmem [shape: f32[8,128], index: 4, kind: output, shape index: {1}]  }
   0x1   :  { %v924_v0 = vld [vmem:[%s1234_s1 + $0x40] sm:$0xff]   ;;  %v928_v4 = vld [vmem:[%s1234_s1 + $0x48] sm:$0xff]   ;;  %v932_v8 = vld [vmem:[%s1234_s1 + $0x50] sm:$0xff]  }
   0x2   :  { %v925_v1 = vld [vmem:[%s1234_s1 + $0xc0] sm:$0xff]   ;;  %836 = vmatprep.subr.bf16.mxu0 %v924_v0  ;;  %v929_v5 = vld [vmem:[%s1234_s1 + $0xc8] sm:$0xff]   ;;  %v933_v9 = vld [vmem:[%s1234_s1 + $0xd0] sm:$0xff]  }
   0x3   :  { %v926_v2 = vld [vmem:[%s1234_s1] sm:$0xff]   ;;  %858 = vmatprep.subr.bf16.mxu1 %v925_v1  ;;  %v930_v6 = vld [vmem:[%s1234_s1 + $0x8] sm:$0xff]   ;;  %v934_v10 = vld [vmem:[%s1234_s1 + $0x10] sm:$0xff]  }
   0x4   :  { %v927_v3 = vld [vmem:[%s1234_s1 + $0x80] sm:$0xff]   ;;  %837 = vmatpush3.bf16.msra.mxu0 %v926_v2  ;;  %v931_v7 = vld [vmem:[%s1234_s1 + $0x88] sm:$0xff]   ;;  %v935_v11 = vld [vmem:[%s1234_s1 + $0x90] sm:$0xff]  }
   0x5   :  { %859 = vmatpush3.bf16.msra.mxu1 %v927_v3  ;;  %838 = vmatprep.subr.bf16.mxu0 %v928_v4  ;;  %v936_v12 = vld [vmem:[%s1234_s1 + $0x58] sm:$0xff]   ;;  %v940_v16 = vld [vmem:[%s1234_s1 + $0x60] sm:$0xff]   ;;  %v944_v20 = vld [vmem:[%s1234_s1 + $0x68] sm:$0xff]  }
   0x6   :  { %860 = vmatprep.subr.bf16.mxu1 %v929_v5  ;;  %v937_v13 = vld [vmem:[%s1234_s1 + $0xd8] sm:$0xff]   ;;  %v941_v17 = vld [vmem:[%s1234_s1 + $0xe0] sm:$0xff]   ;;  %v945_v21 = vld [vmem:[%s1234_s1 + $0xe8] sm:$0xff]  }
   0x7   :  { %v938_v14 = vld [vmem:[%s1234_s1 + $0x18] sm:$0xff]   ;;  %v942_v18 = vld [vmem:[%s1234_s1 + $0x20] sm:$0xff]   ;;  %v946_v22 = vld [vmem:[%s1234_s1 + $0x28] sm:$0xff]  }
   0x8   :  { %839 = vmatpush3.bf16.msra.mxu0 %v930_v6  ;;  %v939_v15 = vld [vmem:[%s1234_s1 + $0x98] sm:$0xff]   ;;  %v943_v19 = vld [vmem:[%s1234_s1 + $0xa0] sm:$0xff]   ;;  %v947_v23 = vld [vmem:[%s1234_s1 + $0xa8] sm:$0xff]  }
   0x9   :  { %861 = vmatpush3.bf16.msra.mxu1 %v931_v7  ;;  %840 = vmatprep.subr.bf16.mxu0 %v932_v8  ;;  %v948_v24 = vld [vmem:[%s1234_s1 + $0x70] sm:$0xff]   ;;  %v952_v28 = vld [vmem:[%s1234_s1 + $0x78] sm:$0xff]   ;;  %v17_v32 = vld [vmem:[%s1235_s0] sm:$0xff] }
   0xa   :  { %862 = vmatprep.subr.bf16.mxu1 %v933_v9  ;;  %v949_v25 = vld [vmem:[%s1234_s1 + $0xf0] sm:$0xff]   ;;  %v953_v29 = vld [vmem:[%s1234_s1 + $0xf8] sm:$0xff]   ;;  %v18_v33 = vld [vmem:[%s1235_s0 + $0x8] sm:$0xff]  ;;  %v764_v34 = vcombine.low %v17_v32, %v17_v32  ;;  %v765_v35 = vcombine.high %v17_v32, %v17_v32 }
   0xb   :  { %v950_v26 = vld [vmem:[%s1234_s1 + $0x30] sm:$0xff]   ;;  %v954_v30 = vld [vmem:[%s1234_s1 + $0x38] sm:$0xff]   ;;  %v766_v36 = vcombine.low %v18_v33, %v18_v33  ;;  %v767_v37 = vcombine.high %v18_v33, %v18_v33  ;;  %v960_v38 = vld [vmem:[%s1234_s1 + $0x140] sm:$0xff]  }
   0xc   :  { %841 = vmatpush3.bf16.msra.mxu0 %v934_v10  ;;  %v951_v27 = vld [vmem:[%s1234_s1 + $0xb0] sm:$0xff]   ;;  %v955_v31 = vld [vmem:[%s1234_s1 + $0xb8] sm:$0xff]   ;;  %v961_v39 = vld [vmem:[%s1234_s1 + $0x1c0] sm:$0xff]   ;;  %600 = vmatprep.mubr.bf16.mxu0 %v765_v35 }
   0xd   :  { %863 = vmatpush3.bf16.msra.mxu1 %v935_v11  ;;  %842 = vmatprep.subr.bf16.mxu0 %v936_v12  ;;  %v962_v40 = vld [vmem:[%s1234_s1 + $0x100] sm:$0xff]   ;;  %v964_v42 = vld [vmem:[%s1234_s1 + $0x148] sm:$0xff]   ;;  %v968_v46 = vld [vmem:[%s1234_s1 + $0x150] sm:$0xff]  }
   0xe   :  { %864 = vmatprep.subr.bf16.mxu1 %v937_v13  ;;  %640 = vmatprep.mubr.bf16.mxu1 %v767_v37  ;;  %v963_v41 = vld [vmem:[%s1234_s1 + $0x180] sm:$0xff]   ;;  %v965_v43 = vld [vmem:[%s1234_s1 + $0x1c8] sm:$0xff]   ;;  %v969_v47 = vld [vmem:[%s1234_s1 + $0x1d0] sm:$0xff]  }
   0xf   :  { %v966_v44 = vld [vmem:[%s1234_s1 + $0x108] sm:$0xff]   ;;  %v970_v48 = vld [vmem:[%s1234_s1 + $0x110] sm:$0xff]   ;;  %v972_v50 = vld [vmem:[%s1234_s1 + $0x158] sm:$0xff]  }
  0x10   :  { %843 = vmatpush3.bf16.msra.mxu0 %v938_v14  ;;  %v967_v45 = vld [vmem:[%s1234_s1 + $0x188] sm:$0xff]   ;;  %v971_v49 = vld [vmem:[%s1234_s1 + $0x190] sm:$0xff]   ;;  %v973_v51 = vld [vmem:[%s1234_s1 + $0x1d8] sm:$0xff]  }
  0x11   :  { %865 = vmatpush3.bf16.msra.mxu1 %v939_v15  ;;  %844 = vmatprep.subr.bf16.mxu0 %v940_v16  ;;  %v974_v52 = vld [vmem:[%s1234_s1 + $0x118] sm:$0xff]   ;;  %v976_v54 = vld [vmem:[%s1234_s1 + $0x160] sm:$0xff]   ;;  %v980_v58 = vld [vmem:[%s1234_s1 + $0x168] sm:$0xff]  }
  0x12   :  { %866 = vmatprep.subr.bf16.mxu1 %v941_v17  ;;  %v975_v53 = vld [vmem:[%s1234_s1 + $0x198] sm:$0xff]   ;;  %v977_v55 = vld [vmem:[%s1234_s1 + $0x1e0] sm:$0xff]   ;;  %v981_v59 = vld [vmem:[%s1234_s1 + $0x1e8] sm:$0xff]  }
  0x13   :  { %v978_v56 = vld [vmem:[%s1234_s1 + $0x120] sm:$0xff]   ;;  %v982_v60 = vld [vmem:[%s1234_s1 + $0x128] sm:$0xff]   ;;  %v984_v62 = vld [vmem:[%s1234_s1 + $0x170] sm:$0xff]  }
  0x14   :  { %845 = vmatpush3.bf16.msra.mxu0 %v942_v18  ;;  %v979_v57 = vld [vmem:[%s1234_s1 + $0x1a0] sm:$0xff]   ;;  %v983_v61 = vld [vmem:[%s1234_s1 + $0x1a8] sm:$0xff]   ;;  %v985_v63 = vld [vmem:[%s1234_s1 + $0x1f0] sm:$0xff]  }
  0x15   :  { %867 = vmatpush3.bf16.msra.mxu1 %v943_v19  ;;  %846 = vmatprep.subr.bf16.mxu0 %v944_v20  ;;  %v986_v0 = vld [vmem:[%s1234_s1 + $0x130] sm:$0xff]   ;;  %v988_v2 = vld [vmem:[%s1234_s1 + $0x178] sm:$0xff]   ;;  %v763_v14 = vld [vmem:[%s1236_s2] ss:$0 sm:$0xff] }
  0x16   :  { %868 = vmatprep.subr.bf16.mxu1 %v945_v21  ;;  %v987_v1 = vld [vmem:[%s1234_s1 + $0x1b0] sm:$0xff]   ;;  %v989_v3 = vld [vmem:[%s1234_s1 + $0x1f8] sm:$0xff]  }
  0x17   :  { %v990_v4 = vld [vmem:[%s1234_s1 + $0x138] sm:$0xff]   ;;  %v19_v6 = vld [vmem:[%s1235_s0 + $0x10] sm:$0xff] }
  0x18   :  { %847 = vmatpush3.bf16.msra.mxu0 %v946_v22  ;;  %v991_v5 = vld [vmem:[%s1234_s1 + $0x1b8] sm:$0xff]   ;;  %v768_v7 = vcombine.low %v19_v6, %v19_v6  ;;  %v769_v8 = vcombine.high %v19_v6, %v19_v6 }
  0x19   :  { %869 = vmatpush3.bf16.msra.mxu1 %v947_v23  ;;  %848 = vmatprep.subr.bf16.mxu0 %v948_v24  ;;  %v20_v9 = vld [vmem:[%s1235_s0 + $0x18] sm:$0xff] }
  0x1a   :  { %870 = vmatprep.subr.bf16.mxu1 %v949_v25  ;;  %v770_v10 = vcombine.low %v20_v9, %v20_v9  ;;  %v771_v11 = vcombine.high %v20_v9, %v20_v9 }
  0x1c   :  { %849 = vmatpush3.bf16.msra.mxu0 %v950_v26 }
  0x1d   :  { %871 = vmatpush3.bf16.msra.mxu1 %v951_v27  ;;  %850 = vmatprep.subr.bf16.mxu0 %v952_v28 }
  0x1e   :  { %872 = vmatprep.subr.bf16.mxu1 %v953_v29 }
  0x20   :  { %851 = vmatpush3.bf16.msra.mxu0 %v954_v30 }
  0x21   :  { %873 = vmatpush3.bf16.msra.mxu1 %v955_v31  ;;  %880 = vmatprep.subr.bf16.mxu0 %v960_v38 }
  0x22   :  { %902 = vmatprep.subr.bf16.mxu1 %v961_v39 }
  0x23   :  { %601 = vmatmul.mubr.bf16.vlgmr.msra.gmra.mrb[0].mxu0 %v764_v34 }
  0x24   :  { %641 = vmatmul.mubr.bf16.vlgmr.msra.gmra.mrb[0].mxu1 %v766_v36  ;;  %881 = vmatpush3.bf16.msra.mxu0 %v962_v40 }
  0x25   :  { %903 = vmatpush3.bf16.msra.mxu1 %v963_v41  ;;  %882 = vmatprep.subr.bf16.mxu0 %v964_v42  ;;  %v729_v41 = vlaneseq }
  0x26   :  { %904 = vmatprep.subr.bf16.mxu1 %v965_v43  ;;  %680 = vmatprep.mubr.bf16.mxu0 %v769_v8 }
  0x27   :  { %720 = vmatprep.mubr.bf16.mxu1 %v771_v11 }
  0x28   :  { %883 = vmatpush3.bf16.msra.mxu0 %v966_v44 }
  0x29   :  { %905 = vmatpush3.bf16.msra.mxu1 %v967_v45  ;;  %884 = vmatprep.subr.bf16.mxu0 %v968_v46  ;;  %v730_v46 = vshrl.u32 %v729_v41, 7 }
  0x2a   :  { %906 = vmatprep.subr.bf16.mxu1 %v969_v47 }
  0x2b   :  { %vm749_vm0 = vcmp.eq.s32.totalorder %v730_v46, 0  ;;  %vm751_vm1 = vcmp.eq.s32.totalorder %v730_v46, 1 }
  0x2c   :  { %885 = vmatpush3.bf16.msra.mxu0 %v970_v48 }
  0x2d   :  { %907 = vmatpush3.bf16.msra.mxu1 %v971_v49  ;;  %886 = vmatprep.subr.bf16.mxu0 %v972_v50 }
  0x2e   :  { %908 = vmatprep.subr.bf16.mxu1 %v973_v51 }
  0x30   :  { %887 = vmatpush3.bf16.msra.mxu0 %v974_v52 }
  0x31   :  { %909 = vmatpush3.bf16.msra.mxu1 %v975_v53  ;;  %888 = vmatprep.subr.bf16.mxu0 %v976_v54 }
  0x32   :  { %910 = vmatprep.subr.bf16.mxu1 %v977_v55 }
  0x34   :  { %889 = vmatpush3.bf16.msra.mxu0 %v978_v56 }
  0x35   :  { %911 = vmatpush3.bf16.msra.mxu1 %v979_v57  ;;  %890 = vmatprep.subr.bf16.mxu0 %v980_v58 }
  0x36   :  { %912 = vmatprep.subr.bf16.mxu1 %v981_v59 }
  0x38   :  { %891 = vmatpush3.bf16.msra.mxu0 %v982_v60 }
  0x39   :  { %913 = vmatpush3.bf16.msra.mxu1 %v983_v61  ;;  %892 = vmatprep.subr.bf16.mxu0 %v984_v62 }
  0x3a   :  { %914 = vmatprep.subr.bf16.mxu1 %v985_v63 }
  0x3c   :  { %893 = vmatpush3.bf16.msra.mxu0 %v986_v0 }
  0x3d   :  { %915 = vmatpush3.bf16.msra.mxu1 %v987_v1  ;;  %894 = vmatprep.subr.bf16.mxu0 %v988_v2 }
  0x3e   :  { %916 = vmatprep.subr.bf16.mxu1 %v989_v3 }
  0x40   :  { %895 = vmatpush3.bf16.msra.mxu0 %v990_v4 }
  0x41   :  { %917 = vmatpush3.bf16.msra.mxu1 %v991_v5 }
  0x43   :  { %681 = vmatmul.mubr.bf16.vlgmr.msra.gmra.mrb[4].mxu0 %v768_v7 }
  0x44   :  { %721 = vmatmul.mubr.bf16.vlgmr.msra.gmra.mrb[4].mxu1 %v770_v10 }
  0xf6   :  { %v852_v12 = vpop.f32.mrb[0].mxu0 }
  0xf7   :  { %v874_v13 = vpop.f32.mrb[0].mxu1  ;;  %v853_v15 = vpop.f32.mrb[1].mxu0 }
  0xf8   :  { %v875_v16 = vpop.f32.mrb[1].mxu1  ;;  %v854_v17 = vadd.f32 %v853_v15, %v852_v12  ;;  %v855_v19 = vpop.f32.mrb[2].mxu0 }
  0xf9   :  { %v876_v18 = vadd.f32 %v875_v16, %v874_v13  ;;  %v877_v20 = vpop.f32.mrb[2].mxu1  ;;  %v856_v21 = vpop.f32.mrb[3].mxu0 }
  0xfa   :  { %v878_v22 = vpop.f32.mrb[3].mxu1  ;;  %v603_v23 = vadd.f32 %v854_v17, %v763_v14 }
  0xfc   :  { %v643_v24 = vadd.f32 %v876_v18, %v603_v23 }
 0x116   :  { %v896_v25 = vpop.f32.mrb[4].mxu0 }
 0x117   :  { %v918_v26 = vpop.f32.mrb[4].mxu1  ;;  %v897_v27 = vpop.f32.mrb[5].mxu0 }
 0x118   :  { %v919_v28 = vpop.f32.mrb[5].mxu1  ;;  %v898_v29 = vadd.f32 %v897_v27, %v896_v25  ;;  %v899_v31 = vpop.f32.mrb[6].mxu0 }
 0x119   :  { %v920_v30 = vadd.f32 %v919_v28, %v918_v26  ;;  %v921_v32 = vpop.f32.mrb[6].mxu1  ;;  %v900_v33 = vpop.f32.mrb[7].mxu0 }
 0x11a   :  { %v922_v34 = vpop.f32.mrb[7].mxu1  ;;  %v683_v35 = vadd.f32 %v898_v29, %v643_v24 }
 0x11c   :  { %v723_v36 = vadd.f32 %v920_v30, %v683_v35 }
 0x11e   :  { %728 = vst [vmem:[%s1237_s3] sm:$0xff] %v723_v36  ;;  %v736_v37 = vrot.slane %v723_v36, 4  ;;  %v742_v38 = vmul.f32 %v723_v36, %v723_v36 }
 0x120   :  { %v737_v39 = vadd.f32 %v736_v37, %v723_v36  ;;  %v743_v40 = vrot.slane %v742_v38, 4 }
 0x122   :  { %v738_v42 = vrot.slane %v737_v39, 2  ;;  %v744_v43 = vadd.f32 %v743_v40, %v742_v38 }
 0x124   :  { %v739_v44 = vadd.f32 %v738_v42, %v737_v39  ;;  %v745_v45 = vrot.slane %v744_v43, 2 }
 0x126   :  { %v740_v47 = vrot.slane %v739_v44, 1  ;;  %v746_v48 = vadd.f32 %v745_v45, %v744_v43 }
 0x128   :  { %v741_v49 = vadd.f32 %v740_v47, %v739_v44  ;;  %v747_v50 = vrot.slane %v746_v48, 1 }
 0x12a   :  { %v748_v51 = vadd.f32 %v747_v50, %v746_v48  ;;  %v750_v52 = vsel %vm749_vm0, %v741_v49, 0.0 }
 0x12c   :  { %v752_v53 = vsel %vm751_vm1, %v748_v51, 0.0 }
 0x12d   :  { %v753_v54 = vadd.f32 %v752_v53, %v750_v52 }
 0x12f   :  { %754 = vst [vmem:[%s1238_s4] sm:$0xff] %v753_v54 }

// kernel: gruse_forward.41
= control target key start
LH: loop header
LB: loop body
LE: loop exit
PB: predicated region body
PF: predicated region fallthrough
CT: control target
= control target key end

     0   :  { %v3174_v0 = vmov 0.0   ;;  %s3215_s24 = smov 0   ;;  %s4182_s0 = inlined_call_operand.vmem [shape: f32[4,8,768], index: 0, kind: input, shape index: {}]   ;;  %s4183_s1 = inlined_call_operand.vmem [shape: bf16[256,768], index: 1, kind: input, shape index: {}]   ;;  %s4184_s2 = inlined_call_operand.vmem [shape: f32[1,768], index: 2, kind: input, shape index: {}]   ;;  %s4185_s3 = inlined_call_operand.vmem [shape: bf16[256,768], index: 3, kind: input, shape index: {}]   ;;  %s4186_s4 = inlined_call_operand.vmem [shape: f32[1,768], index: 4, kind: input, shape index: {}]   ;;  %s4187_s5 = inlined_call_operand.vmem [shape: bf16[256,768], index: 5, kind: input, shape index: {}]   ;;  %s4188_s6 = inlined_call_operand.vmem [shape: f32[1,768], index: 6, kind: input, shape index: {}]   ;;  %s4189_s7 = inlined_call_operand.vmem [shape: bf16[4,8,256], index: 7, kind: output, shape index: {}]  }
   0x1   :  { %30 = vst [vmem:[#allocation2] sm:$0xff] %v3174_v0  ;;  %31 = vst [vmem:[#allocation2 + $0x8] sm:$0xff] %v3174_v0 }
   0x2   :  { %32 = vst [vmem:[#allocation3] sm:$0xff] %v3174_v0  ;;  %33 = vst [vmem:[#allocation3 + $0x8] sm:$0xff] %v3174_v0 }
   0x3 LB: > { %v2693_v1 = vld [vmem:[%s4183_s1 + $0x4] ss:$24 sps:$4 sm:$0xff]   ;;  %v2695_v2 = vld [vmem:[%s4183_s1] ss:$24 sps:$4 sm:$0xff]   ;;  %v2696_v3 = vld [vmem:[%s4183_s1 + $0x34] ss:$24 sps:$4 sm:$0xff]   ;;  %s3172_s24 = sphi %s3215_s24, %s39_s24  }
   0x4   : > { %663 = vmatprep.subr.bf16.mxu0 %v2693_v1  ;;  %v2698_v4 = vld [vmem:[%s4183_s1 + $0x30] ss:$24 sps:$4 sm:$0xff]   ;;  %v2699_v5 = vld [vmem:[%s4183_s1 + $0x64] ss:$24 sps:$4 sm:$0xff]   ;;  %v2701_v6 = vld [vmem:[%s4183_s1 + $0x60] ss:$24 sps:$4 sm:$0xff]  }
   0x5   : > { %664 = vmatpush1.bf16.msra.mxu0 %v2695_v2  ;;  %v2702_v7 = vld [vmem:[%s4183_s1 + $0x94] ss:$24 sps:$4 sm:$0xff]   ;;  %v2704_v8 = vld [vmem:[%s4183_s1 + $0x90] ss:$24 sps:$4 sm:$0xff]   ;;  %v2705_v9 = vld [vmem:[%s4183_s1 + $0xc4] ss:$24 sps:$4 sm:$0xff]  }
   0x6   : > { %665 = vmatprep.subr.bf16.mxu0 %v2696_v3  ;;  %v2707_v10 = vld [vmem:[%s4183_s1 + $0xc0] ss:$24 sps:$4 sm:$0xff]   ;;  %v2708_v11 = vld [vmem:[%s4183_s1 + $0xf4] ss:$24 sps:$4 sm:$0xff]   ;;  %v2710_v14 = vld [vmem:[%s4183_s1 + $0xf0] ss:$24 sps:$4 sm:$0xff]  }
   0x7   : > { %v2729_v12 = vld [vmem:[%s4183_s1 + $0xc] ss:$24 sps:$4 sm:$0xff]   ;;  %v2731_v13 = vld [vmem:[%s4183_s1 + $0x8] ss:$24 sps:$4 sm:$0xff]   ;;  %v2735_v15 = vld [vmem:[%s4183_s1 + $0x3c] ss:$24 sps:$4 sm:$0xff]  }
   0x8   : > { %704 = vmatprep.subr.bf16.mxu1 %v2729_v12  ;;  %v2737_v16 = vld [vmem:[%s4183_s1 + $0x38] ss:$24 sps:$4 sm:$0xff]   ;;  %v2711_v17 = vld [vmem:[%s4183_s1 + $0x124] ss:$24 sps:$4 sm:$0xff]   ;;  %v2714_v20 = vld [vmem:[%s4183_s1 + $0x154] ss:$24 sps:$4 sm:$0xff]  }
   0x9   : > { %666 = vmatpush1.bf16.msra.mxu0 %v2698_v4  ;;  %705 = vmatpush1.bf16.msra.mxu1 %v2731_v13  ;;  %v2713_v18 = vld [vmem:[%s4183_s1 + $0x120] ss:$24 sps:$4 sm:$0xff]   ;;  %v2741_v19 = vld [vmem:[%s4183_s1 + $0x6c] ss:$24 sps:$4 sm:$0xff]   ;;  %v2747_v22 = vld [vmem:[%s4183_s1 + $0x9c] ss:$24 sps:$4 sm:$0xff]  }
   0xa   : > { %667 = vmatprep.subr.bf16.mxu0 %v2699_v5  ;;  %706 = vmatprep.subr.bf16.mxu1 %v2735_v15  ;;  %v2743_v21 = vld [vmem:[%s4183_s1 + $0x68] ss:$24 sps:$4 sm:$0xff]   ;;  %v2749_v24 = vld [vmem:[%s4183_s1 + $0x98] ss:$24 sps:$4 sm:$0xff]   ;;  %v2717_v26 = vld [vmem:[%s4183_s1 + $0x184] ss:$24 sps:$4 sm:$0xff]  }
   0xb   : > { %v2716_v23 = vld [vmem:[%s4183_s1 + $0x150] ss:$24 sps:$4 sm:$0xff]   ;;  %v2753_v27 = vld [vmem:[%s4183_s1 + $0xcc] ss:$24 sps:$4 sm:$0xff]   ;;  %v2719_v29 = vld [vmem:[%s4183_s1 + $0x180] ss:$24 sps:$4 sm:$0xff]  }
   0xc   : > { %v41_v25 = vld [vmem:[#allocation2 + $0x8] sm:$0xff]  ;;  %v2759_v32 = vld [vmem:[%s4183_s1 + $0xfc] ss:$24 sps:$4 sm:$0xff]   ;;  %v2761_v34 = vld [vmem:[%s4183_s1 + $0xf8] ss:$24 sps:$4 sm:$0xff]   ;;  %s2665_s20 = smul.u32 48, %s3172_s24 }
   0xd   : > { %668 = vmatpush1.bf16.msra.mxu0 %v2701_v6  ;;  %707 = vmatpush1.bf16.msra.mxu1 %v2737_v16  ;;  %v3298_v28 = vpack.c.bf16 %v41_v25, %v41_v25  ;;  %v2755_v30 = vld [vmem:[%s4183_s1 + $0xc8] ss:$24 sps:$4 sm:$0xff]   ;;  %v2720_v31 = vld [vmem:[%s4183_s1 + $0x1b4] ss:$24 sps:$4 sm:$0xff]   ;;  %v2723_v35 = vld [vmem:[%s4183_s1 + $0x1e4] ss:$24 sps:$4 sm:$0xff]  }
   0xe   : > { %669 = vmatprep.subr.bf16.mxu0 %v2702_v7  ;;  %708 = vmatprep.subr.bf16.mxu1 %v2741_v19  ;;  %v2722_v33 = vld [vmem:[%s4183_s1 + $0x1b0] ss:$24 sps:$4 sm:$0xff]   ;;  %v2765_v36 = vld [vmem:[%s4183_s1 + $0x12c] ss:$24 sps:$4 sm:$0xff]   ;;  %v2725_v37 = vld [vmem:[%s4183_s1 + $0x1e0] ss:$24 sps:$4 sm:$0xff]   ;;  %s3733_s23 = scalar_lea.vmem %s4182_s0, %s2665_s20 }
   0xf   : > { %695 = vmatprep.mubr.bf16.mxu0 %v3298_v28  ;;  %736 = vmatprep.mubr.bf16.mxu1 %v3298_v28  ;;  %v2767_v38 = vld [vmem:[%s4183_s1 + $0x128] ss:$24 sps:$4 sm:$0xff]   ;;  %v2726_v39 = vld [vmem:[%s4183_s1 + $0x214] ss:$24 sps:$4 sm:$0xff]   ;;  %v2773_v42 = vld [vmem:[%s4183_s1 + $0x158] ss:$24 sps:$4 sm:$0xff]  }
  0x10   : > { %v2771_v40 = vld [vmem:[%s4183_s1 + $0x15c] ss:$24 sps:$4 sm:$0xff]   ;;  %v2728_v41 = vld [vmem:[%s4183_s1 + $0x210] ss:$24 sps:$4 sm:$0xff]   ;;  %v2777_v44 = vld [vmem:[%s4183_s1 + $0x18c] ss:$24 sps:$4 sm:$0xff]  }
  0x11   : > { %670 = vmatpush1.bf16.msra.mxu0 %v2704_v8  ;;  %709 = vmatpush1.bf16.msra.mxu1 %v2743_v21  ;;  %v2732_v43 = vld [vmem:[%s4183_s1 + $0x244] ss:$24 sps:$4 sm:$0xff]   ;;  %v2734_v45 = vld [vmem:[%s4183_s1 + $0x240] ss:$24 sps:$4 sm:$0xff]   ;;  %v2738_v47 = vld [vmem:[%s4183_s1 + $0x274] ss:$24 sps:$4 sm:$0xff]  }
  0x12   : > { %671 = vmatprep.subr.bf16.mxu0 %v2705_v9  ;;  %710 = vmatprep.subr.bf16.mxu1 %v2747_v22  ;;  %v2779_v46 = vld [vmem:[%s4183_s1 + $0x188] ss:$24 sps:$4 sm:$0xff]   ;;  %v2783_v48 = vld [vmem:[%s4183_s1 + $0x1bc] ss:$24 sps:$4 sm:$0xff]   ;;  %v2785_v50 = vld [vmem:[%s4183_s1 + $0x1b8] ss:$24 sps:$4 sm:$0xff]  }
  0x13   : > { %v2740_v49 = vld [vmem:[%s4183_s1 + $0x270] ss:$24 sps:$4 sm:$0xff]   ;;  %v2744_v51 = vld [vmem:[%s4183_s1 + $0x2a4] ss:$24 sps:$4 sm:$0xff]   ;;  %v2746_v53 = vld [vmem:[%s4183_s1 + $0x2a0] ss:$24 sps:$4 sm:$0xff]  }
  0x14   : > { %v2789_v52 = vld [vmem:[%s4183_s1 + $0x1ec] ss:$24 sps:$4 sm:$0xff]   ;;  %v2791_v54 = vld [vmem:[%s4183_s1 + $0x1e8] ss:$24 sps:$4 sm:$0xff]   ;;  %v2795_v56 = vld [vmem:[%s4183_s1 + $0x21c] ss:$24 sps:$4 sm:$0xff]  }
  0x15   : > { %672 = vmatpush1.bf16.msra.mxu0 %v2707_v10  ;;  %711 = vmatpush1.bf16.msra.mxu1 %v2749_v24  ;;  %v2750_v55 = vld [vmem:[%s4183_s1 + $0x2d4] ss:$24 sps:$4 sm:$0xff]   ;;  %v2752_v57 = vld [vmem:[%s4183_s1 + $0x2d0] ss:$24 sps:$4 sm:$0xff]   ;;  %v3389_v58 = vld [vmem:[#allocation2] sm:$0xff]  ;;  %s2667_s16 = sshll.u32 %s3172_s24, 3 }
  0x16   : > { %673 = vmatprep.subr.bf16.mxu0 %v2708_v11  ;;  %712 = vmatprep.subr.bf16.mxu1 %v2753_v27  ;;  %v2797_v59 = vld [vmem:[%s4183_s1 + $0x218] ss:$24 sps:$4 sm:$0xff]   ;;  %v2758_v60 = vld [vmem:[%s4183_s1 + $0x14] ss:$24 sps:$4 sm:$0xff]   ;;  %v3402_v62 = vpack.c.bf16 %v3389_v58, %v3389_v58  ;;  %v2803_v0 = vld [vmem:[%s4183_s1 + $0x248] ss:$24 sps:$4 sm:$0xff]   ;;  %s2350_s19 = scalar_lea.vmem %s4189_s7, %s2667_s16 }
  0x17   : > { %v2801_v61 = vld [vmem:[%s4183_s1 + $0x24c] ss:$24 sps:$4 sm:$0xff]   ;;  %v2756_v63 = vld [vmem:[%s4183_s1 + $0x10] ss:$24 sps:$4 sm:$0xff]   ;;  %v2807_v2 = vld [vmem:[%s4183_s1 + $0x27c] ss:$24 sps:$4 sm:$0xff]  }
  0x18   : > { %v2764_v1 = vld [vmem:[%s4183_s1 + $0x44] ss:$24 sps:$4 sm:$0xff]   ;;  %v2762_v3 = vld [vmem:[%s4183_s1 + $0x40] ss:$24 sps:$4 sm:$0xff]   ;;  %v2770_v5 = vld [vmem:[%s4183_s1 + $0x74] ss:$24 sps:$4 sm:$0xff]  }
  0x19   : > { %674 = vmatpush1.bf16.msra.mxu0 %v2710_v14  ;;  %713 = vmatpush1.bf16.msra.mxu1 %v2755_v30  ;;  %v2809_v4 = vld [vmem:[%s4183_s1 + $0x278] ss:$24 sps:$4 sm:$0xff]   ;;  %v2813_v6 = vld [vmem:[%s4183_s1 + $0x2ac] ss:$24 sps:$4 sm:$0xff]   ;;  %v2815_v8 = vld [vmem:[%s4183_s1 + $0x2a8] ss:$24 sps:$4 sm:$0xff]  }
  0x1a   : > { %675 = vmatprep.subr.bf16.mxu0 %v2711_v17  ;;  %714 = vmatprep.subr.bf16.mxu1 %v2759_v32  ;;  %v2768_v7 = vld [vmem:[%s4183_s1 + $0x70] ss:$24 sps:$4 sm:$0xff]   ;;  %v2776_v9 = vld [vmem:[%s4183_s1 + $0xa4] ss:$24 sps:$4 sm:$0xff]   ;;  %v2774_v11 = vld [vmem:[%s4183_s1 + $0xa0] ss:$24 sps:$4 sm:$0xff]  }
  0x1b   : > { %v2819_v10 = vld [vmem:[%s4183_s1 + $0x2dc] ss:$24 sps:$4 sm:$0xff]   ;;  %v2821_v12 = vld [vmem:[%s4183_s1 + $0x2d8] ss:$24 sps:$4 sm:$0xff]   ;;  %s39_s24 = sadd.s32 1, %s3172_s24  }
  0x1c   : > { %v2782_v13 = vld [vmem:[%s4183_s1 + $0xd4] ss:$24 sps:$4 sm:$0xff]   ;;  %v2780_v14 = vld [vmem:[%s4183_s1 + $0xd0] ss:$24 sps:$4 sm:$0xff]   ;;  %v2788_v15 = vld [vmem:[%s4183_s1 + $0x104] ss:$24 sps:$4 sm:$0xff]  }
  0x1d   : > { %676 = vmatpush1.bf16.msra.mxu0 %v2713_v18  ;;  %715 = vmatpush1.bf16.msra.mxu1 %v2761_v34  ;;  %v2786_v16 = vld [vmem:[%s4183_s1 + $0x100] ss:$24 sps:$4 sm:$0xff]   ;;  %v2794_v17 = vld [vmem:[%s4183_s1 + $0x134] ss:$24 sps:$4 sm:$0xff]   ;;  %v2792_v18 = vld [vmem:[%s4183_s1 + $0x130] ss:$24 sps:$4 sm:$0xff]  }
  0x1e   : > { %677 = vmatprep.subr.bf16.mxu0 %v2714_v20  ;;  %716 = vmatprep.subr.bf16.mxu1 %v2765_v36  ;;  %v2800_v19 = vld [vmem:[%s4183_s1 + $0x164] ss:$24 sps:$4 sm:$0xff]   ;;  %v2798_v20 = vld [vmem:[%s4183_s1 + $0x160] ss:$24 sps:$4 sm:$0xff]   ;;  %v2806_v21 = vld [vmem:[%s4183_s1 + $0x194] ss:$24 sps:$4 sm:$0xff]  }
  0x1f   : > { %v2804_v22 = vld [vmem:[%s4183_s1 + $0x190] ss:$24 sps:$4 sm:$0xff]   ;;  %v2810_v24 = vld [vmem:[%s4183_s1 + $0x1c0] ss:$24 sps:$4 sm:$0xff]   ;;  %v2818_v25 = vld [vmem:[%s4183_s1 + $0x1f4] ss:$24 sps:$4 sm:$0xff]  }
  0x20   : > { %v2824_v27 = vld [vmem:[%s4183_s1 + $0x224] ss:$24 sps:$4 sm:$0xff]   ;;  %v2825_v30 = vld [vmem:[%s4183_s1 + $0x250] ss:$24 sps:$4 sm:$0xff]   ;;  %v2828_v32 = vld [vmem:[%s4183_s1 + $0x280] ss:$24 sps:$4 sm:$0xff]  }
  0x21   : > { %678 = vmatpush1.bf16.msra.mxu0 %v2716_v23  ;;  %717 = vmatpush1.bf16.msra.mxu1 %v2767_v38  ;;  %v2812_v23 = vld [vmem:[%s4183_s1 + $0x1c4] ss:$24 sps:$4 sm:$0xff]   ;;  %v2831_v34 = vld [vmem:[%s4183_s1 + $0x2b0] ss:$24 sps:$4 sm:$0xff]   ;;  %v2834_v36 = vld [vmem:[%s4183_s1 + $0x2e0] ss:$24 sps:$4 sm:$0xff]  }
  0x22   : > { %679 = vmatprep.subr.bf16.mxu0 %v2717_v26  ;;  %718 = vmatprep.subr.bf16.mxu1 %v2771_v40  ;;  %v2816_v26 = vld [vmem:[%s4183_s1 + $0x1f0] ss:$24 sps:$4 sm:$0xff]   ;;  %v2839_v38 = vld [vmem:[%s4185_s3 + $0x4] ss:$24 sps:$4 sm:$0xff]   ;;  %p36_p0 = scmp.ge.s32.totalorder %s39_s24, 4  }
  0x23   : > { %v2842_v40 = vld [vmem:[%s4185_s3 + $0xc] ss:$24 sps:$4 sm:$0xff]  }
  0x25   : > { %680 = vmatpush1.bf16.msra.mxu0 %v2719_v29  ;;  %719 = vmatpush1.bf16.msra.mxu1 %v2773_v42  ;;  %v2827_v29 = vld [vmem:[%s4183_s1 + $0x254] ss:$24 sps:$4 sm:$0xff]  }
  0x26   : > { %681 = vmatprep.subr.bf16.mxu0 %v2720_v31  ;;  %720 = vmatprep.subr.bf16.mxu1 %v2777_v44  ;;  %v2830_v31 = vld [vmem:[%s4183_s1 + $0x284] ss:$24 sps:$4 sm:$0xff]   ;;  %v2846_v44 = vld [vmem:[%s4185_s3 + $0x38] ss:$24 sps:$4 sm:$0xff]  }
  0x27   : > { %v2848_v42 = vld [vmem:[%s4185_s3 + $0x3c] ss:$24 sps:$4 sm:$0xff]  }
  0x29   : > { %682 = vmatpush1.bf16.msra.mxu0 %v2722_v33  ;;  %721 = vmatpush1.bf16.msra.mxu1 %v2779_v46  ;;  %v2833_v33 = vld [vmem:[%s4183_s1 + $0x2b4] ss:$24 sps:$4 sm:$0xff]  }
  0x2a   : > { %683 = vmatprep.subr.bf16.mxu0 %v2723_v35  ;;  %722 = vmatprep.subr.bf16.mxu1 %v2783_v48  ;;  %v2836_v35 = vld [vmem:[%s4183_s1 + $0x2e4] ss:$24 sps:$4 sm:$0xff]   ;;  %v2852_v48 = vld [vmem:[%s4185_s3 + $0x68] ss:$24 sps:$4 sm:$0xff]  }
  0x2b   : > { %v2854_v46 = vld [vmem:[%s4185_s3 + $0x6c] ss:$24 sps:$4 sm:$0xff]  }
  0x2d   : > { %684 = vmatpush1.bf16.msra.mxu0 %v2725_v37  ;;  %723 = vmatpush1.bf16.msra.mxu1 %v2785_v50  ;;  %v2837_v37 = vld [vmem:[%s4185_s3] ss:$24 sps:$4 sm:$0xff]   ;;  %v2860_v50 = vld [vmem:[%s4185_s3 + $0x9c] ss:$24 sps:$4 sm:$0xff]  }
  0x2e   : > { %685 = vmatprep.subr.bf16.mxu0 %v2726_v39  ;;  %724 = vmatprep.subr.bf16.mxu1 %v2789_v52  ;;  %v2840_v39 = vld [vmem:[%s4185_s3 + $0x8] ss:$24 sps:$4 sm:$0xff]   ;;  %v2858_v52 = vld [vmem:[%s4185_s3 + $0x98] ss:$24 sps:$4 sm:$0xff]  }
  0x31   : > { %686 = vmatpush1.bf16.msra.mxu0 %v2728_v41  ;;  %725 = vmatpush1.bf16.msra.mxu1 %v2791_v54  ;;  %v2845_v41 = vld [vmem:[%s4185_s3 + $0x34] ss:$24 sps:$4 sm:$0xff]  }
  0x32   : > { %687 = vmatprep.subr.bf16.mxu0 %v2732_v43  ;;  %726 = vmatprep.subr.bf16.mxu1 %v2795_v56  ;;  %v2843_v43 = vld [vmem:[%s4185_s3 + $0x30] ss:$24 sps:$4 sm:$0xff]   ;;  %v2866_v54 = vld [vmem:[%s4185_s3 + $0xcc] ss:$24 sps:$4 sm:$0xff]  }
  0x33   : > { %v2864_v56 = vld [vmem:[%s4185_s3 + $0xc8] ss:$24 sps:$4 sm:$0xff]  }
  0x35   : > { %688 = vmatpush1.bf16.msra.mxu0 %v2734_v45  ;;  %727 = vmatpush1.bf16.msra.mxu1 %v2797_v59  ;;  %v2851_v45 = vld [vmem:[%s4185_s3 + $0x64] ss:$24 sps:$4 sm:$0xff]  }
  0x36   : > { %689 = vmatprep.subr.bf16.mxu0 %v2738_v47  ;;  %728 = vmatprep.subr.bf16.mxu1 %v2801_v61  ;;  %v2849_v47 = vld [vmem:[%s4185_s3 + $0x60] ss:$24 sps:$4 sm:$0xff]   ;;  %v2872_v59 = vld [vmem:[%s4185_s3 + $0xfc] ss:$24 sps:$4 sm:$0xff]  }
  0x37   : > { %v2870_v61 = vld [vmem:[%s4185_s3 + $0xf8] ss:$24 sps:$4 sm:$0xff]  }
  0x39   : > { %690 = vmatpush1.bf16.msra.mxu0 %v2740_v49  ;;  %729 = vmatpush1.bf16.msra.mxu1 %v2803_v0  ;;  %v2857_v49 = vld [vmem:[%s4185_s3 + $0x94] ss:$24 sps:$4 sm:$0xff]   ;;  %v2873_v0 = vld [vmem:[%s4185_s3 + $0x120] ss:$24 sps:$4 sm:$0xff]  }
  0x3a   : > { %691 = vmatprep.subr.bf16.mxu0 %v2744_v51  ;;  %730 = vmatprep.subr.bf16.mxu1 %v2807_v2  ;;  %v2855_v51 = vld [vmem:[%s4185_s3 + $0x90] ss:$24 sps:$4 sm:$0xff]   ;;  %v2881_v2 = vld [vmem:[%s4185_s3 + $0x154] ss:$24 sps:$4 sm:$0xff]  }
  0x3d   : > { %692 = vmatpush1.bf16.msra.mxu0 %v2746_v53  ;;  %731 = vmatpush1.bf16.msra.mxu1 %v2809_v4  ;;  %v2863_v53 = vld [vmem:[%s4185_s3 + $0xc4] ss:$24 sps:$4 sm:$0xff]   ;;  %v2879_v4 = vld [vmem:[%s4185_s3 + $0x150] ss:$24 sps:$4 sm:$0xff]  }
  0x3e   : > { %693 = vmatprep.subr.bf16.mxu0 %v2750_v55  ;;  %732 = vmatprep.subr.bf16.mxu1 %v2813_v6  ;;  %v2861_v55 = vld [vmem:[%s4185_s3 + $0xc0] ss:$24 sps:$4 sm:$0xff]   ;;  %v2887_v6 = vld [vmem:[%s4185_s3 + $0x184] ss:$24 sps:$4 sm:$0xff]  }
  0x41   : > { %694 = vmatpush1.bf16.msra.mxu0 %v2752_v57  ;;  %733 = vmatpush1.bf16.msra.mxu1 %v2815_v8  ;;  %v2869_v57 = vld [vmem:[%s4185_s3 + $0xf4] ss:$24 sps:$4 sm:$0xff]   ;;  %v2885_v8 = vld [vmem:[%s4185_s3 + $0x180] ss:$24 sps:$4 sm:$0xff]  }
  0x42   : > { %745 = vmatprep.subr.bf16.mxu0 %v2758_v60  ;;  %734 = vmatprep.subr.bf16.mxu1 %v2819_v10  ;;  %v2867_v60 = vld [vmem:[%s4185_s3 + $0xf0] ss:$24 sps:$4 sm:$0xff]   ;;  %v2893_v10 = vld [vmem:[%s4185_s3 + $0x1b4] ss:$24 sps:$4 sm:$0xff]  }
  0x44   : > { %696 = vmatmul.mubr.bf16.vlgmr.msra.gmra.mrb[0].mxu0 %v3402_v62 }
  0x45   : > { %746 = vmatpush1.bf16.msra.mxu0 %v2756_v63  ;;  %777 = vmatprep.mubr.bf16.mxu0 %v3298_v28  ;;  %v2822_v28 = vld [vmem:[%s4183_s1 + $0x220] ss:$24 sps:$4 sm:$0xff]   ;;  %v2878_v63 = vld [vmem:[%s4185_s3 + $0x12c] ss:$24 sps:$4 sm:$0xff]  }
  0x46   : > { %747 = vmatprep.subr.bf16.mxu0 %v2764_v1  ;;  %735 = vmatpush1.bf16.msra.mxu1 %v2821_v12  ;;  %v2876_v1 = vld [vmem:[%s4185_s3 + $0x128] ss:$24 sps:$4 sm:$0xff]  }
  0x47   : > { %1438 = vmatprep.subr.bf16.mxu1 %v2839_v38  ;;  %v2891_v12 = vld [vmem:[%s4185_s3 + $0x1b0] ss:$24 sps:$4 sm:$0xff]   ;;  %v2935_v38 = vld [vmem:[%s4185_s3 + $0x14] ss:$24 sps:$4 sm:$0xff]  }
  0x49   : > { %748 = vmatpush1.bf16.msra.mxu0 %v2762_v3  ;;  %737 = vmatmul.mubr.bf16.vlgmr.msra.gmra.mrb[0].mxu1 %v3402_v62  ;;  %v2884_v3 = vld [vmem:[%s4185_s3 + $0x15c] ss:$24 sps:$4 sm:$0xff]  }
  0x4a   : > { %749 = vmatprep.subr.bf16.mxu0 %v2770_v5  ;;  %1439 = vmatpush1.bf16.msra.mxu1 %v2837_v37  ;;  %v2882_v5 = vld [vmem:[%s4185_s3 + $0x158] ss:$24 sps:$4 sm:$0xff]  }
  0x4b   : > { %1440 = vmatprep.subr.bf16.mxu1 %v2845_v41  ;;  %v2930_v37 = vld [vmem:[%s4185_s3 + $0x2d8] ss:$24 sps:$4 sm:$0xff]  }
  0x4d   : > { %750 = vmatpush1.bf16.msra.mxu0 %v2768_v7  ;;  %v2890_v7 = vld [vmem:[%s4185_s3 + $0x18c] ss:$24 sps:$4 sm:$0xff]  }
  0x4e   : > { %751 = vmatprep.subr.bf16.mxu0 %v2776_v9  ;;  %1441 = vmatpush1.bf16.msra.mxu1 %v2843_v43  ;;  %v2888_v9 = vld [vmem:[%s4185_s3 + $0x188] ss:$24 sps:$4 sm:$0xff]  }
  0x4f   : > { %1442 = vmatprep.subr.bf16.mxu1 %v2851_v45 }
  0x51   : > { %752 = vmatpush1.bf16.msra.mxu0 %v2774_v11  ;;  %v2896_v11 = vld [vmem:[%s4185_s3 + $0x1bc] ss:$24 sps:$4 sm:$0xff]  }
  0x52   : > { %753 = vmatprep.subr.bf16.mxu0 %v2782_v13  ;;  %1443 = vmatpush1.bf16.msra.mxu1 %v2849_v47  ;;  %v2894_v13 = vld [vmem:[%s4185_s3 + $0x1b8] ss:$24 sps:$4 sm:$0xff]  }
  0x53   : > { %1444 = vmatprep.subr.bf16.mxu1 %v2857_v49 }
  0x55   : > { %754 = vmatpush1.bf16.msra.mxu0 %v2780_v14  ;;  %v2899_v14 = vld [vmem:[%s4185_s3 + $0x1e4] ss:$24 sps:$4 sm:$0xff]  }
  0x56   : > { %755 = vmatprep.subr.bf16.mxu0 %v2788_v15  ;;  %1445 = vmatpush1.bf16.msra.mxu1 %v2855_v51  ;;  %v2902_v15 = vld [vmem:[%s4185_s3 + $0x1ec] ss:$24 sps:$4 sm:$0xff]  }
  0x57   : > { %1446 = vmatprep.subr.bf16.mxu1 %v2863_v53  ;;  %v151_v51 = vld [vmem:[%s4184_s2] sm:$0x3f] }
  0x59   : > { %756 = vmatpush1.bf16.msra.mxu0 %v2786_v16  ;;  %v2897_v16 = vld [vmem:[%s4185_s3 + $0x1e0] ss:$24 sps:$4 sm:$0xff]  }
  0x5a   : > { %757 = vmatprep.subr.bf16.mxu0 %v2794_v17  ;;  %1447 = vmatpush1.bf16.msra.mxu1 %v2861_v55  ;;  %v2900_v17 = vld [vmem:[%s4185_s3 + $0x1e8] ss:$24 sps:$4 sm:$0xff]  }
  0x5b   : > { %1448 = vmatprep.subr.bf16.mxu1 %v2869_v57 }
  0x5d   : > { %758 = vmatpush1.bf16.msra.mxu0 %v2792_v18  ;;  %v2905_v18 = vld [vmem:[%s4185_s3 + $0x214] ss:$24 sps:$4 sm:$0xff]  }
  0x5e   : > { %759 = vmatprep.subr.bf16.mxu0 %v2800_v19  ;;  %1449 = vmatpush1.bf16.msra.mxu1 %v2867_v60  ;;  %v2908_v19 = vld [vmem:[%s4185_s3 + $0x21c] ss:$24 sps:$4 sm:$0xff]   ;;  %v48_v60 = vld [vmem:[%s3733_s23 + $0x8] sm:$0xff] }
  0x61   : > { %760 = vmatpush1.bf16.msra.mxu0 %v2798_v20  ;;  %v2903_v20 = vld [vmem:[%s4185_s3 + $0x210] ss:$24 sps:$4 sm:$0xff]  }
  0x62   : > { %761 = vmatprep.subr.bf16.mxu0 %v2806_v21  ;;  %v2906_v21 = vld [vmem:[%s4185_s3 + $0x218] ss:$24 sps:$4 sm:$0xff]  }
  0x65   : > { %762 = vmatpush1.bf16.msra.mxu0 %v2804_v22  ;;  %v2911_v22 = vld [vmem:[%s4185_s3 + $0x244] ss:$24 sps:$4 sm:$0xff]  }
  0x66   : > { %763 = vmatprep.subr.bf16.mxu0 %v2812_v23  ;;  %v2914_v23 = vld [vmem:[%s4185_s3 + $0x24c] ss:$24 sps:$4 sm:$0xff]  }
  0x69   : > { %764 = vmatpush1.bf16.msra.mxu0 %v2810_v24  ;;  %v2909_v24 = vld [vmem:[%s4185_s3 + $0x240] ss:$24 sps:$4 sm:$0xff]  }
  0x6a   : > { %765 = vmatprep.subr.bf16.mxu0 %v2818_v25  ;;  %v2912_v25 = vld [vmem:[%s4185_s3 + $0x248] ss:$24 sps:$4 sm:$0xff]  }
  0x6d   : > { %766 = vmatpush1.bf16.msra.mxu0 %v2816_v26  ;;  %v2917_v26 = vld [vmem:[%s4185_s3 + $0x274] ss:$24 sps:$4 sm:$0xff]  }
  0x6e   : > { %767 = vmatprep.subr.bf16.mxu0 %v2824_v27  ;;  %v2920_v27 = vld [vmem:[%s4185_s3 + $0x27c] ss:$24 sps:$4 sm:$0xff]  }
  0x71   : > { %768 = vmatpush1.bf16.msra.mxu0 %v2822_v28  ;;  %v2915_v28 = vld [vmem:[%s4185_s3 + $0x270] ss:$24 sps:$4 sm:$0xff]  }
  0x72   : > { %769 = vmatprep.subr.bf16.mxu0 %v2827_v29  ;;  %v2918_v29 = vld [vmem:[%s4185_s3 + $0x278] ss:$24 sps:$4 sm:$0xff]  }
  0x75   : > { %770 = vmatpush1.bf16.msra.mxu0 %v2825_v30  ;;  %v2923_v30 = vld [vmem:[%s4185_s3 + $0x2a4] ss:$24 sps:$4 sm:$0xff]  }
  0x76   : > { %771 = vmatprep.subr.bf16.mxu0 %v2830_v31  ;;  %v2926_v31 = vld [vmem:[%s4185_s3 + $0x2ac] ss:$24 sps:$4 sm:$0xff]  }
  0x79   : > { %772 = vmatpush1.bf16.msra.mxu0 %v2828_v32  ;;  %v2921_v32 = vld [vmem:[%s4185_s3 + $0x2a0] ss:$24 sps:$4 sm:$0xff]  }
  0x7a   : > { %773 = vmatprep.subr.bf16.mxu0 %v2833_v33  ;;  %v2924_v33 = vld [vmem:[%s4185_s3 + $0x2a8] ss:$24 sps:$4 sm:$0xff]  }
  0x7d   : > { %774 = vmatpush1.bf16.msra.mxu0 %v2831_v34  ;;  %v2929_v34 = vld [vmem:[%s4185_s3 + $0x2d4] ss:$24 sps:$4 sm:$0xff]  }
  0x7e   : > { %775 = vmatprep.subr.bf16.mxu0 %v2836_v35  ;;  %v2932_v35 = vld [vmem:[%s4185_s3 + $0x2dc] ss:$24 sps:$4 sm:$0xff]  }
  0x81   : > { %776 = vmatpush1.bf16.msra.mxu0 %v2834_v36  ;;  %v2927_v36 = vld [vmem:[%s4185_s3 + $0x2d0] ss:$24 sps:$4 sm:$0xff]  }
  0x82   : > { %1479 = vmatprep.subr.bf16.mxu0 %v2842_v40 }
  0x84   : > { %778 = vmatmul.mubr.bf16.vlgmr.msra.gmra.mrb[4].mxu0 %v3402_v62  ;;  %v2875_v62 = vld [vmem:[%s4185_s3 + $0x124] ss:$24 sps:$4 sm:$0xff]  }
  0x85   : > { %1480 = vmatpush1.bf16.msra.mxu0 %v2840_v39  ;;  %1450 = vmatprep.subr.bf16.mxu1 %v2875_v62  ;;  %v2938_v39 = vld [vmem:[%s4187_s5 + $0xc] ss:$24 sps:$4 sm:$0xff]  }
  0x86   : > { %1481 = vmatprep.subr.bf16.mxu0 %v2848_v42  ;;  %1451 = vmatpush1.bf16.msra.mxu1 %v2873_v0 }
  0x87   : > { %1452 = vmatprep.subr.bf16.mxu1 %v2881_v2 }
  0x89   : > { %1482 = vmatpush1.bf16.msra.mxu0 %v2846_v44  ;;  %v153_v44 = vlaneseq }
  0x8a   : > { %1483 = vmatprep.subr.bf16.mxu0 %v2854_v46  ;;  %1453 = vmatpush1.bf16.msra.mxu1 %v2879_v4 }
  0x8b   : > { %1454 = vmatprep.subr.bf16.mxu1 %v2887_v6  ;;  %v154_v45 = vshrl.u32 %v153_v44, 7 }
  0x8d   : > { %1484 = vmatpush1.bf16.msra.mxu0 %v2852_v48  ;;  %v3720_v49 = vsub.s32 0, %v154_v45 }
  0x8e   : > { %1485 = vmatprep.subr.bf16.mxu0 %v2860_v50  ;;  %1455 = vmatpush1.bf16.msra.mxu1 %v2885_v8 }
  0x8f   : > { %1456 = vmatprep.subr.bf16.mxu1 %v2893_v10  ;;  %v156_v53 = vrot.slane %v151_v51, %v3720_v49 }
  0x91   : > { %1486 = vmatpush1.bf16.msra.mxu0 %v2858_v52  ;;  %v3725_v52 = vsub.s32 1, %v154_v45 }
  0x92   : > { %1487 = vmatprep.subr.bf16.mxu0 %v2866_v54  ;;  %1457 = vmatpush1.bf16.msra.mxu1 %v2891_v12 }
  0x93   : > { %1458 = vmatprep.subr.bf16.mxu1 %v2899_v14  ;;  %v160_v54 = vrot.slane %v151_v51, %v3725_v52 }
  0x95   : > { %1488 = vmatpush1.bf16.msra.mxu0 %v2864_v56  ;;  %v47_v56 = vld [vmem:[%s3733_s23] sm:$0xff] }
  0x96   : > { %1489 = vmatprep.subr.bf16.mxu0 %v2872_v59  ;;  %1459 = vmatpush1.bf16.msra.mxu1 %v2897_v16  ;;  %v3736_v59 = vsub.s32 2, %v154_v45  ;;  %v3745_v16 = vsub.s32 4, %v154_v45 }
  0x97   : > { %1460 = vmatprep.subr.bf16.mxu1 %v2905_v18  ;;  %v3747_v18 = vsub.s32 5, %v154_v45 }
  0x98   : > { %v164_v0 = vrot.slane %v151_v51, %v3736_v59 }
  0x99   : > { %1490 = vmatpush1.bf16.msra.mxu0 %v2870_v61  ;;  %v3739_v61 = vsub.s32 3, %v154_v45 }
  0x9a   : > { %1491 = vmatprep.subr.bf16.mxu0 %v2878_v63  ;;  %1461 = vmatpush1.bf16.msra.mxu1 %v2903_v20 }
  0x9b   : > { %1462 = vmatprep.subr.bf16.mxu1 %v2911_v22 }
  0x9d   : > { %1492 = vmatpush1.bf16.msra.mxu0 %v2876_v1  ;;  %v168_v1 = vrot.slane %v151_v51, %v3739_v61 }
  0x9e   : > { %1493 = vmatprep.subr.bf16.mxu0 %v2884_v3  ;;  %1463 = vmatpush1.bf16.msra.mxu1 %v2909_v24 }
  0x9f   : > { %1464 = vmatprep.subr.bf16.mxu1 %v2917_v26 }
  0xa1   : > { %1494 = vmatpush1.bf16.msra.mxu0 %v2882_v5  ;;  %v49_v5 = vld [vmem:[%s3733_s23 + $0x10] sm:$0xff] }
  0xa2   : > { %1495 = vmatprep.subr.bf16.mxu0 %v2890_v7  ;;  %1465 = vmatpush1.bf16.msra.mxu1 %v2915_v28  ;;  %v50_v7 = vld [vmem:[%s3733_s23 + $0x18] sm:$0xff]  ;;  %v51_v28 = vld [vmem:[%s3733_s23 + $0x20] sm:$0xff] }
  0xa3   : > { %1466 = vmatprep.subr.bf16.mxu1 %v2923_v30 }
  0xa5   : > { %1496 = vmatpush1.bf16.msra.mxu0 %v2888_v9 }
  0xa6   : > { %1497 = vmatprep.subr.bf16.mxu0 %v2896_v11  ;;  %1467 = vmatpush1.bf16.msra.mxu1 %v2921_v32 }
  0xa7   : > { %1468 = vmatprep.subr.bf16.mxu1 %v2929_v34 }
  0xa9   : > { %1498 = vmatpush1.bf16.msra.mxu0 %v2894_v13 }
  0xaa   : > { %1499 = vmatprep.subr.bf16.mxu0 %v2902_v15  ;;  %1469 = vmatpush1.bf16.msra.mxu1 %v2927_v36 }
  0xab   : > { %1520 = vmatprep.subr.bf16.mxu1 %v2935_v38 }
  0xad   : > { %1500 = vmatpush1.bf16.msra.mxu0 %v2900_v17 }
  0xae   : > { %1501 = vmatprep.subr.bf16.mxu0 %v2908_v19 }
  0xb1   : > { %1502 = vmatpush1.bf16.msra.mxu0 %v2906_v21  ;;  %v172_v21 = vrot.slane %v151_v51, %v3745_v16 }
  0xb2   : > { %1503 = vmatprep.subr.bf16.mxu0 %v2914_v23  ;;  %v176_v23 = vrot.slane %v151_v51, %v3747_v18 }
  0xb5   : > { %1504 = vmatpush1.bf16.msra.mxu0 %v2912_v25 }
  0xb6   : > { %1505 = vmatprep.subr.bf16.mxu0 %v2920_v27 }
  0xb9   : > { %1506 = vmatpush1.bf16.msra.mxu0 %v2918_v29 }
  0xba   : > { %1507 = vmatprep.subr.bf16.mxu0 %v2926_v31 }
  0xbd   : > { %1508 = vmatpush1.bf16.msra.mxu0 %v2924_v33  ;;  %v52_v33 = vld [vmem:[%s3733_s23 + $0x28] sm:$0xff] }
  0xbe   : > { %1509 = vmatprep.subr.bf16.mxu0 %v2932_v35 }
  0xc1   : > { %1510 = vmatpush1.bf16.msra.mxu0 %v2930_v37 }
  0xc2   : > { %2212 = vmatprep.subr.bf16.mxu0 %v2938_v39 }
 0x117   : > { %v697_v40 = vpop.f32.mrb[0].mxu0 }
 0x118   : > { %v699_v41 = vpop.f32.mrb[1].mxu0  ;;  %v698_v55 = vadd.f32 %v697_v40, %v156_v53  ;;  %v3754_v53 = vld [vmem:[#allocation3 + $0x8] sm:$0xff] }
 0x119   : > { %v701_v42 = vpop.f32.mrb[2].mxu0  ;;  %v700_v57 = vadd.f32 %v699_v41, %v160_v54 }
 0x11a   : > { %v702_v43 = vpop.f32.mrb[3].mxu0  ;;  %v786_v62 = vadd.f32 %v698_v55, %v47_v56  ;;  %v2933_v55 = vld [vmem:[%s4185_s3 + $0x10] ss:$24 sps:$4 sm:$0xff]  }
 0x11b   : > { %v787_v63 = vadd.f32 %v700_v57, %v48_v60  ;;  %v2936_v56 = vld [vmem:[%s4187_s5 + $0x8] ss:$24 sps:$4 sm:$0xff]   ;;  %v2944_v60 = vld [vmem:[%s4187_s5 + $0x3c] ss:$24 sps:$4 sm:$0xff]  }
 0x11c   : > { %v738_v46 = vpop.f32.mrb[0].mxu1  ;;  %v2462_v2 = vmul.f32 -1.442695, %v786_v62  ;;  %v3772_v62 = vpack.c.bf16 %v3754_v53, %v3754_v53 }
 0x11d   : > { %v740_v47 = vpop.f32.mrb[1].mxu1  ;;  %v2463_v3 = vmul.f32 -1.442695, %v787_v63  ;;  %v739_v4 = vadd.f32 %v738_v46, %v164_v0  ;;  %v2939_v63 = vld [vmem:[%s4185_s3 + $0x40] ss:$24 sps:$4 sm:$0xff]  }
 0x11e   : > { %v742_v48 = vpop.f32.mrb[2].mxu1  ;;  %v741_v6 = vadd.f32 %v740_v47, %v168_v1  ;;  %3125 = vpow2.f32 %v2462_v2  ;;  %v3165_v47 = vld [vmem:[#allocation2 + $0x8] sm:$0xff]  ;;  %v2942_v0 = vld [vmem:[%s4187_s5 + $0x38] ss:$24 sps:$4 sm:$0xff]  }
 0x11f   : > { %v743_v50 = vpop.f32.mrb[3].mxu1  ;;  %3127 = vpow2.f32 %v2463_v3  ;;  %v800_v8 = vadd.f32 %v739_v4, %v49_v5  ;;  %v2947_v1 = vld [vmem:[%s4185_s3 + $0x74] ss:$24 sps:$4 sm:$0xff]   ;;  %v2945_v3 = vld [vmem:[%s4185_s3 + $0x70] ss:$24 sps:$4 sm:$0xff]  }
 0x120   : > { %v801_v9 = vadd.f32 %v741_v6, %v50_v7  ;;  %v2950_v2 = vld [vmem:[%s4187_s5 + $0x6c] ss:$24 sps:$4 sm:$0xff]   ;;  %v2948_v4 = vld [vmem:[%s4187_s5 + $0x68] ss:$24 sps:$4 sm:$0xff]   ;;  %v2956_v6 = vld [vmem:[%s4187_s5 + $0x9c] ss:$24 sps:$4 sm:$0xff]  }
 0x121   : > { %v2464_v10 = vmul.f32 -1.442695, %v800_v8  ;;  %v2953_v5 = vld [vmem:[%s4185_s3 + $0xa4] ss:$24 sps:$4 sm:$0xff]   ;;  %v2951_v7 = vld [vmem:[%s4185_s3 + $0xa0] ss:$24 sps:$4 sm:$0xff]  }
 0x122   : > { %v2465_v11 = vmul.f32 -1.442695, %v801_v9  ;;  %v2954_v8 = vld [vmem:[%s4187_s5 + $0x98] ss:$24 sps:$4 sm:$0xff]   ;;  %v2959_v9 = vld [vmem:[%s4185_s3 + $0xd4] ss:$24 sps:$4 sm:$0xff]  }
 0x123   : > { %3129 = vpow2.f32 %v2464_v10  ;;  %v2962_v10 = vld [vmem:[%s4187_s5 + $0xcc] ss:$24 sps:$4 sm:$0xff]  }
 0x124   : > { %3131 = vpow2.f32 %v2465_v11  ;;  %v2957_v11 = vld [vmem:[%s4185_s3 + $0xd0] ss:$24 sps:$4 sm:$0xff]  }
 0x128   : > { %v3126_v12 = vpop.eup %3125 }
 0x129   : > { %v3128_v13 = vpop.eup %3127  ;;  %v794_v14 = vadd.f32 1.0, %v3126_v12  ;;  %v2960_v12 = vld [vmem:[%s4187_s5 + $0xc8] ss:$24 sps:$4 sm:$0xff]  }
 0x12a   : > { %v795_v15 = vadd.f32 1.0, %v3128_v13  ;;  %v2965_v13 = vld [vmem:[%s4185_s3 + $0x104] ss:$24 sps:$4 sm:$0xff]  }
 0x12b   : > { %3133 = vrcp.f32 %v794_v14  ;;  %v2968_v14 = vld [vmem:[%s4187_s5 + $0xfc] ss:$24 sps:$4 sm:$0xff]  }
 0x12c   : > { %3135 = vrcp.f32 %v795_v15  ;;  %v2963_v15 = vld [vmem:[%s4185_s3 + $0x100] ss:$24 sps:$4 sm:$0xff]  }
 0x12d   : > { %v3130_v17 = vpop.eup %3129 }
 0x12e   : > { %v3132_v19 = vpop.eup %3131  ;;  %v808_v20 = vadd.f32 1.0, %v3130_v17  ;;  %v2966_v17 = vld [vmem:[%s4187_s5 + $0xf8] ss:$24 sps:$4 sm:$0xff]  }
 0x12f   : > { %v809_v22 = vadd.f32 1.0, %v3132_v19  ;;  %v2971_v19 = vld [vmem:[%s4185_s3 + $0x134] ss:$24 sps:$4 sm:$0xff]  }
 0x130   : > { %3137 = vrcp.f32 %v808_v20  ;;  %v2974_v20 = vld [vmem:[%s4187_s5 + $0x12c] ss:$24 sps:$4 sm:$0xff]  }
 0x131   : > { %3139 = vrcp.f32 %v809_v22  ;;  %v2972_v22 = vld [vmem:[%s4187_s5 + $0x128] ss:$24 sps:$4 sm:$0xff]  }
 0x135   : > { %v3134_v27 = vpop.eup %3133 }
 0x136   : > { %v3136_v31 = vpop.eup %3135 }
 0x13a   : > { %v3138_v38 = vpop.eup %3137 }
 0x13b   : > { %v3140_v39 = vpop.eup %3139  ;;  %v820_v40 = vsub.f32 1.0, %v3138_v38  ;;  %v824_v45 = vmul.f32 %v3138_v38, %v3389_v58  ;;  %v2941_v58 = vld [vmem:[%s4185_s3 + $0x44] ss:$24 sps:$4 sm:$0xff]   ;;  %v2996_v38 = vld [vmem:[%s4187_s5 + $0x1e8] ss:$24 sps:$4 sm:$0xff]  }
 0x13c   : > { %v821_v41 = vsub.f32 1.0, %v3140_v39  ;;  %v825_v48 = vmul.f32 %v3165_v47, %v3140_v39  ;;  %v3001_v39 = vld [vmem:[%s4185_s3 + $0x224] ss:$24 sps:$4 sm:$0xff]  }
 0x13d   : > { %v3013_v47 = vld [vmem:[%s4185_s3 + $0x284] ss:$24 sps:$4 sm:$0xff]  }
 0x157   : > { %v779_v24 = vpop.f32.mrb[4].mxu0 }
 0x158   : > { %v780_v25 = vadd.f32 %v779_v24, %v172_v21  ;;  %v781_v26 = vpop.f32.mrb[5].mxu0  ;;  %v2969_v21 = vld [vmem:[%s4185_s3 + $0x130] ss:$24 sps:$4 sm:$0xff]   ;;  %v2980_v24 = vld [vmem:[%s4187_s5 + $0x15c] ss:$24 sps:$4 sm:$0xff]  }
 0x159   : > { %v782_v29 = vadd.f32 %v781_v26, %v176_v23  ;;  %v783_v30 = vpop.f32.mrb[6].mxu0  ;;  %v2977_v23 = vld [vmem:[%s4185_s3 + $0x164] ss:$24 sps:$4 sm:$0xff]   ;;  %v2978_v26 = vld [vmem:[%s4187_s5 + $0x158] ss:$24 sps:$4 sm:$0xff]  }
 0x15a   : > { %v814_v32 = vmul.f32 %v3134_v27, %v780_v25  ;;  %v784_v34 = vpop.f32.mrb[7].mxu0  ;;  %v2975_v25 = vld [vmem:[%s4185_s3 + $0x160] ss:$24 sps:$4 sm:$0xff]   ;;  %v2983_v27 = vld [vmem:[%s4185_s3 + $0x194] ss:$24 sps:$4 sm:$0xff]  }
 0x15b   : > { %v815_v35 = vmul.f32 %v3136_v31, %v782_v29  ;;  %v2981_v29 = vld [vmem:[%s4185_s3 + $0x190] ss:$24 sps:$4 sm:$0xff]   ;;  %v2989_v31 = vld [vmem:[%s4185_s3 + $0x1c4] ss:$24 sps:$4 sm:$0xff]  }
 0x15c   : > { %v816_v36 = vadd.f32 %v814_v32, %v51_v28  ;;  %v2986_v28 = vld [vmem:[%s4187_s5 + $0x18c] ss:$24 sps:$4 sm:$0xff]   ;;  %v2984_v30 = vld [vmem:[%s4187_s5 + $0x188] ss:$24 sps:$4 sm:$0xff]   ;;  %v2992_v32 = vld [vmem:[%s4187_s5 + $0x1bc] ss:$24 sps:$4 sm:$0xff]  }
 0x15d   : > { %v817_v37 = vadd.f32 %v815_v35, %v52_v33  ;;  %v2987_v33 = vld [vmem:[%s4185_s3 + $0x1c0] ss:$24 sps:$4 sm:$0xff]   ;;  %v2995_v35 = vld [vmem:[%s4185_s3 + $0x1f4] ss:$24 sps:$4 sm:$0xff]  }
 0x15e   : > { %3141 = vtanh.f32 %v816_v36  ;;  %v2990_v34 = vld [vmem:[%s4187_s5 + $0x1b8] ss:$24 sps:$4 sm:$0xff]   ;;  %v2998_v36 = vld [vmem:[%s4187_s5 + $0x1ec] ss:$24 sps:$4 sm:$0xff]  }
 0x15f   : > { %3143 = vtanh.f32 %v817_v37  ;;  %v2993_v37 = vld [vmem:[%s4185_s3 + $0x1f0] ss:$24 sps:$4 sm:$0xff]  }
 0x168   : > { %v3142_v42 = vpop.eup %3141 }
 0x169   : > { %v3144_v43 = vpop.eup %3143  ;;  %v822_v44 = vmul.f32 %v3142_v42, %v820_v40  ;;  %v3004_v40 = vld [vmem:[%s4187_s5 + $0x21c] ss:$24 sps:$4 sm:$0xff]   ;;  %v3002_v42 = vld [vmem:[%s4187_s5 + $0x218] ss:$24 sps:$4 sm:$0xff]  }
 0x16a   : > { %v823_v46 = vmul.f32 %v3144_v43, %v821_v41  ;;  %v2999_v41 = vld [vmem:[%s4185_s3 + $0x220] ss:$24 sps:$4 sm:$0xff]   ;;  %v3007_v43 = vld [vmem:[%s4185_s3 + $0x254] ss:$24 sps:$4 sm:$0xff]  }
 0x16b   : > { %v826_v50 = vadd.f32 %v824_v45, %v822_v44  ;;  %v3010_v44 = vld [vmem:[%s4187_s5 + $0x24c] ss:$24 sps:$4 sm:$0xff]   ;;  %v3005_v45 = vld [vmem:[%s4185_s3 + $0x250] ss:$24 sps:$4 sm:$0xff]  }
 0x16c   : > { %v827_v51 = vadd.f32 %v825_v48, %v823_v46  ;;  %v3008_v46 = vld [vmem:[%s4187_s5 + $0x248] ss:$24 sps:$4 sm:$0xff]   ;;  %v3016_v48 = vld [vmem:[%s4187_s5 + $0x27c] ss:$24 sps:$4 sm:$0xff]  }
 0x16d   : > { %2336 = vst [vmem:[#allocation2] sm:$0xff] %v826_v50  ;;  %v3762_v57 = vpack.c.bf16 %v826_v50, %v826_v50  ;;  %v3011_v50 = vld [vmem:[%s4185_s3 + $0x280] ss:$24 sps:$4 sm:$0xff]  }
 0x16e   : > { %v829_v54 = vpack.c.bf16 %v827_v51, %v827_v51  ;;  %2337 = vst [vmem:[#allocation2 + $0x8] sm:$0xff] %v827_v51  ;;  %v3014_v51 = vld [vmem:[%s4187_s5 + $0x278] ss:$24 sps:$4 sm:$0xff]  }
 0x170   : > { %1470 = vmatprep.mubr.bf16.mxu1 %v829_v54  ;;  %1511 = vmatprep.mubr.bf16.mxu0 %v829_v54 }
 0x171   : > { %1471 = vmatmul.mubr.bf16.vlgmr.msra.gmra.mrb[4].mxu1 %v3762_v57  ;;  %1512 = vmatmul.mubr.bf16.vlgmr.msra.gmra.mrb[8].mxu0 %v3762_v57 }
 0x172   : > { %1521 = vmatpush1.bf16.msra.mxu1 %v2933_v55  ;;  %2213 = vmatpush1.bf16.msra.mxu0 %v2936_v56  ;;  %v3022_v55 = vld [vmem:[%s4187_s5 + $0x2ac] ss:$24 sps:$4 sm:$0xff]   ;;  %v3017_v56 = vld [vmem:[%s4185_s3 + $0x2b0] ss:$24 sps:$4 sm:$0xff]  }
 0x173   : > { %1552 = vmatprep.mubr.bf16.mxu1 %v829_v54  ;;  %1522 = vmatprep.subr.bf16.mxu1 %v2941_v58  ;;  %v3019_v54 = vld [vmem:[%s4185_s3 + $0x2b4] ss:$24 sps:$4 sm:$0xff]   ;;  %v3020_v58 = vld [vmem:[%s4187_s5 + $0x2a8] ss:$24 sps:$4 sm:$0xff]  }
 0x174   : > { %2214 = vmatprep.subr.bf16.mxu0 %v2944_v60  ;;  %2244 = vmatprep.mubr.bf16.mxu0 %v3772_v62  ;;  %v3025_v60 = vld [vmem:[%s4185_s3 + $0x2e4] ss:$24 sps:$4 sm:$0xff]  }
 0x176   : > { %1523 = vmatpush1.bf16.msra.mxu1 %v2939_v63  ;;  %2215 = vmatpush1.bf16.msra.mxu0 %v2942_v0  ;;  %v3028_v63 = vld [vmem:[%s4187_s5 + $0x2dc] ss:$24 sps:$4 sm:$0xff]   ;;  %v3023_v0 = vld [vmem:[%s4185_s3 + $0x2e0] ss:$24 sps:$4 sm:$0xff]  }
 0x177   : > { %1524 = vmatprep.subr.bf16.mxu1 %v2947_v1  ;;  %2216 = vmatprep.subr.bf16.mxu0 %v2950_v2  ;;  %v3026_v1 = vld [vmem:[%s4187_s5 + $0x2d8] ss:$24 sps:$4 sm:$0xff]  }
 0x178   : > { %v3951_v2 = vld [vmem:[#allocation3] sm:$0xff] }
 0x17a   : > { %1525 = vmatpush1.bf16.msra.mxu1 %v2945_v3  ;;  %2217 = vmatpush1.bf16.msra.mxu0 %v2948_v4  ;;  %v3031_v3 = vld [vmem:[%s4187_s5 + $0x4] ss:$24 sps:$4 sm:$0xff]   ;;  %v3049_v4 = vld [vmem:[%s4187_s5 + $0x14] ss:$24 sps:$4 sm:$0xff]  }
 0x17b   : > { %1526 = vmatprep.subr.bf16.mxu1 %v2953_v5  ;;  %2218 = vmatprep.subr.bf16.mxu0 %v2956_v6  ;;  %v3961_v5 = vpack.c.bf16 %v3951_v2, %v3951_v2  ;;  %v3029_v6 = vld [vmem:[%s4187_s5] ss:$24 sps:$4 sm:$0xff]  }
 0x17e   : > { %1527 = vmatpush1.bf16.msra.mxu1 %v2951_v7  ;;  %2219 = vmatpush1.bf16.msra.mxu0 %v2954_v8  ;;  %v3047_v7 = vld [vmem:[%s4187_s5 + $0x10] ss:$24 sps:$4 sm:$0xff]   ;;  %v3034_v8 = vld [vmem:[%s4187_s5 + $0x34] ss:$24 sps:$4 sm:$0xff]  }
 0x17f   : > { %1528 = vmatprep.subr.bf16.mxu1 %v2959_v9  ;;  %2220 = vmatprep.subr.bf16.mxu0 %v2962_v10  ;;  %v3055_v9 = vld [vmem:[%s4187_s5 + $0x44] ss:$24 sps:$4 sm:$0xff]   ;;  %v3032_v10 = vld [vmem:[%s4187_s5 + $0x30] ss:$24 sps:$4 sm:$0xff]  }
 0x182   : > { %1529 = vmatpush1.bf16.msra.mxu1 %v2957_v11  ;;  %2221 = vmatpush1.bf16.msra.mxu0 %v2960_v12  ;;  %v3053_v11 = vld [vmem:[%s4187_s5 + $0x40] ss:$24 sps:$4 sm:$0xff]   ;;  %v3037_v12 = vld [vmem:[%s4187_s5 + $0x64] ss:$24 sps:$4 sm:$0xff]  }
 0x183   : > { %1530 = vmatprep.subr.bf16.mxu1 %v2965_v13  ;;  %2222 = vmatprep.subr.bf16.mxu0 %v2968_v14  ;;  %v3035_v13 = vld [vmem:[%s4187_s5 + $0x60] ss:$24 sps:$4 sm:$0xff]   ;;  %v3059_v14 = vld [vmem:[%s4187_s5 + $0x70] ss:$24 sps:$4 sm:$0xff]  }
 0x186   : > { %1531 = vmatpush1.bf16.msra.mxu1 %v2963_v15  ;;  %2223 = vmatpush1.bf16.msra.mxu0 %v2966_v17  ;;  %v3040_v15 = vld [vmem:[%s4187_s5 + $0x94] ss:$24 sps:$4 sm:$0xff]   ;;  %v3038_v17 = vld [vmem:[%s4187_s5 + $0x90] ss:$24 sps:$4 sm:$0xff]  }
 0x187   : > { %1532 = vmatprep.subr.bf16.mxu1 %v2971_v19  ;;  %2224 = vmatprep.subr.bf16.mxu0 %v2974_v20  ;;  %v3065_v19 = vld [vmem:[%s4187_s5 + $0xa0] ss:$24 sps:$4 sm:$0xff]   ;;  %v3043_v20 = vld [vmem:[%s4187_s5 + $0xc4] ss:$24 sps:$4 sm:$0xff]  }
 0x18a   : > { %1533 = vmatpush1.bf16.msra.mxu1 %v2969_v21  ;;  %2225 = vmatpush1.bf16.msra.mxu0 %v2972_v22  ;;  %v3073_v21 = vld [vmem:[%s4187_s5 + $0xd4] ss:$24 sps:$4 sm:$0xff]   ;;  %v3041_v22 = vld [vmem:[%s4187_s5 + $0xc0] ss:$24 sps:$4 sm:$0xff]  }
 0x18b   : > { %1534 = vmatprep.subr.bf16.mxu1 %v2977_v23  ;;  %2226 = vmatprep.subr.bf16.mxu0 %v2980_v24  ;;  %v3071_v23 = vld [vmem:[%s4187_s5 + $0xd0] ss:$24 sps:$4 sm:$0xff]   ;;  %v3046_v24 = vld [vmem:[%s4187_s5 + $0xf4] ss:$24 sps:$4 sm:$0xff]  }
 0x18e   : > { %1535 = vmatpush1.bf16.msra.mxu1 %v2975_v25  ;;  %2227 = vmatpush1.bf16.msra.mxu0 %v2978_v26  ;;  %v3079_v25 = vld [vmem:[%s4187_s5 + $0x104] ss:$24 sps:$4 sm:$0xff]   ;;  %v3044_v26 = vld [vmem:[%s4187_s5 + $0xf0] ss:$24 sps:$4 sm:$0xff]  }
 0x18f   : > { %1536 = vmatprep.subr.bf16.mxu1 %v2983_v27  ;;  %2228 = vmatprep.subr.bf16.mxu0 %v2986_v28  ;;  %v3077_v27 = vld [vmem:[%s4187_s5 + $0x100] ss:$24 sps:$4 sm:$0xff]   ;;  %v3052_v28 = vld [vmem:[%s4187_s5 + $0x124] ss:$24 sps:$4 sm:$0xff]  }
 0x192   : > { %1537 = vmatpush1.bf16.msra.mxu1 %v2981_v29  ;;  %2229 = vmatpush1.bf16.msra.mxu0 %v2984_v30  ;;  %v3085_v29 = vld [vmem:[%s4187_s5 + $0x134] ss:$24 sps:$4 sm:$0xff]   ;;  %v3050_v30 = vld [vmem:[%s4187_s5 + $0x120] ss:$24 sps:$4 sm:$0xff]  }
 0x193   : > { %1538 = vmatprep.subr.bf16.mxu1 %v2989_v31  ;;  %2230 = vmatprep.subr.bf16.mxu0 %v2992_v32  ;;  %v3083_v31 = vld [vmem:[%s4187_s5 + $0x130] ss:$24 sps:$4 sm:$0xff]   ;;  %v3058_v32 = vld [vmem:[%s4187_s5 + $0x154] ss:$24 sps:$4 sm:$0xff]  }
 0x196   : > { %1539 = vmatpush1.bf16.msra.mxu1 %v2987_v33  ;;  %2231 = vmatpush1.bf16.msra.mxu0 %v2990_v34  ;;  %v3091_v33 = vld [vmem:[%s4187_s5 + $0x164] ss:$24 sps:$4 sm:$0xff]   ;;  %v3056_v34 = vld [vmem:[%s4187_s5 + $0x150] ss:$24 sps:$4 sm:$0xff]  }
 0x197   : > { %1540 = vmatprep.subr.bf16.mxu1 %v2995_v35  ;;  %2232 = vmatprep.subr.bf16.mxu0 %v2998_v36  ;;  %v3089_v35 = vld [vmem:[%s4187_s5 + $0x160] ss:$24 sps:$4 sm:$0xff]   ;;  %v3064_v36 = vld [vmem:[%s4187_s5 + $0x184] ss:$24 sps:$4 sm:$0xff]  }
 0x19a   : > { %1541 = vmatpush1.bf16.msra.mxu1 %v2993_v37  ;;  %2233 = vmatpush1.bf16.msra.mxu0 %v2996_v38  ;;  %v3097_v37 = vld [vmem:[%s4187_s5 + $0x194] ss:$24 sps:$4 sm:$0xff]   ;;  %v3062_v38 = vld [vmem:[%s4187_s5 + $0x180] ss:$24 sps:$4 sm:$0xff]  }
 0x19b   : > { %1542 = vmatprep.subr.bf16.mxu1 %v3001_v39  ;;  %2234 = vmatprep.subr.bf16.mxu0 %v3004_v40  ;;  %v3095_v39 = vld [vmem:[%s4187_s5 + $0x190] ss:$24 sps:$4 sm:$0xff]   ;;  %v3070_v40 = vld [vmem:[%s4187_s5 + $0x1b4] ss:$24 sps:$4 sm:$0xff]  }
 0x19e   : > { %1543 = vmatpush1.bf16.msra.mxu1 %v2999_v41  ;;  %2235 = vmatpush1.bf16.msra.mxu0 %v3002_v42  ;;  %v3103_v41 = vld [vmem:[%s4187_s5 + $0x1c4] ss:$24 sps:$4 sm:$0xff]   ;;  %v3068_v42 = vld [vmem:[%s4187_s5 + $0x1b0] ss:$24 sps:$4 sm:$0xff]  }
 0x19f   : > { %1544 = vmatprep.subr.bf16.mxu1 %v3007_v43  ;;  %2236 = vmatprep.subr.bf16.mxu0 %v3010_v44  ;;  %v3101_v43 = vld [vmem:[%s4187_s5 + $0x1c0] ss:$24 sps:$4 sm:$0xff]   ;;  %v3076_v44 = vld [vmem:[%s4187_s5 + $0x1e4] ss:$24 sps:$4 sm:$0xff]  }
 0x1a2   : > { %1545 = vmatpush1.bf16.msra.mxu1 %v3005_v45  ;;  %2237 = vmatpush1.bf16.msra.mxu0 %v3008_v46  ;;  %v3109_v45 = vld [vmem:[%s4187_s5 + $0x1f4] ss:$24 sps:$4 sm:$0xff]   ;;  %v3074_v46 = vld [vmem:[%s4187_s5 + $0x1e0] ss:$24 sps:$4 sm:$0xff]  }
 0x1a3   : > { %1546 = vmatprep.subr.bf16.mxu1 %v3013_v47  ;;  %2238 = vmatprep.subr.bf16.mxu0 %v3016_v48  ;;  %v3107_v47 = vld [vmem:[%s4187_s5 + $0x1f0] ss:$24 sps:$4 sm:$0xff]   ;;  %v3082_v48 = vld [vmem:[%s4187_s5 + $0x214] ss:$24 sps:$4 sm:$0xff]  }
 0x1a6   : > { %1547 = vmatpush1.bf16.msra.mxu1 %v3011_v50  ;;  %2239 = vmatpush1.bf16.msra.mxu0 %v3014_v51  ;;  %v3112_v50 = vld [vmem:[%s4187_s5 + $0x224] ss:$24 sps:$4 sm:$0xff]   ;;  %v3080_v51 = vld [vmem:[%s4187_s5 + $0x210] ss:$24 sps:$4 sm:$0xff]  }
 0x1a7   : > { %1548 = vmatprep.subr.bf16.mxu1 %v3019_v54  ;;  %2240 = vmatprep.subr.bf16.mxu0 %v3022_v55  ;;  %v3110_v54 = vld [vmem:[%s4187_s5 + $0x220] ss:$24 sps:$4 sm:$0xff]   ;;  %v3088_v55 = vld [vmem:[%s4187_s5 + $0x244] ss:$24 sps:$4 sm:$0xff]  }
 0x1aa   : > { %1549 = vmatpush1.bf16.msra.mxu1 %v3017_v56  ;;  %2241 = vmatpush1.bf16.msra.mxu0 %v3020_v58  ;;  %v3115_v56 = vld [vmem:[%s4187_s5 + $0x254] ss:$24 sps:$4 sm:$0xff]   ;;  %v3086_v58 = vld [vmem:[%s4187_s5 + $0x240] ss:$24 sps:$4 sm:$0xff]  }
 0x1ab   : > { %1550 = vmatprep.subr.bf16.mxu1 %v3025_v60  ;;  %2242 = vmatprep.subr.bf16.mxu0 %v3028_v63  ;;  %v3113_v60 = vld [vmem:[%s4187_s5 + $0x250] ss:$24 sps:$4 sm:$0xff]   ;;  %v3094_v63 = vld [vmem:[%s4187_s5 + $0x274] ss:$24 sps:$4 sm:$0xff]  }
 0x1ae   : > { %1551 = vmatpush1.bf16.msra.mxu1 %v3023_v0  ;;  %2243 = vmatpush1.bf16.msra.mxu0 %v3026_v1  ;;  %v3118_v0 = vld [vmem:[%s4187_s5 + $0x284] ss:$24 sps:$4 sm:$0xff]   ;;  %v3092_v1 = vld [vmem:[%s4187_s5 + $0x270] ss:$24 sps:$4 sm:$0xff]  }
 0x1af   : > { %2171 = vmatprep.subr.bf16.mxu1 %v3031_v3  ;;  %2253 = vmatprep.subr.bf16.mxu0 %v3049_v4  ;;  %v3116_v3 = vld [vmem:[%s4187_s5 + $0x280] ss:$24 sps:$4 sm:$0xff]   ;;  %v3100_v4 = vld [vmem:[%s4187_s5 + $0x2a4] ss:$24 sps:$4 sm:$0xff]  }
 0x1b1   : > { %1553 = vmatmul.mubr.bf16.vlgmr.msra.gmra.mrb[8].mxu1 %v3762_v57  ;;  %2245 = vmatmul.mubr.bf16.vlgmr.msra.gmra.mrb[8].mxu0 %v3961_v5  ;;  %v3061_v57 = vld [vmem:[%s4187_s5 + $0x74] ss:$24 sps:$4 sm:$0xff]  }
 0x1b2   : > { %2172 = vmatpush1.bf16.msra.mxu1 %v3029_v6  ;;  %2254 = vmatpush1.bf16.msra.mxu0 %v3047_v7  ;;  %v3121_v6 = vld [vmem:[%s4187_s5 + $0x2b4] ss:$24 sps:$4 sm:$0xff]   ;;  %v3098_v7 = vld [vmem:[%s4187_s5 + $0x2a0] ss:$24 sps:$4 sm:$0xff]  }
 0x1b3   : > { %2173 = vmatprep.subr.bf16.mxu1 %v3034_v8  ;;  %2255 = vmatprep.subr.bf16.mxu0 %v3055_v9  ;;  %v3119_v8 = vld [vmem:[%s4187_s5 + $0x2b0] ss:$24 sps:$4 sm:$0xff]   ;;  %v3106_v9 = vld [vmem:[%s4187_s5 + $0x2d4] ss:$24 sps:$4 sm:$0xff]  }
 0x1b4   : > { %2203 = vmatprep.mubr.bf16.mxu1 %v3772_v62  ;;  %2285 = vmatprep.mubr.bf16.mxu0 %v3772_v62  ;;  %v3067_v62 = vld [vmem:[%s4187_s5 + $0xa4] ss:$24 sps:$4 sm:$0xff]  }
 0x1b6   : > { %2174 = vmatpush1.bf16.msra.mxu1 %v3032_v10  ;;  %2256 = vmatpush1.bf16.msra.mxu0 %v3053_v11  ;;  %v3124_v10 = vld [vmem:[%s4187_s5 + $0x2e4] ss:$24 sps:$4 sm:$0xff]   ;;  %v3104_v11 = vld [vmem:[%s4187_s5 + $0x2d0] ss:$24 sps:$4 sm:$0xff]  }
 0x1b7   : > { %2175 = vmatprep.subr.bf16.mxu1 %v3037_v12  ;;  %2257 = vmatprep.subr.bf16.mxu0 %v3061_v57  ;;  %v3122_v12 = vld [vmem:[%s4187_s5 + $0x2e0] ss:$24 sps:$4 sm:$0xff]  }
 0x1ba   : > { %2176 = vmatpush1.bf16.msra.mxu1 %v3035_v13  ;;  %2258 = vmatpush1.bf16.msra.mxu0 %v3059_v14 }
 0x1bb   : > { %2177 = vmatprep.subr.bf16.mxu1 %v3040_v15  ;;  %2259 = vmatprep.subr.bf16.mxu0 %v3067_v62 }
 0x1be   : > { %2178 = vmatpush1.bf16.msra.mxu1 %v3038_v17  ;;  %2260 = vmatpush1.bf16.msra.mxu0 %v3065_v19 }
 0x1bf   : > { %2179 = vmatprep.subr.bf16.mxu1 %v3043_v20  ;;  %2261 = vmatprep.subr.bf16.mxu0 %v3073_v21  ;;  %v926_v21 = vld [vmem:[%s4186_s4] sm:$0x3f] }
 0x1c2   : > { %2180 = vmatpush1.bf16.msra.mxu1 %v3041_v22  ;;  %2262 = vmatpush1.bf16.msra.mxu0 %v3071_v23  ;;  %v1659_v22 = vld [vmem:[%s4188_s6] sm:$0x3f]  ;;  %v931_v23 = vrot.slane %v926_v21, %v3720_v49 }
 0x1c3   : > { %2181 = vmatprep.subr.bf16.mxu1 %v3046_v24  ;;  %2263 = vmatprep.subr.bf16.mxu0 %v3079_v25  ;;  %v935_v24 = vrot.slane %v926_v21, %v3725_v52  ;;  %v1668_v25 = vrot.slane %v1659_v22, %v3725_v52 }
 0x1c6   : > { %2182 = vmatpush1.bf16.msra.mxu1 %v3044_v26  ;;  %2264 = vmatpush1.bf16.msra.mxu0 %v3077_v27  ;;  %v939_v26 = vrot.slane %v926_v21, %v3736_v59  ;;  %v1672_v27 = vrot.slane %v1659_v22, %v3736_v59 }
 0x1c7   : > { %2183 = vmatprep.subr.bf16.mxu1 %v3052_v28  ;;  %2265 = vmatprep.subr.bf16.mxu0 %v3085_v29  ;;  %v943_v28 = vrot.slane %v926_v21, %v3739_v61  ;;  %v1676_v29 = vrot.slane %v1659_v22, %v3739_v61 }
 0x1ca   : > { %2184 = vmatpush1.bf16.msra.mxu1 %v3050_v30  ;;  %2266 = vmatpush1.bf16.msra.mxu0 %v3083_v31  ;;  %v2670_v31 = vadd.f32 %v1668_v25, %v935_v24 }
 0x1cb   : > { %2185 = vmatprep.subr.bf16.mxu1 %v3058_v32  ;;  %2267 = vmatprep.subr.bf16.mxu0 %v3091_v33  ;;  %v2672_v32 = vadd.f32 %v1672_v27, %v939_v26 }
 0x1ce   : > { %2186 = vmatpush1.bf16.msra.mxu1 %v3056_v34  ;;  %2268 = vmatpush1.bf16.msra.mxu0 %v3089_v35  ;;  %v2674_v35 = vadd.f32 %v1676_v29, %v943_v28 }
 0x1cf   : > { %2187 = vmatprep.subr.bf16.mxu1 %v3064_v36  ;;  %2269 = vmatprep.subr.bf16.mxu0 %v3097_v37 }
 0x1d2   : > { %2188 = vmatpush1.bf16.msra.mxu1 %v3062_v38  ;;  %2270 = vmatpush1.bf16.msra.mxu0 %v3095_v39 }
 0x1d3   : > { %2189 = vmatprep.subr.bf16.mxu1 %v3070_v40  ;;  %2271 = vmatprep.subr.bf16.mxu0 %v3103_v41 }
 0x1d6   : > { %2190 = vmatpush1.bf16.msra.mxu1 %v3068_v42  ;;  %2272 = vmatpush1.bf16.msra.mxu0 %v3101_v43 }
 0x1d7   : > { %2191 = vmatprep.subr.bf16.mxu1 %v3076_v44  ;;  %2273 = vmatprep.subr.bf16.mxu0 %v3109_v45 }
 0x1da   : > { %2192 = vmatpush1.bf16.msra.mxu1 %v3074_v46  ;;  %2274 = vmatpush1.bf16.msra.mxu0 %v3107_v47 }
 0x1db   : > { %2193 = vmatprep.subr.bf16.mxu1 %v3082_v48  ;;  %2275 = vmatprep.subr.bf16.mxu0 %v3112_v50 }
 0x1de   : > { %2194 = vmatpush1.bf16.msra.mxu1 %v3080_v51  ;;  %2276 = vmatpush1.bf16.msra.mxu0 %v3110_v54  ;;  %v1680_v51 = vrot.slane %v1659_v22, %v3745_v16 }
 0x1df   : > { %2195 = vmatprep.subr.bf16.mxu1 %v3088_v55  ;;  %2277 = vmatprep.subr.bf16.mxu0 %v3115_v56  ;;  %v1684_v55 = vrot.slane %v1659_v22, %v3747_v18 }
 0x1e2   : > { %2196 = vmatpush1.bf16.msra.mxu1 %v3086_v58  ;;  %2278 = vmatpush1.bf16.msra.mxu0 %v3113_v60  ;;  %v947_v58 = vrot.slane %v926_v21, %v3745_v16 }
 0x1e3   : > { %2197 = vmatprep.subr.bf16.mxu1 %v3094_v63  ;;  %2279 = vmatprep.subr.bf16.mxu0 %v3118_v0  ;;  %v951_v0 = vrot.slane %v926_v21, %v3747_v18 }
 0x1e6   : > { %2198 = vmatpush1.bf16.msra.mxu1 %v3092_v1  ;;  %2280 = vmatpush1.bf16.msra.mxu0 %v3116_v3 }
 0x1e7   : > { %2199 = vmatprep.subr.bf16.mxu1 %v3100_v4  ;;  %2281 = vmatprep.subr.bf16.mxu0 %v3121_v6 }
 0x1ea   : > { %2200 = vmatpush1.bf16.msra.mxu1 %v3098_v7  ;;  %2282 = vmatpush1.bf16.msra.mxu0 %v3119_v8 }
 0x1eb   : > { %2201 = vmatprep.subr.bf16.mxu1 %v3106_v9  ;;  %2283 = vmatprep.subr.bf16.mxu0 %v3124_v10 }
 0x1ee   : > { %2202 = vmatpush1.bf16.msra.mxu1 %v3104_v11  ;;  %2284 = vmatpush1.bf16.msra.mxu0 %v3122_v12 }
 0x1f1   : > { %2204 = vmatmul.mubr.bf16.vlgmr.msra.gmra.mrb[4].mxu1 %v3961_v5  ;;  %2286 = vmatmul.mubr.bf16.vlgmr.msra.gmra.mrb[12].mxu0 %v3961_v5  ;;  %v1664_v5 = vrot.slane %v1659_v22, %v3720_v49 }
 0x1f3   : > { %v2668_v30 = vadd.f32 %v1664_v5, %v931_v23 }
 0x284   : > { %v1554_v57 = vpop.f32.mrb[8].mxu1  ;;  %v2246_v13 = vpop.f32.mrb[8].mxu0 }
 0x285   : > { %v1556_v14 = vpop.f32.mrb[9].mxu1  ;;  %v2248_v15 = vpop.f32.mrb[9].mxu0  ;;  %v2673_v59 = vadd.f32 %v2672_v32, %v2246_v13  ;;  %v1555_v7 = vadd.f32 %v1554_v57, %v947_v58 }
 0x286   : > { %v1558_v62 = vpop.f32.mrb[10].mxu1  ;;  %v2250_v17 = vpop.f32.mrb[10].mxu0  ;;  %v2675_v44 = vadd.f32 %v2674_v35, %v2248_v15  ;;  %v1557_v9 = vadd.f32 %v1556_v14, %v951_v0 }
 0x287   : > { %v1559_v19 = vpop.f32.mrb[11].mxu1  ;;  %v2251_v20 = vpop.f32.mrb[11].mxu0  ;;  %v2660_v61 = vmul.f32 -1.442695, %v2673_v59 }
 0x288   : > { %v2661_v45 = vmul.f32 -1.442695, %v2675_v44 }
 0x2c4   : > { %v2205_v33 = vpop.f32.mrb[4].mxu1  ;;  %v2287_v34 = vpop.f32.mrb[12].mxu0 }
 0x2c5   : > { %v2669_v36 = vadd.f32 %v2668_v30, %v2205_v33  ;;  %v2207_v49 = vpop.f32.mrb[5].mxu1  ;;  %v2289_v37 = vpop.f32.mrb[13].mxu0  ;;  %v2288_v63 = vadd.f32 %v2287_v34, %v1680_v51 }
 0x2c6   : > { %v2671_v38 = vadd.f32 %v2670_v31, %v2207_v49  ;;  %v2209_v39 = vpop.f32.mrb[6].mxu1  ;;  %v2291_v52 = vpop.f32.mrb[14].mxu0  ;;  %v2290_v3 = vadd.f32 %v2289_v37, %v1684_v55 }
 0x2c7   : > { %v2658_v40 = vmul.f32 -1.442695, %v2669_v36  ;;  %v2210_v41 = vpop.f32.mrb[7].mxu1  ;;  %v2292_v42 = vpop.f32.mrb[15].mxu0 }
 0x2c8   : > { %v2659_v43 = vmul.f32 -1.442695, %v2671_v38 }
 0x2c9   : > { %3145 = vpow2.f32 %v2658_v40 }
 0x2ca   : > { %3147 = vpow2.f32 %v2659_v43 }
 0x2cb   : > { %3149 = vpow2.f32 %v2660_v61 }
 0x2cc   : > { %3151 = vpow2.f32 %v2661_v45 }
 0x2d3   : > { %v3146_v46 = vpop.eup %3145 }
 0x2d4   : > { %v3148_v47 = vpop.eup %3147  ;;  %v2302_v48 = vadd.f32 1.0, %v3146_v46 }
 0x2d5   : > { %v2303_v50 = vadd.f32 1.0, %v3148_v47  ;;  %v3150_v54 = vpop.eup %3149 }
 0x2d6   : > { %3153 = vrcp.f32 %v2302_v48  ;;  %v3152_v56 = vpop.eup %3151  ;;  %v2316_v60 = vadd.f32 1.0, %v3150_v54 }
 0x2d7   : > { %3155 = vrcp.f32 %v2303_v50  ;;  %v2317_v1 = vadd.f32 1.0, %v3152_v56 }
 0x2d8   : > { %3157 = vrcp.f32 %v2316_v60 }
 0x2d9   : > { %3159 = vrcp.f32 %v2317_v1 }
 0x2e0   : > { %v3154_v4 = vpop.eup %3153 }
 0x2e1   : > { %v3156_v6 = vpop.eup %3155  ;;  %v2322_v8 = vmul.f32 %v3154_v4, %v2288_v63 }
 0x2e2   : > { %v2323_v10 = vmul.f32 %v3156_v6, %v2290_v3  ;;  %v3158_v16 = vpop.eup %3157 }
 0x2e3   : > { %v2324_v11 = vadd.f32 %v2322_v8, %v1555_v7  ;;  %v3160_v13 = vpop.eup %3159  ;;  %v2328_v15 = vsub.f32 1.0, %v3158_v16  ;;  %v2332_v19 = vmul.f32 %v3158_v16, %v3951_v2 }
 0x2e4   : > { %v2325_v12 = vadd.f32 %v2323_v10, %v1557_v9  ;;  %v2329_v18 = vsub.f32 1.0, %v3160_v13  ;;  %v2333_v57 = vmul.f32 %v3160_v13, %v3754_v53 }
 0x2e5   : > { %3161 = vtanh.f32 %v2324_v11 }
 0x2e6   : > { %3163 = vtanh.f32 %v2325_v12 }
 0x2ef   : > { %v3162_v62 = vpop.eup %3161 }
 0x2f0   : > { %v3164_v17 = vpop.eup %3163  ;;  %v2330_v20 = vmul.f32 %v3162_v62, %v2328_v15 }
 0x2f1   : > { %v2331_v21 = vmul.f32 %v3164_v17, %v2329_v18  ;;  %38 = sbr.rel (!%p36_p0) target bundleno = 3 (0x3), region = 61 }
 0x2f2   : > { %v2334_v14 = vadd.f32 %v2332_v19, %v2330_v20 }
 0x2f3   : > { %v2335_v22 = vadd.f32 %v2333_v57, %v2331_v21 }
 0x2f4   : > { %2338 = vst [vmem:[#allocation3] sm:$0xff] %v2334_v14 }
 0x2f5   : > { %2339 = vst [vmem:[#allocation3 + $0x8] sm:$0xff] %v2335_v22  ;;  %v2666_v23 = vpack.c.bf16 %v2335_v22, %v2334_v14 }
 0x2f7   : > { %2351 = vst [vmem:[%s2350_s19] sm:$0xff] %v2666_v23 }

// kernel: gruse_forward.48
= control target key start
LH: loop header
LB: loop body
LE: loop exit
PB: predicated region body
PF: predicated region fallthrough
CT: control target
= control target key end

     0   :  { %vm54_vm2 = vcmask 519168   ;;  %s111_s0 = inlined_call_operand.vmem [shape: f32[16,64], index: 0, kind: input, shape index: {}]   ;;  %s112_s1 = inlined_call_operand.vmem [shape: f32[1,64], index: 1, kind: input, shape index: {}]   ;;  %s113_s2 = inlined_call_operand.vmem [shape: f32[1,64], index: 2, kind: input, shape index: {}]   ;;  %s114_s3 = inlined_call_operand.vmem [shape: bf16[16,64], index: 3, kind: output, shape index: {}]  }
   0x1   :  { %v14_v0 = vld [vmem:[%s111_s0] sm:$0xff]  ;;  %v15_v4 = vld [vmem:[%s111_s0 + $0x8] sm:$0xff] }
   0x2   :  { %v61_v1 = vld [vmem:[%s112_s1] ss:$0 sm:$0xff] }
   0x3   :  { %v62_v2 = vld [vmem:[%s113_s2] ss:$0 sm:$0xff]  ;;  %v23_v3 = vmul.f32 %v61_v1, %v14_v0  ;;  %v24_v5 = vmul.f32 %v61_v1, %v15_v4 }
   0x5   :  { %v32_v6 = vadd.f32 %v62_v2, %v23_v3  ;;  %v33_v7 = vadd.f32 %v62_v2, %v24_v5 }
   0x7   :  { %v36_v8 = vmin.f32 %v32_v6, 0.0  ;;  %v37_v9 = vmin.f32 %v33_v7, 0.0  ;;  %vm34_vm0 = vcmp.gt.f32.partialorder %v32_v6, 0.0  ;;  %vm35_vm1 = vcmp.gt.f32.partialorder %v33_v7, 0.0 }
   0x9   :  { %v38_v10 = vmul.f32 1.442695, %v36_v8  ;;  %v40_v11 = vmul.f32 1.442695, %v37_v9 }
   0xb   :  { %69 = vpow2.f32 %v38_v10 }
   0xc   :  { %71 = vpow2.f32 %v40_v11 }
  0x15   :  { %v70_v12 = vpop.eup %69 }
  0x16   :  { %v72_v13 = vpop.eup %71  ;;  %v63_v14 = vadd.f32 -1.0, %v70_v12 }
  0x17   :  { %v64_v15 = vadd.f32 -1.0, %v72_v13 }
  0x18   :  { %v44_v16 = vsel %vm34_vm0, %v32_v6, %v63_v14 }
  0x19   :  { %v67_v17 = vpack.c.bf16 %v44_v16, %v44_v16  ;;  %v45_v18 = vsel %vm35_vm1, %v33_v7, %v64_v15 }
  0x1a   :  { %v68_v19 = vpack.c.bf16 %v45_v18, %v45_v18 }
  0x1b   :  { %55 = vst.msk [vmem:[%s114_s3] sm:$0xf] %vm54_vm2, %v67_v17 }
  0x1c   :  { %56 = vst.msk [vmem:[%s114_s3 + $0x4] sm:$0xf] %vm54_vm2, %v68_v19 }

// kernel: gruse_forward.46
= control target key start
LH: loop header
LB: loop body
LE: loop exit
PB: predicated region body
PF: predicated region fallthrough
CT: control target
= control target key end

     0   :  { %vm386_vm0 = vcmask 523264   ;;  %s705_s1 = inlined_call_operand.vmem [shape: bf16[512,64], index: 1, kind: input, shape index: {}]   ;;  %s706_s0 = inlined_call_operand.vmem [shape: bf16[16,512], index: 0, kind: input, shape index: {}]   ;;  %s707_s2 = inlined_call_operand.vmem [shape: f32[1,64], index: 2, kind: input, shape index: {}]   ;;  %s708_s3 = inlined_call_operand.vmem [shape: f32[16,64], index: 3, kind: output, shape index: {0}]   ;;  %s709_s4 = inlined_call_operand.vmem [shape: f32[8,64], index: 4, kind: output, shape index: {1}]  }
   0x1   :  { %v515_v0 = vld [vmem:[%s705_s1 + $0x40] sm:$0xff]   ;;  %v519_v4 = vld [vmem:[%s705_s1 + $0x48] sm:$0xff]   ;;  %v523_v8 = vld [vmem:[%s705_s1 + $0x50] sm:$0xff]  }
   0x2   :  { %v516_v1 = vld [vmem:[%s705_s1 + $0xc0] sm:$0xff]   ;;  %471 = vmatprep.subr.bf16.mxu0 %v515_v0  ;;  %v520_v5 = vld [vmem:[%s705_s1 + $0xc8] sm:$0xff]   ;;  %v524_v9 = vld [vmem:[%s705_s1 + $0xd0] sm:$0xff]   ;;  %v389_v0 = vlaneseq }
   0x3   :  { %v517_v2 = vld [vmem:[%s705_s1] sm:$0xff]   ;;  %493 = vmatprep.subr.bf16.mxu1 %v516_v1  ;;  %v521_v6 = vld [vmem:[%s705_s1 + $0x8] sm:$0xff]   ;;  %v525_v10 = vld [vmem:[%s705_s1 + $0x10] sm:$0xff]  }
   0x4   :  { %v518_v3 = vld [vmem:[%s705_s1 + $0x80] sm:$0xff]   ;;  %472 = vmatpush3.bf16.msra.mxu0 %v517_v2  ;;  %v522_v7 = vld [vmem:[%s705_s1 + $0x88] sm:$0xff]   ;;  %v526_v11 = vld [vmem:[%s705_s1 + $0x90] sm:$0xff]  }
   0x5   :  { %494 = vmatpush3.bf16.msra.mxu1 %v518_v3  ;;  %473 = vmatprep.subr.bf16.mxu0 %v519_v4  ;;  %v527_v12 = vld [vmem:[%s705_s1 + $0x58] sm:$0xff]   ;;  %v531_v16 = vld [vmem:[%s705_s1 + $0x60] sm:$0xff]   ;;  %v535_v20 = vld [vmem:[%s705_s1 + $0x68] sm:$0xff]  }
   0x6   :  { %495 = vmatprep.subr.bf16.mxu1 %v520_v5  ;;  %v528_v13 = vld [vmem:[%s705_s1 + $0xd8] sm:$0xff]   ;;  %v532_v17 = vld [vmem:[%s705_s1 + $0xe0] sm:$0xff]   ;;  %v536_v21 = vld [vmem:[%s705_s1 + $0xe8] sm:$0xff]   ;;  %v390_v5 = vshrl.u32 %v389_v0, 7 }
   0x7   :  { %v529_v14 = vld [vmem:[%s705_s1 + $0x18] sm:$0xff]   ;;  %v533_v18 = vld [vmem:[%s705_s1 + $0x20] sm:$0xff]   ;;  %v537_v22 = vld [vmem:[%s705_s1 + $0x28] sm:$0xff]  }
   0x8   :  { %474 = vmatpush3.bf16.msra.mxu0 %v521_v6  ;;  %v530_v15 = vld [vmem:[%s705_s1 + $0x98] sm:$0xff]   ;;  %v534_v19 = vld [vmem:[%s705_s1 + $0xa0] sm:$0xff]   ;;  %v538_v23 = vld [vmem:[%s705_s1 + $0xa8] sm:$0xff]   ;;  %vm420_vm1 = vcmp.eq.s32.totalorder %v390_v5, 0  ;;  %vm422_vm2 = vcmp.eq.s32.totalorder %v390_v5, 1 }
   0x9   :  { %496 = vmatpush3.bf16.msra.mxu1 %v522_v7  ;;  %475 = vmatprep.subr.bf16.mxu0 %v523_v8  ;;  %v539_v24 = vld [vmem:[%s705_s1 + $0x70] sm:$0xff]   ;;  %v543_v28 = vld [vmem:[%s705_s1 + $0x78] sm:$0xff]   ;;  %v434_v38 = vld [vmem:[%s707_s2] ss:$0 sm:$0xff] }
   0xa   :  { %497 = vmatprep.subr.bf16.mxu1 %v524_v9  ;;  %v540_v25 = vld [vmem:[%s705_s1 + $0xf0] sm:$0xff]   ;;  %v544_v29 = vld [vmem:[%s705_s1 + $0xf8] sm:$0xff]  }
   0xb   :  { %v541_v26 = vld [vmem:[%s705_s1 + $0x30] sm:$0xff]   ;;  %v545_v30 = vld [vmem:[%s705_s1 + $0x38] sm:$0xff]  }
   0xc   :  { %476 = vmatpush3.bf16.msra.mxu0 %v525_v10  ;;  %v542_v27 = vld [vmem:[%s705_s1 + $0xb0] sm:$0xff]   ;;  %v546_v31 = vld [vmem:[%s705_s1 + $0xb8] sm:$0xff]  }
   0xd   :  { %498 = vmatpush3.bf16.msra.mxu1 %v526_v11  ;;  %477 = vmatprep.subr.bf16.mxu0 %v527_v12  ;;  %v547_v32 = vld [vmem:[%s706_s0] ss:$16 sps:$4 sm:$0xff]   ;;  %v549_v33 = vld [vmem:[%s706_s0 + $0x4] ss:$16 sps:$4 sm:$0xff]   ;;  %v550_v34 = vld [vmem:[%s706_s0 + $0x8] ss:$16 sps:$4 sm:$0xff]  }
   0xe   :  { %499 = vmatprep.subr.bf16.mxu1 %v528_v13  ;;  %v552_v35 = vld [vmem:[%s706_s0 + $0xc] ss:$16 sps:$4 sm:$0xff]   ;;  %336 = vmatprep.mubr.bf16.mxu0 %v549_v33 }
   0xf   :  { %377 = vmatprep.mubr.bf16.mxu1 %v552_v35 }
  0x10   :  { %478 = vmatpush3.bf16.msra.mxu0 %v529_v14 }
  0x11   :  { %500 = vmatpush3.bf16.msra.mxu1 %v530_v15  ;;  %479 = vmatprep.subr.bf16.mxu0 %v531_v16 }
  0x12   :  { %501 = vmatprep.subr.bf16.mxu1 %v532_v17 }
  0x14   :  { %480 = vmatpush3.bf16.msra.mxu0 %v533_v18 }
  0x15   :  { %502 = vmatpush3.bf16.msra.mxu1 %v534_v19  ;;  %481 = vmatprep.subr.bf16.mxu0 %v535_v20 }
  0x16   :  { %503 = vmatprep.subr.bf16.mxu1 %v536_v21 }
  0x18   :  { %482 = vmatpush3.bf16.msra.mxu0 %v537_v22 }
  0x19   :  { %504 = vmatpush3.bf16.msra.mxu1 %v538_v23  ;;  %483 = vmatprep.subr.bf16.mxu0 %v539_v24 }
  0x1a   :  { %505 = vmatprep.subr.bf16.mxu1 %v540_v25 }
  0x1c   :  { %484 = vmatpush3.bf16.msra.mxu0 %v541_v26 }
  0x1d   :  { %506 = vmatpush3.bf16.msra.mxu1 %v542_v27  ;;  %485 = vmatprep.subr.bf16.mxu0 %v543_v28 }
  0x1e   :  { %507 = vmatprep.subr.bf16.mxu1 %v544_v29 }
  0x20   :  { %486 = vmatpush3.bf16.msra.mxu0 %v545_v30 }
  0x21   :  { %508 = vmatpush3.bf16.msra.mxu1 %v546_v31 }
  0x23   :  { %337 = vmatmul.mubr.bf16.vlgmr.msra.gmra.mrb[0].mxu0 %v547_v32 }
  0x24   :  { %378 = vmatmul.mubr.bf16.vlgmr.msra.gmra.mrb[0].mxu1 %v550_v34 }
  0xf6   :  { %v487_v36 = vpop.f32.mrb[0].mxu0 }
  0xf7   :  { %v509_v37 = vpop.f32.mrb[0].mxu1  ;;  %v488_v39 = vpop.f32.mrb[1].mxu0 }
  0xf8   :  { %v489_v40 = vadd.f32 %v488_v39, %v487_v36  ;;  %v510_v41 = vpop.f32.mrb[1].mxu1  ;;  %v490_v42 = vpop.f32.mrb[2].mxu0 }
  0xf9   :  { %v511_v43 = vadd.f32 %v510_v41, %v509_v37  ;;  %v512_v44 = vpop.f32.mrb[2].mxu1  ;;  %v491_v45 = vpop.f32.mrb[3].mxu0 }
  0xfa   :  { %v339_v46 = vadd.f32 %v489_v40, %v434_v38  ;;  %v492_v47 = vadd.f32 %v491_v45, %v490_v42  ;;  %v513_v48 = vpop.f32.mrb[3].mxu1 }
  0xfb   :  { %v514_v49 = vadd.f32 %v513_v48, %v512_v44 }
  0xfc   :  { %v380_v50 = vadd.f32 %v511_v43, %v339_v46  ;;  %v342_v51 = vadd.f32 %v492_v47, %v434_v38 }
  0xfe   :  { %387 = vst.msk [vmem:[%s708_s3] sm:$0xff] %vm386_vm0, %v380_v50  ;;  %v409_v52 = vmul.f32 %v380_v50, %v380_v50  ;;  %v383_v53 = vadd.f32 %v514_v49, %v342_v51  ;;  %v400_v54 = vsel %vm386_vm0, %v380_v50, 0.0 }
 0x100   :  { %388 = vst.msk [vmem:[%s708_s3 + $0x8] sm:$0xff] %vm386_vm0, %v383_v53  ;;  %v401_v55 = vsel %vm386_vm0, %v383_v53, 0.0  ;;  %v410_v56 = vmul.f32 %v383_v53, %v383_v53  ;;  %v411_v58 = vsel %vm386_vm0, %v409_v52, 0.0 }
 0x101   :  { %v402_v57 = vadd.f32 %v401_v55, %v400_v54 }
 0x102   :  { %v412_v59 = vsel %vm386_vm0, %v410_v56, 0.0 }
 0x103   :  { %v403_v60 = vrot.slane %v402_v57, 4  ;;  %v413_v61 = vadd.f32 %v412_v59, %v411_v58 }
 0x105   :  { %v404_v62 = vadd.f32 %v403_v60, %v402_v57  ;;  %v414_v63 = vrot.slane %v413_v61, 4 }
 0x107   :  { %v405_v1 = vrot.slane %v404_v62, 2  ;;  %v415_v2 = vadd.f32 %v414_v63, %v413_v61 }
 0x109   :  { %v406_v3 = vadd.f32 %v405_v1, %v404_v62  ;;  %v416_v4 = vrot.slane %v415_v2, 2 }
 0x10b   :  { %v407_v6 = vrot.slane %v406_v3, 1  ;;  %v417_v7 = vadd.f32 %v416_v4, %v415_v2 }
 0x10d   :  { %v408_v8 = vadd.f32 %v407_v6, %v406_v3  ;;  %v418_v9 = vrot.slane %v417_v7, 1 }
 0x10f   :  { %v419_v10 = vadd.f32 %v418_v9, %v417_v7  ;;  %v421_v11 = vsel %vm420_vm1, %v408_v8, 0.0 }
 0x111   :  { %v423_v12 = vsel %vm422_vm2, %v419_v10, 0.0 }
 0x112   :  { %v424_v13 = vadd.f32 %v423_v12, %v421_v11 }
 0x114   :  { %425 = vst.msk [vmem:[%s709_s4] sm:$0xff] %vm386_vm0, %v424_v13 }

// kernel: gruse_forward.50
= control target key start
LH: loop header
LB: loop body
LE: loop exit
PB: predicated region body
PF: predicated region fallthrough
CT: control target
= control target key end

     0   :  { %vm225_vm0 = vcmask 261120   ;;  %v230_v58 = vlaneseq  ;;  %s496_s1 = inlined_call_operand.vmem [shape: bf16[256,32], index: 1, kind: input, shape index: {}]   ;;  %s497_s0 = inlined_call_operand.vmem [shape: bf16[32,256], index: 0, kind: input, shape index: {}]   ;;  %s498_s2 = inlined_call_operand.vmem [shape: f32[1,32], index: 2, kind: input, shape index: {}]   ;;  %s499_s3 = inlined_call_operand.vmem [shape: f32[32,32], index: 3, kind: output, shape index: {0}]   ;;  %s500_s4 = inlined_call_operand.vmem [shape: f32[8,32], index: 4, kind: output, shape index: {1}]  }
   0x1   :  { %v358_v0 = vld [vmem:[%s496_s1 + $0x40] sm:$0xff]   ;;  %v360_v2 = vld [vmem:[%s496_s1 + $0x48] sm:$0xff]   ;;  %v362_v4 = vld [vmem:[%s496_s1 + $0x50] sm:$0xff]  }
   0x2   :  { %v359_v1 = vld [vmem:[%s496_s1] sm:$0xff]   ;;  %314 = vmatprep.subr.bf16.mxu0 %v358_v0  ;;  %342 = vmatprep.subr.bf16.mxu1 %v358_v0  ;;  %v361_v3 = vld [vmem:[%s496_s1 + $0x8] sm:$0xff]   ;;  %v363_v5 = vld [vmem:[%s496_s1 + $0x10] sm:$0xff]   ;;  %v231_v63 = vshrl.u32 %v230_v58, 7 }
   0x3   :  { %315 = vmatpush3.bf16.msra.mxu0 %v359_v1  ;;  %350 = vmatpush3.bf16.msra.mxu1 %v359_v1  ;;  %v364_v6 = vld [vmem:[%s496_s1 + $0x58] sm:$0xff]   ;;  %v366_v8 = vld [vmem:[%s496_s1 + $0x60] sm:$0xff]   ;;  %v368_v10 = vld [vmem:[%s496_s1 + $0x68] sm:$0xff]  }
   0x4   :  { %316 = vmatprep.subr.bf16.mxu0 %v360_v2  ;;  %343 = vmatprep.subr.bf16.mxu1 %v360_v2  ;;  %v365_v7 = vld [vmem:[%s496_s1 + $0x18] sm:$0xff]   ;;  %v367_v9 = vld [vmem:[%s496_s1 + $0x20] sm:$0xff]   ;;  %v369_v13 = vld [vmem:[%s496_s1 + $0x28] sm:$0xff]   ;;  %vm279_vm1 = vcmp.eq.s32.totalorder %v231_v63, 0  ;;  %vm281_vm2 = vcmp.eq.s32.totalorder %v231_v63, 1 }
   0x5   :  { %v376_v11 = vld [vmem:[%s497_s0 + $0x4] ss:$8 sps:$4 sm:$0xff]   ;;  %v379_v12 = vld [vmem:[%s497_s0 + $0x14] ss:$8 sps:$4 sm:$0xff]   ;;  %v374_v18 = vld [vmem:[%s497_s0] ss:$8 sps:$4 sm:$0xff]  }
   0x6   :  { %v370_v14 = vld [vmem:[%s496_s1 + $0x70] sm:$0xff]   ;;  %208 = vmatprep.mubr.bf16.mxu0 %v376_v11  ;;  %216 = vmatprep.mubr.bf16.mxu1 %v379_v12  ;;  %v372_v16 = vld [vmem:[%s496_s1 + $0x78] sm:$0xff]   ;;  %v293_v22 = vld [vmem:[%s498_s2] ss:$0 sm:$0xff] }
   0x7   :  { %317 = vmatpush3.bf16.msra.mxu0 %v361_v3  ;;  %351 = vmatpush3.bf16.msra.mxu1 %v361_v3  ;;  %v371_v15 = vld [vmem:[%s496_s1 + $0x30] sm:$0xff]   ;;  %v373_v17 = vld [vmem:[%s496_s1 + $0x38] sm:$0xff]  }
   0x8   :  { %318 = vmatprep.subr.bf16.mxu0 %v362_v4  ;;  %344 = vmatprep.subr.bf16.mxu1 %v362_v4  ;;  %v377_v19 = vld [vmem:[%s497_s0 + $0x10] ss:$8 sps:$4 sm:$0xff]  }
   0xb   :  { %319 = vmatpush3.bf16.msra.mxu0 %v363_v5  ;;  %352 = vmatpush3.bf16.msra.mxu1 %v363_v5 }
   0xc   :  { %320 = vmatprep.subr.bf16.mxu0 %v364_v6  ;;  %345 = vmatprep.subr.bf16.mxu1 %v364_v6 }
   0xf   :  { %321 = vmatpush3.bf16.msra.mxu0 %v365_v7  ;;  %353 = vmatpush3.bf16.msra.mxu1 %v365_v7 }
  0x10   :  { %322 = vmatprep.subr.bf16.mxu0 %v366_v8  ;;  %346 = vmatprep.subr.bf16.mxu1 %v366_v8 }
  0x13   :  { %323 = vmatpush3.bf16.msra.mxu0 %v367_v9  ;;  %354 = vmatpush3.bf16.msra.mxu1 %v367_v9 }
  0x14   :  { %324 = vmatprep.subr.bf16.mxu0 %v368_v10  ;;  %347 = vmatprep.subr.bf16.mxu1 %v368_v10 }
  0x17   :  { %325 = vmatpush3.bf16.msra.mxu0 %v369_v13  ;;  %355 = vmatpush3.bf16.msra.mxu1 %v369_v13 }
  0x18   :  { %326 = vmatprep.subr.bf16.mxu0 %v370_v14  ;;  %348 = vmatprep.subr.bf16.mxu1 %v370_v14 }
  0x1b   :  { %327 = vmatpush3.bf16.msra.mxu0 %v371_v15  ;;  %356 = vmatpush3.bf16.msra.mxu1 %v371_v15 }
  0x1c   :  { %328 = vmatprep.subr.bf16.mxu0 %v372_v16  ;;  %349 = vmatprep.subr.bf16.mxu1 %v372_v16 }
  0x1f   :  { %329 = vmatpush3.bf16.msra.mxu0 %v373_v17  ;;  %357 = vmatpush3.bf16.msra.mxu1 %v373_v17 }
  0x22   :  { %209 = vmatmul.mubr.bf16.vlgmr.msra.gmra.mrb[0].mxu0 %v374_v18  ;;  %217 = vmatmul.mubr.bf16.vlgmr.msra.gmra.mrb[0].mxu1 %v377_v19 }
  0xf5   :  { %v330_v20 = vpop.f32.mrb[0].mxu0  ;;  %v336_v21 = vpop.f32.mrb[0].mxu1 }
  0xf6   :  { %v331_v23 = vpop.f32.mrb[1].mxu0  ;;  %v337_v24 = vpop.f32.mrb[1].mxu1 }
  0xf7   :  { %v332_v25 = vadd.f32 %v331_v23, %v330_v20  ;;  %v333_v26 = vpop.f32.mrb[2].mxu0  ;;  %v338_v27 = vadd.f32 %v337_v24, %v336_v21  ;;  %v339_v28 = vpop.f32.mrb[2].mxu1 }
  0xf8   :  { %v334_v29 = vpop.f32.mrb[3].mxu0  ;;  %v340_v30 = vpop.f32.mrb[3].mxu1 }
  0xf9   :  { %v211_v31 = vadd.f32 %v332_v25, %v293_v22  ;;  %v219_v32 = vadd.f32 %v338_v27, %v293_v22  ;;  %v335_v33 = vadd.f32 %v334_v29, %v333_v26  ;;  %v341_v34 = vadd.f32 %v340_v30, %v339_v28 }
  0xfb   :  { %226 = vst.msk [vmem:[%s499_s3] sm:$0xff] %vm225_vm0, %v211_v31  ;;  %228 = vst.msk [vmem:[%s499_s3 + $0x10] sm:$0xff] %vm225_vm0, %v219_v32  ;;  %v262_v35 = vmul.f32 %v211_v31, %v211_v31  ;;  %v264_v36 = vmul.f32 %v219_v32, %v219_v32  ;;  %v214_v37 = vadd.f32 %v335_v33, %v293_v22  ;;  %v249_v39 = vsel %vm225_vm0, %v211_v31, 0.0 }
  0xfc   :  { %v222_v38 = vadd.f32 %v341_v34, %v293_v22  ;;  %v252_v40 = vsel %vm225_vm0, %v219_v32, 0.0 }
  0xfd   :  { %227 = vst.msk [vmem:[%s499_s3 + $0x8] sm:$0xff] %vm225_vm0, %v214_v37  ;;  %v250_v41 = vsel %vm225_vm0, %v214_v37, 0.0  ;;  %v263_v42 = vmul.f32 %v214_v37, %v214_v37  ;;  %v266_v44 = vsel %vm225_vm0, %v262_v35, 0.0  ;;  %v269_v45 = vsel %vm225_vm0, %v264_v36, 0.0 }
  0xfe   :  { %229 = vst.msk [vmem:[%s499_s3 + $0x18] sm:$0xff] %vm225_vm0, %v222_v38  ;;  %v251_v43 = vadd.f32 %v250_v41, %v249_v39  ;;  %v265_v47 = vmul.f32 %v222_v38, %v222_v38  ;;  %v254_v50 = vsel %vm225_vm0, %v222_v38, 0.0 }
  0xff   :  { %v267_v46 = vsel %vm225_vm0, %v263_v42, 0.0 }
 0x100   :  { %v268_v48 = vadd.f32 %v267_v46, %v266_v44  ;;  %v253_v49 = vadd.f32 %v252_v40, %v251_v43  ;;  %v271_v53 = vsel %vm225_vm0, %v265_v47, 0.0 }
 0x102   :  { %v255_v51 = vadd.f32 %v254_v50, %v253_v49  ;;  %v270_v52 = vadd.f32 %v269_v45, %v268_v48 }
 0x104   :  { %v256_v54 = vrot.slane %v255_v51, 4  ;;  %v272_v55 = vadd.f32 %v271_v53, %v270_v52 }
 0x106   :  { %v257_v56 = vadd.f32 %v256_v54, %v255_v51  ;;  %v273_v57 = vrot.slane %v272_v55, 4 }
 0x108   :  { %v258_v59 = vrot.slane %v257_v56, 2  ;;  %v274_v60 = vadd.f32 %v273_v57, %v272_v55 }
 0x10a   :  { %v259_v61 = vadd.f32 %v258_v59, %v257_v56  ;;  %v275_v62 = vrot.slane %v274_v60, 2 }
 0x10c   :  { %v260_v0 = vrot.slane %v259_v61, 1  ;;  %v276_v1 = vadd.f32 %v275_v62, %v274_v60 }
 0x10e   :  { %v261_v2 = vadd.f32 %v260_v0, %v259_v61  ;;  %v277_v3 = vrot.slane %v276_v1, 1 }
 0x110   :  { %v278_v4 = vadd.f32 %v277_v3, %v276_v1  ;;  %v280_v5 = vsel %vm279_vm1, %v261_v2, 0.0 }
 0x112   :  { %v282_v6 = vsel %vm281_vm2, %v278_v4, 0.0 }
 0x113   :  { %v283_v7 = vadd.f32 %v282_v6, %v280_v5 }
 0x115   :  { %284 = vst.msk [vmem:[%s500_s4] sm:$0xff] %vm225_vm0, %v283_v7 }

// kernel: gruse_forward.52
= control target key start
LH: loop header
LB: loop body
LE: loop exit
PB: predicated region body
PF: predicated region fallthrough
CT: control target
= control target key end

     0   :  { %vm80_vm3 = vcmask 257024   ;;  %s161_s0 = inlined_call_operand.vmem [shape: f32[32,32], index: 0, kind: input, shape index: {}]   ;;  %s162_s1 = inlined_call_operand.vmem [shape: f32[1,32], index: 1, kind: input, shape index: {}]   ;;  %s163_s2 = inlined_call_operand.vmem [shape: f32[1,32], index: 2, kind: input, shape index: {}]   ;;  %s164_s3 = inlined_call_operand.vmem [shape: bf16[32,32], index: 3, kind: output, shape index: {}]  }
   0x1   :  { %v14_v0 = vld [vmem:[%s161_s0] sm:$0xff]  ;;  %v15_v4 = vld [vmem:[%s161_s0 + $0x8] sm:$0xff]  ;;  %v16_v5 = vld [vmem:[%s161_s0 + $0x10] sm:$0xff] }
   0x2   :  { %v89_v1 = vld [vmem:[%s162_s1] ss:$0 sm:$0xff]  ;;  %v17_v6 = vld [vmem:[%s161_s0 + $0x18] sm:$0xff] }
   0x3   :  { %v90_v2 = vld [vmem:[%s163_s2] ss:$0 sm:$0xff]  ;;  %v25_v3 = vmul.f32 %v89_v1, %v14_v0  ;;  %v26_v7 = vmul.f32 %v89_v1, %v15_v4  ;;  %v27_v8 = vmul.f32 %v89_v1, %v16_v5  ;;  %v28_v9 = vmul.f32 %v89_v1, %v17_v6 }
   0x5   :  { %v36_v10 = vadd.f32 %v90_v2, %v25_v3  ;;  %v37_v11 = vadd.f32 %v90_v2, %v26_v7  ;;  %v38_v12 = vadd.f32 %v90_v2, %v27_v8  ;;  %v39_v13 = vadd.f32 %v90_v2, %v28_v9 }
   0x7   :  { %v44_v14 = vmin.f32 %v36_v10, 0.0  ;;  %v45_v15 = vmin.f32 %v37_v11, 0.0  ;;  %v46_v16 = vmin.f32 %v38_v12, 0.0  ;;  %v47_v18 = vmin.f32 %v39_v13, 0.0 }
   0x8   :  { %vm40_vm0 = vcmp.gt.f32.partialorder %v36_v10, 0.0  ;;  %vm41_vm1 = vcmp.gt.f32.partialorder %v37_v11, 0.0  ;;  %vm42_vm2 = vcmp.gt.f32.partialorder %v38_v12, 0.0  ;;  %vm43_vm4 = vcmp.gt.f32.partialorder %v39_v13, 0.0 }
   0x9   :  { %v48_v17 = vmul.f32 1.442695, %v44_v14  ;;  %v50_v19 = vmul.f32 1.442695, %v45_v15  ;;  %v52_v20 = vmul.f32 1.442695, %v46_v16 }
   0xa   :  { %v54_v21 = vmul.f32 1.442695, %v47_v18 }
   0xb   :  { %103 = vpow2.f32 %v48_v17 }
   0xc   :  { %105 = vpow2.f32 %v50_v19 }
   0xd   :  { %107 = vpow2.f32 %v52_v20 }
   0xe   :  { %109 = vpow2.f32 %v54_v21 }
  0x15   :  { %v104_v22 = vpop.eup %103 }
  0x16   :  { %v106_v23 = vpop.eup %105  ;;  %v91_v24 = vadd.f32 -1.0, %v104_v22 }
  0x17   :  { %v108_v25 = vpop.eup %107  ;;  %v92_v26 = vadd.f32 -1.0, %v106_v23 }
  0x18   :  { %v110_v27 = vpop.eup %109  ;;  %v60_v28 = vsel %vm40_vm0, %v36_v10, %v91_v24  ;;  %v93_v29 = vadd.f32 -1.0, %v108_v25 }
  0x19   :  { %v99_v30 = vpack.c.bf16 %v60_v28, %v60_v28  ;;  %v61_v31 = vsel %vm41_vm1, %v37_v11, %v92_v26  ;;  %v94_v32 = vadd.f32 -1.0, %v110_v27 }
  0x1a   :  { %v100_v33 = vpack.c.bf16 %v61_v31, %v61_v31  ;;  %v62_v34 = vsel %vm42_vm2, %v38_v12, %v93_v29 }
  0x1b   :  { %81 = vst.msk [vmem:[%s164_s3] sm:$0xf] %vm80_vm3, %v99_v30  ;;  %v101_v35 = vpack.c.bf16 %v62_v34, %v62_v34  ;;  %v63_v36 = vsel %vm43_vm4, %v39_v13, %v94_v32 }
  0x1c   :  { %82 = vst.msk [vmem:[%s164_s3 + $0x4] sm:$0xf] %vm80_vm3, %v100_v33  ;;  %v102_v37 = vpack.c.bf16 %v63_v36, %v63_v36 }
  0x1d   :  { %83 = vst.msk [vmem:[%s164_s3 + $0x8] sm:$0xf] %vm80_vm3, %v101_v35 }
  0x1e   :  { %84 = vst.msk [vmem:[%s164_s3 + $0xc] sm:$0xf] %vm80_vm3, %v102_v37 }

// kernel: gruse_forward.54
= control target key start
LH: loop header
LB: loop body
LE: loop exit
PB: predicated region body
PF: predicated region fallthrough
CT: control target
= control target key end

     0   :  { %vm185_vm0 = vcmask 130048   ;;  %s486_s1 = inlined_call_operand.vmem [shape: bf16[128,16], index: 1, kind: input, shape index: {}]   ;;  %s487_s0 = inlined_call_operand.vmem [shape: bf16[64,128], index: 0, kind: input, shape index: {}]   ;;  %s488_s2 = inlined_call_operand.vmem [shape: f32[1,16], index: 2, kind: input, shape index: {}]   ;;  %s489_s3 = inlined_call_operand.vmem [shape: f32[64,16], index: 3, kind: output, shape index: {0}]   ;;  %s490_s4 = inlined_call_operand.vmem [shape: f32[8,16], index: 4, kind: output, shape index: {1}]  }
   0x1   :  { %v358_v0 = vld [vmem:[%s486_s1] sm:$0xff]   ;;  %v359_v1 = vld [vmem:[%s486_s1 + $0x8] sm:$0xff]   ;;  %v360_v2 = vld [vmem:[%s486_s1 + $0x10] sm:$0xff]  }
   0x2   :  { %318 = vmatprep.subr.bf16.mxu0 %v358_v0  ;;  %342 = vmatprep.subr.bf16.mxu1 %v358_v0  ;;  %v361_v3 = vld [vmem:[%s486_s1 + $0x18] sm:$0xff]   ;;  %v366_v4 = vld [vmem:[%s487_s0] sm:$0xff]   ;;  %v368_v5 = vld [vmem:[%s487_s0 + $0x10] sm:$0xff]  }
   0x3   :  { %319 = vmatpush3.bf16.msra.mxu0 %v358_v0  ;;  %350 = vmatpush3.bf16.msra.mxu1 %v358_v0  ;;  %v362_v6 = vld [vmem:[%s486_s1 + $0x20] sm:$0xff]   ;;  %v363_v7 = vld [vmem:[%s486_s1 + $0x28] sm:$0xff]   ;;  %v364_v8 = vld [vmem:[%s486_s1 + $0x30] sm:$0xff]  }
   0x4   :  { %320 = vmatprep.subr.bf16.mxu0 %v359_v1  ;;  %343 = vmatprep.subr.bf16.mxu1 %v359_v1  ;;  %v365_v9 = vld [vmem:[%s486_s1 + $0x38] sm:$0xff]   ;;  %v367_v10 = vld [vmem:[%s487_s0 + $0x8] sm:$0xff]   ;;  %v293_v12 = vld [vmem:[%s488_s2] ss:$0 sm:$0xff] }
   0x5   :  { %334 = vmatprep.mubr.bf16.mxu0 %v366_v4  ;;  %338 = vmatprep.mubr.bf16.mxu1 %v368_v5  ;;  %v369_v11 = vld [vmem:[%s487_s0 + $0x18] sm:$0xff]  }
   0x7   :  { %321 = vmatpush3.bf16.msra.mxu0 %v359_v1  ;;  %351 = vmatpush3.bf16.msra.mxu1 %v359_v1 }
   0x8   :  { %322 = vmatprep.subr.bf16.mxu0 %v360_v2  ;;  %344 = vmatprep.subr.bf16.mxu1 %v360_v2 }
   0xb   :  { %323 = vmatpush3.bf16.msra.mxu0 %v360_v2  ;;  %352 = vmatpush3.bf16.msra.mxu1 %v360_v2 }
   0xc   :  { %324 = vmatprep.subr.bf16.mxu0 %v361_v3  ;;  %345 = vmatprep.subr.bf16.mxu1 %v361_v3 }
   0xf   :  { %325 = vmatpush3.bf16.msra.mxu0 %v361_v3  ;;  %353 = vmatpush3.bf16.msra.mxu1 %v361_v3 }
  0x10   :  { %326 = vmatprep.subr.bf16.mxu0 %v362_v6  ;;  %346 = vmatprep.subr.bf16.mxu1 %v362_v6 }
  0x13   :  { %327 = vmatpush3.bf16.msra.mxu0 %v362_v6  ;;  %354 = vmatpush3.bf16.msra.mxu1 %v362_v6  ;;  %v194_v6 = vlaneseq }
  0x14   :  { %328 = vmatprep.subr.bf16.mxu0 %v363_v7  ;;  %347 = vmatprep.subr.bf16.mxu1 %v363_v7 }
  0x17   :  { %329 = vmatpush3.bf16.msra.mxu0 %v363_v7  ;;  %355 = vmatpush3.bf16.msra.mxu1 %v363_v7 }
  0x18   :  { %330 = vmatprep.subr.bf16.mxu0 %v364_v8  ;;  %348 = vmatprep.subr.bf16.mxu1 %v364_v8 }
  0x1b   :  { %331 = vmatpush3.bf16.msra.mxu0 %v364_v8  ;;  %356 = vmatpush3.bf16.msra.mxu1 %v364_v8 }
  0x1c   :  { %332 = vmatprep.subr.bf16.mxu0 %v365_v9  ;;  %349 = vmatprep.subr.bf16.mxu1 %v365_v9 }
  0x1f   :  { %333 = vmatpush3.bf16.msra.mxu0 %v365_v9  ;;  %357 = vmatpush3.bf16.msra.mxu1 %v365_v9 }
  0x22   :  { %335 = vmatmul.mubr.bf16.vlgmr.msra.gmra.mrb[0].mxu0 %v367_v10  ;;  %339 = vmatmul.mubr.bf16.vlgmr.msra.gmra.mrb[0].mxu1 %v369_v11  ;;  %v195_v11 = vshrl.u32 %v194_v6, 7 }
  0x24   :  { %vm279_vm1 = vcmp.eq.s32.totalorder %v195_v11, 0  ;;  %vm281_vm2 = vcmp.eq.s32.totalorder %v195_v11, 1 }
  0xf5   :  { %v336_v13 = vpop.f32.mrb[0].mxu0  ;;  %v340_v14 = vpop.f32.mrb[0].mxu1 }
  0xf6   :  { %v163_v15 = vadd.f32 %v336_v13, %v293_v12  ;;  %v154_v16 = vpop.f32.mrb[1].mxu0  ;;  %v179_v17 = vadd.f32 %v340_v14, %v293_v12  ;;  %v170_v18 = vpop.f32.mrb[1].mxu1 }
  0xf7   :  { %v155_v19 = vadd.f32 %v293_v12, %v154_v16  ;;  %v337_v20 = vpop.f32.mrb[2].mxu0  ;;  %v171_v21 = vadd.f32 %v293_v12, %v170_v18  ;;  %v341_v22 = vpop.f32.mrb[2].mxu1 }
  0xf8   :  { %188 = vst.msk [vmem:[%s489_s3 + $0x10] sm:$0xff] %vm185_vm0, %v163_v15  ;;  %v166_v23 = vadd.f32 %v337_v20, %v293_v12  ;;  %v157_v24 = vpop.f32.mrb[3].mxu0  ;;  %192 = vst.msk [vmem:[%s489_s3 + $0x30] sm:$0xff] %vm185_vm0, %v179_v17  ;;  %v173_v25 = vpop.f32.mrb[3].mxu1  ;;  %v252_v28 = vmul.f32 %v163_v15, %v163_v15  ;;  %v232_v32 = vsel %vm185_vm0, %v163_v15, 0.0  ;;  %v182_v35 = vadd.f32 %v341_v22, %v293_v12 }
  0xf9   :  { %186 = vst.msk [vmem:[%s489_s3] sm:$0xff] %vm185_vm0, %v155_v19  ;;  %v250_v26 = vmul.f32 %v155_v19, %v155_v19  ;;  %v158_v27 = vadd.f32 %v293_v12, %v157_v24  ;;  %190 = vst.msk [vmem:[%s489_s3 + $0x20] sm:$0xff] %vm185_vm0, %v171_v21  ;;  %v229_v29 = vsel %vm185_vm0, %v155_v19, 0.0  ;;  %v254_v38 = vmul.f32 %v171_v21, %v171_v21 }
  0xfa   :  { %189 = vst.msk [vmem:[%s489_s3 + $0x18] sm:$0xff] %vm185_vm0, %v166_v23  ;;  %v253_v33 = vmul.f32 %v166_v23, %v166_v23  ;;  %v174_v39 = vadd.f32 %v293_v12, %v173_v25  ;;  %193 = vst.msk [vmem:[%s489_s3 + $0x38] sm:$0xff] %vm185_vm0, %v182_v35  ;;  %v261_v42 = vsel %vm185_vm0, %v252_v28, 0.0  ;;  %v234_v43 = vsel %vm185_vm0, %v166_v23, 0.0 }
  0xfb   :  { %187 = vst.msk [vmem:[%s489_s3 + $0x8] sm:$0xff] %vm185_vm0, %v158_v27  ;;  %v230_v30 = vsel %vm185_vm0, %v158_v27, 0.0  ;;  %v251_v31 = vmul.f32 %v158_v27, %v158_v27  ;;  %v258_v36 = vsel %vm185_vm0, %v250_v26, 0.0  ;;  %v236_v44 = vsel %vm185_vm0, %v171_v21, 0.0 }
  0xfc   :  { %v231_v34 = vadd.f32 %v230_v30, %v229_v29  ;;  %191 = vst.msk [vmem:[%s489_s3 + $0x28] sm:$0xff] %vm185_vm0, %v174_v39  ;;  %v263_v47 = vsel %vm185_vm0, %v253_v33, 0.0  ;;  %v265_v48 = vsel %vm185_vm0, %v254_v38, 0.0  ;;  %v255_v49 = vmul.f32 %v174_v39, %v174_v39 }
  0xfd   :  { %v259_v37 = vsel %vm185_vm0, %v251_v31, 0.0  ;;  %v256_v52 = vmul.f32 %v179_v17, %v179_v17  ;;  %v238_v53 = vsel %vm185_vm0, %v174_v39, 0.0  ;;  %v240_v56 = vsel %vm185_vm0, %v179_v17, 0.0 }
  0xfe   :  { %v233_v40 = vadd.f32 %v232_v32, %v231_v34  ;;  %v260_v41 = vadd.f32 %v259_v37, %v258_v36  ;;  %v257_v57 = vmul.f32 %v182_v35, %v182_v35  ;;  %v267_v58 = vsel %vm185_vm0, %v255_v49, 0.0 }
  0xff   :  { %v269_v61 = vsel %vm185_vm0, %v256_v52, 0.0  ;;  %v242_v62 = vsel %vm185_vm0, %v182_v35, 0.0 }
 0x100   :  { %v262_v45 = vadd.f32 %v261_v42, %v260_v41  ;;  %v235_v46 = vadd.f32 %v234_v43, %v233_v40  ;;  %v271_v1 = vsel %vm185_vm0, %v257_v57, 0.0 }
 0x102   :  { %v237_v50 = vadd.f32 %v236_v44, %v235_v46  ;;  %v264_v51 = vadd.f32 %v263_v47, %v262_v45 }
 0x104   :  { %v266_v54 = vadd.f32 %v265_v48, %v264_v51  ;;  %v239_v55 = vadd.f32 %v238_v53, %v237_v50 }
 0x106   :  { %v241_v59 = vadd.f32 %v240_v56, %v239_v55  ;;  %v268_v60 = vadd.f32 %v267_v58, %v266_v54 }
 0x108   :  { %v243_v63 = vadd.f32 %v242_v62, %v241_v59  ;;  %v270_v0 = vadd.f32 %v269_v61, %v268_v60 }
 0x10a   :  { %v244_v2 = vrot.slane %v243_v63, 4  ;;  %v272_v3 = vadd.f32 %v271_v1, %v270_v0 }
 0x10c   :  { %v245_v4 = vadd.f32 %v244_v2, %v243_v63  ;;  %v273_v5 = vrot.slane %v272_v3, 4 }
 0x10e   :  { %v246_v7 = vrot.slane %v245_v4, 2  ;;  %v274_v8 = vadd.f32 %v273_v5, %v272_v3 }
 0x110   :  { %v247_v9 = vadd.f32 %v246_v7, %v245_v4  ;;  %v275_v10 = vrot.slane %v274_v8, 2 }
 0x112   :  { %v248_v12 = vrot.slane %v247_v9, 1  ;;  %v276_v13 = vadd.f32 %v275_v10, %v274_v8 }
 0x114   :  { %v249_v14 = vadd.f32 %v248_v12, %v247_v9  ;;  %v277_v15 = vrot.slane %v276_v13, 1 }
 0x116   :  { %v278_v16 = vadd.f32 %v277_v15, %v276_v13  ;;  %v280_v17 = vsel %vm279_vm1, %v249_v14, 0.0 }
 0x118   :  { %v282_v18 = vsel %vm281_vm2, %v278_v16, 0.0 }
 0x119   :  { %v283_v19 = vadd.f32 %v282_v18, %v280_v17 }
 0x11b   :  { %284 = vst.msk [vmem:[%s490_s4] sm:$0xff] %vm185_vm0, %v283_v19 }

// kernel: gruse_forward.56
= control target key start
LH: loop header
LB: loop body
LE: loop exit
PB: predicated region body
PF: predicated region fallthrough
CT: control target
= control target key end

     0   :  { %vm132_vm3 = vcmask 125952   ;;  %s279_s0 = inlined_call_operand.vmem [shape: f32[64,16], index: 0, kind: input, shape index: {}]   ;;  %s280_s1 = inlined_call_operand.vmem [shape: f32[1,16], index: 1, kind: input, shape index: {}]   ;;  %s281_s2 = inlined_call_operand.vmem [shape: f32[1,16], index: 2, kind: input, shape index: {}]   ;;  %s282_s3 = inlined_call_operand.vmem [shape: bf16[64,16], index: 3, kind: output, shape index: {}]  }
   0x1   :  { %v14_v0 = vld [vmem:[%s279_s0] sm:$0xff]  ;;  %v15_v4 = vld [vmem:[%s279_s0 + $0x8] sm:$0xff]  ;;  %v16_v5 = vld [vmem:[%s279_s0 + $0x10] sm:$0xff] }
   0x2   :  { %v145_v1 = vld [vmem:[%s280_s1] ss:$0 sm:$0xff]  ;;  %v17_v6 = vld [vmem:[%s279_s0 + $0x18] sm:$0xff]  ;;  %v19_v11 = vld [vmem:[%s279_s0 + $0x28] sm:$0xff] }
   0x3   :  { %v146_v2 = vld [vmem:[%s281_s2] ss:$0 sm:$0xff]  ;;  %v29_v3 = vmul.f32 %v145_v1, %v14_v0  ;;  %v30_v7 = vmul.f32 %v145_v1, %v15_v4  ;;  %v31_v8 = vmul.f32 %v145_v1, %v16_v5  ;;  %v32_v9 = vmul.f32 %v145_v1, %v17_v6  ;;  %v20_v12 = vld [vmem:[%s279_s0 + $0x30] sm:$0xff]  ;;  %v21_v16 = vld [vmem:[%s279_s0 + $0x38] sm:$0xff] }
   0x4   :  { %v18_v10 = vld [vmem:[%s279_s0 + $0x20] sm:$0xff]  ;;  %v34_v15 = vmul.f32 %v145_v1, %v19_v11  ;;  %v35_v23 = vmul.f32 %v145_v1, %v20_v12  ;;  %v36_v26 = vmul.f32 %v145_v1, %v21_v16 }
   0x5   :  { %v44_v13 = vadd.f32 %v146_v2, %v29_v3  ;;  %v33_v14 = vmul.f32 %v145_v1, %v18_v10  ;;  %v45_v17 = vadd.f32 %v146_v2, %v30_v7  ;;  %v46_v18 = vadd.f32 %v146_v2, %v31_v8 }
   0x6   :  { %v47_v19 = vadd.f32 %v146_v2, %v32_v9  ;;  %v239_v22 = vadd.f32 %v146_v2, %v34_v15  ;;  %v50_v34 = vadd.f32 %v146_v2, %v35_v23  ;;  %v51_v36 = vadd.f32 %v146_v2, %v36_v26 }
   0x7   :  { %v60_v20 = vmin.f32 %v44_v13, 0.0  ;;  %v237_v21 = vadd.f32 %v146_v2, %v33_v14  ;;  %v61_v24 = vmin.f32 %v45_v17, 0.0  ;;  %v62_v25 = vmin.f32 %v46_v18, 0.0 }
   0x8   :  { %v63_v28 = vmin.f32 %v47_v19, 0.0  ;;  %v65_v33 = vmin.f32 %v239_v22, 0.0  ;;  %v66_v38 = vmin.f32 %v50_v34, 0.0  ;;  %v67_v39 = vmin.f32 %v51_v36, 0.0 }
   0x9   :  { %v68_v27 = vmul.f32 1.442695, %v60_v20  ;;  %v70_v29 = vmul.f32 1.442695, %v61_v24  ;;  %v72_v30 = vmul.f32 1.442695, %v62_v25 }
   0xa   :  { %v64_v31 = vmin.f32 %v237_v21, 0.0  ;;  %v74_v32 = vmul.f32 1.442695, %v63_v28  ;;  %v78_v37 = vmul.f32 1.442695, %v65_v33  ;;  %vm52_vm0 = vcmp.gt.f32.partialorder %v44_v13, 0.0 }
   0xb   :  { %171 = vpow2.f32 %v68_v27  ;;  %v80_v40 = vmul.f32 1.442695, %v66_v38  ;;  %v82_v41 = vmul.f32 1.442695, %v67_v39  ;;  %vm53_vm1 = vcmp.gt.f32.partialorder %v45_v17, 0.0 }
   0xc   :  { %173 = vpow2.f32 %v70_v29  ;;  %v76_v35 = vmul.f32 1.442695, %v64_v31  ;;  %vm54_vm2 = vcmp.gt.f32.partialorder %v46_v18, 0.0  ;;  %vm55_vm4 = vcmp.gt.f32.partialorder %v47_v19, 0.0 }
   0xd   :  { %175 = vpow2.f32 %v72_v30  ;;  %vm56_vm5 = vcmp.gt.f32.partialorder %v237_v21, 0.0  ;;  %vm57_vm6 = vcmp.gt.f32.partialorder %v239_v22, 0.0  ;;  %vm58_vm7 = vcmp.gt.f32.partialorder %v50_v34, 0.0 }
   0xe   :  { %177 = vpow2.f32 %v74_v32  ;;  %vm59_vm8 = vcmp.gt.f32.partialorder %v51_v36, 0.0 }
   0xf   :  { %179 = vpow2.f32 %v76_v35 }
  0x10   :  { %181 = vpow2.f32 %v78_v37 }
  0x11   :  { %183 = vpow2.f32 %v80_v40 }
  0x12   :  { %185 = vpow2.f32 %v82_v41 }
  0x15   :  { %v172_v42 = vpop.eup %171 }
  0x16   :  { %v174_v43 = vpop.eup %173  ;;  %v147_v44 = vadd.f32 -1.0, %v172_v42 }
  0x17   :  { %v176_v45 = vpop.eup %175  ;;  %v148_v46 = vadd.f32 -1.0, %v174_v43 }
  0x18   :  { %v178_v47 = vpop.eup %177  ;;  %v92_v48 = vsel %vm52_vm0, %v44_v13, %v147_v44  ;;  %v149_v49 = vadd.f32 -1.0, %v176_v45 }
  0x19   :  { %v180_v50 = vpop.eup %179  ;;  %v163_v51 = vpack.c.bf16 %v92_v48, %v92_v48  ;;  %v93_v52 = vsel %vm53_vm1, %v45_v17, %v148_v46  ;;  %v150_v53 = vadd.f32 -1.0, %v178_v47 }
  0x1a   :  { %v182_v54 = vpop.eup %181  ;;  %v164_v55 = vpack.c.bf16 %v93_v52, %v93_v52  ;;  %v94_v56 = vsel %vm54_vm2, %v46_v18, %v149_v49  ;;  %v151_v57 = vadd.f32 -1.0, %v180_v50 }
  0x1b   :  { %v184_v58 = vpop.eup %183  ;;  %133 = vst.msk [vmem:[%s282_s3] sm:$0xf] %vm132_vm3, %v163_v51  ;;  %v165_v59 = vpack.c.bf16 %v94_v56, %v94_v56  ;;  %v95_v60 = vsel %vm55_vm4, %v47_v19, %v150_v53  ;;  %v152_v61 = vadd.f32 -1.0, %v182_v54 }
  0x1c   :  { %v186_v62 = vpop.eup %185  ;;  %134 = vst.msk [vmem:[%s282_s3 + $0x4] sm:$0xf] %vm132_vm3, %v164_v55  ;;  %v166_v63 = vpack.c.bf16 %v95_v60, %v95_v60  ;;  %v96_v0 = vsel %vm56_vm5, %v237_v21, %v151_v57  ;;  %v153_v1 = vadd.f32 -1.0, %v184_v58 }
  0x1d   :  { %135 = vst.msk [vmem:[%s282_s3 + $0x8] sm:$0xf] %vm132_vm3, %v165_v59  ;;  %v167_v2 = vpack.c.bf16 %v96_v0, %v96_v0  ;;  %v97_v3 = vsel %vm57_vm6, %v239_v22, %v152_v61  ;;  %v154_v4 = vadd.f32 -1.0, %v186_v62 }
  0x1e   :  { %136 = vst.msk [vmem:[%s282_s3 + $0xc] sm:$0xf] %vm132_vm3, %v166_v63  ;;  %v168_v5 = vpack.c.bf16 %v97_v3, %v97_v3  ;;  %v98_v6 = vsel %vm58_vm7, %v50_v34, %v153_v1 }
  0x1f   :  { %137 = vst.msk [vmem:[%s282_s3 + $0x10] sm:$0xf] %vm132_vm3, %v167_v2  ;;  %v169_v7 = vpack.c.bf16 %v98_v6, %v98_v6  ;;  %v99_v8 = vsel %vm59_vm8, %v51_v36, %v154_v4 }
  0x20   :  { %138 = vst.msk [vmem:[%s282_s3 + $0x14] sm:$0xf] %vm132_vm3, %v168_v5  ;;  %v170_v9 = vpack.c.bf16 %v99_v8, %v99_v8 }
  0x21   :  { %139 = vst.msk [vmem:[%s282_s3 + $0x18] sm:$0xf] %vm132_vm3, %v169_v7 }
  0x22   :  { %140 = vst.msk [vmem:[%s282_s3 + $0x1c] sm:$0xf] %vm132_vm3, %v170_v9 }

// kernel: gruse_forward.59
= control target key start
LH: loop header
LB: loop body
LE: loop exit
PB: predicated region body
PF: predicated region fallthrough
CT: control target
= control target key end

     0   :  { %vm80_vm0 = vcmask 7168   ;;  %s241_s1 = inlined_call_operand.<no memory space> [shape: f32[1,1], index: 1, kind: input, shape index: {}]   ;;  %s242_s2 = inlined_call_operand.<no memory space> [shape: f32[1,1], index: 2, kind: input, shape index: {}]   ;;  %s243_s0 = inlined_call_operand.vmem [shape: f32[128,1], index: 0, kind: input, shape index: {}]   ;;  %s244_s3 = inlined_call_operand.vmem [shape: f32[128,1], index: 3, kind: output, shape index: {}]  }
   0x1   :  { %v8_v0 = vstv %s241_s1  ;;  %v10_v1 = vstv %s242_s2  ;;  %v18_v2 = vld [vmem:[%s243_s0] sm:$0xff]  ;;  %v19_v3 = vld [vmem:[%s243_s0 + $0x8] sm:$0xff] }
   0x2   :  { %9 = vst [vmem:[#allocation2] sm:$0x1] %v8_v0  ;;  %11 = vst [vmem:[#allocation3] sm:$0x1] %v10_v1  ;;  %v20_v4 = vld [vmem:[%s243_s0 + $0x10] sm:$0xff]  ;;  %v21_v5 = vld [vmem:[%s243_s0 + $0x18] sm:$0xff] }
   0x3   :  { %v22_v6 = vld [vmem:[%s243_s0 + $0x20] sm:$0xff]  ;;  %v23_v7 = vld [vmem:[%s243_s0 + $0x28] sm:$0xff]  ;;  %v24_v8 = vld [vmem:[%s243_s0 + $0x30] sm:$0xff] }
   0x4   :  { %v25_v9 = vld [vmem:[%s243_s0 + $0x38] sm:$0xff]  ;;  %v26_v16 = vld [vmem:[%s243_s0 + $0x40] sm:$0xff]  ;;  %v27_v17 = vld [vmem:[%s243_s0 + $0x48] sm:$0xff] }
   0x5   :  { %v28_v22 = vld [vmem:[%s243_s0 + $0x50] sm:$0xff]  ;;  %v29_v23 = vld [vmem:[%s243_s0 + $0x58] sm:$0xff]  ;;  %v30_v24 = vld [vmem:[%s243_s0 + $0x60] sm:$0xff] }
   0x6   :  { %v31_v29 = vld [vmem:[%s243_s0 + $0x68] sm:$0xff]  ;;  %v32_v30 = vld [vmem:[%s243_s0 + $0x70] sm:$0xff]  ;;  %v33_v31 = vld [vmem:[%s243_s0 + $0x78] sm:$0xff] }
   0x9   :  { %v101_v10 = vld [vmem:[#allocation2] ss:$0 sm:$0xff]  ;;  %v102_v11 = vld [vmem:[#allocation3] ss:$0 sm:$0xff] }
   0xa   :  { %v41_v12 = vmul.f32 %v101_v10, %v18_v2  ;;  %v42_v13 = vmul.f32 %v101_v10, %v19_v3  ;;  %v43_v14 = vmul.f32 %v101_v10, %v20_v4  ;;  %v44_v15 = vmul.f32 %v101_v10, %v21_v5 }
   0xb   :  { %v45_v18 = vmul.f32 %v101_v10, %v22_v6  ;;  %v46_v19 = vmul.f32 %v101_v10, %v23_v7  ;;  %v47_v20 = vmul.f32 %v101_v10, %v24_v8  ;;  %v48_v21 = vmul.f32 %v101_v10, %v25_v9 }
   0xc   :  { %v64_v25 = vadd.f32 %v102_v11, %v41_v12  ;;  %v65_v26 = vadd.f32 %v102_v11, %v42_v13  ;;  %v66_v27 = vadd.f32 %v102_v11, %v43_v14  ;;  %v67_v28 = vadd.f32 %v102_v11, %v44_v15 }
   0xd   :  { %v68_v32 = vadd.f32 %v102_v11, %v45_v18  ;;  %v69_v33 = vadd.f32 %v102_v11, %v46_v19  ;;  %v70_v34 = vadd.f32 %v102_v11, %v47_v20  ;;  %v71_v35 = vadd.f32 %v102_v11, %v48_v21 }
   0xe   :  { %81 = vst.msk [vmem:[%s244_s3] sm:$0xff] %vm80_vm0, %v64_v25  ;;  %82 = vst.msk [vmem:[%s244_s3 + $0x8] sm:$0xff] %vm80_vm0, %v65_v26  ;;  %v49_v36 = vmul.f32 %v101_v10, %v26_v16  ;;  %v50_v37 = vmul.f32 %v101_v10, %v27_v17  ;;  %v51_v38 = vmul.f32 %v101_v10, %v28_v22 }
   0xf   :  { %83 = vst.msk [vmem:[%s244_s3 + $0x10] sm:$0xff] %vm80_vm0, %v66_v27  ;;  %84 = vst.msk [vmem:[%s244_s3 + $0x18] sm:$0xff] %vm80_vm0, %v67_v28  ;;  %v52_v39 = vmul.f32 %v101_v10, %v29_v23  ;;  %v53_v40 = vmul.f32 %v101_v10, %v30_v24  ;;  %v54_v41 = vmul.f32 %v101_v10, %v31_v29 }
  0x10   :  { %85 = vst.msk [vmem:[%s244_s3 + $0x20] sm:$0xff] %vm80_vm0, %v68_v32  ;;  %86 = vst.msk [vmem:[%s244_s3 + $0x28] sm:$0xff] %vm80_vm0, %v69_v33  ;;  %v55_v42 = vmul.f32 %v101_v10, %v32_v30  ;;  %v56_v43 = vmul.f32 %v101_v10, %v33_v31  ;;  %v72_v44 = vadd.f32 %v102_v11, %v49_v36 }
  0x11   :  { %87 = vst.msk [vmem:[%s244_s3 + $0x30] sm:$0xff] %vm80_vm0, %v70_v34  ;;  %88 = vst.msk [vmem:[%s244_s3 + $0x38] sm:$0xff] %vm80_vm0, %v71_v35  ;;  %v73_v45 = vadd.f32 %v102_v11, %v50_v37  ;;  %v74_v46 = vadd.f32 %v102_v11, %v51_v38  ;;  %v75_v47 = vadd.f32 %v102_v11, %v52_v39 }
  0x12   :  { %v76_v48 = vadd.f32 %v102_v11, %v53_v40  ;;  %v77_v49 = vadd.f32 %v102_v11, %v54_v41  ;;  %v78_v50 = vadd.f32 %v102_v11, %v55_v42  ;;  %v79_v51 = vadd.f32 %v102_v11, %v56_v43  ;;  %89 = vst.msk [vmem:[%s244_s3 + $0x40] sm:$0xff] %vm80_vm0, %v72_v44 }
  0x13   :  { %90 = vst.msk [vmem:[%s244_s3 + $0x48] sm:$0xff] %vm80_vm0, %v73_v45  ;;  %91 = vst.msk [vmem:[%s244_s3 + $0x50] sm:$0xff] %vm80_vm0, %v74_v46 }
  0x14   :  { %92 = vst.msk [vmem:[%s244_s3 + $0x58] sm:$0xff] %vm80_vm0, %v75_v47  ;;  %93 = vst.msk [vmem:[%s244_s3 + $0x60] sm:$0xff] %vm80_vm0, %v76_v48 }
  0x15   :  { %94 = vst.msk [vmem:[%s244_s3 + $0x68] sm:$0xff] %vm80_vm0, %v77_v49  ;;  %95 = vst.msk [vmem:[%s244_s3 + $0x70] sm:$0xff] %vm80_vm0, %v78_v50 }
  0x16   :  { %96 = vst.msk [vmem:[%s244_s3 + $0x78] sm:$0xff] %vm80_vm0, %v79_v51 }

// kernel: gruse_forward.58
= control target key start
LH: loop header
LB: loop body
LE: loop exit
PB: predicated region body
PF: predicated region fallthrough
CT: control target
= control target key end

     0   :  { %v642_v0 = vmov 0   ;;  %vm226_vm0 = vcmask 785408   ;;  %vm348_vm1 = vcmask 7168   ;;  %s945_s1 = inlined_call_operand.vmem [shape: bf16[224,1], index: 1, kind: input, shape index: {}]   ;;  %s946_s2 = inlined_call_operand.<no memory space> [shape: f32[1,1], index: 2, kind: input, shape index: {}]   ;;  %s947_s0 = inlined_call_operand.vmem [shape: bf16[128,224], index: 0, kind: input, shape index: {}]   ;;  %s948_s3 = inlined_call_operand.vmem [shape: f32[128,1], index: 3, kind: output, shape index: {0}]   ;;  %s949_s4 = inlined_call_operand.vmem [shape: f32[8,1], index: 4, kind: output, shape index: {1}]  }
   0x1   :  { %251 = vmatprep.subr.bf16.mxu0 %v642_v0  ;;  %v604_v1 = vld [vmem:[%s945_s1] sm:$0xff]   ;;  %575 = vmatprep.subr.bf16.mxu1 %v642_v0  ;;  %v10_v2 = vstv %s946_s2  ;;  %v605_v3 = vld [vmem:[%s945_s1 + $0x8] sm:$0xff]   ;;  %v606_v4 = vld [vmem:[%s945_s1 + $0x10] sm:$0xff]  }
   0x2   :  { %11 = vst [vmem:[#allocation2] sm:$0x1] %v10_v2  ;;  %252 = vmatpush1.bf16.msra.mxu0 %v604_v1  ;;  %589 = vmatpush1.bf16.msra.mxu1 %v604_v1  ;;  %v607_v5 = vld [vmem:[%s945_s1 + $0x18] sm:$0xff]   ;;  %v608_v6 = vld [vmem:[%s945_s1 + $0x20] sm:$0xff]   ;;  %v609_v9 = vld [vmem:[%s945_s1 + $0x28] sm:$0xff]  }
   0x3   :  { %253 = vmatprep.subr.bf16.mxu0 %v642_v0  ;;  %576 = vmatprep.subr.bf16.mxu1 %v642_v0  ;;  %v620_v7 = vld [vmem:[%s947_s0 + $0x4] ss:$8 sps:$4 sm:$0xff]   ;;  %v610_v10 = vld [vmem:[%s945_s1 + $0x30] sm:$0xff]   ;;  %v611_v11 = vld [vmem:[%s945_s1 + $0x38] sm:$0xff]  }
   0x4   :  { %567 = vmatprep.mubr.msk.bf16.mxu0 %vm226_vm0, %v620_v7  ;;  %v626_v8 = vld [vmem:[%s947_s0 + $0x44] ss:$8 sps:$4 sm:$0xff]   ;;  %v614_v14 = vld [vmem:[%s945_s1 + $0x50] sm:$0xff]   ;;  %v615_v15 = vld [vmem:[%s945_s1 + $0x58] sm:$0xff]  }
   0x5   :  { %571 = vmatprep.mubr.msk.bf16.mxu1 %vm226_vm0, %v626_v8  ;;  %v612_v12 = vld [vmem:[%s945_s1 + $0x40] sm:$0xff]   ;;  %v613_v13 = vld [vmem:[%s945_s1 + $0x48] sm:$0xff]   ;;  %v621_v20 = vld [vmem:[%s947_s0 + $0x14] ss:$8 sps:$4 sm:$0xff]  }
   0x6   :  { %254 = vmatpush1.bf16.msra.mxu0 %v605_v3  ;;  %590 = vmatpush1.bf16.msra.mxu1 %v605_v3  ;;  %v616_v16 = vld [vmem:[%s945_s1 + $0x60] sm:$0xff]   ;;  %v617_v17 = vld [vmem:[%s945_s1 + $0x68] sm:$0xff]   ;;  %v630_v21 = vld [vmem:[%s947_s0 + $0x54] ss:$8 sps:$4 sm:$0xff]  }
   0x7   :  { %255 = vmatprep.subr.bf16.mxu0 %v642_v0  ;;  %577 = vmatprep.subr.bf16.mxu1 %v642_v0  ;;  %v618_v18 = vld [vmem:[%s947_s0] ss:$8 sps:$4 sm:$0xff]   ;;  %v623_v22 = vld [vmem:[%s947_s0 + $0x10] ss:$8 sps:$4 sm:$0xff]   ;;  %v627_v24 = vld [vmem:[%s947_s0 + $0x24] ss:$8 sps:$4 sm:$0xff]  }
   0x8   :  { %v624_v19 = vld [vmem:[%s947_s0 + $0x40] ss:$8 sps:$4 sm:$0xff]   ;;  %v632_v23 = vld [vmem:[%s947_s0 + $0x50] ss:$8 sps:$4 sm:$0xff]   ;;  %v636_v25 = vld [vmem:[%s947_s0 + $0x64] ss:$8 sps:$4 sm:$0xff]  }
   0x9   :  { %v629_v26 = vld [vmem:[%s947_s0 + $0x20] ss:$8 sps:$4 sm:$0xff]   ;;  %v633_v28 = vld [vmem:[%s947_s0 + $0x34] ss:$8 sps:$4 sm:$0xff]   ;;  %v635_v30 = vld [vmem:[%s947_s0 + $0x30] ss:$8 sps:$4 sm:$0xff]  }
   0xa   :  { %256 = vmatpush1.bf16.msra.mxu0 %v606_v4  ;;  %591 = vmatpush1.bf16.msra.mxu1 %v606_v4  ;;  %v638_v27 = vld [vmem:[%s947_s0 + $0x60] ss:$8 sps:$4 sm:$0xff]   ;;  %v639_v29 = vld [vmem:[%s947_s0 + $0x74] ss:$8 sps:$4 sm:$0xff]   ;;  %v641_v31 = vld [vmem:[%s947_s0 + $0x70] ss:$8 sps:$4 sm:$0xff]  }
   0xb   :  { %257 = vmatprep.subr.bf16.mxu0 %v642_v0  ;;  %578 = vmatprep.subr.bf16.mxu1 %v642_v0  ;;  %v797_v32 = vld [vmem:[#allocation2] ss:$0 sm:$0xff] }
   0xe   :  { %258 = vmatpush1.bf16.msra.mxu0 %v607_v5  ;;  %592 = vmatpush1.bf16.msra.mxu1 %v607_v5 }
   0xf   :  { %259 = vmatprep.subr.bf16.mxu0 %v642_v0  ;;  %579 = vmatprep.subr.bf16.mxu1 %v642_v0 }
  0x12   :  { %260 = vmatpush1.bf16.msra.mxu0 %v608_v6  ;;  %593 = vmatpush1.bf16.msra.mxu1 %v608_v6 }
  0x13   :  { %261 = vmatprep.subr.bf16.mxu0 %v642_v0  ;;  %580 = vmatprep.subr.bf16.mxu1 %v642_v0 }
  0x16   :  { %262 = vmatpush1.bf16.msra.mxu0 %v609_v9  ;;  %594 = vmatpush1.bf16.msra.mxu1 %v609_v9 }
  0x17   :  { %263 = vmatprep.subr.bf16.mxu0 %v642_v0  ;;  %581 = vmatprep.subr.bf16.mxu1 %v642_v0 }
  0x1a   :  { %264 = vmatpush1.bf16.msra.mxu0 %v610_v10  ;;  %595 = vmatpush1.bf16.msra.mxu1 %v610_v10 }
  0x1b   :  { %265 = vmatprep.subr.bf16.mxu0 %v642_v0  ;;  %582 = vmatprep.subr.bf16.mxu1 %v642_v0 }
  0x1e   :  { %266 = vmatpush1.bf16.msra.mxu0 %v611_v11  ;;  %596 = vmatpush1.bf16.msra.mxu1 %v611_v11 }
  0x1f   :  { %267 = vmatprep.subr.bf16.mxu0 %v642_v0  ;;  %583 = vmatprep.subr.bf16.mxu1 %v642_v0 }
  0x22   :  { %268 = vmatpush1.bf16.msra.mxu0 %v612_v12  ;;  %597 = vmatpush1.bf16.msra.mxu1 %v612_v12 }
  0x23   :  { %269 = vmatprep.subr.bf16.mxu0 %v642_v0  ;;  %584 = vmatprep.subr.bf16.mxu1 %v642_v0 }
  0x26   :  { %270 = vmatpush1.bf16.msra.mxu0 %v613_v13  ;;  %598 = vmatpush1.bf16.msra.mxu1 %v613_v13 }
  0x27   :  { %271 = vmatprep.subr.bf16.mxu0 %v642_v0  ;;  %585 = vmatprep.subr.bf16.mxu1 %v642_v0 }
  0x2a   :  { %272 = vmatpush1.bf16.msra.mxu0 %v614_v14  ;;  %599 = vmatpush1.bf16.msra.mxu1 %v614_v14 }
  0x2b   :  { %273 = vmatprep.subr.bf16.mxu0 %v642_v0  ;;  %586 = vmatprep.subr.bf16.mxu1 %v642_v0 }
  0x2e   :  { %274 = vmatpush1.bf16.msra.mxu0 %v615_v15  ;;  %600 = vmatpush1.bf16.msra.mxu1 %v615_v15 }
  0x2f   :  { %275 = vmatprep.subr.bf16.mxu0 %v642_v0  ;;  %587 = vmatprep.subr.bf16.mxu1 %v642_v0 }
  0x32   :  { %276 = vmatpush1.bf16.msra.mxu0 %v616_v16  ;;  %601 = vmatpush1.bf16.msra.mxu1 %v616_v16 }
  0x33   :  { %277 = vmatprep.subr.bf16.mxu0 %v642_v0  ;;  %588 = vmatprep.subr.bf16.mxu1 %v642_v0 }
  0x36   :  { %278 = vmatpush1.bf16.msra.mxu0 %v617_v17  ;;  %602 = vmatpush1.bf16.msra.mxu1 %v617_v17 }
  0x39   :  { %284 = vmatmul.mubr.bf16.vlgmr.msra.gmra.mrb[0].mxu0 %v618_v18  ;;  %316 = vmatmul.mubr.bf16.vlgmr.msra.gmra.mrb[0].mxu1 %v624_v19 }
  0x3a   :  { %568 = vmatprep.mubr.msk.bf16.mxu0 %vm226_vm0, %v621_v20  ;;  %572 = vmatprep.mubr.msk.bf16.mxu1 %vm226_vm0, %v630_v21 }
  0x41   :  { %292 = vmatmul.mubr.bf16.gmra.mrb[4].mxu0 %v623_v22  ;;  %324 = vmatmul.mubr.bf16.gmra.mrb[4].mxu1 %v632_v23 }
  0x42   :  { %569 = vmatprep.mubr.msk.bf16.mxu0 %vm226_vm0, %v627_v24  ;;  %573 = vmatprep.mubr.msk.bf16.mxu1 %vm226_vm0, %v636_v25 }
  0x49   :  { %300 = vmatmul.mubr.bf16.gmra.mrb[8].mxu0 %v629_v26  ;;  %332 = vmatmul.mubr.bf16.gmra.mrb[8].mxu1 %v638_v27 }
  0x4a   :  { %570 = vmatprep.mubr.msk.bf16.mxu0 %vm226_vm0, %v633_v28  ;;  %574 = vmatprep.mubr.msk.bf16.mxu1 %vm226_vm0, %v639_v29 }
  0x51   :  { %308 = vmatmul.mubr.bf16.gmra.mrb[12].mxu0 %v635_v30  ;;  %340 = vmatmul.mubr.bf16.gmra.mrb[12].mxu1 %v641_v31 }
 0x10c   :  { %v285_v33 = vpop.f32.mrb[0].mxu0  ;;  %v317_v34 = vpop.f32.mrb[0].mxu1 }
 0x10d   :  { %v286_v35 = vadd.f32 %v797_v32, %v285_v33  ;;  %v287_v36 = vpop.f32.mrb[1].mxu0  ;;  %v801_v37 = vadd.f32 %v797_v32, %v317_v34  ;;  %v319_v38 = vpop.f32.mrb[1].mxu1 }
 0x10e   :  { %v288_v39 = vpop.f32.mrb[2].mxu0  ;;  %v320_v40 = vpop.f32.mrb[2].mxu1 }
 0x10f   :  { %349 = vst.msk [vmem:[%s948_s3] sm:$0xff] %vm348_vm1, %v286_v35  ;;  %v469_v41 = vmul.f32 %v286_v35, %v286_v35  ;;  %v289_v42 = vadd.f32 %v797_v32, %v288_v39  ;;  %v290_v43 = vpop.f32.mrb[3].mxu0  ;;  %357 = vst.msk [vmem:[%s948_s3 + $0x40] sm:$0xff] %vm348_vm1, %v801_v37  ;;  %v322_v44 = vpop.f32.mrb[3].mxu1  ;;  %v814_v45 = vadd.f32 %v797_v32, %v320_v40  ;;  %v432_v46 = vsel %vm348_vm1, %v286_v35, 0.0 }
 0x111   :  { %350 = vst.msk [vmem:[%s948_s3 + $0x8] sm:$0xff] %vm348_vm1, %v289_v42  ;;  %v433_v47 = vsel %vm348_vm1, %v289_v42, 0.0  ;;  %v470_v48 = vmul.f32 %v289_v42, %v289_v42  ;;  %358 = vst.msk [vmem:[%s948_s3 + $0x48] sm:$0xff] %vm348_vm1, %v814_v45  ;;  %v485_v50 = vsel %vm348_vm1, %v469_v41, 0.0 }
 0x112   :  { %v434_v49 = vadd.f32 %v433_v47, %v432_v46 }
 0x113   :  { %v486_v51 = vsel %vm348_vm1, %v470_v48, 0.0 }
 0x114   :  { %v487_v52 = vadd.f32 %v486_v51, %v485_v50  ;;  %v293_v53 = vpop.f32.mrb[4].mxu0  ;;  %v325_v54 = vpop.f32.mrb[4].mxu1  ;;  %v477_v51 = vmul.f32 %v801_v37, %v801_v37 }
 0x115   :  { %v294_v55 = vadd.f32 %v797_v32, %v293_v53  ;;  %v295_v56 = vpop.f32.mrb[5].mxu0  ;;  %v831_v57 = vadd.f32 %v797_v32, %v325_v54  ;;  %v327_v58 = vpop.f32.mrb[5].mxu1 }
 0x116   :  { %v296_v59 = vpop.f32.mrb[6].mxu0  ;;  %v328_v60 = vpop.f32.mrb[6].mxu1  ;;  %v478_v58 = vmul.f32 %v814_v45, %v814_v45 }
 0x117   :  { %351 = vst.msk [vmem:[%s948_s3 + $0x10] sm:$0xff] %vm348_vm1, %v294_v55  ;;  %v435_v61 = vsel %vm348_vm1, %v294_v55, 0.0  ;;  %v471_v62 = vmul.f32 %v294_v55, %v294_v55  ;;  %v297_v63 = vadd.f32 %v797_v32, %v296_v59  ;;  %v298_v0 = vpop.f32.mrb[7].mxu0  ;;  %359 = vst.msk [vmem:[%s948_s3 + $0x50] sm:$0xff] %vm348_vm1, %v831_v57  ;;  %v330_v1 = vpop.f32.mrb[7].mxu1  ;;  %v845_v3 = vadd.f32 %v797_v32, %v328_v60 }
 0x118   :  { %v436_v2 = vadd.f32 %v435_v61, %v434_v49  ;;  %v479_v0 = vmul.f32 %v831_v57, %v831_v57 }
 0x119   :  { %v488_v4 = vsel %vm348_vm1, %v471_v62, 0.0  ;;  %352 = vst.msk [vmem:[%s948_s3 + $0x18] sm:$0xff] %vm348_vm1, %v297_v63  ;;  %v437_v5 = vsel %vm348_vm1, %v297_v63, 0.0  ;;  %v472_v6 = vmul.f32 %v297_v63, %v297_v63  ;;  %360 = vst.msk [vmem:[%s948_s3 + $0x58] sm:$0xff] %vm348_vm1, %v845_v3  ;;  %v500_v62 = vsel %vm348_vm1, %v477_v51, 0.0 }
 0x11a   :  { %v489_v7 = vadd.f32 %v488_v4, %v487_v52  ;;  %v438_v8 = vadd.f32 %v437_v5, %v436_v2  ;;  %v449_v63 = vsel %vm348_vm1, %v814_v45, 0.0  ;;  %v502_v4 = vsel %vm348_vm1, %v478_v58, 0.0 }
 0x11b   :  { %v490_v9 = vsel %vm348_vm1, %v472_v6, 0.0  ;;  %v480_v5 = vmul.f32 %v845_v3, %v845_v3  ;;  %v453_v45 = vsel %vm348_vm1, %v845_v3, 0.0 }
 0x11c   :  { %v491_v10 = vadd.f32 %v490_v9, %v489_v7  ;;  %v301_v11 = vpop.f32.mrb[8].mxu0  ;;  %v333_v12 = vpop.f32.mrb[8].mxu1 }
 0x11d   :  { %v302_v13 = vadd.f32 %v797_v32, %v301_v11  ;;  %v303_v14 = vpop.f32.mrb[9].mxu0  ;;  %v861_v15 = vadd.f32 %v797_v32, %v333_v12  ;;  %v335_v16 = vpop.f32.mrb[9].mxu1  ;;  %v506_v12 = vsel %vm348_vm1, %v480_v5, 0.0 }
 0x11e   :  { %v304_v17 = vpop.f32.mrb[10].mxu0  ;;  %v336_v18 = vpop.f32.mrb[10].mxu1 }
 0x11f   :  { %353 = vst.msk [vmem:[%s948_s3 + $0x20] sm:$0xff] %vm348_vm1, %v302_v13  ;;  %v439_v19 = vsel %vm348_vm1, %v302_v13, 0.0  ;;  %v473_v20 = vmul.f32 %v302_v13, %v302_v13  ;;  %v305_v21 = vadd.f32 %v797_v32, %v304_v17  ;;  %v306_v22 = vpop.f32.mrb[11].mxu0  ;;  %361 = vst.msk [vmem:[%s948_s3 + $0x60] sm:$0xff] %vm348_vm1, %v861_v15  ;;  %v338_v23 = vpop.f32.mrb[11].mxu1  ;;  %v337_v25 = vadd.f32 %v797_v32, %v336_v18 }
 0x120   :  { %v440_v24 = vadd.f32 %v439_v19, %v438_v8  ;;  %v504_v8 = vsel %vm348_vm1, %v479_v0, 0.0  ;;  %v481_v9 = vmul.f32 %v861_v15, %v861_v15 }
 0x121   :  { %v492_v26 = vsel %vm348_vm1, %v473_v20, 0.0  ;;  %354 = vst.msk [vmem:[%s948_s3 + $0x28] sm:$0xff] %vm348_vm1, %v305_v21  ;;  %v441_v27 = vsel %vm348_vm1, %v305_v21, 0.0  ;;  %v474_v28 = vmul.f32 %v305_v21, %v305_v21  ;;  %362 = vst.msk [vmem:[%s948_s3 + $0x68] sm:$0xff] %vm348_vm1, %v337_v25  ;;  %v482_v13 = vmul.f32 %v337_v25, %v337_v25 }
 0x122   :  { %v493_v29 = vadd.f32 %v492_v26, %v491_v10  ;;  %v442_v30 = vadd.f32 %v441_v27, %v440_v24  ;;  %v508_v18 = vsel %vm348_vm1, %v481_v9, 0.0  ;;  %v457_v19 = vsel %vm348_vm1, %v337_v25, 0.0 }
 0x123   :  { %v494_v31 = vsel %vm348_vm1, %v474_v28, 0.0  ;;  %v510_v22 = vsel %vm348_vm1, %v482_v13, 0.0 }
 0x124   :  { %v495_v33 = vadd.f32 %v494_v31, %v493_v29  ;;  %v309_v34 = vpop.f32.mrb[12].mxu0  ;;  %v341_v35 = vpop.f32.mrb[12].mxu1 }
 0x125   :  { %v310_v36 = vadd.f32 %v797_v32, %v309_v34  ;;  %v311_v38 = vpop.f32.mrb[13].mxu0  ;;  %v342_v39 = vadd.f32 %v797_v32, %v341_v35  ;;  %v343_v40 = vpop.f32.mrb[13].mxu1  ;;  %v365_v35 = vlaneseq }
 0x126   :  { %v312_v41 = vpop.f32.mrb[14].mxu0  ;;  %v344_v42 = vpop.f32.mrb[14].mxu1 }
 0x127   :  { %355 = vst.msk [vmem:[%s948_s3 + $0x30] sm:$0xff] %vm348_vm1, %v310_v36  ;;  %v443_v43 = vsel %vm348_vm1, %v310_v36, 0.0  ;;  %v475_v44 = vmul.f32 %v310_v36, %v310_v36  ;;  %v313_v46 = vadd.f32 %v797_v32, %v312_v41  ;;  %v314_v47 = vpop.f32.mrb[15].mxu0  ;;  %363 = vst.msk [vmem:[%s948_s3 + $0x70] sm:$0xff] %vm348_vm1, %v342_v39  ;;  %v346_v48 = vpop.f32.mrb[15].mxu1  ;;  %v345_v50 = vadd.f32 %v797_v32, %v344_v42 }
 0x128   :  { %v444_v49 = vadd.f32 %v443_v43, %v442_v30  ;;  %v447_v32 = vsel %vm348_vm1, %v801_v37, 0.0  ;;  %v451_v37 = vsel %vm348_vm1, %v831_v57, 0.0  ;;  %v455_v57 = vsel %vm348_vm1, %v861_v15, 0.0 }
 0x129   :  { %v496_v52 = vsel %vm348_vm1, %v475_v44, 0.0  ;;  %356 = vst.msk [vmem:[%s948_s3 + $0x38] sm:$0xff] %vm348_vm1, %v313_v46  ;;  %v445_v53 = vsel %vm348_vm1, %v313_v46, 0.0  ;;  %v476_v54 = vmul.f32 %v313_v46, %v313_v46  ;;  %364 = vst.msk [vmem:[%s948_s3 + $0x78] sm:$0xff] %vm348_vm1, %v345_v50  ;;  %v483_v14 = vmul.f32 %v342_v39, %v342_v39 }
 0x12a   :  { %v497_v55 = vadd.f32 %v496_v52, %v495_v33  ;;  %v446_v56 = vadd.f32 %v445_v53, %v444_v49  ;;  %v459_v3 = vsel %vm348_vm1, %v342_v39, 0.0  ;;  %v484_v24 = vmul.f32 %v345_v50, %v345_v50 }
 0x12b   :  { %v498_v59 = vsel %vm348_vm1, %v476_v54, 0.0  ;;  %v512_v23 = vsel %vm348_vm1, %v483_v14, 0.0  ;;  %v461_v15 = vsel %vm348_vm1, %v345_v50, 0.0  ;;  %v366_v41 = vshrl.u32 %v365_v35, 7 }
 0x12c   :  { %v448_v60 = vadd.f32 %v447_v32, %v446_v56  ;;  %v499_v61 = vadd.f32 %v498_v59, %v497_v55  ;;  %v514_v30 = vsel %vm348_vm1, %v484_v24, 0.0 }
 0x12d   :  { %vm522_vm2 = vcmp.eq.s32.totalorder %v366_v41, 0  ;;  %vm524_vm3 = vcmp.eq.s32.totalorder %v366_v41, 1 }
 0x12e   :  { %v450_v1 = vadd.f32 %v449_v63, %v448_v60  ;;  %v501_v2 = vadd.f32 %v500_v62, %v499_v61 }
 0x130   :  { %v503_v6 = vadd.f32 %v502_v4, %v501_v2  ;;  %v452_v7 = vadd.f32 %v451_v37, %v450_v1 }
 0x132   :  { %v454_v10 = vadd.f32 %v453_v45, %v452_v7  ;;  %v505_v11 = vadd.f32 %v504_v8, %v503_v6 }
 0x134   :  { %v456_v16 = vadd.f32 %v455_v57, %v454_v10  ;;  %v507_v17 = vadd.f32 %v506_v12, %v505_v11 }
 0x136   :  { %v509_v20 = vadd.f32 %v508_v18, %v507_v17  ;;  %v458_v21 = vadd.f32 %v457_v19, %v456_v16 }
 0x138   :  { %v511_v26 = vadd.f32 %v510_v22, %v509_v20  ;;  %v460_v27 = vadd.f32 %v459_v3, %v458_v21 }
 0x13a   :  { %v513_v28 = vadd.f32 %v512_v23, %v511_v26  ;;  %v462_v29 = vadd.f32 %v461_v15, %v460_v27 }
 0x13c   :  { %v463_v31 = vrot.slane %v462_v29, 4  ;;  %v515_v33 = vadd.f32 %v514_v30, %v513_v28 }
 0x13e   :  { %v464_v25 = vadd.f32 %v463_v31, %v462_v29  ;;  %v516_v34 = vrot.slane %v515_v33, 4 }
 0x140   :  { %v465_v36 = vrot.slane %v464_v25, 2  ;;  %v517_v38 = vadd.f32 %v516_v34, %v515_v33 }
 0x142   :  { %v466_v39 = vadd.f32 %v465_v36, %v464_v25  ;;  %v518_v40 = vrot.slane %v517_v38, 2 }
 0x144   :  { %v467_v42 = vrot.slane %v466_v39, 1  ;;  %v519_v43 = vadd.f32 %v518_v40, %v517_v38 }
 0x146   :  { %v468_v44 = vadd.f32 %v467_v42, %v466_v39  ;;  %v520_v46 = vrot.slane %v519_v43, 1 }
 0x148   :  { %v521_v47 = vadd.f32 %v520_v46, %v519_v43  ;;  %v523_v48 = vsel %vm522_vm2, %v468_v44, 0.0 }
 0x14a   :  { %v525_v49 = vsel %vm524_vm3, %v521_v47, 0.0 }
 0x14b   :  { %v526_v50 = vadd.f32 %v525_v49, %v523_v48 }
 0x14d   :  { %527 = vst.msk [vmem:[%s949_s4] sm:$0xff] %vm348_vm1, %v526_v50 }

</bundles_post_ra>
